<compile_context>
chip_gen: v5e
topology: v5e:2x2
jax: 0.10.0
libtpu: 0.0.40
codegen_flags: <defaults>
</compile_context>

<pallas_src>
import functools

import jax
import jax.numpy as jnp
from jax.experimental import pallas as pl
from jax.experimental.pallas import tpu as pltpu

BN_EPS = 1e-5
NEG_SLOPE = 0.2


def _act(y, act):
    if act == "lrelu":
        return jnp.where(y > 0, y, NEG_SLOPE * y)
    if act == "relu":
        return jnp.maximum(y, 0.0)
    if act == "tanh":
        return jnp.tanh(y)
    return y


# ----------------------------------------------------------------------------
# Kernel 1: fused conv GEMM  (y = cols @ W + b, optional batch-norm over rows, activation)
# ----------------------------------------------------------------------------
def _gemm_bn_act_kernel(x_ref, w_ref, b_ref, g_ref, beta_ref, o_ref, *, act, use_bn, eps):
    y = jnp.dot(x_ref[...], w_ref[...], preferred_element_type=jnp.float32)
    y = y + b_ref[...]
    if use_bn:
        # rows are (batch * spatial) positions -> per-channel batch statistics
        mu = jnp.mean(y, axis=0, keepdims=True)
        var = jnp.mean(jnp.square(y - mu), axis=0, keepdims=True)
        y = (y - mu) * jax.lax.rsqrt(var + eps) * g_ref[...] + beta_ref[...]
    o_ref[...] = _act(y, act).astype(o_ref.dtype)


def fused_gemm(x, w, b, gamma, beta, *, act, use_bn, m_blocks=1, out_dtype=jnp.bfloat16):
    M, K = x.shape
    N = w.shape[1]
    kern = functools.partial(_gemm_bn_act_kernel, act=act, use_bn=use_bn, eps=BN_EPS)
    args = (
        x.astype(jnp.bfloat16),
        w.astype(jnp.bfloat16),
        b.reshape(1, N).astype(jnp.float32),
        gamma.reshape(1, N).astype(jnp.float32),
        beta.reshape(1, N).astype(jnp.float32),
    )
    # Only BN-free layers may be tiled over M (per-block rows are independent there);
    # BN layers stay whole-M so batch statistics are not computed per tile.
    if m_blocks > 1 and not use_bn and M % (16 * m_blocks) == 0:
        bm = M // m_blocks
        return pl.pallas_call(
            kern,
            grid=(m_blocks,),
            in_specs=[
                pl.BlockSpec((bm, K), lambda i: (i, 0)),
                pl.BlockSpec((K, N), lambda i: (0, 0)),
                pl.BlockSpec((1, N), lambda i: (0, 0)),
                pl.BlockSpec((1, N), lambda i: (0, 0)),
                pl.BlockSpec((1, N), lambda i: (0, 0)),
            ],
            out_specs=pl.BlockSpec((bm, N), lambda i: (i, 0)),
            out_shape=jax.ShapeDtypeStruct((M, N), out_dtype),
            compiler_params=pltpu.CompilerParams(dimension_semantics=("parallel",)),
        )(*args)
    return pl.pallas_call(kern, out_shape=jax.ShapeDtypeStruct((M, N), out_dtype))(*args)


# ----------------------------------------------------------------------------
# Kernel 2: generator middle = bottleneck conv (4x4 map -> 1x1) + dec0 convT (1x1 -> 4x4),
#           both spatially trivial, fused into one dense kernel (no HBM round-trip).
# ----------------------------------------------------------------------------
def _gen_mid_kernel(x_ref, wb_ref, bb_ref, gb_ref, betab_ref,
                    wd_ref, bd_ref, gd_ref, betad_ref, o_ref, *, eps):
    # bottleneck: 4x4 conv on a 4x4 map with pad 0 == dense layer on the flattened map
    h = jnp.dot(x_ref[...], wb_ref[...], preferred_element_type=jnp.float32) + bb_ref[...]
    mu = jnp.mean(h, axis=0, keepdims=True)
    var = jnp.mean(jnp.square(h - mu), axis=0, keepdims=True)
    h = (h - mu) * jax.lax.rsqrt(var + eps) * gb_ref[...] + betab_ref[...]
    h = jnp.where(h > 0, h, NEG_SLOPE * h).astype(jnp.bfloat16)

    # dec0: ConvTranspose2d(4x4, stride 1, pad 0) on a 1x1 map == 16 independent dense taps
    n_taps = wd_ref.shape[0]
    blocks = [jnp.dot(h, wd_ref[t], preferred_element_type=jnp.float32) for t in range(n_taps)]
    d = jnp.stack(blocks, axis=0) + bd_ref[...]                   # [taps, N, c_out]
    mu2 = jnp.mean(jnp.mean(d, axis=0, keepdims=True), axis=1, keepdims=True)
    var2 = jnp.mean(jnp.mean(jnp.square(d - mu2), axis=0, keepdims=True), axis=1, keepdims=True)
    d = (d - mu2) * jax.lax.rsqrt(var2 + eps) * gd_ref[...] + betad_ref[...]
    o_ref[...] = jnp.maximum(d, 0.0).astype(o_ref.dtype)


def gen_mid_block(h_enc, p_bott, p_dec0):
    N, Hh, Wh, C = h_enc.shape
    flat = h_enc.reshape(N, Hh * Wh * C)                  # (h, w, c) order == (kh, kw, cin) order
    kh, kw, cb_in, cb = p_bott["w"].shape
    kd0, kd1, _, cd = p_dec0["w"].shape
    wb = p_bott["w"].reshape(kh * kw * cb_in, cb)
    wd = p_dec0["w"].reshape(kd0 * kd1, cb, cd)           # tap-major [16, cb, cd]
    out = pl.pallas_call(
        functools.partial(_gen_mid_kernel, eps=BN_EPS),
        out_shape=jax.ShapeDtypeStruct((kd0 * kd1, N, cd), jnp.bfloat16),
    )(
        flat.astype(jnp.bfloat16),
        wb.astype(jnp.bfloat16),
        p_bott["b"].reshape(1, cb).astype(jnp.float32),
        p_bott["gamma"].reshape(1, cb).astype(jnp.float32),
        p_bott["beta"].reshape(1, cb).astype(jnp.float32),
        wd.astype(jnp.bfloat16),
        p_dec0["b"].reshape(1, 1, cd).astype(jnp.float32),
        p_dec0["gamma"].reshape(1, 1, cd).astype(jnp.float32),
        p_dec0["beta"].reshape(1, 1, cd).astype(jnp.float32),
    )
    # rows are (tap=(i,j), n) -> NHWC [N, 4, 4, cd]
    return out.reshape(kd0, kd1, N, cd).transpose(2, 0, 1, 3)


# ----------------------------------------------------------------------------
# Kernel 3: generator output block (dec2 convT GEMM + tanh) fused with the L1 recon loss
# ----------------------------------------------------------------------------
def _gen_out_kernel(x_ref, w_ref, b_ref, t_ref, o_ref, l1_ref):
    y = jnp.dot(x_ref[...], w_ref[...], preferred_element_type=jnp.float32) + b_ref[...]
    y = jnp.tanh(y)
    o_ref[...] = y.astype(o_ref.dtype)
    l1_ref[...] = jnp.mean(jnp.abs(y - t_ref[...]), keepdims=True)


# ----------------------------------------------------------------------------
# Kernel 4: discriminator tail = 2nd conv block (split-batch BN) + 1-channel "out" conv
#           folded in as per-image weighted sums + both MSE adversarial terms.
# ----------------------------------------------------------------------------
def _disc_tail_kernel(x_ref, w_ref, b_ref, g_ref, beta_ref, wo_ref, bo_ref,
                      mse_r1_ref, mse_f0_ref, mse_f1_ref, *,
                      n_real, n_fake, rows_per_img, eps):
    y = jnp.dot(x_ref[...], w_ref[...], preferred_element_type=jnp.float32) + b_ref[...]
    # Separate batch statistics for the real half and fake half of the batched pass, so this
    # matches two independent discriminator forward passes (training-mode BatchNorm).
    ridx = jax.lax.broadcasted_iota(jnp.int32, y.shape, 0)
    real_rows = n_real * rows_per_img
    fake_rows = n_fake * rows_per_img
    rmask = ridx < real_rows
    mu_r = jnp.sum(jnp.where(rmask, y, 0.0), axis=0, keepdims=True) / real_rows
    var_r = jnp.sum(jnp.where(rmask, jnp.square(y - mu_r), 0.0), axis=0, keepdims=True) / real_rows
    mu_f = jnp.sum(jnp.where(rmask, 0.0, y), axis=0, keepdims=True) / fake_rows
    var_f = jnp.sum(jnp.where(rmask, 0.0, jnp.square(y - mu_f)), axis=0, keepdims=True) / fake_rows
    mu = jnp.where(rmask, mu_r, mu_f)
    var = jnp.where(rmask, var_r, var_f)
    y = (y - mu) * jax.lax.rsqrt(var + eps) * g_ref[...] + beta_ref[...]
    y = jnp.where(y > 0, y, NEG_SLOPE * y)

    # Final 4x4 conv on the 4x4 map (cout=1) == per-image weighted sum of y against the tiled
    # out-conv weight; losses computed in-kernel -> three scalar (1,1) outputs.
    pw = y * wo_ref[...]
    preds = []
    for g in range(n_real + n_fake):
        m = (ridx >= g * rows_per_img) & (ridx < (g + 1) * rows_per_img)
        preds.append(jnp.sum(jnp.where(m, pw, 0.0), keepdims=True) + bo_ref[...])
    real_p, fake_p = preds[:n_real], preds[n_real:]
    mse_r1_ref[...] = sum(jnp.square(q - 1.0) for q in real_p) / n_real
    mse_f0_ref[...] = sum(jnp.square(q) for q in fake_p) / n_fake
    mse_f1_ref[...] = sum(jnp.square(q - 1.0) for q in fake_p) / n_fake


# ----------------------------------------------------------------------------
# Conv plumbing (im2col glue stays in plain JAX; the hot path runs in the Pallas kernels)
# ----------------------------------------------------------------------------
def im2col(x, kh, kw, stride, pad):
    N, H, W, C = x.shape
    xp = jnp.pad(x, ((0, 0), (pad, pad), (pad, pad), (0, 0)))
    Hp, Wp = H + 2 * pad, W + 2 * pad
    Ho = (Hp - kh) // stride + 1
    Wo = (Wp - kw) // stride + 1
    cols = []
    for i in range(kh):
        for j in range(kw):
            cols.append(
                xp[:, i:i + (Ho - 1) * stride + 1:stride,
                      j:j + (Wo - 1) * stride + 1:stride, :]
            )
    cols = jnp.stack(cols, axis=3)                        # [N, Ho, Wo, kh*kw, C]
    return cols.reshape(N * Ho * Wo, kh * kw * C), (N, Ho, Wo)


def conv_block(x, p, stride, pad, act, use_bn, m_blocks=1):
    kh, kw, cin, cout = p["w"].shape
    cols, (N, Ho, Wo) = im2col(x, kh, kw, stride, pad)
    w2 = p["w"].reshape(kh * kw * cin, cout)
    y = fused_gemm(cols, w2, p["b"], p["gamma"], p["beta"],
                   act=act, use_bn=use_bn, m_blocks=m_blocks)
    return y.reshape(N, Ho, Wo, cout)


def conv_transpose_block(x, p, stride, pad, act, use_bn):
    """ConvTranspose2d(k, stride, pad) via input dilation + spatially-flipped forward conv.
    Weight convention: p["w"][i, j, cin, cout] == torch convT weight[cin, cout, i, j]."""
    # TODO(synk): at realistic sizes replace input dilation with a sub-pixel / col2im GEMM to
    #             avoid the 75% zero MACs; at these toy shapes launch latency dominates.
    N, H, W, C = x.shape
    kh = p["w"].shape[0]
    if stride > 1:
        xd = jnp.zeros((N, (H - 1) * stride + 1, (W - 1) * stride + 1, C), x.dtype)
        xd = xd.at[:, ::stride, ::stride, :].set(x)
    else:
        xd = x
    p_eff = dict(p, w=p["w"][::-1, ::-1, :, :])
    return conv_block(xd, p_eff, 1, kh - 1 - pad, act, use_bn)


def gen_out_block(h, p, img_t):
    """dec2: ConvTranspose2d(c_hidden, c_out, 4, stride 2, pad 1) + tanh, fused with L1(., img_t)."""
    N, H, W, C = h.shape
    kh, kw, cin, cout = p["w"].shape
    stride, pad = 2, 1
    xd = jnp.zeros((N, (H - 1) * stride + 1, (W - 1) * stride + 1, C), h.dtype)
    xd = xd.at[:, ::stride, ::stride, :].set(h)
    w_eff = p["w"][::-1, ::-1, :, :]
    cols, (_, Ho, Wo) = im2col(xd, kh, kw, 1, kh - 1 - pad)
    t_rows = img_t.reshape(N * Ho * Wo, cout).astype(jnp.float32)
    out, l1 = pl.pallas_call(
        _gen_out_kernel,
        out_shape=(
            jax.ShapeDtypeStruct((N * Ho * Wo, cout), jnp.float32),
            jax.ShapeDtypeStruct((1, 1), jnp.float32),
        ),
    )(
        cols.astype(jnp.bfloat16),
        w_eff.reshape(kh * kw * cin, cout).astype(jnp.bfloat16),
        p["b"].reshape(1, cout).astype(jnp.float32),
        t_rows,
    )
    return out.reshape(N, Ho, Wo, cout), l1[0, 0]


# ----------------------------------------------------------------------------
# Sub-networks (small-scale PixelDTGan generator / discriminators)
# ----------------------------------------------------------------------------
def generator_forward(p, img_s, img_t):
    h = conv_block(img_s.astype(jnp.bfloat16), p["enc1"], 2, 1, "lrelu",
                   use_bn=False, m_blocks=2)                       # 16 -> 8
    h = conv_block(h, p["enc2"], 2, 1, "lrelu", use_bn=True)       # 8  -> 4
    h = gen_mid_block(h, p["bottleneck"], p["dec0"])               # 4 -> 1 -> 4 (fused)
    h = conv_transpose_block(h, p["dec1"], 2, 1, "relu", True)     # 4  -> 8
    img_t_hat, recon_l1 = gen_out_block(h, p["dec2"], img_t)       # 8  -> 16, tanh + L1
    return img_t_hat, recon_l1


def discriminator_forward(p, x_real, x_fake):
    """Batched real+fake pass. Returns (MSE(pred_real,1), MSE(pred_fake,0), MSE(pred_fake,1))."""
    n_real, n_fake = x_real.shape[0], x_fake.shape[0]
    x = jnp.concatenate([x_real.astype(jnp.bfloat16), x_fake.astype(jnp.bfloat16)], axis=0)
    h = conv_block(x, p["b1"], 2, 1, "lrelu", use_bn=False, m_blocks=2)     # 16 -> 8
    cols, (NI, Ho, Wo) = im2col(h, 4, 4, 2, 1)                              # 8 -> 4
    rows_per_img = Ho * Wo
    kh, kw, cin2, cout2 = p["b2"]["w"].shape
    w2 = p["b2"]["w"].reshape(kh * kw * cin2, cout2)
    wo_t = jnp.tile(p["out"]["w"].reshape(rows_per_img, cout2), (NI, 1))
    kern = functools.partial(_disc_tail_kernel, n_real=n_real, n_fake=n_fake,
                             rows_per_img=rows_per_img, eps=BN_EPS)
    mse_r1, mse_f0, mse_f1 = pl.pallas_call(
        kern,
        out_shape=(jax.ShapeDtypeStruct((1, 1), jnp.float32),) * 3,
    )(
        cols.astype(jnp.bfloat16),
        w2.astype(jnp.bfloat16),
        p["b2"]["b"].reshape(1, cout2).astype(jnp.float32),
        p["b2"]["gamma"].reshape(1, cout2).astype(jnp.float32),
        p["b2"]["beta"].reshape(1, cout2).astype(jnp.float32),
        wo_t.astype(jnp.float32),
        p["out"]["b"].reshape(1, 1).astype(jnp.float32),
    )
    return mse_r1[0, 0], mse_f0[0, 0], mse_f1[0, 0]


def pixel_dt_gan_forward(params, img_s, img_t):
    """Mirrors PixelDTGan.forward loss computation: (disc_r_loss, disc_a_loss, gen_loss)."""
    img_t_hat, recon_l1 = generator_forward(params["gen"], img_s, img_t)

    # --- disc_r: real/fake discriminator (MSE adversarial criterion), real+fake batched ---
    r_mse_real1, r_mse_fake0, r_mse_fake1 = discriminator_forward(
        params["disc_r"], img_t, img_t_hat)
    disc_r_loss = 0.5 * (r_mse_real1 + r_mse_fake0)

    # --- disc_a: associated-pair discriminator (channel-concat condition, 2*c_in) ---
    real_pair = jnp.concatenate([img_s, img_t], axis=-1)
    fake_pair = jnp.concatenate([img_s, img_t_hat], axis=-1)
    a_mse_real1, a_mse_fake0, a_mse_fake1 = discriminator_forward(
        params["disc_a"], real_pair, fake_pair)
    # TODO(synk): real_unassoc (img_t_prev replay buffer) is a training-time side effect; the
    #             first-call behaviour (img_t_prev is None) gives the two-term disc_a loss.
    disc_a_loss = 0.5 * (a_mse_real1 + a_mse_fake0)

    # --- generator loss: adversarial terms (disc fake vs. 1) + L1 reconstruction ---
    gen_loss = r_mse_fake1 + a_mse_fake1 + recon_l1

    return disc_r_loss, disc_a_loss, gen_loss


# ----------------------------------------------------------------------------
# Deterministic parameter init (DCGAN-style normal(0, 0.02), like weights_init_naive).
# Conv weights: [kh, kw, cin, cout]; transposed-conv weights use the same layout and
# correspond to torch ConvTranspose2d weight[cin, cout, kh, kw] permuted.
# ----------------------------------------------------------------------------
def init_conv(key, kh, kw, cin, cout):
    return {
        "w": 0.02 * jax.random.normal(key, (kh, kw, cin, cout), jnp.float32),
        "b": jnp.zeros((cout,), jnp.float32),
        "gamma": jnp.ones((cout,), jnp.float32),
        "beta": jnp.zeros((cout,), jnp.float32),
    }


def init_params(key, c_in=4, c_out=4, c_hidden=32, c_bottleneck=16):
    ks = jax.random.split(key, 12)
    gen = {
        "enc1": init_conv(ks[0], 4, 4, c_in, c_hidden),
        "enc2": init_conv(ks[1], 4, 4, c_hidden, 2 * c_hidden),
        "bottleneck": init_conv(ks[2], 4, 4, 2 * c_hidden, c_bottleneck),
        "dec0": init_conv(ks[3], 4, 4, c_bottleneck, 2 * c_hidden),
        "dec1": init_conv(ks[4], 4, 4, 2 * c_hidden, c_hidden),
        "dec2": init_conv(ks[5], 4, 4, c_hidden, c_out),
    }

    def disc(keys, cin):
        return {
            "b1": init_conv(keys[0], 4, 4, cin, c_hidden),
            "b2": init_conv(keys[1], 4, 4, c_hidden, 2 * c_hidden),
            "out": init_conv(keys[2], 4, 4, 2 * c_hidden, 1),
        }

    return {
        "gen": gen,
        "disc_r": disc(ks[6:9], c_in),
        "disc_a": disc(ks[9:12], 2 * c_in),   # conditioned discriminator: 2*c_in channels
    }


# ----------------------------------------------------------------------------
if __name__ == "__main__":
    key = jax.random.PRNGKey(0)
    kp, k_s, k_t = jax.random.split(key, 3)

    params = init_params(kp)

    # NHWC here; the equivalent PyTorch NCHW shape is [2, 4, 16, 16]
    img_s = jax.random.uniform(k_s, (2, 16, 16, 4), jnp.float32, -1.0, 1.0)
    img_t = jax.random.uniform(k_t, (2, 16, 16, 4), jnp.float32, -1.0, 1.0)

    fwd = jax.jit(pixel_dt_gan_forward)
    disc_r_loss, disc_a_loss, gen_loss = fwd(params, img_s, img_t)
    jax.block_until_ready((disc_r_loss, disc_a_loss, gen_loss))

    print("KERNEL_OK")
</pallas_src>

<mosaic_0001>
module attributes {stable_mosaic.version = 11 : i64} {
  func.func @_gemm_bn_act_kernel(%arg0: i32, %arg1: memref<64x64xbf16, #tpu.memory_space<vmem>>, %arg2: memref<64x32xbf16, #tpu.memory_space<vmem>>, %arg3: memref<1x32xf32, #tpu.memory_space<vmem>>, %arg4: memref<1x32xf32, #tpu.memory_space<vmem>>, %arg5: memref<1x32xf32, #tpu.memory_space<vmem>>, %arg6: memref<64x32xbf16, #tpu.memory_space<vmem>>) attributes {dimension_semantics = [#tpu.dimension_semantics<parallel>], iteration_bounds = array<i64: 2>, scalar_prefetch = 0 : i64, scratch_operands = 0 : i64, tpu.core_type = #tpu.core_type<tc>, window_params = [{transform_indices = @transform_0, window_bounds = array<i64: 64, 64>}, {pipeline_mode = #tpu.pipeline_mode<synchronous>, transform_indices = @transform_1, window_bounds = array<i64: 64, 32>}, {pipeline_mode = #tpu.pipeline_mode<synchronous>, transform_indices = @transform_2, window_bounds = array<i64: 1, 32>}, {pipeline_mode = #tpu.pipeline_mode<synchronous>, transform_indices = @transform_3, window_bounds = array<i64: 1, 32>}, {pipeline_mode = #tpu.pipeline_mode<synchronous>, transform_indices = @transform_4, window_bounds = array<i64: 1, 32>}, {transform_indices = @transform_5, window_bounds = array<i64: 64, 32>}]} {
    %c0 = arith.constant 0 : index
    %c0_0 = arith.constant 0 : index
    %0 = vector.load %arg1[%c0, %c0_0] : memref<64x64xbf16, #tpu.memory_space<vmem>>, vector<64x64xbf16>
    %c0_1 = arith.constant 0 : index
    %c0_2 = arith.constant 0 : index
    %1 = vector.load %arg2[%c0_1, %c0_2] : memref<64x32xbf16, #tpu.memory_space<vmem>>, vector<64x32xbf16>
    %cst = arith.constant dense<0.000000e+00> : vector<64x32xf32>
    %2 = tpu.matmul %0, %1, %cst {dimension_numbers = #tpu.dot_dimension_numbers<[1], [0], [0], [1], [0, 0, 1, 1], [], []>} : vector<64x64xbf16>, vector<64x32xbf16>, vector<64x32xf32> -> vector<64x32xf32>
    %c0_3 = arith.constant 0 : index
    %c0_4 = arith.constant 0 : index
    %3 = vector.load %arg3[%c0_3, %c0_4] : memref<1x32xf32, #tpu.memory_space<vmem>>, vector<1x32xf32>
    %4 = vector.broadcast %3 : vector<1x32xf32> to vector<64x32xf32>
    %5 = arith.addf %2, %4 : vector<64x32xf32>
    %cst_5 = arith.constant 0.000000e+00 : f32
    %6 = vector.broadcast %cst_5 : f32 to vector<64x32xf32>
    %7 = arith.cmpf ogt, %5, %6 : vector<64x32xf32>
    %cst_6 = arith.constant 2.000000e-01 : f32
    %8 = vector.broadcast %cst_6 : f32 to vector<64x32xf32>
    %9 = arith.mulf %8, %5 : vector<64x32xf32>
    %10 = arith.select %7, %5, %9 : vector<64x32xi1>, vector<64x32xf32>
    %11 = arith.truncf %10 : vector<64x32xf32> to vector<64x32xbf16>
    %c0_7 = arith.constant 0 : index
    %c0_8 = arith.constant 0 : index
    %12 = vector.load %arg6[%c0_7, %c0_8] : memref<64x32xbf16, #tpu.memory_space<vmem>>, vector<64x32xbf16>
    tpu.vector_store %arg6[%c0_7, %c0_8], %11 {strides = array<i32>} : memref<64x32xbf16, #tpu.memory_space<vmem>>, vector<64x32xbf16>,
    return
  }
  func.func @transform_0(%arg0: i32) -> (i32, i32) {
    %c0_i32 = arith.constant 0 : i32
    %c0_i32_0 = arith.constant 0 : i32
    return %arg0, %c0_i32 : i32, i32
  }
  func.func @transform_1(%arg0: i32) -> (i32, i32) {
    %c0_i32 = arith.constant 0 : i32
    %c0_i32_0 = arith.constant 0 : i32
    %c0_i32_1 = arith.constant 0 : i32
    return %c0_i32, %c0_i32_0 : i32, i32
  }
  func.func @transform_2(%arg0: i32) -> (i32, i32) {
    %c0_i32 = arith.constant 0 : i32
    %c0_i32_0 = arith.constant 0 : i32
    %c0_i32_1 = arith.constant 0 : i32
    return %c0_i32, %c0_i32_0 : i32, i32
  }
  func.func @transform_3(%arg0: i32) -> (i32, i32) {
    %c0_i32 = arith.constant 0 : i32
    %c0_i32_0 = arith.constant 0 : i32
    %c0_i32_1 = arith.constant 0 : i32
    return %c0_i32, %c0_i32_0 : i32, i32
  }
  func.func @transform_4(%arg0: i32) -> (i32, i32) {
    %c0_i32 = arith.constant 0 : i32
    %c0_i32_0 = arith.constant 0 : i32
    %c0_i32_1 = arith.constant 0 : i32
    return %c0_i32, %c0_i32_0 : i32, i32
  }
  func.func @transform_5(%arg0: i32) -> (i32, i32) {
    %c0_i32 = arith.constant 0 : i32
    %c0_i32_0 = arith.constant 0 : i32
    return %arg0, %c0_i32 : i32, i32
  }
}

module attributes {stable_mosaic.version = 11 : i64} {
  func.func @_gemm_bn_act_kernel(%arg0: memref<32x512xbf16, #tpu.memory_space<vmem>>, %arg1: memref<512x64xbf16, #tpu.memory_space<vmem>>, %arg2: memref<1x64xf32, #tpu.memory_space<vmem>>, %arg3: memref<1x64xf32, #tpu.memory_space<vmem>>, %arg4: memref<1x64xf32, #tpu.memory_space<vmem>>, %arg5: memref<32x64xbf16, #tpu.memory_space<vmem>>) attributes {dimension_semantics = [], scalar_prefetch = 0 : i64, scratch_operands = 0 : i64, tpu.core_type = #tpu.core_type<tc>} {
    %c0 = arith.constant 0 : index
    %c0_0 = arith.constant 0 : index
    %0 = vector.load %arg0[%c0, %c0_0] : memref<32x512xbf16, #tpu.memory_space<vmem>>, vector<32x512xbf16>
    %c0_1 = arith.constant 0 : index
    %c0_2 = arith.constant 0 : index
    %1 = vector.load %arg1[%c0_1, %c0_2] : memref<512x64xbf16, #tpu.memory_space<vmem>>, vector<512x64xbf16>
    %cst = arith.constant dense<0.000000e+00> : vector<32x64xf32>
    %2 = tpu.matmul %0, %1, %cst {dimension_numbers = #tpu.dot_dimension_numbers<[1], [0], [0], [1], [0, 0, 1, 1], [], []>} : vector<32x512xbf16>, vector<512x64xbf16>, vector<32x64xf32> -> vector<32x64xf32>
    %c0_3 = arith.constant 0 : index
    %c0_4 = arith.constant 0 : index
    %3 = vector.load %arg2[%c0_3, %c0_4] : memref<1x64xf32, #tpu.memory_space<vmem>>, vector<1x64xf32>
    %4 = vector.broadcast %3 : vector<1x64xf32> to vector<32x64xf32>
    %5 = arith.addf %2, %4 : vector<32x64xf32>
    %cst_5 = arith.constant dense<0.000000e+00> : vector<64xf32>
    %6 = vector.multi_reduction <add>, %5, %cst_5 [0] : vector<32x64xf32> to vector<64xf32>
    %7 = vector.shape_cast %6 : vector<64xf32> to vector<1x64xf32>
    %cst_6 = arith.constant 3.200000e+01 : f32
    %8 = vector.broadcast %cst_6 : f32 to vector<1x64xf32>
    %9 = arith.divf %7, %8 : vector<1x64xf32>
    %10 = vector.broadcast %9 : vector<1x64xf32> to vector<32x64xf32>
    %11 = arith.subf %5, %10 : vector<32x64xf32>
    %12 = arith.mulf %11, %11 : vector<32x64xf32>
    %cst_7 = arith.constant dense<0.000000e+00> : vector<64xf32>
    %13 = vector.multi_reduction <add>, %12, %cst_7 [0] : vector<32x64xf32> to vector<64xf32>
    %14 = vector.shape_cast %13 : vector<64xf32> to vector<1x64xf32>
    %cst_8 = arith.constant 3.200000e+01 : f32
    %15 = vector.broadcast %cst_8 : f32 to vector<1x64xf32>
    %16 = arith.divf %14, %15 : vector<1x64xf32>
    %17 = vector.broadcast %9 : vector<1x64xf32> to vector<32x64xf32>
    %18 = arith.subf %5, %17 : vector<32x64xf32>
    %cst_9 = arith.constant 9.99999974E-6 : f32
    %19 = vector.broadcast %cst_9 : f32 to vector<1x64xf32>
    %20 = arith.addf %16, %19 : vector<1x64xf32>
    %21 = math.rsqrt %20 : vector<1x64xf32>
    %22 = vector.broadcast %21 : vector<1x64xf32> to vector<32x64xf32>
    %23 = arith.mulf %18, %22 : vector<32x64xf32>
    %c0_10 = arith.constant 0 : index
    %c0_11 = arith.constant 0 : index
    %24 = vector.load %arg3[%c0_10, %c0_11] : memref<1x64xf32, #tpu.memory_space<vmem>>, vector<1x64xf32>
    %25 = vector.broadcast %24 : vector<1x64xf32> to vector<32x64xf32>
    %26 = arith.mulf %23, %25 : vector<32x64xf32>
    %c0_12 = arith.constant 0 : index
    %c0_13 = arith.constant 0 : index
    %27 = vector.load %arg4[%c0_12, %c0_13] : memref<1x64xf32, #tpu.memory_space<vmem>>, vector<1x64xf32>
    %28 = vector.broadcast %27 : vector<1x64xf32> to vector<32x64xf32>
    %29 = arith.addf %26, %28 : vector<32x64xf32>
    %cst_14 = arith.constant 0.000000e+00 : f32
    %30 = vector.broadcast %cst_14 : f32 to vector<32x64xf32>
    %31 = arith.cmpf ogt, %29, %30 : vector<32x64xf32>
    %cst_15 = arith.constant 2.000000e-01 : f32
    %32 = vector.broadcast %cst_15 : f32 to vector<32x64xf32>
    %33 = arith.mulf %32, %29 : vector<32x64xf32>
    %34 = arith.select %31, %29, %33 : vector<32x64xi1>, vector<32x64xf32>
    %35 = arith.truncf %34 : vector<32x64xf32> to vector<32x64xbf16>
    %c0_16 = arith.constant 0 : index
    %c0_17 = arith.constant 0 : index
    %36 = vector.load %arg5[%c0_16, %c0_17] : memref<32x64xbf16, #tpu.memory_space<vmem>>, vector<32x64xbf16>
    tpu.vector_store %arg5[%c0_16, %c0_17], %35 {strides = array<i32>} : memref<32x64xbf16, #tpu.memory_space<vmem>>, vector<32x64xbf16>,
    return
  }
}

module attributes {stable_mosaic.version = 11 : i64} {
  func.func @_gen_mid_kernel(%arg0: memref<2x1024xbf16, #tpu.memory_space<vmem>>, %arg1: memref<1024x16xbf16, #tpu.memory_space<vmem>>, %arg2: memref<1x16xf32, #tpu.memory_space<vmem>>, %arg3: memref<1x16xf32, #tpu.memory_space<vmem>>, %arg4: memref<1x16xf32, #tpu.memory_space<vmem>>, %arg5: memref<16x16x64xbf16, #tpu.memory_space<vmem>>, %arg6: memref<1x1x64xf32, #tpu.memory_space<vmem>>, %arg7: memref<1x1x64xf32, #tpu.memory_space<vmem>>, %arg8: memref<1x1x64xf32, #tpu.memory_space<vmem>>, %arg9: memref<16x2x64xbf16, #tpu.memory_space<vmem>>) attributes {dimension_semantics = [], scalar_prefetch = 0 : i64, scratch_operands = 0 : i64, tpu.core_type = #tpu.core_type<tc>} {
    %c0 = arith.constant 0 : index
    %c0_0 = arith.constant 0 : index
    %0 = vector.load %arg0[%c0, %c0_0] : memref<2x1024xbf16, #tpu.memory_space<vmem>>, vector<2x1024xbf16>
    %c0_1 = arith.constant 0 : index
    %c0_2 = arith.constant 0 : index
    %1 = vector.load %arg1[%c0_1, %c0_2] : memref<1024x16xbf16, #tpu.memory_space<vmem>>, vector<1024x16xbf16>
    %cst = arith.constant dense<0.000000e+00> : vector<2x16xf32>
    %2 = tpu.matmul %0, %1, %cst {dimension_numbers = #tpu.dot_dimension_numbers<[1], [0], [0], [1], [0, 0, 1, 1], [], []>} : vector<2x1024xbf16>, vector<1024x16xbf16>, vector<2x16xf32> -> vector<2x16xf32>
    %c0_3 = arith.constant 0 : index
    %c0_4 = arith.constant 0 : index
    %3 = vector.load %arg2[%c0_3, %c0_4] : memref<1x16xf32, #tpu.memory_space<vmem>>, vector<1x16xf32>
    %4 = vector.broadcast %3 : vector<1x16xf32> to vector<2x16xf32>
    %5 = arith.addf %2, %4 : vector<2x16xf32>
    %cst_5 = arith.constant dense<0.000000e+00> : vector<16xf32>
    %6 = vector.multi_reduction <add>, %5, %cst_5 [0] : vector<2x16xf32> to vector<16xf32>
    %7 = vector.shape_cast %6 : vector<16xf32> to vector<1x16xf32>
    %cst_6 = arith.constant 2.000000e+00 : f32
    %8 = vector.broadcast %cst_6 : f32 to vector<1x16xf32>
    %9 = arith.divf %7, %8 : vector<1x16xf32>
    %10 = vector.broadcast %9 : vector<1x16xf32> to vector<2x16xf32>
    %11 = arith.subf %5, %10 : vector<2x16xf32>
    %12 = arith.mulf %11, %11 : vector<2x16xf32>
    %cst_7 = arith.constant dense<0.000000e+00> : vector<16xf32>
    %13 = vector.multi_reduction <add>, %12, %cst_7 [0] : vector<2x16xf32> to vector<16xf32>
    %14 = vector.shape_cast %13 : vector<16xf32> to vector<1x16xf32>
    %cst_8 = arith.constant 2.000000e+00 : f32
    %15 = vector.broadcast %cst_8 : f32 to vector<1x16xf32>
    %16 = arith.divf %14, %15 : vector<1x16xf32>
    %17 = vector.broadcast %9 : vector<1x16xf32> to vector<2x16xf32>
    %18 = arith.subf %5, %17 : vector<2x16xf32>
    %cst_9 = arith.constant 9.99999974E-6 : f32
    %19 = vector.broadcast %cst_9 : f32 to vector<1x16xf32>
    %20 = arith.addf %16, %19 : vector<1x16xf32>
    %21 = math.rsqrt %20 : vector<1x16xf32>
    %22 = vector.broadcast %21 : vector<1x16xf32> to vector<2x16xf32>
    %23 = arith.mulf %18, %22 : vector<2x16xf32>
    %c0_10 = arith.constant 0 : index
    %c0_11 = arith.constant 0 : index
    %24 = vector.load %arg3[%c0_10, %c0_11] : memref<1x16xf32, #tpu.memory_space<vmem>>, vector<1x16xf32>
    %25 = vector.broadcast %24 : vector<1x16xf32> to vector<2x16xf32>
    %26 = arith.mulf %23, %25 : vector<2x16xf32>
    %c0_12 = arith.constant 0 : index
    %c0_13 = arith.constant 0 : index
    %27 = vector.load %arg4[%c0_12, %c0_13] : memref<1x16xf32, #tpu.memory_space<vmem>>, vector<1x16xf32>
    %28 = vector.broadcast %27 : vector<1x16xf32> to vector<2x16xf32>
    %29 = arith.addf %26, %28 : vector<2x16xf32>
    %cst_14 = arith.constant 0.000000e+00 : f32
    %30 = vector.broadcast %cst_14 : f32 to vector<2x16xf32>
    %31 = arith.cmpf ogt, %29, %30 : vector<2x16xf32>
    %cst_15 = arith.constant 2.000000e-01 : f32
    %32 = vector.broadcast %cst_15 : f32 to vector<2x16xf32>
    %33 = arith.mulf %32, %29 : vector<2x16xf32>
    %34 = arith.select %31, %29, %33 : vector<2x16xi1>, vector<2x16xf32>
    %35 = arith.truncf %34 : vector<2x16xf32> to vector<2x16xbf16>
    %c0_16 = arith.constant 0 : index
    %c0_17 = arith.constant 0 : index
    %c0_18 = arith.constant 0 : index
    %36 = vector.load %arg5[%c0_16, %c0_17, %c0_18] : memref<16x16x64xbf16, #tpu.memory_space<vmem>>, vector<1x16x64xbf16>
    %37 = vector.shape_cast %36 : vector<1x16x64xbf16> to vector<16x64xbf16>
    %cst_19 = arith.constant dense<0.000000e+00> : vector<2x64xf32>
    %38 = tpu.matmul %35, %37, %cst_19 {dimension_numbers = #tpu.dot_dimension_numbers<[1], [0], [0], [1], [0, 0, 1, 1], [], []>} : vector<2x16xbf16>, vector<16x64xbf16>, vector<2x64xf32> -> vector<2x64xf32>
    %c1 = arith.constant 1 : index
    %c0_20 = arith.constant 0 : index
    %c0_21 = arith.constant 0 : index
    %39 = vector.load %arg5[%c1, %c0_20, %c0_21] : memref<16x16x64xbf16, #tpu.memory_space<vmem>>, vector<1x16x64xbf16>
    %40 = vector.shape_cast %39 : vector<1x16x64xbf16> to vector<16x64xbf16>
    %cst_22 = arith.constant dense<0.000000e+00> : vector<2x64xf32>
    %41 = tpu.matmul %35, %40, %cst_22 {dimension_numbers = #tpu.dot_dimension_numbers<[1], [0], [0], [1], [0, 0, 1, 1], [], []>} : vector<2x16xbf16>, vector<16x64xbf16>, vector<2x64xf32> -> vector<2x64xf32>
    %c2 = arith.constant 2 : index
    %c0_23 = arith.constant 0 : index
    %c0_24 = arith.constant 0 : index
    %42 = vector.load %arg5[%c2, %c0_23, %c0_24] : memref<16x16x64xbf16, #tpu.memory_space<vmem>>, vector<1x16x64xbf16>
    %43 = vector.shape_cast %42 : vector<1x16x64xbf16> to vector<16x64xbf16>
    %cst_25 = arith.constant dense<0.000000e+00> : vector<2x64xf32>
    %44 = tpu.matmul %35, %43, %cst_25 {dimension_numbers = #tpu.dot_dimension_numbers<[1], [0], [0], [1], [0, 0, 1, 1], [], []>} : vector<2x16xbf16>, vector<16x64xbf16>, vector<2x64xf32> -> vector<2x64xf32>
    %c3 = arith.constant 3 : index
    %c0_26 = arith.constant 0 : index
    %c0_27 = arith.constant 0 : index
    %45 = vector.load %arg5[%c3, %c0_26, %c0_27] : memref<16x16x64xbf16, #tpu.memory_space<vmem>>, vector<1x16x64xbf16>
    %46 = vector.shape_cast %45 : vector<1x16x64xbf16> to vector<16x64xbf16>
    %cst_28 = arith.constant dense<0.000000e+00> : vector<2x64xf32>
    %47 = tpu.matmul %35, %46, %cst_28 {dimension_numbers = #tpu.dot_dimension_numbers<[1], [0], [0], [1], [0, 0, 1, 1], [], []>} : vector<2x16xbf16>, vector<16x64xbf16>, vector<2x64xf32> -> vector<2x64xf32>
    %c4 = arith.constant 4 : index
    %c0_29 = arith.constant 0 : index
    %c0_30 = arith.constant 0 : index
    %48 = vector.load %arg5[%c4, %c0_29, %c0_30] : memref<16x16x64xbf16, #tpu.memory_space<vmem>>, vector<1x16x64xbf16>
    %49 = vector.shape_cast %48 : vector<1x16x64xbf16> to vector<16x64xbf16>
    %cst_31 = arith.constant dense<0.000000e+00> : vector<2x64xf32>
    %50 = tpu.matmul %35, %49, %cst_31 {dimension_numbers = #tpu.dot_dimension_numbers<[1], [0], [0], [1], [0, 0, 1, 1], [], []>} : vector<2x16xbf16>, vector<16x64xbf16>, vector<2x64xf32> -> vector<2x64xf32>
    %c5 = arith.constant 5 : index
    %c0_32 = arith.constant 0 : index
    %c0_33 = arith.constant 0 : index
    %51 = vector.load %arg5[%c5, %c0_32, %c0_33] : memref<16x16x64xbf16, #tpu.memory_space<vmem>>, vector<1x16x64xbf16>
    %52 = vector.shape_cast %51 : vector<1x16x64xbf16> to vector<16x64xbf16>
    %cst_34 = arith.constant dense<0.000000e+00> : vector<2x64xf32>
    %53 = tpu.matmul %35, %52, %cst_34 {dimension_numbers = #tpu.dot_dimension_numbers<[1], [0], [0], [1], [0, 0, 1, 1], [], []>} : vector<2x16xbf16>, vector<16x64xbf16>, vector<2x64xf32> -> vector<2x64xf32>
    %c6 = arith.constant 6 : index
    %c0_35 = arith.constant 0 : index
    %c0_36 = arith.constant 0 : index
    %54 = vector.load %arg5[%c6, %c0_35, %c0_36] : memref<16x16x64xbf16, #tpu.memory_space<vmem>>, vector<1x16x64xbf16>
    %55 = vector.shape_cast %54 : vector<1x16x64xbf16> to vector<16x64xbf16>
    %cst_37 = arith.constant dense<0.000000e+00> : vector<2x64xf32>
    %56 = tpu.matmul %35, %55, %cst_37 {dimension_numbers = #tpu.dot_dimension_numbers<[1], [0], [0], [1], [0, 0, 1, 1], [], []>} : vector<2x16xbf16>, vector<16x64xbf16>, vector<2x64xf32> -> vector<2x64xf32>
    %c7 = arith.constant 7 : index
    %c0_38 = arith.constant 0 : index
    %c0_39 = arith.constant 0 : index
    %57 = vector.load %arg5[%c7, %c0_38, %c0_39] : memref<16x16x64xbf16, #tpu.memory_space<vmem>>, vector<1x16x64xbf16>
    %58 = vector.shape_cast %57 : vector<1x16x64xbf16> to vector<16x64xbf16>
    %cst_40 = arith.constant dense<0.000000e+00> : vector<2x64xf32>
    %59 = tpu.matmul %35, %58, %cst_40 {dimension_numbers = #tpu.dot_dimension_numbers<[1], [0], [0], [1], [0, 0, 1, 1], [], []>} : vector<2x16xbf16>, vector<16x64xbf16>, vector<2x64xf32> -> vector<2x64xf32>
    %c8 = arith.constant 8 : index
    %c0_41 = arith.constant 0 : index
    %c0_42 = arith.constant 0 : index
    %60 = vector.load %arg5[%c8, %c0_41, %c0_42] : memref<16x16x64xbf16, #tpu.memory_space<vmem>>, vector<1x16x64xbf16>
    %61 = vector.shape_cast %60 : vector<1x16x64xbf16> to vector<16x64xbf16>
    %cst_43 = arith.constant dense<0.000000e+00> : vector<2x64xf32>
    %62 = tpu.matmul %35, %61, %cst_43 {dimension_numbers = #tpu.dot_dimension_numbers<[1], [0], [0], [1], [0, 0, 1, 1], [], []>} : vector<2x16xbf16>, vector<16x64xbf16>, vector<2x64xf32> -> vector<2x64xf32>
    %c9 = arith.constant 9 : index
    %c0_44 = arith.constant 0 : index
    %c0_45 = arith.constant 0 : index
    %63 = vector.load %arg5[%c9, %c0_44, %c0_45] : memref<16x16x64xbf16, #tpu.memory_space<vmem>>, vector<1x16x64xbf16>
    %64 = vector.shape_cast %63 : vector<1x16x64xbf16> to vector<16x64xbf16>
    %cst_46 = arith.constant dense<0.000000e+00> : vector<2x64xf32>
    %65 = tpu.matmul %35, %64, %cst_46 {dimension_numbers = #tpu.dot_dimension_numbers<[1], [0], [0], [1], [0, 0, 1, 1], [], []>} : vector<2x16xbf16>, vector<16x64xbf16>, vector<2x64xf32> -> vector<2x64xf32>
    %c10 = arith.constant 10 : index
    %c0_47 = arith.constant 0 : index
    %c0_48 = arith.constant 0 : index
    %66 = vector.load %arg5[%c10, %c0_47, %c0_48] : memref<16x16x64xbf16, #tpu.memory_space<vmem>>, vector<1x16x64xbf16>
    %67 = vector.shape_cast %66 : vector<1x16x64xbf16> to vector<16x64xbf16>
    %cst_49 = arith.constant dense<0.000000e+00> : vector<2x64xf32>
    %68 = tpu.matmul %35, %67, %cst_49 {dimension_numbers = #tpu.dot_dimension_numbers<[1], [0], [0], [1], [0, 0, 1, 1], [], []>} : vector<2x16xbf16>, vector<16x64xbf16>, vector<2x64xf32> -> vector<2x64xf32>
    %c11 = arith.constant 11 : index
    %c0_50 = arith.constant 0 : index
    %c0_51 = arith.constant 0 : index
    %69 = vector.load %arg5[%c11, %c0_50, %c0_51] : memref<16x16x64xbf16, #tpu.memory_space<vmem>>, vector<1x16x64xbf16>
    %70 = vector.shape_cast %69 : vector<1x16x64xbf16> to vector<16x64xbf16>
    %cst_52 = arith.constant dense<0.000000e+00> : vector<2x64xf32>
    %71 = tpu.matmul %35, %70, %cst_52 {dimension_numbers = #tpu.dot_dimension_numbers<[1], [0], [0], [1], [0, 0, 1, 1], [], []>} : vector<2x16xbf16>, vector<16x64xbf16>, vector<2x64xf32> -> vector<2x64xf32>
    %c12 = arith.constant 12 : index
    %c0_53 = arith.constant 0 : index
    %c0_54 = arith.constant 0 : index
    %72 = vector.load %arg5[%c12, %c0_53, %c0_54] : memref<16x16x64xbf16, #tpu.memory_space<vmem>>, vector<1x16x64xbf16>
    %73 = vector.shape_cast %72 : vector<1x16x64xbf16> to vector<16x64xbf16>
    %cst_55 = arith.constant dense<0.000000e+00> : vector<2x64xf32>
    %74 = tpu.matmul %35, %73, %cst_55 {dimension_numbers = #tpu.dot_dimension_numbers<[1], [0], [0], [1], [0, 0, 1, 1], [], []>} : vector<2x16xbf16>, vector<16x64xbf16>, vector<2x64xf32> -> vector<2x64xf32>
    %c13 = arith.constant 13 : index
    %c0_56 = arith.constant 0 : index
    %c0_57 = arith.constant 0 : index
    %75 = vector.load %arg5[%c13, %c0_56, %c0_57] : memref<16x16x64xbf16, #tpu.memory_space<vmem>>, vector<1x16x64xbf16>
    %76 = vector.shape_cast %75 : vector<1x16x64xbf16> to vector<16x64xbf16>
    %cst_58 = arith.constant dense<0.000000e+00> : vector<2x64xf32>
    %77 = tpu.matmul %35, %76, %cst_58 {dimension_numbers = #tpu.dot_dimension_numbers<[1], [0], [0], [1], [0, 0, 1, 1], [], []>} : vector<2x16xbf16>, vector<16x64xbf16>, vector<2x64xf32> -> vector<2x64xf32>
    %c14 = arith.constant 14 : index
    %c0_59 = arith.constant 0 : index
    %c0_60 = arith.constant 0 : index
    %78 = vector.load %arg5[%c14, %c0_59, %c0_60] : memref<16x16x64xbf16, #tpu.memory_space<vmem>>, vector<1x16x64xbf16>
    %79 = vector.shape_cast %78 : vector<1x16x64xbf16> to vector<16x64xbf16>
    %cst_61 = arith.constant dense<0.000000e+00> : vector<2x64xf32>
    %80 = tpu.matmul %35, %79, %cst_61 {dimension_numbers = #tpu.dot_dimension_numbers<[1], [0], [0], [1], [0, 0, 1, 1], [], []>} : vector<2x16xbf16>, vector<16x64xbf16>, vector<2x64xf32> -> vector<2x64xf32>
    %c15 = arith.constant 15 : index
    %c0_62 = arith.constant 0 : index
    %c0_63 = arith.constant 0 : index
    %81 = vector.load %arg5[%c15, %c0_62, %c0_63] : memref<16x16x64xbf16, #tpu.memory_space<vmem>>, vector<1x16x64xbf16>
    %82 = vector.shape_cast %81 : vector<1x16x64xbf16> to vector<16x64xbf16>
    %cst_64 = arith.constant dense<0.000000e+00> : vector<2x64xf32>
    %83 = tpu.matmul %35, %82, %cst_64 {dimension_numbers = #tpu.dot_dimension_numbers<[1], [0], [0], [1], [0, 0, 1, 1], [], []>} : vector<2x16xbf16>, vector<16x64xbf16>, vector<2x64xf32> -> vector<2x64xf32>
    %84 = vector.shape_cast %38 : vector<2x64xf32> to vector<1x2x64xf32>
    %85 = vector.shape_cast %41 : vector<2x64xf32> to vector<1x2x64xf32>
    %86 = vector.shape_cast %44 : vector<2x64xf32> to vector<1x2x64xf32>
    %87 = vector.shape_cast %47 : vector<2x64xf32> to vector<1x2x64xf32>
    %88 = vector.shape_cast %50 : vector<2x64xf32> to vector<1x2x64xf32>
    %89 = vector.shape_cast %53 : vector<2x64xf32> to vector<1x2x64xf32>
    %90 = vector.shape_cast %56 : vector<2x64xf32> to vector<1x2x64xf32>
    %91 = vector.shape_cast %59 : vector<2x64xf32> to vector<1x2x64xf32>
    %92 = vector.shape_cast %62 : vector<2x64xf32> to vector<1x2x64xf32>
    %93 = vector.shape_cast %65 : vector<2x64xf32> to vector<1x2x64xf32>
    %94 = vector.shape_cast %68 : vector<2x64xf32> to vector<1x2x64xf32>
    %95 = vector.shape_cast %71 : vector<2x64xf32> to vector<1x2x64xf32>
    %96 = vector.shape_cast %74 : vector<2x64xf32> to vector<1x2x64xf32>
    %97 = vector.shape_cast %77 : vector<2x64xf32> to vector<1x2x64xf32>
    %98 = vector.shape_cast %80 : vector<2x64xf32> to vector<1x2x64xf32>
    %99 = vector.shape_cast %83 : vector<2x64xf32> to vector<1x2x64xf32>
    %100 = tpu.concatenate %84, %85, %86, %87, %88, %89, %90, %91, %92, %93, %94, %95, %96, %97, %98, %99 in 0 : vector<1x2x64xf32>, vector<1x2x64xf32>, vector<1x2x64xf32>, vector<1x2x64xf32>, vector<1x2x64xf32>, vector<1x2x64xf32>, vector<1x2x64xf32>, vector<1x2x64xf32>, vector<1x2x64xf32>, vector<1x2x64xf32>, vector<1x2x64xf32>, vector<1x2x64xf32>, vector<1x2x64xf32>, vector<1x2x64xf32>, vector<1x2x64xf32>, vector<1x2x64xf32> -> vector<16x2x64xf32>
    %c0_65 = arith.constant 0 : index
    %c0_66 = arith.constant 0 : index
    %c0_67 = arith.constant 0 : index
    %101 = vector.load %arg6[%c0_65, %c0_66, %c0_67] : memref<1x1x64xf32, #tpu.memory_space<vmem>>, vector<1x1x64xf32>
    %102 = vector.broadcast %101 : vector<1x1x64xf32> to vector<16x2x64xf32>
    %103 = arith.addf %100, %102 : vector<16x2x64xf32>
    %cst_68 = arith.constant dense<0.000000e+00> : vector<2x64xf32>
    %104 = vector.multi_reduction <add>, %103, %cst_68 [0] : vector<16x2x64xf32> to vector<2x64xf32>
    %105 = vector.shape_cast %104 : vector<2x64xf32> to vector<1x2x64xf32>
    %cst_69 = arith.constant 1.600000e+01 : f32
    %106 = vector.broadcast %cst_69 : f32 to vector<1x2x64xf32>
    %107 = arith.divf %105, %106 : vector<1x2x64xf32>
    %cst_70 = arith.constant dense<0.000000e+00> : vector<1x64xf32>
    %108 = vector.multi_reduction <add>, %107, %cst_70 [1] : vector<1x2x64xf32> to vector<1x64xf32>
    %109 = vector.shape_cast %108 : vector<1x64xf32> to vector<1x1x64xf32>
    %cst_71 = arith.constant 2.000000e+00 : f32
    %110 = vector.broadcast %cst_71 : f32 to vector<1x1x64xf32>
    %111 = arith.divf %109, %110 : vector<1x1x64xf32>
    %112 = vector.broadcast %111 : vector<1x1x64xf32> to vector<16x2x64xf32>
    %113 = arith.subf %103, %112 : vector<16x2x64xf32>
    %114 = arith.mulf %113, %113 : vector<16x2x64xf32>
    %cst_72 = arith.constant dense<0.000000e+00> : vector<2x64xf32>
    %115 = vector.multi_reduction <add>, %114, %cst_72 [0] : vector<16x2x64xf32> to vector<2x64xf32>
    %116 = vector.shape_cast %115 : vector<2x64xf32> to vector<1x2x64xf32>
    %cst_73 = arith.constant 1.600000e+01 : f32
    %117 = vector.broadcast %cst_73 : f32 to vector<1x2x64xf32>
    %118 = arith.divf %116, %117 : vector<1x2x64xf32>
    %cst_74 = arith.constant dense<0.000000e+00> : vector<1x64xf32>
    %119 = vector.multi_reduction <add>, %118, %cst_74 [1] : vector<1x2x64xf32> to vector<1x64xf32>
    %120 = vector.shape_cast %119 : vector<1x64xf32> to vector<1x1x64xf32>
    %cst_75 = arith.constant 2.000000e+00 : f32
    %121 = vector.broadcast %cst_75 : f32 to vector<1x1x64xf32>
    %122 = arith.divf %120, %121 : vector<1x1x64xf32>
    %123 = vector.broadcast %111 : vector<1x1x64xf32> to vector<16x2x64xf32>
    %124 = arith.subf %103, %123 : vector<16x2x64xf32>
    %cst_76 = arith.constant 9.99999974E-6 : f32
    %125 = vector.broadcast %cst_76 : f32 to vector<1x1x64xf32>
    %126 = arith.addf %122, %125 : vector<1x1x64xf32>
    %127 = math.rsqrt %126 : vector<1x1x64xf32>
    %128 = vector.broadcast %127 : vector<1x1x64xf32> to vector<16x2x64xf32>
    %129 = arith.mulf %124, %128 : vector<16x2x64xf32>
    %c0_77 = arith.constant 0 : index
    %c0_78 = arith.constant 0 : index
    %c0_79 = arith.constant 0 : index
    %130 = vector.load %arg7[%c0_77, %c0_78, %c0_79] : memref<1x1x64xf32, #tpu.memory_space<vmem>>, vector<1x1x64xf32>
    %131 = vector.broadcast %130 : vector<1x1x64xf32> to vector<16x2x64xf32>
    %132 = arith.mulf %129, %131 : vector<16x2x64xf32>
    %c0_80 = arith.constant 0 : index
    %c0_81 = arith.constant 0 : index
    %c0_82 = arith.constant 0 : index
    %133 = vector.load %arg8[%c0_80, %c0_81, %c0_82] : memref<1x1x64xf32, #tpu.memory_space<vmem>>, vector<1x1x64xf32>
    %134 = vector.broadcast %133 : vector<1x1x64xf32> to vector<16x2x64xf32>
    %135 = arith.addf %132, %134 : vector<16x2x64xf32>
    %cst_83 = arith.constant 0.000000e+00 : f32
    %136 = vector.broadcast %cst_83 : f32 to vector<16x2x64xf32>
    %137 = arith.maximumf %135, %136 : vector<16x2x64xf32>
    %138 = arith.truncf %137 : vector<16x2x64xf32> to vector<16x2x64xbf16>
    %c0_84 = arith.constant 0 : index
    %c0_85 = arith.constant 0 : index
    %c0_86 = arith.constant 0 : index
    %139 = vector.load %arg9[%c0_84, %c0_85, %c0_86] : memref<16x2x64xbf16, #tpu.memory_space<vmem>>, vector<16x2x64xbf16>
    tpu.vector_store %arg9[%c0_84, %c0_85, %c0_86], %138 {strides = array<i32>} : memref<16x2x64xbf16, #tpu.memory_space<vmem>>, vector<16x2x64xbf16>,
    return
  }
}

module attributes {stable_mosaic.version = 11 : i64} {
  func.func @_gemm_bn_act_kernel(%arg0: memref<128x1024xbf16, #tpu.memory_space<vmem>>, %arg1: memref<1024x32xbf16, #tpu.memory_space<vmem>>, %arg2: memref<1x32xf32, #tpu.memory_space<vmem>>, %arg3: memref<1x32xf32, #tpu.memory_space<vmem>>, %arg4: memref<1x32xf32, #tpu.memory_space<vmem>>, %arg5: memref<128x32xbf16, #tpu.memory_space<vmem>>) attributes {dimension_semantics = [], scalar_prefetch = 0 : i64, scratch_operands = 0 : i64, tpu.core_type = #tpu.core_type<tc>} {
    %c0 = arith.constant 0 : index
    %c0_0 = arith.constant 0 : index
    %0 = vector.load %arg0[%c0, %c0_0] : memref<128x1024xbf16, #tpu.memory_space<vmem>>, vector<128x1024xbf16>
    %c0_1 = arith.constant 0 : index
    %c0_2 = arith.constant 0 : index
    %1 = vector.load %arg1[%c0_1, %c0_2] : memref<1024x32xbf16, #tpu.memory_space<vmem>>, vector<1024x32xbf16>
    %cst = arith.constant dense<0.000000e+00> : vector<128x32xf32>
    %2 = tpu.matmul %0, %1, %cst {dimension_numbers = #tpu.dot_dimension_numbers<[1], [0], [0], [1], [0, 0, 1, 1], [], []>} : vector<128x1024xbf16>, vector<1024x32xbf16>, vector<128x32xf32> -> vector<128x32xf32>
    %c0_3 = arith.constant 0 : index
    %c0_4 = arith.constant 0 : index
    %3 = vector.load %arg2[%c0_3, %c0_4] : memref<1x32xf32, #tpu.memory_space<vmem>>, vector<1x32xf32>
    %4 = vector.broadcast %3 : vector<1x32xf32> to vector<128x32xf32>
    %5 = arith.addf %2, %4 : vector<128x32xf32>
    %cst_5 = arith.constant dense<0.000000e+00> : vector<32xf32>
    %6 = vector.multi_reduction <add>, %5, %cst_5 [0] : vector<128x32xf32> to vector<32xf32>
    %7 = vector.shape_cast %6 : vector<32xf32> to vector<1x32xf32>
    %cst_6 = arith.constant 1.280000e+02 : f32
    %8 = vector.broadcast %cst_6 : f32 to vector<1x32xf32>
    %9 = arith.divf %7, %8 : vector<1x32xf32>
    %10 = vector.broadcast %9 : vector<1x32xf32> to vector<128x32xf32>
    %11 = arith.subf %5, %10 : vector<128x32xf32>
    %12 = arith.mulf %11, %11 : vector<128x32xf32>
    %cst_7 = arith.constant dense<0.000000e+00> : vector<32xf32>
    %13 = vector.multi_reduction <add>, %12, %cst_7 [0] : vector<128x32xf32> to vector<32xf32>
    %14 = vector.shape_cast %13 : vector<32xf32> to vector<1x32xf32>
    %cst_8 = arith.constant 1.280000e+02 : f32
    %15 = vector.broadcast %cst_8 : f32 to vector<1x32xf32>
    %16 = arith.divf %14, %15 : vector<1x32xf32>
    %17 = vector.broadcast %9 : vector<1x32xf32> to vector<128x32xf32>
    %18 = arith.subf %5, %17 : vector<128x32xf32>
    %cst_9 = arith.constant 9.99999974E-6 : f32
    %19 = vector.broadcast %cst_9 : f32 to vector<1x32xf32>
    %20 = arith.addf %16, %19 : vector<1x32xf32>
    %21 = math.rsqrt %20 : vector<1x32xf32>
    %22 = vector.broadcast %21 : vector<1x32xf32> to vector<128x32xf32>
    %23 = arith.mulf %18, %22 : vector<128x32xf32>
    %c0_10 = arith.constant 0 : index
    %c0_11 = arith.constant 0 : index
    %24 = vector.load %arg3[%c0_10, %c0_11] : memref<1x32xf32, #tpu.memory_space<vmem>>, vector<1x32xf32>
    %25 = vector.broadcast %24 : vector<1x32xf32> to vector<128x32xf32>
    %26 = arith.mulf %23, %25 : vector<128x32xf32>
    %c0_12 = arith.constant 0 : index
    %c0_13 = arith.constant 0 : index
    %27 = vector.load %arg4[%c0_12, %c0_13] : memref<1x32xf32, #tpu.memory_space<vmem>>, vector<1x32xf32>
    %28 = vector.broadcast %27 : vector<1x32xf32> to vector<128x32xf32>
    %29 = arith.addf %26, %28 : vector<128x32xf32>
    %cst_14 = arith.constant 0.000000e+00 : f32
    %30 = vector.broadcast %cst_14 : f32 to vector<128x32xf32>
    %31 = arith.maximumf %29, %30 : vector<128x32xf32>
    %32 = arith.truncf %31 : vector<128x32xf32> to vector<128x32xbf16>
    %c0_15 = arith.constant 0 : index
    %c0_16 = arith.constant 0 : index
    %33 = vector.load %arg5[%c0_15, %c0_16] : memref<128x32xbf16, #tpu.memory_space<vmem>>, vector<128x32xbf16>
    tpu.vector_store %arg5[%c0_15, %c0_16], %32 {strides = array<i32>} : memref<128x32xbf16, #tpu.memory_space<vmem>>, vector<128x32xbf16>,
    return
  }
}

module attributes {stable_mosaic.version = 11 : i64} {
  func.func @_gen_out_kernel(%arg0: memref<512x512xbf16, #tpu.memory_space<vmem>>, %arg1: memref<512x4xbf16, #tpu.memory_space<vmem>>, %arg2: memref<1x4xf32, #tpu.memory_space<vmem>>, %arg3: memref<512x4xf32, #tpu.memory_space<vmem>>, %arg4: memref<512x4xf32, #tpu.memory_space<vmem>>, %arg5: memref<1x1xf32, #tpu.memory_space<vmem>>) attributes {dimension_semantics = [], scalar_prefetch = 0 : i64, scratch_operands = 0 : i64, tpu.core_type = #tpu.core_type<tc>} {
    %c0 = arith.constant 0 : index
    %c0_0 = arith.constant 0 : index
    %0 = vector.load %arg0[%c0, %c0_0] : memref<512x512xbf16, #tpu.memory_space<vmem>>, vector<512x512xbf16>
    %c0_1 = arith.constant 0 : index
    %c0_2 = arith.constant 0 : index
    %1 = vector.load %arg1[%c0_1, %c0_2] : memref<512x4xbf16, #tpu.memory_space<vmem>>, vector<512x4xbf16>
    %cst = arith.constant dense<0.000000e+00> : vector<512x4xf32>
    %2 = tpu.matmul %0, %1, %cst {dimension_numbers = #tpu.dot_dimension_numbers<[1], [0], [0], [1], [0, 0, 1, 1], [], []>} : vector<512x512xbf16>, vector<512x4xbf16>, vector<512x4xf32> -> vector<512x4xf32>
    %c0_3 = arith.constant 0 : index
    %c0_4 = arith.constant 0 : index
    %3 = vector.load %arg2[%c0_3, %c0_4] : memref<1x4xf32, #tpu.memory_space<vmem>>, vector<1x4xf32>
    %4 = vector.broadcast %3 : vector<1x4xf32> to vector<512x4xf32>
    %5 = arith.addf %2, %4 : vector<512x4xf32>
    %6 = math.tanh %5 : vector<512x4xf32>
    %c0_5 = arith.constant 0 : index
    %c0_6 = arith.constant 0 : index
    %7 = vector.load %arg4[%c0_5, %c0_6] : memref<512x4xf32, #tpu.memory_space<vmem>>, vector<512x4xf32>
    tpu.vector_store %arg4[%c0_5, %c0_6], %6 {strides = array<i32>} : memref<512x4xf32, #tpu.memory_space<vmem>>, vector<512x4xf32>,
    %c0_7 = arith.constant 0 : index
    %c0_8 = arith.constant 0 : index
    %8 = vector.load %arg3[%c0_7, %c0_8] : memref<512x4xf32, #tpu.memory_space<vmem>>, vector<512x4xf32>
    %9 = arith.subf %6, %8 : vector<512x4xf32>
    %10 = math.absf %9 : vector<512x4xf32>
    %11 = vector.shape_cast %10 : vector<512x4xf32> to vector<1x512x4xf32>
    %cst_9 = arith.constant dense<0.000000e+00> : vector<1xf32>
    %12 = vector.multi_reduction <add>, %11, %cst_9 [1, 2] : vector<1x512x4xf32> to vector<1xf32>
    %13 = vector.shape_cast %12 : vector<1xf32> to vector<1x1x1xf32>
    %14 = vector.extract %13[0, 0, 0] : f32 from vector<1x1x1xf32>
    %15 = vector.broadcast %14 : f32 to vector<1x1xf32>
    %cst_10 = arith.constant 2.048000e+03 : f32
    %16 = vector.broadcast %cst_10 : f32 to vector<1x1xf32>
    %17 = arith.divf %15, %16 : vector<1x1xf32>
    %c0_11 = arith.constant 0 : index
    %c0_12 = arith.constant 0 : index
    %18 = vector.load %arg5[%c0_11, %c0_12] : memref<1x1xf32, #tpu.memory_space<vmem>>, vector<1x1xf32>
    tpu.vector_store %arg5[%c0_11, %c0_12], %17 {strides = array<i32>} : memref<1x1xf32, #tpu.memory_space<vmem>>, vector<1x1xf32>,
    return
  }
}

module attributes {stable_mosaic.version = 11 : i64} {
  func.func @_gemm_bn_act_kernel(%arg0: i32, %arg1: memref<128x128xbf16, #tpu.memory_space<vmem>>, %arg2: memref<128x32xbf16, #tpu.memory_space<vmem>>, %arg3: memref<1x32xf32, #tpu.memory_space<vmem>>, %arg4: memref<1x32xf32, #tpu.memory_space<vmem>>, %arg5: memref<1x32xf32, #tpu.memory_space<vmem>>, %arg6: memref<128x32xbf16, #tpu.memory_space<vmem>>) attributes {dimension_semantics = [#tpu.dimension_semantics<parallel>], iteration_bounds = array<i64: 2>, scalar_prefetch = 0 : i64, scratch_operands = 0 : i64, tpu.core_type = #tpu.core_type<tc>, window_params = [{transform_indices = @transform_0, window_bounds = array<i64: 128, 128>}, {pipeline_mode = #tpu.pipeline_mode<synchronous>, transform_indices = @transform_1, window_bounds = array<i64: 128, 32>}, {pipeline_mode = #tpu.pipeline_mode<synchronous>, transform_indices = @transform_2, window_bounds = array<i64: 1, 32>}, {pipeline_mode = #tpu.pipeline_mode<synchronous>, transform_indices = @transform_3, window_bounds = array<i64: 1, 32>}, {pipeline_mode = #tpu.pipeline_mode<synchronous>, transform_indices = @transform_4, window_bounds = array<i64: 1, 32>}, {transform_indices = @transform_5, window_bounds = array<i64: 128, 32>}]} {
    %c0 = arith.constant 0 : index
    %c0_0 = arith.constant 0 : index
    %0 = vector.load %arg1[%c0, %c0_0] : memref<128x128xbf16, #tpu.memory_space<vmem>>, vector<128x128xbf16>
    %c0_1 = arith.constant 0 : index
    %c0_2 = arith.constant 0 : index
    %1 = vector.load %arg2[%c0_1, %c0_2] : memref<128x32xbf16, #tpu.memory_space<vmem>>, vector<128x32xbf16>
    %cst = arith.constant dense<0.000000e+00> : vector<128x32xf32>
    %2 = tpu.matmul %0, %1, %cst {dimension_numbers = #tpu.dot_dimension_numbers<[1], [0], [0], [1], [0, 0, 1, 1], [], []>} : vector<128x128xbf16>, vector<128x32xbf16>, vector<128x32xf32> -> vector<128x32xf32>
    %c0_3 = arith.constant 0 : index
    %c0_4 = arith.constant 0 : index
    %3 = vector.load %arg3[%c0_3, %c0_4] : memref<1x32xf32, #tpu.memory_space<vmem>>, vector<1x32xf32>
    %4 = vector.broadcast %3 : vector<1x32xf32> to vector<128x32xf32>
    %5 = arith.addf %2, %4 : vector<128x32xf32>
    %cst_5 = arith.constant 0.000000e+00 : f32
    %6 = vector.broadcast %cst_5 : f32 to vector<128x32xf32>
    %7 = arith.cmpf ogt, %5, %6 : vector<128x32xf32>
    %cst_6 = arith.constant 2.000000e-01 : f32
    %8 = vector.broadcast %cst_6 : f32 to vector<128x32xf32>
    %9 = arith.mulf %8, %5 : vector<128x32xf32>
    %10 = arith.select %7, %5, %9 : vector<128x32xi1>, vector<128x32xf32>
    %11 = arith.truncf %10 : vector<128x32xf32> to vector<128x32xbf16>
    %c0_7 = arith.constant 0 : index
    %c0_8 = arith.constant 0 : index
    %12 = vector.load %arg6[%c0_7, %c0_8] : memref<128x32xbf16, #tpu.memory_space<vmem>>, vector<128x32xbf16>
    tpu.vector_store %arg6[%c0_7, %c0_8], %11 {strides = array<i32>} : memref<128x32xbf16, #tpu.memory_space<vmem>>, vector<128x32xbf16>,
    return
  }
  func.func @transform_0(%arg0: i32) -> (i32, i32) {
    %c0_i32 = arith.constant 0 : i32
    %c0_i32_0 = arith.constant 0 : i32
    return %arg0, %c0_i32 : i32, i32
  }
  func.func @transform_1(%arg0: i32) -> (i32, i32) {
    %c0_i32 = arith.constant 0 : i32
    %c0_i32_0 = arith.constant 0 : i32
    %c0_i32_1 = arith.constant 0 : i32
    return %c0_i32, %c0_i32_0 : i32, i32
  }
  func.func @transform_2(%arg0: i32) -> (i32, i32) {
    %c0_i32 = arith.constant 0 : i32
    %c0_i32_0 = arith.constant 0 : i32
    %c0_i32_1 = arith.constant 0 : i32
    return %c0_i32, %c0_i32_0 : i32, i32
  }
  func.func @transform_3(%arg0: i32) -> (i32, i32) {
    %c0_i32 = arith.constant 0 : i32
    %c0_i32_0 = arith.constant 0 : i32
    %c0_i32_1 = arith.constant 0 : i32
    return %c0_i32, %c0_i32_0 : i32, i32
  }
  func.func @transform_4(%arg0: i32) -> (i32, i32) {
    %c0_i32 = arith.constant 0 : i32
    %c0_i32_0 = arith.constant 0 : i32
    %c0_i32_1 = arith.constant 0 : i32
    return %c0_i32, %c0_i32_0 : i32, i32
  }
  func.func @transform_5(%arg0: i32) -> (i32, i32) {
    %c0_i32 = arith.constant 0 : i32
    %c0_i32_0 = arith.constant 0 : i32
    return %arg0, %c0_i32 : i32, i32
  }
}

module attributes {stable_mosaic.version = 11 : i64} {
  func.func @_disc_tail_kernel(%arg0: memref<64x512xbf16, #tpu.memory_space<vmem>>, %arg1: memref<512x64xbf16, #tpu.memory_space<vmem>>, %arg2: memref<1x64xf32, #tpu.memory_space<vmem>>, %arg3: memref<1x64xf32, #tpu.memory_space<vmem>>, %arg4: memref<1x64xf32, #tpu.memory_space<vmem>>, %arg5: memref<64x64xf32, #tpu.memory_space<vmem>>, %arg6: memref<1x1xf32, #tpu.memory_space<vmem>>, %arg7: memref<1x1xf32, #tpu.memory_space<vmem>>, %arg8: memref<1x1xf32, #tpu.memory_space<vmem>>, %arg9: memref<1x1xf32, #tpu.memory_space<vmem>>) attributes {dimension_semantics = [], scalar_prefetch = 0 : i64, scratch_operands = 0 : i64, tpu.core_type = #tpu.core_type<tc>} {
    %c0 = arith.constant 0 : index
    %c0_0 = arith.constant 0 : index
    %0 = vector.load %arg0[%c0, %c0_0] : memref<64x512xbf16, #tpu.memory_space<vmem>>, vector<64x512xbf16>
    %c0_1 = arith.constant 0 : index
    %c0_2 = arith.constant 0 : index
    %1 = vector.load %arg1[%c0_1, %c0_2] : memref<512x64xbf16, #tpu.memory_space<vmem>>, vector<512x64xbf16>
    %cst = arith.constant dense<0.000000e+00> : vector<64x64xf32>
    %2 = tpu.matmul %0, %1, %cst {dimension_numbers = #tpu.dot_dimension_numbers<[1], [0], [0], [1], [0, 0, 1, 1], [], []>} : vector<64x512xbf16>, vector<512x64xbf16>, vector<64x64xf32> -> vector<64x64xf32>
    %c0_3 = arith.constant 0 : index
    %c0_4 = arith.constant 0 : index
    %3 = vector.load %arg2[%c0_3, %c0_4] : memref<1x64xf32, #tpu.memory_space<vmem>>, vector<1x64xf32>
    %4 = vector.broadcast %3 : vector<1x64xf32> to vector<64x64xf32>
    %5 = arith.addf %2, %4 : vector<64x64xf32>
    %6 = tpu.iota {dimensions = array<i32: 0>} : vector<64x64xi32>
    %c32_i32 = arith.constant 32 : i32
    %7 = vector.broadcast %c32_i32 : i32 to vector<64x64xi32>
    %8 = arith.cmpi slt, %6, %7 : vector<64x64xi32>
    %cst_5 = arith.constant 0.000000e+00 : f32
    %9 = vector.broadcast %cst_5 : f32 to vector<64x64xf32>
    %10 = arith.select %8, %5, %9 : vector<64x64xi1>, vector<64x64xf32>
    %cst_6 = arith.constant dense<0.000000e+00> : vector<64xf32>
    %11 = vector.multi_reduction <add>, %10, %cst_6 [0] : vector<64x64xf32> to vector<64xf32>
    %12 = vector.shape_cast %11 : vector<64xf32> to vector<1x64xf32>
    %cst_7 = arith.constant 3.200000e+01 : f32
    %13 = vector.broadcast %cst_7 : f32 to vector<1x64xf32>
    %14 = arith.divf %12, %13 : vector<1x64xf32>
    %15 = vector.broadcast %14 : vector<1x64xf32> to vector<64x64xf32>
    %16 = arith.subf %5, %15 : vector<64x64xf32>
    %17 = arith.mulf %16, %16 : vector<64x64xf32>
    %cst_8 = arith.constant 0.000000e+00 : f32
    %18 = vector.broadcast %cst_8 : f32 to vector<64x64xf32>
    %19 = arith.select %8, %17, %18 : vector<64x64xi1>, vector<64x64xf32>
    %cst_9 = arith.constant dense<0.000000e+00> : vector<64xf32>
    %20 = vector.multi_reduction <add>, %19, %cst_9 [0] : vector<64x64xf32> to vector<64xf32>
    %21 = vector.shape_cast %20 : vector<64xf32> to vector<1x64xf32>
    %cst_10 = arith.constant 3.200000e+01 : f32
    %22 = vector.broadcast %cst_10 : f32 to vector<1x64xf32>
    %23 = arith.divf %21, %22 : vector<1x64xf32>
    %cst_11 = arith.constant 0.000000e+00 : f32
    %24 = vector.broadcast %cst_11 : f32 to vector<64x64xf32>
    %25 = arith.select %8, %24, %5 : vector<64x64xi1>, vector<64x64xf32>
    %cst_12 = arith.constant dense<0.000000e+00> : vector<64xf32>
    %26 = vector.multi_reduction <add>, %25, %cst_12 [0] : vector<64x64xf32> to vector<64xf32>
    %27 = vector.shape_cast %26 : vector<64xf32> to vector<1x64xf32>
    %cst_13 = arith.constant 3.200000e+01 : f32
    %28 = vector.broadcast %cst_13 : f32 to vector<1x64xf32>
    %29 = arith.divf %27, %28 : vector<1x64xf32>
    %30 = vector.broadcast %29 : vector<1x64xf32> to vector<64x64xf32>
    %31 = arith.subf %5, %30 : vector<64x64xf32>
    %32 = arith.mulf %31, %31 : vector<64x64xf32>
    %cst_14 = arith.constant 0.000000e+00 : f32
    %33 = vector.broadcast %cst_14 : f32 to vector<64x64xf32>
    %34 = arith.select %8, %33, %32 : vector<64x64xi1>, vector<64x64xf32>
    %cst_15 = arith.constant dense<0.000000e+00> : vector<64xf32>
    %35 = vector.multi_reduction <add>, %34, %cst_15 [0] : vector<64x64xf32> to vector<64xf32>
    %36 = vector.shape_cast %35 : vector<64xf32> to vector<1x64xf32>
    %cst_16 = arith.constant 3.200000e+01 : f32
    %37 = vector.broadcast %cst_16 : f32 to vector<1x64xf32>
    %38 = arith.divf %36, %37 : vector<1x64xf32>
    %39 = vector.shape_cast %14 : vector<1x64xf32> to vector<1x64xf32>
    %40 = vector.broadcast %39 : vector<1x64xf32> to vector<64x64xf32>
    %41 = vector.shape_cast %29 : vector<1x64xf32> to vector<1x64xf32>
    %42 = vector.broadcast %41 : vector<1x64xf32> to vector<64x64xf32>
    %43 = arith.select %8, %40, %42 : vector<64x64xi1>, vector<64x64xf32>
    %44 = vector.shape_cast %23 : vector<1x64xf32> to vector<1x64xf32>
    %45 = vector.broadcast %44 : vector<1x64xf32> to vector<64x64xf32>
    %46 = vector.shape_cast %38 : vector<1x64xf32> to vector<1x64xf32>
    %47 = vector.broadcast %46 : vector<1x64xf32> to vector<64x64xf32>
    %48 = arith.select %8, %45, %47 : vector<64x64xi1>, vector<64x64xf32>
    %49 = arith.subf %5, %43 : vector<64x64xf32>
    %cst_17 = arith.constant 9.99999974E-6 : f32
    %50 = vector.broadcast %cst_17 : f32 to vector<64x64xf32>
    %51 = arith.addf %48, %50 : vector<64x64xf32>
    %52 = math.rsqrt %51 : vector<64x64xf32>
    %53 = arith.mulf %49, %52 : vector<64x64xf32>
    %c0_18 = arith.constant 0 : index
    %c0_19 = arith.constant 0 : index
    %54 = vector.load %arg3[%c0_18, %c0_19] : memref<1x64xf32, #tpu.memory_space<vmem>>, vector<1x64xf32>
    %55 = vector.broadcast %54 : vector<1x64xf32> to vector<64x64xf32>
    %56 = arith.mulf %53, %55 : vector<64x64xf32>
    %c0_20 = arith.constant 0 : index
    %c0_21 = arith.constant 0 : index
    %57 = vector.load %arg4[%c0_20, %c0_21] : memref<1x64xf32, #tpu.memory_space<vmem>>, vector<1x64xf32>
    %58 = vector.broadcast %57 : vector<1x64xf32> to vector<64x64xf32>
    %59 = arith.addf %56, %58 : vector<64x64xf32>
    %cst_22 = arith.constant 0.000000e+00 : f32
    %60 = vector.broadcast %cst_22 : f32 to vector<64x64xf32>
    %61 = arith.cmpf ogt, %59, %60 : vector<64x64xf32>
    %cst_23 = arith.constant 2.000000e-01 : f32
    %62 = vector.broadcast %cst_23 : f32 to vector<64x64xf32>
    %63 = arith.mulf %62, %59 : vector<64x64xf32>
    %64 = arith.select %61, %59, %63 : vector<64x64xi1>, vector<64x64xf32>
    %c0_24 = arith.constant 0 : index
    %c0_25 = arith.constant 0 : index
    %65 = vector.load %arg5[%c0_24, %c0_25] : memref<64x64xf32, #tpu.memory_space<vmem>>, vector<64x64xf32>
    %66 = arith.mulf %64, %65 : vector<64x64xf32>
    %c0_i32 = arith.constant 0 : i32
    %67 = vector.broadcast %c0_i32 : i32 to vector<64x64xi32>
    %68 = arith.cmpi sge, %6, %67 : vector<64x64xi32>
    %c16_i32 = arith.constant 16 : i32
    %69 = vector.broadcast %c16_i32 : i32 to vector<64x64xi32>
    %70 = arith.cmpi slt, %6, %69 : vector<64x64xi32>
    %71 = arith.andi %68, %70 : vector<64x64xi1>
    %cst_26 = arith.constant 0.000000e+00 : f32
    %72 = vector.broadcast %cst_26 : f32 to vector<64x64xf32>
    %73 = arith.select %71, %66, %72 : vector<64x64xi1>, vector<64x64xf32>
    %74 = vector.shape_cast %73 : vector<64x64xf32> to vector<1x64x64xf32>
    %cst_27 = arith.constant dense<0.000000e+00> : vector<1xf32>
    %75 = vector.multi_reduction <add>, %74, %cst_27 [1, 2] : vector<1x64x64xf32> to vector<1xf32>
    %76 = vector.shape_cast %75 : vector<1xf32> to vector<1x1x1xf32>
    %77 = vector.extract %76[0, 0, 0] : f32 from vector<1x1x1xf32>
    %78 = vector.broadcast %77 : f32 to vector<1x1xf32>
    %c0_28 = arith.constant 0 : index
    %c0_29 = arith.constant 0 : index
    %79 = vector.load %arg6[%c0_28, %c0_29] : memref<1x1xf32, #tpu.memory_space<vmem>>, vector<1x1xf32>
    %80 = arith.addf %78, %79 : vector<1x1xf32>
    %c16_i32_30 = arith.constant 16 : i32
    %81 = vector.broadcast %c16_i32_30 : i32 to vector<64x64xi32>
    %82 = arith.cmpi sge, %6, %81 : vector<64x64xi32>
    %c32_i32_31 = arith.constant 32 : i32
    %83 = vector.broadcast %c32_i32_31 : i32 to vector<64x64xi32>
    %84 = arith.cmpi slt, %6, %83 : vector<64x64xi32>
    %85 = arith.andi %82, %84 : vector<64x64xi1>
    %cst_32 = arith.constant 0.000000e+00 : f32
    %86 = vector.broadcast %cst_32 : f32 to vector<64x64xf32>
    %87 = arith.select %85, %66, %86 : vector<64x64xi1>, vector<64x64xf32>
    %88 = vector.shape_cast %87 : vector<64x64xf32> to vector<1x64x64xf32>
    %cst_33 = arith.constant dense<0.000000e+00> : vector<1xf32>
    %89 = vector.multi_reduction <add>, %88, %cst_33 [1, 2] : vector<1x64x64xf32> to vector<1xf32>
    %90 = vector.shape_cast %89 : vector<1xf32> to vector<1x1x1xf32>
    %91 = vector.extract %90[0, 0, 0] : f32 from vector<1x1x1xf32>
    %92 = vector.broadcast %91 : f32 to vector<1x1xf32>
    %c0_34 = arith.constant 0 : index
    %c0_35 = arith.constant 0 : index
    %93 = vector.load %arg6[%c0_34, %c0_35] : memref<1x1xf32, #tpu.memory_space<vmem>>, vector<1x1xf32>
    %94 = arith.addf %92, %93 : vector<1x1xf32>
    %c32_i32_36 = arith.constant 32 : i32
    %95 = vector.broadcast %c32_i32_36 : i32 to vector<64x64xi32>
    %96 = arith.cmpi sge, %6, %95 : vector<64x64xi32>
    %c48_i32 = arith.constant 48 : i32
    %97 = vector.broadcast %c48_i32 : i32 to vector<64x64xi32>
    %98 = arith.cmpi slt, %6, %97 : vector<64x64xi32>
    %99 = arith.andi %96, %98 : vector<64x64xi1>
    %cst_37 = arith.constant 0.000000e+00 : f32
    %100 = vector.broadcast %cst_37 : f32 to vector<64x64xf32>
    %101 = arith.select %99, %66, %100 : vector<64x64xi1>, vector<64x64xf32>
    %102 = vector.shape_cast %101 : vector<64x64xf32> to vector<1x64x64xf32>
    %cst_38 = arith.constant dense<0.000000e+00> : vector<1xf32>
    %103 = vector.multi_reduction <add>, %102, %cst_38 [1, 2] : vector<1x64x64xf32> to vector<1xf32>
    %104 = vector.shape_cast %103 : vector<1xf32> to vector<1x1x1xf32>
    %105 = vector.extract %104[0, 0, 0] : f32 from vector<1x1x1xf32>
    %106 = vector.broadcast %105 : f32 to vector<1x1xf32>
    %c0_39 = arith.constant 0 : index
    %c0_40 = arith.constant 0 : index
    %107 = vector.load %arg6[%c0_39, %c0_40] : memref<1x1xf32, #tpu.memory_space<vmem>>, vector<1x1xf32>
    %108 = arith.addf %106, %107 : vector<1x1xf32>
    %c48_i32_41 = arith.constant 48 : i32
    %109 = vector.broadcast %c48_i32_41 : i32 to vector<64x64xi32>
    %110 = arith.cmpi sge, %6, %109 : vector<64x64xi32>
    %c64_i32 = arith.constant 64 : i32
    %111 = vector.broadcast %c64_i32 : i32 to vector<64x64xi32>
    %112 = arith.cmpi slt, %6, %111 : vector<64x64xi32>
    %113 = arith.andi %110, %112 : vector<64x64xi1>
    %cst_42 = arith.constant 0.000000e+00 : f32
    %114 = vector.broadcast %cst_42 : f32 to vector<64x64xf32>
    %115 = arith.select %113, %66, %114 : vector<64x64xi1>, vector<64x64xf32>
    %116 = vector.shape_cast %115 : vector<64x64xf32> to vector<1x64x64xf32>
    %cst_43 = arith.constant dense<0.000000e+00> : vector<1xf32>
    %117 = vector.multi_reduction <add>, %116, %cst_43 [1, 2] : vector<1x64x64xf32> to vector<1xf32>
    %118 = vector.shape_cast %117 : vector<1xf32> to vector<1x1x1xf32>
    %119 = vector.extract %118[0, 0, 0] : f32 from vector<1x1x1xf32>
    %120 = vector.broadcast %119 : f32 to vector<1x1xf32>
    %c0_44 = arith.constant 0 : index
    %c0_45 = arith.constant 0 : index
    %121 = vector.load %arg6[%c0_44, %c0_45] : memref<1x1xf32, #tpu.memory_space<vmem>>, vector<1x1xf32>
    %122 = arith.addf %120, %121 : vector<1x1xf32>
    %cst_46 = arith.constant 1.000000e+00 : f32
    %123 = vector.broadcast %cst_46 : f32 to vector<1x1xf32>
    %124 = arith.subf %80, %123 : vector<1x1xf32>
    %125 = arith.mulf %124, %124 : vector<1x1xf32>
    %cst_47 = arith.constant 0.000000e+00 : f32
    %126 = vector.broadcast %cst_47 : f32 to vector<1x1xf32>
    %127 = arith.addf %126, %125 : vector<1x1xf32>
    %cst_48 = arith.constant 1.000000e+00 : f32
    %128 = vector.broadcast %cst_48 : f32 to vector<1x1xf32>
    %129 = arith.subf %94, %128 : vector<1x1xf32>
    %130 = arith.mulf %129, %129 : vector<1x1xf32>
    %131 = arith.addf %127, %130 : vector<1x1xf32>
    %cst_49 = arith.constant 2.000000e+00 : f32
    %132 = vector.broadcast %cst_49 : f32 to vector<1x1xf32>
    %133 = arith.divf %131, %132 : vector<1x1xf32>
    %c0_50 = arith.constant 0 : index
    %c0_51 = arith.constant 0 : index
    %134 = vector.load %arg7[%c0_50, %c0_51] : memref<1x1xf32, #tpu.memory_space<vmem>>, vector<1x1xf32>
    tpu.vector_store %arg7[%c0_50, %c0_51], %133 {strides = array<i32>} : memref<1x1xf32, #tpu.memory_space<vmem>>, vector<1x1xf32>,
    %135 = arith.mulf %108, %108 : vector<1x1xf32>
    %cst_52 = arith.constant 0.000000e+00 : f32
    %136 = vector.broadcast %cst_52 : f32 to vector<1x1xf32>
    %137 = arith.addf %136, %135 : vector<1x1xf32>
    %138 = arith.mulf %122, %122 : vector<1x1xf32>
    %139 = arith.addf %137, %138 : vector<1x1xf32>
    %cst_53 = arith.constant 2.000000e+00 : f32
    %140 = vector.broadcast %cst_53 : f32 to vector<1x1xf32>
    %141 = arith.divf %139, %140 : vector<1x1xf32>
    %c0_54 = arith.constant 0 : index
    %c0_55 = arith.constant 0 : index
    %142 = vector.load %arg8[%c0_54, %c0_55] : memref<1x1xf32, #tpu.memory_space<vmem>>, vector<1x1xf32>
    tpu.vector_store %arg8[%c0_54, %c0_55], %141 {strides = array<i32>} : memref<1x1xf32, #tpu.memory_space<vmem>>, vector<1x1xf32>,
    %cst_56 = arith.constant 1.000000e+00 : f32
    %143 = vector.broadcast %cst_56 : f32 to vector<1x1xf32>
    %144 = arith.subf %108, %143 : vector<1x1xf32>
    %145 = arith.mulf %144, %144 : vector<1x1xf32>
    %cst_57 = arith.constant 0.000000e+00 : f32
    %146 = vector.broadcast %cst_57 : f32 to vector<1x1xf32>
    %147 = arith.addf %146, %145 : vector<1x1xf32>
    %cst_58 = arith.constant 1.000000e+00 : f32
    %148 = vector.broadcast %cst_58 : f32 to vector<1x1xf32>
    %149 = arith.subf %122, %148 : vector<1x1xf32>
    %150 = arith.mulf %149, %149 : vector<1x1xf32>
    %151 = arith.addf %147, %150 : vector<1x1xf32>
    %cst_59 = arith.constant 2.000000e+00 : f32
    %152 = vector.broadcast %cst_59 : f32 to vector<1x1xf32>
    %153 = arith.divf %151, %152 : vector<1x1xf32>
    %c0_60 = arith.constant 0 : index
    %c0_61 = arith.constant 0 : index
    %154 = vector.load %arg9[%c0_60, %c0_61] : memref<1x1xf32, #tpu.memory_space<vmem>>, vector<1x1xf32>
    tpu.vector_store %arg9[%c0_60, %c0_61], %153 {strides = array<i32>} : memref<1x1xf32, #tpu.memory_space<vmem>>, vector<1x1xf32>,
    return
  }
}

module attributes {stable_mosaic.version = 11 : i64} {
  func.func @_gemm_bn_act_kernel(%arg0: i32, %arg1: memref<128x64xbf16, #tpu.memory_space<vmem>>, %arg2: memref<64x32xbf16, #tpu.memory_space<vmem>>, %arg3: memref<1x32xf32, #tpu.memory_space<vmem>>, %arg4: memref<1x32xf32, #tpu.memory_space<vmem>>, %arg5: memref<1x32xf32, #tpu.memory_space<vmem>>, %arg6: memref<128x32xbf16, #tpu.memory_space<vmem>>) attributes {dimension_semantics = [#tpu.dimension_semantics<parallel>], iteration_bounds = array<i64: 2>, scalar_prefetch = 0 : i64, scratch_operands = 0 : i64, tpu.core_type = #tpu.core_type<tc>, window_params = [{transform_indices = @transform_0, window_bounds = array<i64: 128, 64>}, {pipeline_mode = #tpu.pipeline_mode<synchronous>, transform_indices = @transform_1, window_bounds = array<i64: 64, 32>}, {pipeline_mode = #tpu.pipeline_mode<synchronous>, transform_indices = @transform_2, window_bounds = array<i64: 1, 32>}, {pipeline_mode = #tpu.pipeline_mode<synchronous>, transform_indices = @transform_3, window_bounds = array<i64: 1, 32>}, {pipeline_mode = #tpu.pipeline_mode<synchronous>, transform_indices = @transform_4, window_bounds = array<i64: 1, 32>}, {transform_indices = @transform_5, window_bounds = array<i64: 128, 32>}]} {
    %c0 = arith.constant 0 : index
    %c0_0 = arith.constant 0 : index
    %0 = vector.load %arg1[%c0, %c0_0] : memref<128x64xbf16, #tpu.memory_space<vmem>>, vector<128x64xbf16>
    %c0_1 = arith.constant 0 : index
    %c0_2 = arith.constant 0 : index
    %1 = vector.load %arg2[%c0_1, %c0_2] : memref<64x32xbf16, #tpu.memory_space<vmem>>, vector<64x32xbf16>
    %cst = arith.constant dense<0.000000e+00> : vector<128x32xf32>
    %2 = tpu.matmul %0, %1, %cst {dimension_numbers = #tpu.dot_dimension_numbers<[1], [0], [0], [1], [0, 0, 1, 1], [], []>} : vector<128x64xbf16>, vector<64x32xbf16>, vector<128x32xf32> -> vector<128x32xf32>
    %c0_3 = arith.constant 0 : index
    %c0_4 = arith.constant 0 : index
    %3 = vector.load %arg3[%c0_3, %c0_4] : memref<1x32xf32, #tpu.memory_space<vmem>>, vector<1x32xf32>
    %4 = vector.broadcast %3 : vector<1x32xf32> to vector<128x32xf32>
    %5 = arith.addf %2, %4 : vector<128x32xf32>
    %cst_5 = arith.constant 0.000000e+00 : f32
    %6 = vector.broadcast %cst_5 : f32 to vector<128x32xf32>
    %7 = arith.cmpf ogt, %5, %6 : vector<128x32xf32>
    %cst_6 = arith.constant 2.000000e-01 : f32
    %8 = vector.broadcast %cst_6 : f32 to vector<128x32xf32>
    %9 = arith.mulf %8, %5 : vector<128x32xf32>
    %10 = arith.select %7, %5, %9 : vector<128x32xi1>, vector<128x32xf32>
    %11 = arith.truncf %10 : vector<128x32xf32> to vector<128x32xbf16>
    %c0_7 = arith.constant 0 : index
    %c0_8 = arith.constant 0 : index
    %12 = vector.load %arg6[%c0_7, %c0_8] : memref<128x32xbf16, #tpu.memory_space<vmem>>, vector<128x32xbf16>
    tpu.vector_store %arg6[%c0_7, %c0_8], %11 {strides = array<i32>} : memref<128x32xbf16, #tpu.memory_space<vmem>>, vector<128x32xbf16>,
    return
  }
  func.func @transform_0(%arg0: i32) -> (i32, i32) {
    %c0_i32 = arith.constant 0 : i32
    %c0_i32_0 = arith.constant 0 : i32
    return %arg0, %c0_i32 : i32, i32
  }
  func.func @transform_1(%arg0: i32) -> (i32, i32) {
    %c0_i32 = arith.constant 0 : i32
    %c0_i32_0 = arith.constant 0 : i32
    %c0_i32_1 = arith.constant 0 : i32
    return %c0_i32, %c0_i32_0 : i32, i32
  }
  func.func @transform_2(%arg0: i32) -> (i32, i32) {
    %c0_i32 = arith.constant 0 : i32
    %c0_i32_0 = arith.constant 0 : i32
    %c0_i32_1 = arith.constant 0 : i32
    return %c0_i32, %c0_i32_0 : i32, i32
  }
  func.func @transform_3(%arg0: i32) -> (i32, i32) {
    %c0_i32 = arith.constant 0 : i32
    %c0_i32_0 = arith.constant 0 : i32
    %c0_i32_1 = arith.constant 0 : i32
    return %c0_i32, %c0_i32_0 : i32, i32
  }
  func.func @transform_4(%arg0: i32) -> (i32, i32) {
    %c0_i32 = arith.constant 0 : i32
    %c0_i32_0 = arith.constant 0 : i32
    %c0_i32_1 = arith.constant 0 : i32
    return %c0_i32, %c0_i32_0 : i32, i32
  }
  func.func @transform_5(%arg0: i32) -> (i32, i32) {
    %c0_i32 = arith.constant 0 : i32
    %c0_i32_0 = arith.constant 0 : i32
    return %arg0, %c0_i32 : i32, i32
  }
}

</mosaic_0001>

<bundles_post_ra>
// kernel: pixel_dt_gan_forward.9
= control target key start
LH: loop header
LB: loop body
LE: loop exit
PB: predicated region body
PF: predicated region fallthrough
CT: control target
= control target key end

     0   :  { %s546_s18 = smov 0   ;;  %s603_s0 = inlined_call_operand.vmem [shape: bf16[128,64], index: 0, kind: input, shape index: {}]   ;;  %s604_s1 = inlined_call_operand.vmem [shape: bf16[64,32], index: 1, kind: input, shape index: {}]   ;;  %s605_s2 = inlined_call_operand.vmem [shape: f32[1,32], index: 2, kind: input, shape index: {}]   ;;  %s606_s3 = inlined_call_operand.vmem [shape: f32[1,32], index: 3, kind: input, shape index: {}]   ;;  %s607_s4 = inlined_call_operand.vmem [shape: f32[1,32], index: 4, kind: input, shape index: {}]   ;;  %s608_s5 = inlined_call_operand.vmem [shape: bf16[128,32], index: 5, kind: output, shape index: {}]  }
   0x1 LB: > { %s432_s19 = sadd.s32 4294967295, %s514_s18   ;;  %p436_p0 = scmp.ge.s32.totalorder %s514_s18, 1  ;;  %s514_s18 = sphi %s546_s18, %s15_s18  }
   0x2   : > { %p188_p1 = scmp.lt.s32.totalorder %s514_s18, 3 }
   0x4   : > { %p189_p2 = pnand %p436_p0, %p188_p1 }
   0x5   : > { %s437_s20 = sshll.u32 (!%p189_p2), %s432_s19, 3 }
   0x6   : > { %192 = sbr.rel (%p189_p2) target bundleno = 177 (0xb1), region = 40  ;;  %p217_p3 = scmp.lt.s32.totalorder (!%p189_p2), %s437_s20, 15 }
   0xb   : > { %v486_v0 = vld [vmem:[%s604_s1 + $0x18] sm:$0xff]  ;;  %v485_v1 = vld [vmem:[%s604_s1 + $0x10] sm:$0xff]  ;;  %s610_s20 = smov (!%p217_p3, %s437_s20), 15  ;;  %v484_v2 = vld [vmem:[%s604_s1 + $0x8] sm:$0xff]  ;;  %vm293_vm0 = vcmask 523264   ;;  %vm367_vm3 = vcmask 257024  }
   0xc   : > { %310 = vmatpush.bf16.msra.mxu0 %v486_v0  ;;  %487 = vmatpush.bf16.msra.mxu1 %v486_v0  ;;  %s438_s25 = sshll.u32 %s610_s20, 2  ;;  %v483_v3 = vld [vmem:[%s604_s1] sm:$0xff] }
   0xd   : > { %488 = vmatpush.bf16.msra.mxu2 %v486_v0  ;;  %489 = vmatpush.bf16.msra.mxu3 %v486_v0  ;;  %s220_s30 = scalar_lea.vmem %s603_s0, %s438_s25  ;;  %v507_v8 = vld [vmem:[%s605_s2] ss:$0 sm:$0xff]  ;;  %s582_s10 = scalar_lea.vmem %s608_s5, %s438_s25 }
   0xe   : > { %v479_v4 = vld [vmem:[%s220_s30] sm:$0xff]  ;;  %v480_v5 = vld [vmem:[%s220_s30 + $0x8] sm:$0xff]  ;;  %v481_v6 = vld [vmem:[%s220_s30 + $0x10] sm:$0xff] }
   0xf   : > { %v482_v7 = vld [vmem:[%s220_s30 + $0x18] sm:$0xff] }
  0x10   : > { %311 = vmatpush.bf16.msra.mxu0 %v485_v1  ;;  %490 = vmatpush.bf16.msra.mxu1 %v485_v1 }
  0x11   : > { %491 = vmatpush.bf16.msra.mxu2 %v485_v1  ;;  %492 = vmatpush.bf16.msra.mxu3 %v485_v1 }
  0x14   : > { %312 = vmatpush.bf16.msra.mxu0 %v484_v2  ;;  %493 = vmatpush.bf16.msra.mxu1 %v484_v2 }
  0x15   : > { %494 = vmatpush.bf16.msra.mxu2 %v484_v2  ;;  %495 = vmatpush.bf16.msra.mxu3 %v484_v2 }
  0x18   : > { %313 = vmatpush.bf16.msra.mxu0 %v483_v3  ;;  %496 = vmatpush.bf16.msra.mxu1 %v483_v3 }
  0x19   : > { %497 = vmatpush.bf16.msra.mxu2 %v483_v3  ;;  %498 = vmatpush.bf16.msra.mxu3 %v483_v3 }
  0x1b   : > { %473 = vmatmul.msk.bf16.vlgmr.msra.gmra.mxu0 %vm293_vm0, %v479_v4  ;;  %474 = vmatmul.msk.bf16.vlgmr.msra.gmra.mxu1 %vm293_vm0, %v480_v5 }
  0x1c   : > { %475 = vmatmul.msk.bf16.vlgmr.msra.gmra.mxu2 %vm293_vm0, %v481_v6  ;;  %476 = vmatmul.msk.bf16.vlgmr.msra.gmra.mxu3 %vm293_vm0, %v482_v7 }
  0x98   : > { %v315_v9 = vpop.f32.mrf.mxu0  ;;  %v320_v10 = vpop.f32.mrf.mxu1 }
  0x99   : > { %v316_v11 = vadd.f32 %v507_v8, %v315_v9  ;;  %v321_v12 = vadd.f32 %v507_v8, %v320_v10 }
  0x9b   : > { %vm335_vm1 = vcmp.gt.f32.partialorder %v316_v11, 0.0  ;;  %v343_v13 = vmul.f32 0.2, %v316_v11  ;;  %vm337_vm2 = vcmp.gt.f32.partialorder %v321_v12, 0.0  ;;  %v345_v14 = vmul.f32 0.2, %v321_v12 }
  0x9d   : > { %v351_v15 = vsel %vm335_vm1, %v316_v11, %v343_v13  ;;  %v353_v16 = vsel %vm337_vm2, %v321_v12, %v345_v14 }
  0x9e   : > { %v359_v17 = vpack.c.bf16 %v351_v15, %v351_v15  ;;  %v361_v18 = vpack.c.bf16 %v353_v16, %v353_v16 }
  0x9f   : > { %v325_v19 = vpop.f32.mrf.mxu2  ;;  %v330_v20 = vpop.f32.mrf.mxu3 }
  0xa0   : > { %368 = vst.msk [vmem:[%s582_s10] sm:$0xf] %vm367_vm3, %v359_v17  ;;  %v326_v21 = vadd.f32 %v507_v8, %v325_v19  ;;  %v331_v22 = vadd.f32 %v507_v8, %v330_v20  ;;  %v317_v23 = vpop.f32.mrf.mxu0  ;;  %v322_v24 = vpop.f32.mrf.mxu1 }
  0xa1   : > { %370 = vst.msk [vmem:[%s582_s10 + $0x8] sm:$0xf] %vm367_vm3, %v361_v18  ;;  %v318_v25 = vadd.f32 %v507_v8, %v317_v23  ;;  %v323_v26 = vadd.f32 %v507_v8, %v322_v24 }
  0xa2   : > { %vm339_vm4 = vcmp.gt.f32.partialorder %v326_v21, 0.0  ;;  %v347_v27 = vmul.f32 0.2, %v326_v21  ;;  %vm341_vm5 = vcmp.gt.f32.partialorder %v331_v22, 0.0  ;;  %v349_v28 = vmul.f32 0.2, %v331_v22 }
  0xa3   : > { %vm336_vm6 = vcmp.gt.f32.partialorder %v318_v25, 0.0  ;;  %v344_v29 = vmul.f32 0.2, %v318_v25  ;;  %vm338_vm7 = vcmp.gt.f32.partialorder %v323_v26, 0.0  ;;  %v346_v30 = vmul.f32 0.2, %v323_v26 }
  0xa4   : > { %v355_v31 = vsel %vm339_vm4, %v326_v21, %v347_v27  ;;  %v357_v32 = vsel %vm341_vm5, %v331_v22, %v349_v28 }
  0xa5   : > { %v363_v33 = vpack.c.bf16 %v355_v31, %v355_v31  ;;  %v365_v34 = vpack.c.bf16 %v357_v32, %v357_v32  ;;  %v352_v35 = vsel %vm336_vm6, %v318_v25, %v344_v29  ;;  %v354_v36 = vsel %vm338_vm7, %v323_v26, %v346_v30 }
  0xa6   : > { %v360_v37 = vpack.c.bf16 %v352_v35, %v352_v35  ;;  %v362_v38 = vpack.c.bf16 %v354_v36, %v354_v36 }
  0xa7   : > { %372 = vst.msk [vmem:[%s582_s10 + $0x10] sm:$0xf] %vm367_vm3, %v363_v33  ;;  %v327_v39 = vpop.f32.mrf.mxu2  ;;  %v332_v40 = vpop.f32.mrf.mxu3 }
  0xa8   : > { %374 = vst.msk [vmem:[%s582_s10 + $0x18] sm:$0xf] %vm367_vm3, %v365_v34  ;;  %v328_v41 = vadd.f32 %v507_v8, %v327_v39  ;;  %v333_v42 = vadd.f32 %v507_v8, %v332_v40 }
  0xa9   : > { %369 = vst.msk [vmem:[%s582_s10 + $0x4] sm:$0xf] %vm367_vm3, %v360_v37 }
  0xaa   : > { %371 = vst.msk [vmem:[%s582_s10 + $0xc] sm:$0xf] %vm367_vm3, %v362_v38  ;;  %vm340_vm8 = vcmp.gt.f32.partialorder %v328_v41, 0.0  ;;  %v348_v43 = vmul.f32 0.2, %v328_v41  ;;  %vm342_vm9 = vcmp.gt.f32.partialorder %v333_v42, 0.0 }
  0xab   : > { %v350_v44 = vmul.f32 0.2, %v333_v42 }
  0xac   : > { %v356_v45 = vsel %vm340_vm8, %v328_v41, %v348_v43 }
  0xad   : > { %v364_v46 = vpack.c.bf16 %v356_v45, %v356_v45  ;;  %v358_v47 = vsel %vm342_vm9, %v333_v42, %v350_v44 }
  0xae   : > { %v366_v48 = vpack.c.bf16 %v358_v47, %v358_v47 }
  0xaf   : > { %373 = vst.msk [vmem:[%s582_s10 + $0x14] sm:$0xf] %vm367_vm3, %v364_v46 }
  0xb0   : > { %375 = vst.msk [vmem:[%s582_s10 + $0x1c] sm:$0xf] %vm367_vm3, %v366_v48 }
  0xb1 PF: > { %s15_s18 = sadd.s32 1, %s514_s18  }
  0xb2   : > { %p12_p4 = scmp.ge.s32.totalorder %s15_s18, 4  }
  0xb4   :  { %14 = sbr.rel (!%p12_p4) target bundleno = 1 (0x1), region = 70 }

// kernel: pixel_dt_gan_forward.10
= control target key start
LH: loop header
LB: loop body
LE: loop exit
PB: predicated region body
PF: predicated region fallthrough
CT: control target
= control target key end

     0   :  { %vm404_vm0 = vcmask 523264   ;;  %vm495_vm9 = vcmask 519168   ;;  %s916_s1 = inlined_call_operand.vmem [shape: bf16[512,64], index: 1, kind: input, shape index: {}]   ;;  %s917_s2 = inlined_call_operand.vmem [shape: f32[1,64], index: 2, kind: input, shape index: {}]   ;;  %s918_s0 = inlined_call_operand.vmem [shape: bf16[32,512], index: 0, kind: input, shape index: {}]   ;;  %s919_s3 = inlined_call_operand.vmem [shape: f32[1,64], index: 3, kind: input, shape index: {}]   ;;  %s920_s4 = inlined_call_operand.vmem [shape: f32[1,64], index: 4, kind: input, shape index: {}]   ;;  %s921_s5 = inlined_call_operand.vmem [shape: bf16[32,64], index: 5, kind: output, shape index: {}]  }
   0x1   :  { %v679_v0 = vld [vmem:[%s916_s1 + $0x38] sm:$0xff]  ;;  %v678_v4 = vld [vmem:[%s916_s1 + $0x30] sm:$0xff]  ;;  %v677_v8 = vld [vmem:[%s916_s1 + $0x28] sm:$0xff] }
   0x2   :  { %v687_v1 = vld [vmem:[%s916_s1 + $0x78] sm:$0xff]  ;;  %328 = vmatpush.bf16.msra.mxu0 %v679_v0  ;;  %v686_v5 = vld [vmem:[%s916_s1 + $0x70] sm:$0xff]  ;;  %v685_v9 = vld [vmem:[%s916_s1 + $0x68] sm:$0xff] }
   0x3   :  { %v695_v2 = vld [vmem:[%s916_s1 + $0xb8] sm:$0xff]  ;;  %347 = vmatpush.bf16.msra.mxu1 %v687_v1  ;;  %v694_v6 = vld [vmem:[%s916_s1 + $0xb0] sm:$0xff]  ;;  %v693_v10 = vld [vmem:[%s916_s1 + $0xa8] sm:$0xff] }
   0x4   :  { %v703_v3 = vld [vmem:[%s916_s1 + $0xf8] sm:$0xff]  ;;  %366 = vmatpush.bf16.msra.mxu2 %v695_v2  ;;  %v702_v7 = vld [vmem:[%s916_s1 + $0xf0] sm:$0xff]  ;;  %v701_v11 = vld [vmem:[%s916_s1 + $0xe8] sm:$0xff] }
   0x5   :  { %385 = vmatpush.bf16.msra.mxu3 %v703_v3  ;;  %v676_v12 = vld [vmem:[%s916_s1 + $0x20] sm:$0xff]  ;;  %v675_v16 = vld [vmem:[%s916_s1 + $0x18] sm:$0xff]  ;;  %v674_v20 = vld [vmem:[%s916_s1 + $0x10] sm:$0xff] }
   0x6   :  { %329 = vmatpush.bf16.msra.mxu0 %v678_v4  ;;  %v684_v13 = vld [vmem:[%s916_s1 + $0x60] sm:$0xff]  ;;  %v683_v17 = vld [vmem:[%s916_s1 + $0x58] sm:$0xff]  ;;  %v682_v21 = vld [vmem:[%s916_s1 + $0x50] sm:$0xff] }
   0x7   :  { %348 = vmatpush.bf16.msra.mxu1 %v686_v5  ;;  %v692_v14 = vld [vmem:[%s916_s1 + $0xa0] sm:$0xff]  ;;  %v691_v18 = vld [vmem:[%s916_s1 + $0x98] sm:$0xff]  ;;  %v690_v22 = vld [vmem:[%s916_s1 + $0x90] sm:$0xff] }
   0x8   :  { %367 = vmatpush.bf16.msra.mxu2 %v694_v6  ;;  %v700_v15 = vld [vmem:[%s916_s1 + $0xe0] sm:$0xff]  ;;  %v699_v19 = vld [vmem:[%s916_s1 + $0xd8] sm:$0xff]  ;;  %v698_v23 = vld [vmem:[%s916_s1 + $0xd0] sm:$0xff] }
   0x9   :  { %386 = vmatpush.bf16.msra.mxu3 %v702_v7  ;;  %v673_v24 = vld [vmem:[%s916_s1 + $0x8] sm:$0xff]  ;;  %v672_v28 = vld [vmem:[%s916_s1] sm:$0xff]  ;;  %v666_v33 = vld [vmem:[%s918_s0 + $0xc] sm:$0xf0] }
   0xa   :  { %330 = vmatpush.bf16.msra.mxu0 %v677_v8  ;;  %v681_v25 = vld [vmem:[%s916_s1 + $0x48] sm:$0xff]  ;;  %v680_v29 = vld [vmem:[%s916_s1 + $0x40] sm:$0xff]  ;;  %v508_v35 = vld [vmem:[%s918_s0 + $0x10] sm:$0xf0] }
   0xb   :  { %349 = vmatpush.bf16.msra.mxu1 %v685_v9  ;;  %v689_v26 = vld [vmem:[%s916_s1 + $0x88] sm:$0xff]  ;;  %v688_v30 = vld [vmem:[%s916_s1 + $0x80] sm:$0xff]  ;;  %v667_v37 = vld [vmem:[%s918_s0 + $0x14] sm:$0xf0] }
   0xc   :  { %368 = vmatpush.bf16.msra.mxu2 %v693_v10  ;;  %v697_v27 = vld [vmem:[%s916_s1 + $0xc8] sm:$0xff]  ;;  %v696_v31 = vld [vmem:[%s916_s1 + $0xc0] sm:$0xff]  ;;  %v516_v39 = vld [vmem:[%s918_s0 + $0x18] sm:$0xf0] }
   0xd   :  { %387 = vmatpush.bf16.msra.mxu3 %v701_v11  ;;  %v506_v32 = vld [vmem:[%s918_s0] sm:$0xf]  ;;  %v664_v34 = vld [vmem:[%s918_s0 + $0x4] sm:$0xf]  ;;  %v514_v36 = vld [vmem:[%s918_s0 + $0x8] sm:$0xf] }
   0xe   :  { %331 = vmatpush.bf16.msra.mxu0 %v676_v12  ;;  %v665_v38 = vld [vmem:[%s918_s0 + $0xc] sm:$0xf]  ;;  %v507_v40 = vor.u32 %v666_v33, %v506_v32  ;;  %v511_v41 = vor.u32 %v664_v34, %v508_v35  ;;  %v515_v42 = vor.u32 %v667_v37, %v514_v36  ;;  %v522_v44 = vld [vmem:[%s918_s0 + $0x20] sm:$0xf]  ;;  %v670_v45 = vld [vmem:[%s918_s0 + $0x2c] sm:$0xf0] }
   0xf   :  { %350 = vmatpush.bf16.msra.mxu1 %v684_v13  ;;  %v519_v43 = vor.u32 %v665_v38, %v516_v39  ;;  %v668_v46 = vld [vmem:[%s918_s0 + $0x24] sm:$0xf]  ;;  %v524_v47 = vld [vmem:[%s918_s0 + $0x30] sm:$0xf0]  ;;  %v530_v48 = vld [vmem:[%s918_s0 + $0x28] sm:$0xf]  ;;  %v523_v52 = vor.u32 %v670_v45, %v522_v44 }
  0x10   :  { %369 = vmatpush.bf16.msra.mxu2 %v692_v14  ;;  %v671_v49 = vld [vmem:[%s918_s0 + $0x34] sm:$0xf0]  ;;  %v669_v50 = vld [vmem:[%s918_s0 + $0x2c] sm:$0xf]  ;;  %v532_v51 = vld [vmem:[%s918_s0 + $0x38] sm:$0xf0]  ;;  %v527_v53 = vor.u32 %v668_v46, %v524_v47 }
  0x11   :  { %388 = vmatpush.bf16.msra.mxu3 %v700_v15  ;;  %v531_v54 = vor.u32 %v671_v49, %v530_v48  ;;  %v535_v55 = vor.u32 %v669_v50, %v532_v51  ;;  %v705_v62 = vld [vmem:[%s917_s2] ss:$0 sm:$0xff]  ;;  %v712_v12 = vmov 32.0  }
  0x12   :  { %332 = vmatpush.bf16.msra.mxu0 %v675_v16  ;;  %708 = vrcp.f32 %v712_v12 }
  0x13   :  { %351 = vmatpush.bf16.msra.mxu1 %v683_v17 }
  0x14   :  { %370 = vmatpush.bf16.msra.mxu2 %v691_v18 }
  0x15   :  { %389 = vmatpush.bf16.msra.mxu3 %v699_v19 }
  0x16   :  { %333 = vmatpush.bf16.msra.mxu0 %v674_v20 }
  0x17   :  { %352 = vmatpush.bf16.msra.mxu1 %v682_v21 }
  0x18   :  { %371 = vmatpush.bf16.msra.mxu2 %v690_v22  ;;  %v709_v20 = vpop.eup %708 }
  0x19   :  { %390 = vmatpush.bf16.msra.mxu3 %v698_v23  ;;  %vm423_vm1 = vweird.f32 %v709_v20 }
  0x1a   :  { %334 = vmatpush.bf16.msra.mxu0 %v673_v24 }
  0x1b   :  { %353 = vmatpush.bf16.msra.mxu1 %v681_v25 }
  0x1c   :  { %372 = vmatpush.bf16.msra.mxu2 %v689_v26 }
  0x1d   :  { %391 = vmatpush.bf16.msra.mxu3 %v697_v27 }
  0x1e   :  { %335 = vmatpush.bf16.msra.mxu0 %v672_v28  ;;  %v419_v28 = vmul.f32 32.0, %v709_v20 }
  0x1f   :  { %354 = vmatpush.bf16.msra.mxu1 %v680_v29 }
  0x20   :  { %373 = vmatpush.bf16.msra.mxu2 %v688_v30  ;;  %v420_v34 = vsub.f32 1.0, %v419_v28 }
  0x21   :  { %392 = vmatpush.bf16.msra.mxu3 %v696_v31  ;;  %336 = vmatmul.bf16.vlgmr.msra.gmra.mxu0 %v507_v40 }
  0x22   :  { %355 = vmatmul.bf16.vlgmr.msra.gmra.mxu1 %v511_v41  ;;  %v421_v37 = vmul.f32 %v709_v20, %v420_v34 }
  0x23   :  { %374 = vmatmul.bf16.vlgmr.msra.gmra.mxu2 %v515_v42 }
  0x24   :  { %393 = vmatmul.bf16.vlgmr.msra.gmra.mxu3 %v519_v43  ;;  %v422_v40 = vadd.f32 %v709_v20, %v421_v37 }
  0x26   :  { %v424_v43 = vsel %vm423_vm1, %v709_v20, %v422_v40 }
  0x31   :  { %341 = vmatmul.bf16.gmra.mxu0 %v523_v52 }
  0x32   :  { %360 = vmatmul.bf16.gmra.mxu1 %v527_v53 }
  0x33   :  { %379 = vmatmul.bf16.gmra.mxu2 %v531_v54 }
  0x34   :  { %398 = vmatmul.bf16.gmra.mxu3 %v535_v55 }
  0x9e   :  { %v337_v56 = vpop.f32.mrf.mxu0 }
  0x9f   :  { %v356_v57 = vpop.f32.mrf.mxu1  ;;  %v338_v1 = vadd.f32 %v705_v62, %v337_v56 }
  0xa1   :  { %v357_v6 = vadd.f32 %v356_v57, %v338_v1 }
  0xa6   :  { %v375_v58 = vpop.f32.mrf.mxu2  ;;  %v339_v60 = vpop.f32.mrf.mxu0 }
  0xa7   :  { %v394_v59 = vpop.f32.mrf.mxu3  ;;  %v358_v61 = vpop.f32.mrf.mxu1  ;;  %v340_v2 = vadd.f32 %v705_v62, %v339_v60  ;;  %v376_v13 = vadd.f32 %v375_v58, %v357_v6 }
  0xa9   :  { %v359_v7 = vadd.f32 %v358_v61, %v340_v2  ;;  %v395_v18 = vadd.f32 %v394_v59, %v376_v13 }
  0xab   :  { %v405_v25 = vsel %vm404_vm0, %v395_v18, 0.0 }
  0xae   :  { %v377_v63 = vpop.f32.mrf.mxu2  ;;  %v342_v3 = vpop.f32.mrf.mxu0 }
  0xaf   :  { %v396_v0 = vpop.f32.mrf.mxu3  ;;  %v343_v4 = vadd.f32 %v705_v62, %v342_v3  ;;  %v361_v5 = vpop.f32.mrf.mxu1  ;;  %v378_v9 = vadd.f32 %v377_v63, %v359_v7 }
  0xb1   :  { %v362_v8 = vadd.f32 %v361_v5, %v343_v4  ;;  %v397_v16 = vadd.f32 %v396_v0, %v378_v9 }
  0xb3   :  { %v406_v22 = vsel %vm404_vm0, %v397_v16, 0.0 }
  0xb4   :  { %v407_v29 = vadd.f32 %v406_v22, %v405_v25 }
  0xb6   :  { %v380_v10 = vpop.f32.mrf.mxu2  ;;  %v344_v15 = vpop.f32.mrf.mxu0 }
  0xb7   :  { %v399_v11 = vpop.f32.mrf.mxu3  ;;  %v381_v14 = vadd.f32 %v380_v10, %v362_v8  ;;  %v345_v17 = vadd.f32 %v705_v62, %v344_v15  ;;  %v363_v21 = vpop.f32.mrf.mxu1 }
  0xb9   :  { %v400_v19 = vadd.f32 %v399_v11, %v381_v14  ;;  %v364_v23 = vadd.f32 %v363_v21, %v345_v17  ;;  %v706_v11 = vld [vmem:[%s919_s3] ss:$0 sm:$0xff] }
  0xba   :  { %v707_v17 = vld [vmem:[%s920_s4] ss:$0 sm:$0xff] }
  0xbb   :  { %v408_v26 = vsel %vm404_vm0, %v400_v19, 0.0 }
  0xbc   :  { %v409_v32 = vadd.f32 %v408_v26, %v407_v29 }
  0xbe   :  { %v382_v24 = vpop.f32.mrf.mxu2 }
  0xbf   :  { %v383_v27 = vadd.f32 %v382_v24, %v364_v23  ;;  %v401_v30 = vpop.f32.mrf.mxu3 }
  0xc1   :  { %v402_v31 = vadd.f32 %v401_v30, %v383_v27 }
  0xc3   :  { %v410_v33 = vsel %vm404_vm0, %v402_v31, 0.0 }
  0xc4   :  { %v411_v35 = vadd.f32 %v410_v33, %v409_v32 }
  0xc6   :  { %v412_v36 = vrot.slane %v411_v35, 4 }
  0xc8   :  { %v413_v38 = vadd.f32 %v412_v36, %v411_v35 }
  0xca   :  { %v414_v39 = vrot.slane %v413_v38, 2 }
  0xcc   :  { %v415_v41 = vadd.f32 %v414_v39, %v413_v38 }
  0xce   :  { %v416_v42 = vrot.slane %v415_v41, 1 }
  0xd0   :  { %v417_v44 = vadd.f32 %v416_v42, %v415_v41 }
  0xd2   :  { %v425_v45 = vmul.f32 %v424_v43, %v417_v44 }
  0xd4   :  { %v426_v46 = vsub.f32 %v395_v18, %v425_v45  ;;  %v427_v47 = vsub.f32 %v397_v16, %v425_v45  ;;  %v428_v48 = vsub.f32 %v400_v19, %v425_v45  ;;  %v429_v49 = vsub.f32 %v402_v31, %v425_v45 }
  0xd6   :  { %v430_v50 = vmul.f32 %v426_v46, %v426_v46  ;;  %v431_v51 = vmul.f32 %v427_v47, %v427_v47  ;;  %v432_v52 = vmul.f32 %v428_v48, %v428_v48  ;;  %v433_v53 = vmul.f32 %v429_v49, %v429_v49 }
  0xd8   :  { %v434_v54 = vsel %vm404_vm0, %v430_v50, 0.0  ;;  %v435_v55 = vsel %vm404_vm0, %v431_v51, 0.0  ;;  %v437_v57 = vsel %vm404_vm0, %v432_v52, 0.0  ;;  %v439_v59 = vsel %vm404_vm0, %v433_v53, 0.0 }
  0xd9   :  { %v436_v56 = vadd.f32 %v435_v55, %v434_v54 }
  0xdb   :  { %v438_v58 = vadd.f32 %v437_v57, %v436_v56 }
  0xdd   :  { %v440_v60 = vadd.f32 %v439_v59, %v438_v58 }
  0xdf   :  { %v441_v61 = vrot.slane %v440_v60, 4 }
  0xe1   :  { %v442_v62 = vadd.f32 %v441_v61, %v440_v60 }
  0xe3   :  { %v443_v63 = vrot.slane %v442_v62, 2 }
  0xe5   :  { %v444_v0 = vadd.f32 %v443_v63, %v442_v62 }
  0xe7   :  { %v445_v1 = vrot.slane %v444_v0, 1 }
  0xe9   :  { %v446_v2 = vadd.f32 %v445_v1, %v444_v0 }
  0xeb   :  { %v447_v3 = vmul.f32 %v446_v2, %v424_v43 }
  0xed   :  { %v448_v4 = vadd.f32 1e-05, %v447_v3 }
  0xef   :  { %710 = vrsqrt.f32 %v448_v4  ;;  %vm455_vm3 = vweird.f32 %v448_v4 }
  0xf5   :  { %v711_v5 = vpop.eup %710 }
  0xf6   :  { %v450_v6 = vmul.f32 %v711_v5, %v448_v4  ;;  %vm456_vm2 = vweird.f32 %v711_v5 }
  0xf7   :  { %vm457_vm4 = vmor %vm455_vm3, %vm456_vm2 }
  0xf8   :  { %v451_v7 = vmul.f32 %v711_v5, %v450_v6 }
  0xfa   :  { %v452_v8 = vmul.f32 0.5, %v451_v7 }
  0xfc   :  { %v453_v9 = vsub.f32 1.5, %v452_v8 }
  0xfe   :  { %v454_v10 = vmul.f32 %v711_v5, %v453_v9 }
 0x100   :  { %v458_v12 = vsel %vm457_vm4, %v711_v5, %v454_v10 }
 0x101   :  { %v459_v13 = vmul.f32 %v458_v12, %v426_v46  ;;  %v460_v14 = vmul.f32 %v458_v12, %v427_v47  ;;  %v461_v15 = vmul.f32 %v458_v12, %v428_v48  ;;  %v462_v16 = vmul.f32 %v458_v12, %v429_v49 }
 0x103   :  { %v467_v18 = vmul.f32 %v706_v11, %v459_v13  ;;  %v468_v19 = vmul.f32 %v706_v11, %v460_v14  ;;  %v469_v20 = vmul.f32 %v706_v11, %v461_v15  ;;  %v470_v21 = vmul.f32 %v706_v11, %v462_v16 }
 0x105   :  { %v475_v22 = vadd.f32 %v707_v17, %v467_v18  ;;  %v476_v23 = vadd.f32 %v707_v17, %v468_v19  ;;  %v477_v24 = vadd.f32 %v707_v17, %v469_v20  ;;  %v478_v25 = vadd.f32 %v707_v17, %v470_v21 }
 0x107   :  { %vm479_vm5 = vcmp.gt.f32.partialorder %v475_v22, 0.0  ;;  %vm480_vm6 = vcmp.gt.f32.partialorder %v476_v23, 0.0  ;;  %vm481_vm7 = vcmp.gt.f32.partialorder %v477_v24, 0.0  ;;  %vm482_vm8 = vcmp.gt.f32.partialorder %v478_v25, 0.0 }
 0x108   :  { %v483_v26 = vmul.f32 0.2, %v475_v22  ;;  %v484_v27 = vmul.f32 0.2, %v476_v23  ;;  %v485_v28 = vmul.f32 0.2, %v477_v24 }
 0x109   :  { %v486_v29 = vmul.f32 0.2, %v478_v25 }
 0x10a   :  { %v487_v30 = vsel %vm479_vm5, %v475_v22, %v483_v26  ;;  %v488_v31 = vsel %vm480_vm6, %v476_v23, %v484_v27  ;;  %v489_v32 = vsel %vm481_vm7, %v477_v24, %v485_v28 }
 0x10b   :  { %v490_v33 = vsel %vm482_vm8, %v478_v25, %v486_v29  ;;  %v491_v34 = vpack.c.bf16 %v487_v30, %v487_v30  ;;  %v492_v35 = vpack.c.bf16 %v488_v31, %v488_v31  ;;  %v493_v36 = vpack.c.bf16 %v489_v32, %v489_v32 }
 0x10c   :  { %v494_v37 = vpack.c.bf16 %v490_v33, %v490_v33 }
 0x10d   :  { %496 = vst.msk [vmem:[%s921_s5] sm:$0xf] %vm495_vm9, %v491_v34 }
 0x10e   :  { %497 = vst.msk [vmem:[%s921_s5 + $0x4] sm:$0xf] %vm495_vm9, %v492_v35 }
 0x10f   :  { %498 = vst.msk [vmem:[%s921_s5 + $0x8] sm:$0xf] %vm495_vm9, %v493_v36 }
 0x110   :  { %499 = vst.msk [vmem:[%s921_s5 + $0xc] sm:$0xf] %vm495_vm9, %v494_v37 }

// kernel: pixel_dt_gan_forward.11
= control target key start
LH: loop header
LB: loop body
LE: loop exit
PB: predicated region body
PF: predicated region fallthrough
CT: control target
= control target key end

     0   :  { %vm672_vm0 = vcmask 123904   ;;  %vm732_vm6 = vcmask 130048   ;;  %vm1099_vm7 = vcmask 517120   ;;  %vm1318_vm12 = vcmask 516096   ;;  %s2402_s1 = inlined_call_operand.vmem [shape: bf16[1024,16], index: 1, kind: input, shape index: {}]   ;;  %s2403_s0 = inlined_call_operand.vmem [shape: bf16[2,1024], index: 0, kind: input, shape index: {}]   ;;  %s2404_s2 = inlined_call_operand.vmem [shape: f32[1,16], index: 2, kind: input, shape index: {}]   ;;  %s2405_s3 = inlined_call_operand.vmem [shape: f32[1,16], index: 3, kind: input, shape index: {}]   ;;  %s2406_s4 = inlined_call_operand.vmem [shape: f32[1,16], index: 4, kind: input, shape index: {}]   ;;  %s2407_s6 = inlined_call_operand.vmem [shape: f32[1,1,64], index: 6, kind: input, shape index: {}]   ;;  %s2408_s5 = inlined_call_operand.vmem [shape: bf16[16,16,64], index: 5, kind: input, shape index: {}]   ;;  %s2409_s7 = inlined_call_operand.vmem [shape: f32[1,1,64], index: 7, kind: input, shape index: {}]   ;;  %s2410_s8 = inlined_call_operand.vmem [shape: f32[1,1,64], index: 8, kind: input, shape index: {}]   ;;  %s2411_s9 = inlined_call_operand.vmem [shape: bf16[16,2,64], index: 9, kind: output, shape index: {}]  }
   0x1   :  { %v1712_v0 = vld [vmem:[%s2402_s1 + $0x38] sm:$0xff]  ;;  %v1711_v4 = vld [vmem:[%s2402_s1 + $0x30] sm:$0xff]  ;;  %v1710_v8 = vld [vmem:[%s2402_s1 + $0x28] sm:$0xff] }
   0x2   :  { %v1720_v1 = vld [vmem:[%s2402_s1 + $0x78] sm:$0xff]  ;;  %568 = vmatpush.bf16.msra.mxu0 %v1712_v0  ;;  %v1719_v5 = vld [vmem:[%s2402_s1 + $0x70] sm:$0xff]  ;;  %v1718_v9 = vld [vmem:[%s2402_s1 + $0x68] sm:$0xff] }
   0x3   :  { %v1728_v2 = vld [vmem:[%s2402_s1 + $0xb8] sm:$0xff]  ;;  %581 = vmatpush.bf16.msra.mxu1 %v1720_v1  ;;  %v1727_v6 = vld [vmem:[%s2402_s1 + $0xb0] sm:$0xff]  ;;  %v1726_v10 = vld [vmem:[%s2402_s1 + $0xa8] sm:$0xff] }
   0x4   :  { %v1736_v3 = vld [vmem:[%s2402_s1 + $0xf8] sm:$0xff]  ;;  %594 = vmatpush.bf16.msra.mxu2 %v1728_v2  ;;  %v1735_v7 = vld [vmem:[%s2402_s1 + $0xf0] sm:$0xff]  ;;  %v1734_v11 = vld [vmem:[%s2402_s1 + $0xe8] sm:$0xff] }
   0x5   :  { %607 = vmatpush.bf16.msra.mxu3 %v1736_v3  ;;  %v1709_v12 = vld [vmem:[%s2402_s1 + $0x20] sm:$0xff]  ;;  %v1708_v17 = vld [vmem:[%s2402_s1 + $0x18] sm:$0xff]  ;;  %v1707_v21 = vld [vmem:[%s2402_s1 + $0x10] sm:$0xff] }
   0x6   :  { %569 = vmatpush.bf16.msra.mxu0 %v1711_v4  ;;  %v1717_v13 = vld [vmem:[%s2402_s1 + $0x60] sm:$0xff]  ;;  %v1716_v18 = vld [vmem:[%s2402_s1 + $0x58] sm:$0xff]  ;;  %v1715_v22 = vld [vmem:[%s2402_s1 + $0x50] sm:$0xff] }
   0x7   :  { %582 = vmatpush.bf16.msra.mxu1 %v1719_v5  ;;  %v1725_v14 = vld [vmem:[%s2402_s1 + $0xa0] sm:$0xff]  ;;  %v1724_v19 = vld [vmem:[%s2402_s1 + $0x98] sm:$0xff]  ;;  %v1723_v23 = vld [vmem:[%s2402_s1 + $0x90] sm:$0xff] }
   0x8   :  { %595 = vmatpush.bf16.msra.mxu2 %v1727_v6  ;;  %v1733_v15 = vld [vmem:[%s2402_s1 + $0xe0] sm:$0xff]  ;;  %v1732_v20 = vld [vmem:[%s2402_s1 + $0xd8] sm:$0xff]  ;;  %v1731_v24 = vld [vmem:[%s2402_s1 + $0xd0] sm:$0xff] }
   0x9   :  { %608 = vmatpush.bf16.msra.mxu3 %v1735_v7  ;;  %v33_v16 = vld [vmem:[%s2403_s0] sm:$0xff]  ;;  %v1706_v25 = vld [vmem:[%s2402_s1 + $0x8] sm:$0xff]  ;;  %v1744_v33 = vld [vmem:[%s2402_s1 + $0x138] sm:$0xff] }
   0xa   :  { %570 = vmatpush.bf16.msra.mxu0 %v1710_v8  ;;  %167 = vst [vmem:[#allocation1] ss:$9 sm:$0xff] %v33_v16  ;;  %v1714_v26 = vld [vmem:[%s2402_s1 + $0x48] sm:$0xff]  ;;  %v1705_v29 = vld [vmem:[%s2402_s1] sm:$0xff]  ;;  %v1752_v34 = vld [vmem:[%s2402_s1 + $0x178] sm:$0xff] }
   0xb   :  { %583 = vmatpush.bf16.msra.mxu1 %v1718_v9  ;;  %v1722_v27 = vld [vmem:[%s2402_s1 + $0x88] sm:$0xff]  ;;  %v1713_v30 = vld [vmem:[%s2402_s1 + $0x40] sm:$0xff]  ;;  %v1760_v35 = vld [vmem:[%s2402_s1 + $0x1b8] sm:$0xff] }
   0xc   :  { %596 = vmatpush.bf16.msra.mxu2 %v1726_v10  ;;  %v1730_v28 = vld [vmem:[%s2402_s1 + $0xc8] sm:$0xff]  ;;  %v1721_v31 = vld [vmem:[%s2402_s1 + $0x80] sm:$0xff]  ;;  %v1768_v36 = vld [vmem:[%s2402_s1 + $0x1f8] sm:$0xff] }
   0xd   :  { %609 = vmatpush.bf16.msra.mxu3 %v1734_v11  ;;  %v1729_v32 = vld [vmem:[%s2402_s1 + $0xc0] sm:$0xff]  ;;  %v1743_v37 = vld [vmem:[%s2402_s1 + $0x130] sm:$0xff]  ;;  %v1742_v45 = vld [vmem:[%s2402_s1 + $0x128] sm:$0xff] }
   0xe   :  { %571 = vmatpush.bf16.msra.mxu0 %v1709_v12  ;;  %v1751_v40 = vld [vmem:[%s2402_s1 + $0x170] sm:$0xff]  ;;  %v1750_v46 = vld [vmem:[%s2402_s1 + $0x168] sm:$0xff]  ;;  %v1741_v49 = vld [vmem:[%s2402_s1 + $0x120] sm:$0xff] }
   0xf   :  { %584 = vmatpush.bf16.msra.mxu1 %v1717_v13  ;;  %v1759_v43 = vld [vmem:[%s2402_s1 + $0x1b0] sm:$0xff]  ;;  %v1758_v47 = vld [vmem:[%s2402_s1 + $0x1a8] sm:$0xff]  ;;  %v1749_v50 = vld [vmem:[%s2402_s1 + $0x160] sm:$0xff] }
  0x10   :  { %597 = vmatpush.bf16.msra.mxu2 %v1725_v14  ;;  %v1767_v44 = vld [vmem:[%s2402_s1 + $0x1f0] sm:$0xff]  ;;  %v1766_v48 = vld [vmem:[%s2402_s1 + $0x1e8] sm:$0xff]  ;;  %v1757_v51 = vld [vmem:[%s2402_s1 + $0x1a0] sm:$0xff] }
  0x11   :  { %610 = vmatpush.bf16.msra.mxu3 %v1733_v15  ;;  %v170_v38 = vld [vmem:[#allocation1 + $0x12] sm:$0xff]  ;;  %v168_v39 = vld [vmem:[#allocation1] sm:$0xff]  ;;  %v169_v42 = vld [vmem:[#allocation1 + $0x9] sm:$0xff] }
  0x12   :  { %572 = vmatpush.bf16.msra.mxu0 %v1708_v17  ;;  %v171_v41 = vld [vmem:[#allocation1 + $0x1b] sm:$0xff]  ;;  %v1739_v57 = vld [vmem:[%s2402_s1 + $0x110] sm:$0xff]  ;;  %v1738_v61 = vld [vmem:[%s2402_s1 + $0x108] sm:$0xff] }
  0x13   :  { %585 = vmatpush.bf16.msra.mxu1 %v1716_v18  ;;  %v1765_v52 = vld [vmem:[%s2402_s1 + $0x1e0] sm:$0xff]  ;;  %v1740_v53 = vld [vmem:[%s2402_s1 + $0x118] sm:$0xff]  ;;  %v1747_v58 = vld [vmem:[%s2402_s1 + $0x150] sm:$0xff] }
  0x14   :  { %598 = vmatpush.bf16.msra.mxu2 %v1724_v19  ;;  %v1748_v54 = vld [vmem:[%s2402_s1 + $0x158] sm:$0xff]  ;;  %v1755_v59 = vld [vmem:[%s2402_s1 + $0x190] sm:$0xff]  ;;  %v1746_v62 = vld [vmem:[%s2402_s1 + $0x148] sm:$0xff] }
  0x15   :  { %611 = vmatpush.bf16.msra.mxu3 %v1732_v20  ;;  %v1756_v55 = vld [vmem:[%s2402_s1 + $0x198] sm:$0xff]  ;;  %v1763_v60 = vld [vmem:[%s2402_s1 + $0x1d0] sm:$0xff]  ;;  %v1754_v63 = vld [vmem:[%s2402_s1 + $0x188] sm:$0xff] }
  0x16   :  { %573 = vmatpush.bf16.msra.mxu0 %v1707_v21  ;;  %v1764_v56 = vld [vmem:[%s2402_s1 + $0x1d8] sm:$0xff]  ;;  %v1762_v0 = vld [vmem:[%s2402_s1 + $0x1c8] sm:$0xff]  ;;  %v1737_v1 = vld [vmem:[%s2402_s1 + $0x100] sm:$0xff]  ;;  %v1801_v21 = vmov 2.0  }
  0x17   :  { %586 = vmatpush.bf16.msra.mxu1 %v1715_v22  ;;  %v1745_v2 = vld [vmem:[%s2402_s1 + $0x140] sm:$0xff]  ;;  %v173_v6 = vld [vmem:[#allocation1 + $0x2d] sm:$0xff]  ;;  %v174_v7 = vld [vmem:[#allocation1 + $0x36] sm:$0xff]  ;;  %1793 = vrcp.f32 %v1801_v21 }
  0x18   :  { %599 = vmatpush.bf16.msra.mxu2 %v1723_v23  ;;  %v1753_v3 = vld [vmem:[%s2402_s1 + $0x180] sm:$0xff]  ;;  %v1780_v21 = vld [vmem:[%s2408_s5 + $0x58] sm:$0xff] }
  0x19   :  { %612 = vmatpush.bf16.msra.mxu3 %v1731_v24  ;;  %v1761_v4 = vld [vmem:[%s2402_s1 + $0x1c0] sm:$0xff] }
  0x1a   :  { %574 = vmatpush.bf16.msra.mxu0 %v1706_v25  ;;  %v172_v5 = vld [vmem:[#allocation1 + $0x24] sm:$0xff]  ;;  %v1787_v15 = vld [vmem:[%s2404_s2] ss:$0 sm:$0xff] }
  0x1b   :  { %587 = vmatpush.bf16.msra.mxu1 %v1714_v26  ;;  %v175_v8 = vld [vmem:[#allocation1 + $0x3f] sm:$0xff] }
  0x1c   :  { %600 = vmatpush.bf16.msra.mxu2 %v1722_v27 }
  0x1d   :  { %613 = vmatpush.bf16.msra.mxu3 %v1730_v28  ;;  %v1794_v26 = vpop.eup %1793 }
  0x1e   :  { %575 = vmatpush.bf16.msra.mxu0 %v1705_v29  ;;  %v681_v28 = vmul.f32 2.0, %v1794_v26  ;;  %vm685_vm1 = vweird.f32 %v1794_v26 }
  0x1f   :  { %588 = vmatpush.bf16.msra.mxu1 %v1713_v30 }
  0x20   :  { %601 = vmatpush.bf16.msra.mxu2 %v1721_v31 }
  0x21   :  { %614 = vmatpush.bf16.msra.mxu3 %v1729_v32  ;;  %576 = vmatmul.bf16.vlgmr.msra.gmra.mxu0 %v168_v39 }
  0x22   :  { %620 = vmatpush.bf16.msrb.mxu0 %v1744_v33  ;;  %589 = vmatmul.bf16.vlgmr.msra.gmra.mxu1 %v169_v42 }
  0x23   :  { %633 = vmatpush.bf16.msrb.mxu1 %v1752_v34  ;;  %602 = vmatmul.bf16.vlgmr.msra.gmra.mxu2 %v170_v38 }
  0x24   :  { %646 = vmatpush.bf16.msrb.mxu2 %v1760_v35  ;;  %615 = vmatmul.bf16.vlgmr.msra.gmra.mxu3 %v171_v41  ;;  %v682_v35 = vsub.f32 1.0, %v681_v28 }
  0x25   :  { %659 = vmatpush.bf16.msrb.mxu3 %v1768_v36 }
  0x26   :  { %621 = vmatpush.bf16.msrb.mxu0 %v1743_v37  ;;  %v683_v38 = vmul.f32 %v1794_v26, %v682_v35 }
  0x27   :  { %634 = vmatpush.bf16.msrb.mxu1 %v1751_v40 }
  0x28   :  { %647 = vmatpush.bf16.msrb.mxu2 %v1759_v43  ;;  %v684_v43 = vadd.f32 %v1794_v26, %v683_v38 }
  0x29   :  { %660 = vmatpush.bf16.msrb.mxu3 %v1767_v44 }
  0x2a   :  { %622 = vmatpush.bf16.msrb.mxu0 %v1742_v45 }
  0x2b   :  { %635 = vmatpush.bf16.msrb.mxu1 %v1750_v46  ;;  %v2052_v46 = vsel %vm685_vm1, %v1794_v26, %v684_v43  ;;  %v1782_v26 = vld [vmem:[%s2408_s5 + $0x68] sm:$0xff] }
  0x2c   :  { %648 = vmatpush.bf16.msrb.mxu2 %v1758_v47 }
  0x2d   :  { %661 = vmatpush.bf16.msrb.mxu3 %v1766_v48 }
  0x2e   :  { %623 = vmatpush.bf16.msrb.mxu0 %v1741_v49 }
  0x2f   :  { %636 = vmatpush.bf16.msrb.mxu1 %v1749_v50 }
  0x30   :  { %649 = vmatpush.bf16.msrb.mxu2 %v1757_v51 }
  0x31   :  { %662 = vmatpush.bf16.msrb.mxu3 %v1765_v52 }
  0x32   :  { %624 = vmatpush.bf16.msrb.mxu0 %v1740_v53 }
  0x33   :  { %637 = vmatpush.bf16.msrb.mxu1 %v1748_v54 }
  0x34   :  { %650 = vmatpush.bf16.msrb.mxu2 %v1756_v55 }
  0x35   :  { %663 = vmatpush.bf16.msrb.mxu3 %v1764_v56 }
  0x36   :  { %625 = vmatpush.bf16.msrb.mxu0 %v1739_v57  ;;  %v1771_v57 = vld [vmem:[%s2408_s5 + $0x10] sm:$0xff] }
  0x37   :  { %638 = vmatpush.bf16.msrb.mxu1 %v1747_v58  ;;  %v1769_v58 = vld [vmem:[%s2408_s5] sm:$0xff] }
  0x38   :  { %651 = vmatpush.bf16.msrb.mxu2 %v1755_v59  ;;  %v1772_v59 = vld [vmem:[%s2408_s5 + $0x18] sm:$0xff] }
  0x39   :  { %664 = vmatpush.bf16.msrb.mxu3 %v1763_v60  ;;  %v1770_v60 = vld [vmem:[%s2408_s5 + $0x8] sm:$0xff] }
  0x3a   :  { %626 = vmatpush.bf16.msrb.mxu0 %v1738_v61 }
  0x3b   :  { %639 = vmatpush.bf16.msrb.mxu1 %v1746_v62 }
  0x3c   :  { %652 = vmatpush.bf16.msrb.mxu2 %v1754_v63 }
  0x3d   :  { %665 = vmatpush.bf16.msrb.mxu3 %v1762_v0  ;;  %v1775_v0 = vld [vmem:[%s2408_s5 + $0x30] sm:$0xff] }
  0x3e   :  { %627 = vmatpush.bf16.msrb.mxu0 %v1737_v1  ;;  %v1773_v1 = vld [vmem:[%s2408_s5 + $0x20] sm:$0xff] }
  0x3f   :  { %640 = vmatpush.bf16.msrb.mxu1 %v1745_v2  ;;  %v1776_v2 = vld [vmem:[%s2408_s5 + $0x38] sm:$0xff] }
  0x40   :  { %653 = vmatpush.bf16.msrb.mxu2 %v1753_v3  ;;  %v1774_v3 = vld [vmem:[%s2408_s5 + $0x28] sm:$0xff] }
  0x41   :  { %666 = vmatpush.bf16.msrb.mxu3 %v1761_v4  ;;  %628 = vmatmul.bf16.vlgmr.msrb.gmra.mxu0 %v172_v5 }
  0x42   :  { %641 = vmatmul.bf16.vlgmr.msrb.gmra.mxu1 %v173_v6  ;;  %743 = vmatpush.bf16.msra.mxu0 %v1769_v58 }
  0x43   :  { %654 = vmatmul.bf16.vlgmr.msrb.gmra.mxu2 %v174_v7  ;;  %765 = vmatpush.bf16.msra.mxu1 %v1770_v60 }
  0x44   :  { %667 = vmatmul.bf16.vlgmr.msrb.gmra.mxu3 %v175_v8  ;;  %787 = vmatpush.bf16.msra.mxu2 %v1771_v57 }
  0x45   :  { %809 = vmatpush.bf16.msra.mxu3 %v1772_v59 }
  0x46   :  { %831 = vmatpush.bf16.msrb.mxu0 %v1773_v1 }
  0x47   :  { %853 = vmatpush.bf16.msrb.mxu1 %v1774_v3 }
  0x48   :  { %875 = vmatpush.bf16.msrb.mxu2 %v1775_v0 }
  0x49   :  { %897 = vmatpush.bf16.msrb.mxu3 %v1776_v2 }
  0x9e   :  { %v577_v9 = vpop.f32.mrf.mxu0 }
  0x9f   :  { %v590_v10 = vpop.f32.mrf.mxu1  ;;  %v578_v18 = vadd.f32 %v1787_v15, %v577_v9 }
  0xa1   :  { %v591_v19 = vadd.f32 %v590_v10, %v578_v18  ;;  %v1788_v10 = vld [vmem:[%s2405_s3] ss:$0 sm:$0xff] }
  0xa6   :  { %v603_v11 = vpop.f32.mrf.mxu2  ;;  %v579_v13 = vpop.f32.mrf.mxu0 }
  0xa7   :  { %v616_v12 = vpop.f32.mrf.mxu3  ;;  %v592_v14 = vpop.f32.mrf.mxu1  ;;  %v604_v20 = vadd.f32 %v603_v11, %v591_v19  ;;  %v1789_v13 = vld [vmem:[%s2406_s4] ss:$0 sm:$0xff]  ;;  %v1779_v19 = vld [vmem:[%s2408_s5 + $0x50] sm:$0xff] }
  0xa9   :  { %v617_v22 = vadd.f32 %v616_v12, %v604_v20  ;;  %v1777_v20 = vld [vmem:[%s2408_s5 + $0x40] sm:$0xff] }
  0xae   :  { %v605_v16 = vpop.f32.mrf.mxu2 }
  0xaf   :  { %v618_v17 = vpop.f32.mrf.mxu3 }
  0xbe   :  { %v629_v23 = vpop.f32.mrf.mxu0 }
  0xbf   :  { %v642_v24 = vpop.f32.mrf.mxu1  ;;  %v630_v25 = vadd.f32 %v629_v23, %v617_v22  ;;  %v1778_v22 = vld [vmem:[%s2408_s5 + $0x48] sm:$0xff]  ;;  %v1783_v23 = vld [vmem:[%s2408_s5 + $0x70] sm:$0xff] }
  0xc1   :  { %v643_v27 = vadd.f32 %v642_v24, %v630_v25  ;;  %v1781_v24 = vld [vmem:[%s2408_s5 + $0x60] sm:$0xff]  ;;  %v1784_v25 = vld [vmem:[%s2408_s5 + $0x78] sm:$0xff] }
  0xc6   :  { %v655_v29 = vpop.f32.mrf.mxu2  ;;  %v631_v32 = vpop.f32.mrf.mxu0 }
  0xc7   :  { %v668_v30 = vpop.f32.mrf.mxu3  ;;  %v656_v31 = vadd.f32 %v655_v29, %v643_v27  ;;  %v644_v33 = vpop.f32.mrf.mxu1 }
  0xc8   :  { %v2130_v33 = vld [vmem:[%s2407_s6] ss:$0 sm:$0xff] }
  0xc9   :  { %v669_v34 = vadd.f32 %v668_v30, %v656_v31 }
  0xcb   :  { %v673_v36 = vsel %vm672_vm0, %v669_v34, 0.0 }
  0xcc   :  { %v674_v37 = vrot.slane %v673_v36, 4 }
  0xce   :  { %v675_v39 = vadd.f32 %v674_v37, %v673_v36  ;;  %v657_v40 = vpop.f32.mrf.mxu2 }
  0xcf   :  { %v670_v41 = vpop.f32.mrf.mxu3 }
  0xd0   :  { %v676_v42 = vrot.slane %v675_v39, 2 }
  0xd2   :  { %v677_v44 = vadd.f32 %v676_v42, %v675_v39 }
  0xd4   :  { %v678_v45 = vrot.slane %v677_v44, 1 }
  0xd6   :  { %v679_v47 = vadd.f32 %v678_v45, %v677_v44 }
  0xd8   :  { %v687_v48 = vmul.f32 %v2052_v46, %v679_v47 }
  0xda   :  { %v688_v49 = vsub.f32 %v669_v34, %v687_v48 }
  0xdc   :  { %v689_v50 = vmul.f32 %v688_v49, %v688_v49 }
  0xde   :  { %v690_v51 = vsel %vm672_vm0, %v689_v50, 0.0 }
  0xdf   :  { %v691_v52 = vrot.slane %v690_v51, 4 }
  0xe1   :  { %v692_v53 = vadd.f32 %v691_v52, %v690_v51 }
  0xe3   :  { %v693_v54 = vrot.slane %v692_v53, 2 }
  0xe5   :  { %v694_v55 = vadd.f32 %v693_v54, %v692_v53 }
  0xe7   :  { %v695_v56 = vrot.slane %v694_v55, 1 }
  0xe9   :  { %v696_v61 = vadd.f32 %v695_v56, %v694_v55 }
  0xeb   :  { %v697_v62 = vmul.f32 %v696_v61, %v2052_v46 }
  0xed   :  { %v698_v63 = vadd.f32 1e-05, %v697_v62 }
  0xef   :  { %1795 = vrsqrt.f32 %v698_v63  ;;  %vm705_vm3 = vweird.f32 %v698_v63 }
  0xf5   :  { %v1796_v4 = vpop.eup %1795 }
  0xf6   :  { %v700_v5 = vmul.f32 %v1796_v4, %v698_v63  ;;  %vm706_vm2 = vweird.f32 %v1796_v4 }
  0xf7   :  { %vm707_vm4 = vmor %vm705_vm3, %vm706_vm2 }
  0xf8   :  { %v701_v6 = vmul.f32 %v1796_v4, %v700_v5  ;;  %v1802_v5 = vmov 16.0  }
  0xf9   :  { %1797 = vrcp.f32 %v1802_v5 }
  0xfa   :  { %v702_v7 = vmul.f32 0.5, %v701_v6 }
  0xfc   :  { %v703_v8 = vsub.f32 1.5, %v702_v7 }
  0xfe   :  { %v704_v9 = vmul.f32 %v1796_v4, %v703_v8 }
 0x100   :  { %v708_v11 = vsel %vm707_vm4, %v1796_v4, %v704_v9 }
 0x101   :  { %v709_v12 = vmul.f32 %v708_v11, %v688_v49 }
 0x103   :  { %v714_v14 = vmul.f32 %v1788_v10, %v709_v12 }
 0x105   :  { %v719_v15 = vadd.f32 %v1789_v13, %v714_v14 }
 0x107   :  { %vm720_vm5 = vcmp.gt.f32.partialorder %v719_v15, 0.0  ;;  %v721_v16 = vmul.f32 0.2, %v719_v15 }
 0x109   :  { %v722_v17 = vsel %vm720_vm5, %v719_v15, %v721_v16  ;;  %v1798_v15 = vpop.eup %1797 }
 0x10a   :  { %v723_v18 = vpack.c.bf16 %v722_v17, %v722_v17  ;;  %vm1136_vm8 = vweird.f32 %v1798_v15 }
 0x10c   :  { %1599 = vmatmul.msk.bf16.vlgmr.msra.gmra.mxu0 %vm732_vm6, %v723_v18  ;;  %1606 = vmatmul.msk.bf16.vlgmr.msra.gmra.mxu1 %vm732_vm6, %v723_v18 }
 0x10d   :  { %1613 = vmatmul.msk.bf16.vlgmr.msra.gmra.mxu2 %vm732_vm6, %v723_v18  ;;  %1620 = vmatmul.msk.bf16.vlgmr.msra.gmra.mxu3 %vm732_vm6, %v723_v18 }
 0x10e   :  { %963 = vmatpush.bf16.msra.mxu2 %v1779_v19  ;;  %919 = vmatpush.bf16.msra.mxu0 %v1777_v20  ;;  %v1132_v19 = vmul.f32 16.0, %v1798_v15 }
 0x10f   :  { %985 = vmatpush.bf16.msra.mxu3 %v1780_v21  ;;  %941 = vmatpush.bf16.msra.mxu1 %v1778_v22 }
 0x11c   :  { %1627 = vmatmul.msk.bf16.vlgmr.msrb.gmra.mxu0 %vm732_vm6, %v723_v18  ;;  %1634 = vmatmul.msk.bf16.vlgmr.msrb.gmra.mxu1 %vm732_vm6, %v723_v18 }
 0x11d   :  { %1641 = vmatmul.msk.bf16.vlgmr.msrb.gmra.mxu2 %vm732_vm6, %v723_v18  ;;  %1648 = vmatmul.msk.bf16.vlgmr.msrb.gmra.mxu3 %vm732_vm6, %v723_v18 }
 0x11e   :  { %1051 = vmatpush.bf16.msrb.mxu2 %v1783_v23  ;;  %1007 = vmatpush.bf16.msrb.mxu0 %v1781_v24 }
 0x11f   :  { %1073 = vmatpush.bf16.msrb.mxu3 %v1784_v25  ;;  %1029 = vmatpush.bf16.msrb.mxu1 %v1782_v26 }
 0x12c   :  { %1655 = vmatmul.msk.bf16.vlgmr.msra.gmra.mxu0 %vm732_vm6, %v723_v18  ;;  %1662 = vmatmul.msk.bf16.vlgmr.msra.gmra.mxu1 %vm732_vm6, %v723_v18 }
 0x12d   :  { %1669 = vmatmul.msk.bf16.vlgmr.msra.gmra.mxu2 %vm732_vm6, %v723_v18  ;;  %1676 = vmatmul.msk.bf16.vlgmr.msra.gmra.mxu3 %vm732_vm6, %v723_v18 }
 0x13c   :  { %1683 = vmatmul.msk.bf16.vlgmr.msrb.gmra.mxu0 %vm732_vm6, %v723_v18  ;;  %1690 = vmatmul.msk.bf16.vlgmr.msrb.gmra.mxu1 %vm732_vm6, %v723_v18 }
 0x13d   :  { %1697 = vmatmul.msk.bf16.vlgmr.msrb.gmra.mxu2 %vm732_vm6, %v723_v18  ;;  %1704 = vmatmul.msk.bf16.vlgmr.msrb.gmra.mxu3 %vm732_vm6, %v723_v18 }
 0x189   :  { %v745_v27 = vpop.f32.mrf.mxu0  ;;  %v767_v28 = vpop.f32.mrf.mxu1 }
 0x18a   :  { %v2133_v34 = vadd.f32 %v2130_v33, %v745_v27  ;;  %v2136_v35 = vadd.f32 %v2130_v33, %v767_v28  ;;  %v1133_v27 = vsub.f32 1.0, %v1132_v19 }
 0x18c   :  { %v1100_v41 = vsel %vm1099_vm7, %v2133_v34, 0.0  ;;  %v1101_v42 = vsel %vm1099_vm7, %v2136_v35, 0.0 }
 0x18d   :  { %v1102_v44 = vadd.f32 %v1101_v42, %v1100_v41 }
 0x190   :  { %v789_v29 = vpop.f32.mrf.mxu2  ;;  %v811_v30 = vpop.f32.mrf.mxu3 }
 0x191   :  { %v747_v31 = vpop.f32.mrf.mxu0  ;;  %v769_v32 = vpop.f32.mrf.mxu1  ;;  %v2139_v38 = vadd.f32 %v2130_v33, %v789_v29  ;;  %v2148_v45 = vadd.f32 %v2130_v33, %v811_v30 }
 0x193   :  { %v1103_v43 = vsel %vm1099_vm7, %v2139_v38, 0.0  ;;  %v1105_v53 = vsel %vm1099_vm7, %v2148_v45, 0.0 }
 0x194   :  { %v1104_v48 = vadd.f32 %v1103_v43, %v1102_v44 }
 0x196   :  { %v1106_v55 = vadd.f32 %v1105_v53, %v1104_v48 }
 0x198   :  { %v791_v36 = vpop.f32.mrf.mxu2  ;;  %v813_v37 = vpop.f32.mrf.mxu3 }
 0x199   :  { %v833_v39 = vpop.f32.mrf.mxu0  ;;  %v855_v40 = vpop.f32.mrf.mxu1  ;;  %v1134_v36 = vmul.f32 %v1798_v15, %v1133_v27 }
 0x19a   :  { %v2151_v47 = vadd.f32 %v2130_v33, %v833_v39  ;;  %v2158_v56 = vadd.f32 %v2130_v33, %v855_v40 }
 0x19b   :  { %v1135_v44 = vadd.f32 %v1798_v15, %v1134_v36 }
 0x19c   :  { %v1107_v54 = vsel %vm1099_vm7, %v2151_v47, 0.0  ;;  %v1109_v61 = vsel %vm1099_vm7, %v2158_v56, 0.0 }
 0x19d   :  { %v1108_v58 = vadd.f32 %v1107_v54, %v1106_v55  ;;  %v2212_v54 = vsel %vm1136_vm8, %v1798_v15, %v1135_v44 }
 0x19f   :  { %v1110_v1 = vadd.f32 %v1109_v61, %v1108_v58 }
 0x1a0   :  { %v877_v49 = vpop.f32.mrf.mxu2  ;;  %v899_v50 = vpop.f32.mrf.mxu3 }
 0x1a1   :  { %v835_v51 = vpop.f32.mrf.mxu0  ;;  %v857_v52 = vpop.f32.mrf.mxu1  ;;  %v2161_v57 = vadd.f32 %v2130_v33, %v877_v49  ;;  %v2168_v2 = vadd.f32 %v2130_v33, %v899_v50 }
 0x1a3   :  { %v1111_v62 = vsel %vm1099_vm7, %v2161_v57, 0.0  ;;  %v1113_v6 = vsel %vm1099_vm7, %v2168_v2, 0.0 }
 0x1a4   :  { %v1112_v4 = vadd.f32 %v1111_v62, %v1110_v1 }
 0x1a6   :  { %v1114_v8 = vadd.f32 %v1113_v6, %v1112_v4 }
 0x1a8   :  { %v879_v59 = vpop.f32.mrf.mxu2  ;;  %v901_v60 = vpop.f32.mrf.mxu3 }
 0x1a9   :  { %v921_v63 = vpop.f32.mrf.mxu0  ;;  %v943_v0 = vpop.f32.mrf.mxu1 }
 0x1aa   :  { %v2171_v3 = vadd.f32 %v2130_v33, %v921_v63  ;;  %v2178_v11 = vadd.f32 %v2130_v33, %v943_v0 }
 0x1ac   :  { %v1115_v7 = vsel %vm1099_vm7, %v2171_v3, 0.0  ;;  %v1117_v17 = vsel %vm1099_vm7, %v2178_v11, 0.0 }
 0x1ad   :  { %v1116_v16 = vadd.f32 %v1115_v7, %v1114_v8 }
 0x1af   :  { %v1118_v20 = vadd.f32 %v1117_v17, %v1116_v16 }
 0x1b0   :  { %v965_v9 = vpop.f32.mrf.mxu2  ;;  %v987_v10 = vpop.f32.mrf.mxu3 }
 0x1b1   :  { %v2181_v12 = vadd.f32 %v2130_v33, %v965_v9  ;;  %v923_v13 = vpop.f32.mrf.mxu0  ;;  %v945_v14 = vpop.f32.mrf.mxu1  ;;  %v2188_v21 = vadd.f32 %v2130_v33, %v987_v10 }
 0x1b3   :  { %v1119_v18 = vsel %vm1099_vm7, %v2181_v12, 0.0  ;;  %v1121_v29 = vsel %vm1099_vm7, %v2188_v21, 0.0 }
 0x1b4   :  { %v1120_v22 = vadd.f32 %v1119_v18, %v1118_v20 }
 0x1b6   :  { %v1122_v30 = vadd.f32 %v1121_v29, %v1120_v22 }
 0x1b8   :  { %v967_v23 = vpop.f32.mrf.mxu2  ;;  %v989_v24 = vpop.f32.mrf.mxu3 }
 0x1b9   :  { %v1009_v25 = vpop.f32.mrf.mxu0  ;;  %v1031_v26 = vpop.f32.mrf.mxu1 }
 0x1ba   :  { %v2191_v28 = vadd.f32 %v2130_v33, %v1009_v25  ;;  %v2198_v32 = vadd.f32 %v2130_v33, %v1031_v26 }
 0x1bc   :  { %v1123_v31 = vsel %vm1099_vm7, %v2191_v28, 0.0  ;;  %v1125_v41 = vsel %vm1099_vm7, %v2198_v32, 0.0 }
 0x1bd   :  { %v1124_v37 = vadd.f32 %v1123_v31, %v1122_v30 }
 0x1bf   :  { %v1126_v50 = vadd.f32 %v1125_v41, %v1124_v37 }
 0x1c0   :  { %v1053_v39 = vpop.f32.mrf.mxu2  ;;  %v1075_v40 = vpop.f32.mrf.mxu3 }
 0x1c1   :  { %v2203_v42 = vadd.f32 %v2130_v33, %v1053_v39  ;;  %v2206_v43 = vadd.f32 %v2130_v33, %v1075_v40  ;;  %v1011_v48 = vpop.f32.mrf.mxu0  ;;  %v1033_v49 = vpop.f32.mrf.mxu1 }
 0x1c3   :  { %v1127_v51 = vsel %vm1099_vm7, %v2203_v42, 0.0  ;;  %v1129_v53 = vsel %vm1099_vm7, %v2206_v43, 0.0 }
 0x1c4   :  { %v1128_v52 = vadd.f32 %v1127_v51, %v1126_v50 }
 0x1c6   :  { %v1130_v55 = vadd.f32 %v1129_v53, %v1128_v52 }
 0x1c8   :  { %v1138_v58 = vmul.f32 %v2212_v54, %v1130_v55  ;;  %v1055_v59 = vpop.f32.mrf.mxu2  ;;  %v1077_v33 = vpop.f32.mrf.mxu3 }
 0x1ca   :  { %v1139_v60 = vsel %vm1099_vm7, %v1138_v58, 0.0 }
 0x1cb   :  { %v1140_v61 = vrot.slane %v1139_v60, 4 }
 0x1cd   :  { %v1141_v62 = vadd.f32 %v1140_v61, %v1139_v60 }
 0x1cf   :  { %v1142_v63 = vrot.slane %v1141_v62, 2 }
 0x1d1   :  { %v1143_v0 = vadd.f32 %v1142_v63, %v1141_v62 }
 0x1d3   :  { %v1144_v1 = vrot.slane %v1143_v0, 1 }
 0x1d5   :  { %v1145_v4 = vadd.f32 %v1144_v1, %v1143_v0 }
 0x1d7   :  { %v1146_v5 = vmul.f32 %v1145_v4, %v2052_v46 }
 0x1d9   :  { %v2218_v6 = vsub.f32 %v2133_v34, %v1146_v5  ;;  %v2221_v7 = vsub.f32 %v2136_v35, %v1146_v5  ;;  %v2224_v8 = vsub.f32 %v2139_v38, %v1146_v5  ;;  %v2227_v9 = vsub.f32 %v2148_v45, %v1146_v5 }
 0x1da   :  { %v2234_v14 = vsub.f32 %v2151_v47, %v1146_v5  ;;  %v2239_v35 = vsub.f32 %v2158_v56, %v1146_v5  ;;  %v2246_v17 = vsub.f32 %v2161_v57, %v1146_v5  ;;  %v2252_v56 = vsub.f32 %v2168_v2, %v1146_v5 }
 0x1db   :  { %v1163_v10 = vmul.f32 %v2218_v6, %v2218_v6  ;;  %v1164_v13 = vmul.f32 %v2221_v7, %v2221_v7  ;;  %v1165_v34 = vmul.f32 %v2224_v8, %v2224_v8  ;;  %v1166_v38 = vmul.f32 %v2227_v9, %v2227_v9 }
 0x1dc   :  { %v1167_v47 = vmul.f32 %v2234_v14, %v2234_v14  ;;  %v1168_v20 = vmul.f32 %v2239_v35, %v2239_v35  ;;  %v2258_v24 = vsub.f32 %v2171_v3, %v1146_v5  ;;  %v1169_v57 = vmul.f32 %v2246_v17, %v2246_v17 }
 0x1dd   :  { %v1179_v45 = vsel %vm1099_vm7, %v1163_v10, 0.0  ;;  %v1180_v15 = vsel %vm1099_vm7, %v1164_v13, 0.0  ;;  %v1182_v18 = vsel %vm1099_vm7, %v1165_v34, 0.0  ;;  %v1184_v22 = vsel %vm1099_vm7, %v1166_v38, 0.0 }
 0x1de   :  { %v1181_v16 = vadd.f32 %v1180_v15, %v1179_v45  ;;  %v1186_v25 = vsel %vm1099_vm7, %v1167_v47, 0.0  ;;  %v2264_v27 = vsub.f32 %v2178_v11, %v1146_v5  ;;  %v1170_v2 = vmul.f32 %v2252_v56, %v2252_v56 }
 0x1df   :  { %v1188_v29 = vsel %vm1099_vm7, %v1168_v20, 0.0  ;;  %v2270_v31 = vsub.f32 %v2181_v12, %v1146_v5  ;;  %v1171_v3 = vmul.f32 %v2258_v24, %v2258_v24  ;;  %v1190_v36 = vsel %vm1099_vm7, %v1169_v57, 0.0 }
 0x1e0   :  { %v1183_v19 = vadd.f32 %v1182_v18, %v1181_v16  ;;  %v2276_v39 = vsub.f32 %v2188_v21, %v1146_v5  ;;  %v1172_v11 = vmul.f32 %v2264_v27, %v2264_v27  ;;  %v1192_v40 = vsel %vm1099_vm7, %v1170_v2, 0.0 }
 0x1e1   :  { %v2282_v44 = vsub.f32 %v2191_v28, %v1146_v5  ;;  %v1173_v12 = vmul.f32 %v2270_v31, %v2270_v31  ;;  %v1194_v48 = vsel %vm1099_vm7, %v1171_v3, 0.0  ;;  %v2288_v50 = vsub.f32 %v2198_v32, %v1146_v5 }
 0x1e2   :  { %v1185_v23 = vadd.f32 %v1184_v22, %v1183_v19  ;;  %v1174_v21 = vmul.f32 %v2276_v39, %v2276_v39  ;;  %v1196_v51 = vsel %vm1099_vm7, %v1172_v11, 0.0  ;;  %v2294_v53 = vsub.f32 %v2203_v42, %v1146_v5 }
 0x1e3   :  { %v1175_v28 = vmul.f32 %v2282_v44, %v2282_v44  ;;  %v1198_v55 = vsel %vm1099_vm7, %v1173_v12, 0.0  ;;  %v2300_v59 = vsub.f32 %v2206_v43, %v1146_v5  ;;  %v1176_v32 = vmul.f32 %v2288_v50, %v2288_v50 }
 0x1e4   :  { %v1187_v26 = vadd.f32 %v1186_v25, %v1185_v23  ;;  %v1200_v33 = vsel %vm1099_vm7, %v1174_v21, 0.0  ;;  %v1177_v61 = vmul.f32 %v2294_v53, %v2294_v53 }
 0x1e5   :  { %v1202_v42 = vsel %vm1099_vm7, %v1175_v28, 0.0  ;;  %v1178_v63 = vmul.f32 %v2300_v59, %v2300_v59  ;;  %v1204_v0 = vsel %vm1099_vm7, %v1176_v32, 0.0 }
 0x1e6   :  { %v1189_v30 = vadd.f32 %v1188_v29, %v1187_v26  ;;  %v1206_v43 = vsel %vm1099_vm7, %v1177_v61, 0.0 }
 0x1e7   :  { %v1208_v5 = vsel %vm1099_vm7, %v1178_v63, 0.0 }
 0x1e8   :  { %v1191_v37 = vadd.f32 %v1190_v36, %v1189_v30 }
 0x1ea   :  { %v1193_v41 = vadd.f32 %v1192_v40, %v1191_v37 }
 0x1ec   :  { %v1195_v49 = vadd.f32 %v1194_v48, %v1193_v41 }
 0x1ee   :  { %v1197_v52 = vadd.f32 %v1196_v51, %v1195_v49 }
 0x1f0   :  { %v1199_v58 = vadd.f32 %v1198_v55, %v1197_v52 }
 0x1f2   :  { %v1201_v60 = vadd.f32 %v1200_v33, %v1199_v58 }
 0x1f4   :  { %v1203_v62 = vadd.f32 %v1202_v42, %v1201_v60 }
 0x1f6   :  { %v1205_v1 = vadd.f32 %v1204_v0, %v1203_v62 }
 0x1f8   :  { %v1207_v4 = vadd.f32 %v1206_v43, %v1205_v1 }
 0x1fa   :  { %v1209_v10 = vadd.f32 %v1208_v5, %v1207_v4 }
 0x1fc   :  { %v1210_v13 = vmul.f32 %v1209_v10, %v2212_v54 }
 0x1fe   :  { %v1211_v34 = vsel %vm1099_vm7, %v1210_v13, 0.0 }
 0x1ff   :  { %v1212_v38 = vrot.slane %v1211_v34, 4 }
 0x201   :  { %v1213_v45 = vadd.f32 %v1212_v38, %v1211_v34 }
 0x203   :  { %v1214_v15 = vrot.slane %v1213_v45, 2 }
 0x205   :  { %v1215_v16 = vadd.f32 %v1214_v15, %v1213_v45 }
 0x207   :  { %v1216_v47 = vrot.slane %v1215_v16, 1 }
 0x209   :  { %v1217_v18 = vadd.f32 %v1216_v47, %v1215_v16 }
 0x20b   :  { %v1218_v19 = vmul.f32 %v1217_v18, %v2052_v46  ;;  %v1791_v46 = vld [vmem:[%s2409_s7] ss:$0 sm:$0xff] }
 0x20d   :  { %v1219_v20 = vadd.f32 1e-05, %v1218_v19 }
 0x20f   :  { %1799 = vrsqrt.f32 %v1219_v20  ;;  %vm1226_vm10 = vweird.f32 %v1219_v20 }
 0x215   :  { %v1800_v22 = vpop.eup %1799 }
 0x216   :  { %v1221_v23 = vmul.f32 %v1800_v22, %v1219_v20  ;;  %vm1227_vm9 = vweird.f32 %v1800_v22 }
 0x217   :  { %vm1228_vm11 = vmor %vm1226_vm10, %vm1227_vm9 }
 0x218   :  { %v1222_v57 = vmul.f32 %v1800_v22, %v1221_v23 }
 0x21a   :  { %v1223_v25 = vmul.f32 0.5, %v1222_v57 }
 0x21c   :  { %v1224_v26 = vsub.f32 1.5, %v1223_v25 }
 0x21e   :  { %v1225_v2 = vmul.f32 %v1800_v22, %v1224_v26 }
 0x220   :  { %v1229_v54 = vsel %vm1228_vm11, %v1800_v22, %v1225_v2 }
 0x221   :  { %v1230_v29 = vmul.f32 %v1229_v54, %v2218_v6  ;;  %v1231_v30 = vmul.f32 %v1229_v54, %v2221_v7  ;;  %v1232_v3 = vmul.f32 %v1229_v54, %v2224_v8  ;;  %v1233_v36 = vmul.f32 %v1229_v54, %v2227_v9  ;;  %v1792_v6 = vld [vmem:[%s2410_s8] ss:$0 sm:$0xff] }
 0x222   :  { %v1234_v37 = vmul.f32 %v1229_v54, %v2234_v14  ;;  %v1235_v11 = vmul.f32 %v1229_v54, %v2239_v35  ;;  %v1236_v40 = vmul.f32 %v1229_v54, %v2246_v17  ;;  %v1237_v7 = vmul.f32 %v1229_v54, %v2252_v56 }
 0x223   :  { %v1250_v41 = vmul.f32 %v1791_v46, %v1230_v29  ;;  %v1251_v12 = vmul.f32 %v1791_v46, %v1231_v30  ;;  %v1252_v48 = vmul.f32 %v1791_v46, %v1232_v3  ;;  %v1253_v8 = vmul.f32 %v1791_v46, %v1233_v36 }
 0x224   :  { %v1238_v49 = vmul.f32 %v1229_v54, %v2258_v24  ;;  %v1254_v21 = vmul.f32 %v1791_v46, %v1234_v37  ;;  %v1239_v9 = vmul.f32 %v1229_v54, %v2264_v27  ;;  %v1240_v14 = vmul.f32 %v1229_v54, %v2270_v31 }
 0x225   :  { %v1255_v35 = vmul.f32 %v1791_v46, %v1235_v11  ;;  %v1256_v51 = vmul.f32 %v1791_v46, %v1236_v40  ;;  %v1270_v17 = vadd.f32 %v1792_v6, %v1250_v41  ;;  %v1271_v52 = vadd.f32 %v1792_v6, %v1251_v12 }
 0x226   :  { %v1272_v28 = vadd.f32 %v1792_v6, %v1252_v48  ;;  %v1241_v55 = vmul.f32 %v1229_v54, %v2276_v39  ;;  %v1257_v58 = vmul.f32 %v1791_v46, %v1237_v7  ;;  %v1273_v32 = vadd.f32 %v1792_v6, %v1253_v8 }
 0x227   :  { %v1242_v56 = vmul.f32 %v1229_v54, %v2282_v44  ;;  %v1243_v33 = vmul.f32 %v1229_v54, %v2288_v50  ;;  %v1258_v24 = vmul.f32 %v1791_v46, %v1238_v49  ;;  %v1274_v60 = vadd.f32 %v1792_v6, %v1254_v21 }
 0x228   :  { %v1244_v27 = vmul.f32 %v1229_v54, %v2294_v53  ;;  %v1259_v61 = vmul.f32 %v1791_v46, %v1239_v9  ;;  %v1260_v31 = vmul.f32 %v1791_v46, %v1240_v14  ;;  %v1275_v42 = vadd.f32 %v1792_v6, %v1255_v35 }
 0x229   :  { %v1276_v62 = vadd.f32 %v1792_v6, %v1256_v51  ;;  %v1286_v63 = vmax.f32 %v1270_v17, 0.0  ;;  %v1287_v0 = vmax.f32 %v1271_v52, 0.0  ;;  %v1288_v1 = vmax.f32 %v1272_v28, 0.0 }
 0x22a   :  { %v1245_v39 = vmul.f32 %v1229_v54, %v2300_v59  ;;  %v1261_v43 = vmul.f32 %v1791_v46, %v1241_v55  ;;  %v1277_v4 = vadd.f32 %v1792_v6, %v1257_v58  ;;  %v1289_v5 = vmax.f32 %v1273_v32, 0.0 }
 0x22b   :  { %v1262_v10 = vmul.f32 %v1791_v46, %v1242_v56  ;;  %v1263_v44 = vmul.f32 %v1791_v46, %v1243_v33  ;;  %v1278_v13 = vadd.f32 %v1792_v6, %v1258_v24  ;;  %v1290_v50 = vmax.f32 %v1274_v60, 0.0 }
 0x22c   :  { %v1264_v34 = vmul.f32 %v1791_v46, %v1244_v27  ;;  %v1279_v38 = vadd.f32 %v1792_v6, %v1259_v61  ;;  %v1280_v45 = vadd.f32 %v1792_v6, %v1260_v31  ;;  %v1291_v53 = vmax.f32 %v1275_v42, 0.0 }
 0x22d   :  { %v1292_v15 = vmax.f32 %v1276_v62, 0.0  ;;  %v1302_v16 = vpack.c.bf16 %v1286_v63, %v1286_v63  ;;  %v1303_v47 = vpack.c.bf16 %v1287_v0, %v1287_v0  ;;  %v1304_v18 = vpack.c.bf16 %v1288_v1, %v1288_v1 }
 0x22e   :  { %v1265_v19 = vmul.f32 %v1791_v46, %v1245_v39  ;;  %v1281_v20 = vadd.f32 %v1792_v6, %v1261_v43  ;;  %v1293_v22 = vmax.f32 %v1277_v4, 0.0  ;;  %v1305_v23 = vpack.c.bf16 %v1289_v5, %v1289_v5 }
 0x22f   :  { %v1282_v59 = vadd.f32 %v1792_v6, %v1262_v10  ;;  %v1294_v57 = vmax.f32 %v1278_v13, 0.0  ;;  %v1306_v25 = vpack.c.bf16 %v1290_v50, %v1290_v50  ;;  %1319 = vst.msk [vmem:[%s2411_s9] sm:$0x1] %vm1318_vm12, %v1302_v16  ;;  %v1283_v26 = vadd.f32 %v1792_v6, %v1263_v44 }
 0x230   :  { %v1295_v2 = vmax.f32 %v1279_v38, 0.0  ;;  %v1307_v54 = vpack.c.bf16 %v1291_v53, %v1291_v53  ;;  %1320 = vst.msk [vmem:[%s2411_s9 + $0x1] sm:$0x1] %vm1318_vm12, %v1303_v47  ;;  %v1284_v29 = vadd.f32 %v1792_v6, %v1264_v34  ;;  %v1296_v30 = vmax.f32 %v1280_v45, 0.0 }
 0x231   :  { %v1308_v3 = vpack.c.bf16 %v1292_v15, %v1292_v15  ;;  %1321 = vst.msk [vmem:[%s2411_s9 + $0x2] sm:$0x1] %vm1318_vm12, %v1304_v18  ;;  %v1285_v46 = vadd.f32 %v1792_v6, %v1265_v19  ;;  %v1297_v36 = vmax.f32 %v1281_v20, 0.0  ;;  %v1309_v37 = vpack.c.bf16 %v1293_v22, %v1293_v22 }
 0x232   :  { %1322 = vst.msk [vmem:[%s2411_s9 + $0x3] sm:$0x1] %vm1318_vm12, %v1305_v23  ;;  %v1298_v11 = vmax.f32 %v1282_v59, 0.0  ;;  %v1310_v40 = vpack.c.bf16 %v1294_v57, %v1294_v57  ;;  %v1299_v41 = vmax.f32 %v1283_v26, 0.0  ;;  %v1311_v12 = vpack.c.bf16 %v1295_v2, %v1295_v2 }
 0x233   :  { %1323 = vst.msk [vmem:[%s2411_s9 + $0x4] sm:$0x1] %vm1318_vm12, %v1306_v25  ;;  %v1300_v48 = vmax.f32 %v1284_v29, 0.0  ;;  %v1312_v6 = vpack.c.bf16 %v1296_v30, %v1296_v30  ;;  %v1301_v7 = vmax.f32 %v1285_v46, 0.0  ;;  %v1313_v8 = vpack.c.bf16 %v1297_v36, %v1297_v36 }
 0x234   :  { %1324 = vst.msk [vmem:[%s2411_s9 + $0x5] sm:$0x1] %vm1318_vm12, %v1307_v54  ;;  %v1314_v49 = vpack.c.bf16 %v1298_v11, %v1298_v11  ;;  %v1315_v21 = vpack.c.bf16 %v1299_v41, %v1299_v41 }
 0x235   :  { %1325 = vst.msk [vmem:[%s2411_s9 + $0x6] sm:$0x1] %vm1318_vm12, %v1308_v3  ;;  %v1316_v9 = vpack.c.bf16 %v1300_v48, %v1300_v48  ;;  %v1317_v14 = vpack.c.bf16 %v1301_v7, %v1301_v7 }
 0x236   :  { %1326 = vst.msk [vmem:[%s2411_s9 + $0x7] sm:$0x1] %vm1318_vm12, %v1309_v37 }
 0x237   :  { %1327 = vst.msk [vmem:[%s2411_s9 + $0x8] sm:$0x1] %vm1318_vm12, %v1310_v40 }
 0x238   :  { %1328 = vst.msk [vmem:[%s2411_s9 + $0x9] sm:$0x1] %vm1318_vm12, %v1311_v12 }
 0x239   :  { %1329 = vst.msk [vmem:[%s2411_s9 + $0xa] sm:$0x1] %vm1318_vm12, %v1312_v6 }
 0x23a   :  { %1330 = vst.msk [vmem:[%s2411_s9 + $0xb] sm:$0x1] %vm1318_vm12, %v1313_v8 }
 0x23b   :  { %1331 = vst.msk [vmem:[%s2411_s9 + $0xc] sm:$0x1] %vm1318_vm12, %v1314_v49 }
 0x23c   :  { %1332 = vst.msk [vmem:[%s2411_s9 + $0xd] sm:$0x1] %vm1318_vm12, %v1315_v21 }
 0x23d   :  { %1333 = vst.msk [vmem:[%s2411_s9 + $0xe] sm:$0x1] %vm1318_vm12, %v1316_v9 }
 0x23e   :  { %1334 = vst.msk [vmem:[%s2411_s9 + $0xf] sm:$0x1] %vm1318_vm12, %v1317_v14 }

// kernel: pixel_dt_gan_forward.12
= control target key start
LH: loop header
LB: loop body
LE: loop exit
PB: predicated region body
PF: predicated region fallthrough
CT: control target
= control target key end

     0   :  { %vm1312_vm0 = vcmask 261120   ;;  %vm1527_vm5 = vcmask 257024   ;;  %s3106_s1 = inlined_call_operand.vmem [shape: bf16[1024,32], index: 1, kind: input, shape index: {}]   ;;  %s3107_s2 = inlined_call_operand.vmem [shape: f32[1,32], index: 2, kind: input, shape index: {}]   ;;  %s3108_s0 = inlined_call_operand.vmem [shape: bf16[128,1024], index: 0, kind: input, shape index: {}]   ;;  %s3109_s3 = inlined_call_operand.vmem [shape: f32[1,32], index: 3, kind: input, shape index: {}]   ;;  %s3110_s4 = inlined_call_operand.vmem [shape: f32[1,32], index: 4, kind: input, shape index: {}]   ;;  %s3111_s5 = inlined_call_operand.vmem [shape: bf16[128,32], index: 5, kind: output, shape index: {}]  }
   0x1   :  { %v2131_v0 = vld [vmem:[%s3106_s1 + $0x38] sm:$0xff]  ;;  %v2130_v4 = vld [vmem:[%s3106_s1 + $0x30] sm:$0xff]  ;;  %v2129_v8 = vld [vmem:[%s3106_s1 + $0x28] sm:$0xff] }
   0x2   :  { %v2139_v1 = vld [vmem:[%s3106_s1 + $0x78] sm:$0xff]  ;;  %920 = vmatpush.bf16.msra.mxu0 %v2131_v0  ;;  %v2138_v5 = vld [vmem:[%s3106_s1 + $0x70] sm:$0xff]  ;;  %v2137_v9 = vld [vmem:[%s3106_s1 + $0x68] sm:$0xff] }
   0x3   :  { %v2147_v2 = vld [vmem:[%s3106_s1 + $0xb8] sm:$0xff]  ;;  %969 = vmatpush.bf16.msra.mxu1 %v2139_v1  ;;  %v2146_v6 = vld [vmem:[%s3106_s1 + $0xb0] sm:$0xff]  ;;  %v2145_v10 = vld [vmem:[%s3106_s1 + $0xa8] sm:$0xff] }
   0x4   :  { %v2155_v3 = vld [vmem:[%s3106_s1 + $0xf8] sm:$0xff]  ;;  %1018 = vmatpush.bf16.msra.mxu2 %v2147_v2  ;;  %v2154_v7 = vld [vmem:[%s3106_s1 + $0xf0] sm:$0xff]  ;;  %v2153_v11 = vld [vmem:[%s3106_s1 + $0xe8] sm:$0xff] }
   0x5   :  { %1067 = vmatpush.bf16.msra.mxu3 %v2155_v3  ;;  %v2128_v12 = vld [vmem:[%s3106_s1 + $0x20] sm:$0xff]  ;;  %v2127_v16 = vld [vmem:[%s3106_s1 + $0x18] sm:$0xff]  ;;  %v2126_v20 = vld [vmem:[%s3106_s1 + $0x10] sm:$0xff] }
   0x6   :  { %921 = vmatpush.bf16.msra.mxu0 %v2130_v4  ;;  %v2136_v13 = vld [vmem:[%s3106_s1 + $0x60] sm:$0xff]  ;;  %v2135_v17 = vld [vmem:[%s3106_s1 + $0x58] sm:$0xff]  ;;  %v2134_v21 = vld [vmem:[%s3106_s1 + $0x50] sm:$0xff] }
   0x7   :  { %970 = vmatpush.bf16.msra.mxu1 %v2138_v5  ;;  %v2144_v14 = vld [vmem:[%s3106_s1 + $0xa0] sm:$0xff]  ;;  %v2143_v18 = vld [vmem:[%s3106_s1 + $0x98] sm:$0xff]  ;;  %v2142_v22 = vld [vmem:[%s3106_s1 + $0x90] sm:$0xff] }
   0x8   :  { %1019 = vmatpush.bf16.msra.mxu2 %v2146_v6  ;;  %v2152_v15 = vld [vmem:[%s3106_s1 + $0xe0] sm:$0xff]  ;;  %v2151_v19 = vld [vmem:[%s3106_s1 + $0xd8] sm:$0xff]  ;;  %v2150_v23 = vld [vmem:[%s3106_s1 + $0xd0] sm:$0xff] }
   0x9   :  { %1068 = vmatpush.bf16.msra.mxu3 %v2154_v7  ;;  %v2125_v24 = vld [vmem:[%s3106_s1 + $0x8] sm:$0xff]  ;;  %v2124_v28 = vld [vmem:[%s3106_s1] sm:$0xff]  ;;  %v2179_v40 = vld [vmem:[%s3106_s1 + $0x1b8] sm:$0xff] }
   0xa   :  { %922 = vmatpush.bf16.msra.mxu0 %v2129_v8  ;;  %v2133_v25 = vld [vmem:[%s3106_s1 + $0x48] sm:$0xff]  ;;  %v2132_v29 = vld [vmem:[%s3106_s1 + $0x40] sm:$0xff]  ;;  %v2163_v41 = vld [vmem:[%s3106_s1 + $0x138] sm:$0xff] }
   0xb   :  { %971 = vmatpush.bf16.msra.mxu1 %v2137_v9  ;;  %v2141_v26 = vld [vmem:[%s3106_s1 + $0x88] sm:$0xff]  ;;  %v2140_v30 = vld [vmem:[%s3106_s1 + $0x80] sm:$0xff]  ;;  %v2187_v46 = vld [vmem:[%s3106_s1 + $0x1f8] sm:$0xff] }
   0xc   :  { %1020 = vmatpush.bf16.msra.mxu2 %v2145_v10  ;;  %v2149_v27 = vld [vmem:[%s3106_s1 + $0xc8] sm:$0xff]  ;;  %v2148_v31 = vld [vmem:[%s3106_s1 + $0xc0] sm:$0xff]  ;;  %v2171_v47 = vld [vmem:[%s3106_s1 + $0x178] sm:$0xff] }
   0xd   :  { %1069 = vmatpush.bf16.msra.mxu3 %v2153_v11  ;;  %v1550_v32 = vld [vmem:[%s3108_s0] sm:$0xf]  ;;  %v2060_v34 = vld [vmem:[%s3108_s0 + $0x4] sm:$0xf]  ;;  %v1558_v36 = vld [vmem:[%s3108_s0 + $0x8] sm:$0xf] }
   0xe   :  { %923 = vmatpush.bf16.msra.mxu0 %v2128_v12  ;;  %v2064_v33 = vld [vmem:[%s3108_s0 + $0x1c] sm:$0xf0]  ;;  %v1552_v35 = vld [vmem:[%s3108_s0 + $0x20] sm:$0xf0]  ;;  %v2065_v37 = vld [vmem:[%s3108_s0 + $0x24] sm:$0xf0] }
   0xf   :  { %972 = vmatpush.bf16.msra.mxu1 %v2136_v13  ;;  %v2061_v38 = vld [vmem:[%s3108_s0 + $0xc] sm:$0xf]  ;;  %v1551_v42 = vor.u32 %v2064_v33, %v1550_v32  ;;  %v1555_v43 = vor.u32 %v2060_v34, %v1552_v35  ;;  %v1559_v44 = vor.u32 %v2065_v37, %v1558_v36  ;;  %v2178_v48 = vld [vmem:[%s3106_s1 + $0x1b0] sm:$0xff]  ;;  %v1582_v56 = vld [vmem:[%s3108_s0 + $0x40] sm:$0xf] }
  0x10   :  { %1021 = vmatpush.bf16.msra.mxu2 %v2144_v14  ;;  %v1560_v39 = vld [vmem:[%s3108_s0 + $0x28] sm:$0xf0]  ;;  %v2162_v49 = vld [vmem:[%s3106_s1 + $0x130] sm:$0xff]  ;;  %v2072_v57 = vld [vmem:[%s3108_s0 + $0x5c] sm:$0xf0] }
  0x11   :  { %1070 = vmatpush.bf16.msra.mxu3 %v2152_v15  ;;  %v1563_v45 = vor.u32 %v2061_v38, %v1560_v39  ;;  %v2186_v50 = vld [vmem:[%s3106_s1 + $0x1f0] sm:$0xff]  ;;  %v2177_v52 = vld [vmem:[%s3106_s1 + $0x1a8] sm:$0xff]  ;;  %v2068_v58 = vld [vmem:[%s3108_s0 + $0x44] sm:$0xf]  ;;  %v1583_v0 = vor.u32 %v2072_v57, %v1582_v56 }
  0x12   :  { %924 = vmatpush.bf16.msra.mxu0 %v2127_v16  ;;  %v2170_v51 = vld [vmem:[%s3106_s1 + $0x170] sm:$0xff]  ;;  %v2161_v53 = vld [vmem:[%s3106_s1 + $0x128] sm:$0xff]  ;;  %v1584_v59 = vld [vmem:[%s3108_s0 + $0x60] sm:$0xf0] }
  0x13   :  { %973 = vmatpush.bf16.msra.mxu1 %v2135_v17  ;;  %v2185_v54 = vld [vmem:[%s3106_s1 + $0x1e8] sm:$0xff]  ;;  %v1587_v1 = vor.u32 %v2068_v58, %v1584_v59  ;;  %v2176_v4 = vld [vmem:[%s3106_s1 + $0x1a0] sm:$0xff]  ;;  %v2174_v36 = vld [vmem:[%s3106_s1 + $0x190] sm:$0xff] }
  0x14   :  { %1022 = vmatpush.bf16.msra.mxu2 %v2143_v18  ;;  %v2169_v55 = vld [vmem:[%s3106_s1 + $0x168] sm:$0xff]  ;;  %v2160_v5 = vld [vmem:[%s3106_s1 + $0x120] sm:$0xff]  ;;  %v2158_v37 = vld [vmem:[%s3106_s1 + $0x110] sm:$0xff] }
  0x15   :  { %1071 = vmatpush.bf16.msra.mxu3 %v2151_v19  ;;  %v1590_v60 = vld [vmem:[%s3108_s0 + $0x48] sm:$0xf]  ;;  %v2069_v62 = vld [vmem:[%s3108_s0 + $0x4c] sm:$0xf]  ;;  %v2184_v6 = vld [vmem:[%s3106_s1 + $0x1e0] sm:$0xff] }
  0x16   :  { %925 = vmatpush.bf16.msra.mxu0 %v2126_v20  ;;  %v2073_v61 = vld [vmem:[%s3108_s0 + $0x64] sm:$0xf0]  ;;  %v1592_v63 = vld [vmem:[%s3108_s0 + $0x68] sm:$0xf0]  ;;  %v2168_v7 = vld [vmem:[%s3106_s1 + $0x160] sm:$0xff] }
  0x17   :  { %974 = vmatpush.bf16.msra.mxu1 %v2134_v21  ;;  %v1591_v2 = vor.u32 %v2073_v61, %v1590_v60  ;;  %v1595_v3 = vor.u32 %v2069_v62, %v1592_v63  ;;  %v1614_v8 = vld [vmem:[%s3108_s0 + $0x80] sm:$0xf]  ;;  %v2076_v10 = vld [vmem:[%s3108_s0 + $0x84] sm:$0xf]  ;;  %v1622_v12 = vld [vmem:[%s3108_s0 + $0x88] sm:$0xf] }
  0x18   :  { %1023 = vmatpush.bf16.msra.mxu2 %v2142_v22  ;;  %v2080_v9 = vld [vmem:[%s3108_s0 + $0x9c] sm:$0xf0]  ;;  %v1616_v11 = vld [vmem:[%s3108_s0 + $0xa0] sm:$0xf0]  ;;  %v2081_v13 = vld [vmem:[%s3108_s0 + $0xa4] sm:$0xf0] }
  0x19   :  { %1072 = vmatpush.bf16.msra.mxu3 %v2150_v23  ;;  %v2077_v14 = vld [vmem:[%s3108_s0 + $0x8c] sm:$0xf]  ;;  %v1615_v16 = vor.u32 %v2080_v9, %v1614_v8  ;;  %v1619_v17 = vor.u32 %v2076_v10, %v1616_v11  ;;  %v1623_v18 = vor.u32 %v2081_v13, %v1622_v12  ;;  %v2175_v20 = vld [vmem:[%s3106_s1 + $0x198] sm:$0xff]  ;;  %v2182_v38 = vld [vmem:[%s3106_s1 + $0x1d0] sm:$0xff] }
  0x1a   :  { %926 = vmatpush.bf16.msra.mxu0 %v2125_v24  ;;  %v1624_v15 = vld [vmem:[%s3108_s0 + $0xa8] sm:$0xf0]  ;;  %v2159_v21 = vld [vmem:[%s3106_s1 + $0x118] sm:$0xff]  ;;  %v1646_v24 = vld [vmem:[%s3108_s0 + $0xc0] sm:$0xf] }
  0x1b   :  { %975 = vmatpush.bf16.msra.mxu1 %v2133_v25  ;;  %v1627_v19 = vor.u32 %v2077_v14, %v1624_v15  ;;  %v2183_v22 = vld [vmem:[%s3106_s1 + $0x1d8] sm:$0xff]  ;;  %v2088_v25 = vld [vmem:[%s3108_s0 + $0xdc] sm:$0xf0]  ;;  %v2166_v39 = vld [vmem:[%s3106_s1 + $0x150] sm:$0xff] }
  0x1c   :  { %1024 = vmatpush.bf16.msra.mxu2 %v2141_v26  ;;  %v2167_v23 = vld [vmem:[%s3106_s1 + $0x158] sm:$0xff]  ;;  %v2084_v26 = vld [vmem:[%s3108_s0 + $0xc4] sm:$0xf]  ;;  %v1647_v32 = vor.u32 %v2088_v25, %v1646_v24  ;;  %v1710_v56 = vld [vmem:[%s3108_s0 + $0x140] sm:$0xf] }
  0x1d   :  { %1073 = vmatpush.bf16.msra.mxu3 %v2149_v27  ;;  %v1648_v27 = vld [vmem:[%s3108_s0 + $0xe0] sm:$0xf0]  ;;  %v2104_v57 = vld [vmem:[%s3108_s0 + $0x15c] sm:$0xf0]  ;;  %v1718_v60 = vld [vmem:[%s3108_s0 + $0x148] sm:$0xf] }
  0x1e   :  { %927 = vmatpush.bf16.msra.mxu0 %v2124_v28  ;;  %v1654_v28 = vld [vmem:[%s3108_s0 + $0xc8] sm:$0xf]  ;;  %v1651_v33 = vor.u32 %v2084_v26, %v1648_v27  ;;  %v2100_v58 = vld [vmem:[%s3108_s0 + $0x144] sm:$0xf]  ;;  %v2101_v62 = vld [vmem:[%s3108_s0 + $0x14c] sm:$0xf] }
  0x1f   :  { %976 = vmatpush.bf16.msra.mxu1 %v2132_v29  ;;  %v2089_v29 = vld [vmem:[%s3108_s0 + $0xe4] sm:$0xf0]  ;;  %v1712_v59 = vld [vmem:[%s3108_s0 + $0x160] sm:$0xf0]  ;;  %v1720_v63 = vld [vmem:[%s3108_s0 + $0x168] sm:$0xf0] }
  0x20   :  { %1025 = vmatpush.bf16.msra.mxu2 %v2140_v30  ;;  %v2085_v30 = vld [vmem:[%s3108_s0 + $0xcc] sm:$0xf]  ;;  %v1655_v34 = vor.u32 %v2089_v29, %v1654_v28  ;;  %v2105_v61 = vld [vmem:[%s3108_s0 + $0x164] sm:$0xf0]  ;;  %v1742_v8 = vld [vmem:[%s3108_s0 + $0x180] sm:$0xf] }
  0x21   :  { %1074 = vmatpush.bf16.msra.mxu3 %v2148_v31  ;;  %928 = vmatmul.bf16.vlgmr.msra.gmra.mxu0 %v1551_v42  ;;  %v1656_v31 = vld [vmem:[%s3108_s0 + $0xe8] sm:$0xf0]  ;;  %v2092_v42 = vld [vmem:[%s3108_s0 + $0x104] sm:$0xf]  ;;  %v2112_v9 = vld [vmem:[%s3108_s0 + $0x19c] sm:$0xf0] }
  0x22   :  { %1116 = vmatpush.bf16.msrb.mxu0 %v2163_v41  ;;  %977 = vmatmul.bf16.vlgmr.msra.gmra.mxu1 %v1555_v43  ;;  %v1659_v35 = vor.u32 %v2085_v30, %v1656_v31  ;;  %v2096_v41 = vld [vmem:[%s3108_s0 + $0x11c] sm:$0xf0]  ;;  %v1680_v43 = vld [vmem:[%s3108_s0 + $0x120] sm:$0xf0]  ;;  %v1750_v12 = vld [vmem:[%s3108_s0 + $0x188] sm:$0xf] }
  0x23   :  { %1026 = vmatmul.bf16.vlgmr.msra.gmra.mxu2 %v1559_v44  ;;  %1165 = vmatpush.bf16.msrb.mxu1 %v2171_v47  ;;  %v1686_v44 = vld [vmem:[%s3108_s0 + $0x108] sm:$0xf]  ;;  %v1688_v47 = vld [vmem:[%s3108_s0 + $0x128] sm:$0xf0]  ;;  %v2108_v10 = vld [vmem:[%s3108_s0 + $0x184] sm:$0xf] }
  0x24   :  { %1214 = vmatpush.bf16.msrb.mxu2 %v2179_v40  ;;  %1075 = vmatmul.bf16.vlgmr.msra.gmra.mxu3 %v1563_v45  ;;  %v1678_v40 = vld [vmem:[%s3108_s0 + $0x100] sm:$0xf]  ;;  %v2097_v45 = vld [vmem:[%s3108_s0 + $0x124] sm:$0xf0]  ;;  %v1744_v11 = vld [vmem:[%s3108_s0 + $0x1a0] sm:$0xf0] }
  0x25   :  { %1263 = vmatpush.bf16.msrb.mxu3 %v2187_v46  ;;  %v2093_v46 = vld [vmem:[%s3108_s0 + $0x10c] sm:$0xf]  ;;  %v2113_v13 = vld [vmem:[%s3108_s0 + $0x1a4] sm:$0xf0] }
  0x26   :  { %1117 = vmatpush.bf16.msrb.mxu0 %v2162_v49  ;;  %v1683_v49 = vor.u32 %v2092_v42, %v1680_v43  ;;  %v2109_v14 = vld [vmem:[%s3108_s0 + $0x18c] sm:$0xf]  ;;  %v1782_v24 = vld [vmem:[%s3108_s0 + $0x1c8] sm:$0xf] }
  0x27   :  { %1166 = vmatpush.bf16.msrb.mxu1 %v2170_v51  ;;  %v1691_v51 = vor.u32 %v2093_v46, %v1688_v47  ;;  %v1752_v15 = vld [vmem:[%s3108_s0 + $0x1a8] sm:$0xf0]  ;;  %v2121_v25 = vld [vmem:[%s3108_s0 + $0x1e4] sm:$0xf0] }
  0x28   :  { %1215 = vmatpush.bf16.msrb.mxu2 %v2178_v48  ;;  %v1679_v48 = vor.u32 %v2096_v41, %v1678_v40  ;;  %v2117_v26 = vld [vmem:[%s3108_s0 + $0x1cc] sm:$0xf]  ;;  %v1783_v30 = vor.u32 %v2121_v25, %v1782_v24  ;;  %v1576_v40 = vld [vmem:[%s3108_s0 + $0x38] sm:$0xf0]  ;;  %v1632_v24 = vld [vmem:[%s3108_s0 + $0xb0] sm:$0xf0] }
  0x29   :  { %1264 = vmatpush.bf16.msrb.mxu3 %v2186_v50  ;;  %v1687_v50 = vor.u32 %v2097_v45, %v1686_v44  ;;  %v1784_v27 = vld [vmem:[%s3108_s0 + $0x1e8] sm:$0xf0]  ;;  %v1638_v25 = vld [vmem:[%s3108_s0 + $0x98] sm:$0xf] }
  0x2a   :  { %1118 = vmatpush.bf16.msrb.mxu0 %v2161_v53  ;;  %v2157_v53 = vld [vmem:[%s3106_s1 + $0x108] sm:$0xff]  ;;  %v1787_v31 = vor.u32 %v2117_v26, %v1784_v27  ;;  %v2083_v26 = vld [vmem:[%s3108_s0 + $0xb4] sm:$0xf0]  ;;  %v2079_v27 = vld [vmem:[%s3108_s0 + $0x9c] sm:$0xf] }
  0x2b   :  { %1167 = vmatpush.bf16.msrb.mxu1 %v2169_v55  ;;  %v2165_v55 = vld [vmem:[%s3106_s1 + $0x148] sm:$0xff] }
  0x2c   :  { %1216 = vmatpush.bf16.msrb.mxu2 %v2177_v52  ;;  %v2173_v52 = vld [vmem:[%s3106_s1 + $0x188] sm:$0xff] }
  0x2d   :  { %1265 = vmatpush.bf16.msrb.mxu3 %v2185_v54  ;;  %v2181_v54 = vld [vmem:[%s3106_s1 + $0x1c8] sm:$0xff] }
  0x2e   :  { %1119 = vmatpush.bf16.msrb.mxu0 %v2160_v5  ;;  %v2156_v5 = vld [vmem:[%s3106_s1 + $0x100] sm:$0xff] }
  0x2f   :  { %1168 = vmatpush.bf16.msrb.mxu1 %v2168_v7  ;;  %v2164_v7 = vld [vmem:[%s3106_s1 + $0x140] sm:$0xff] }
  0x30   :  { %1217 = vmatpush.bf16.msrb.mxu2 %v2176_v4  ;;  %v2172_v4 = vld [vmem:[%s3106_s1 + $0x180] sm:$0xff] }
  0x31   :  { %933 = vmatmul.bf16.gmra.mxu0 %v1583_v0  ;;  %1266 = vmatpush.bf16.msrb.mxu3 %v2184_v6  ;;  %v1711_v0 = vor.u32 %v2104_v57, %v1710_v56  ;;  %v2180_v6 = vld [vmem:[%s3106_s1 + $0x1c0] sm:$0xff]  ;;  %v1598_v57 = vld [vmem:[%s3108_s0 + $0x50] sm:$0xf] }
  0x32   :  { %982 = vmatmul.bf16.gmra.mxu1 %v1587_v1  ;;  %1120 = vmatpush.bf16.msrb.mxu0 %v2159_v21  ;;  %v1715_v1 = vor.u32 %v2100_v58, %v1712_v59  ;;  %v2120_v21 = vld [vmem:[%s3108_s0 + $0x1dc] sm:$0xf0]  ;;  %v2074_v58 = vld [vmem:[%s3108_s0 + $0x6c] sm:$0xf0]  ;;  %v2070_v59 = vld [vmem:[%s3108_s0 + $0x54] sm:$0xf] }
  0x33   :  { %1031 = vmatmul.bf16.gmra.mxu2 %v1591_v2  ;;  %1169 = vmatpush.bf16.msrb.mxu1 %v2167_v23  ;;  %v1719_v2 = vor.u32 %v2105_v61, %v1718_v60  ;;  %v1776_v23 = vld [vmem:[%s3108_s0 + $0x1e0] sm:$0xf0]  ;;  %v1600_v60 = vld [vmem:[%s3108_s0 + $0x70] sm:$0xf0]  ;;  %v1606_v61 = vld [vmem:[%s3108_s0 + $0x58] sm:$0xf] }
  0x34   :  { %1080 = vmatmul.bf16.gmra.mxu3 %v1595_v3  ;;  %1218 = vmatpush.bf16.msrb.mxu2 %v2175_v20  ;;  %v1723_v3 = vor.u32 %v2101_v62, %v1720_v63  ;;  %v1774_v20 = vld [vmem:[%s3108_s0 + $0x1c0] sm:$0xf]  ;;  %v2075_v62 = vld [vmem:[%s3108_s0 + $0x74] sm:$0xf0]  ;;  %v2071_v63 = vld [vmem:[%s3108_s0 + $0x5c] sm:$0xf] }
  0x35   :  { %1267 = vmatpush.bf16.msrb.mxu3 %v2183_v22  ;;  %v2116_v22 = vld [vmem:[%s3108_s0 + $0x1c4] sm:$0xf]  ;;  %v1775_v28 = vor.u32 %v2120_v21, %v1774_v20  ;;  %v1630_v21 = vld [vmem:[%s3108_s0 + $0x90] sm:$0xf] }
  0x36   :  { %1121 = vmatpush.bf16.msrb.mxu0 %v2158_v37  ;;  %v1779_v29 = vor.u32 %v2116_v22, %v1776_v23  ;;  %v1574_v37 = vld [vmem:[%s3108_s0 + $0x18] sm:$0xf]  ;;  %v2082_v22 = vld [vmem:[%s3108_s0 + $0xac] sm:$0xf0]  ;;  %v2078_v23 = vld [vmem:[%s3108_s0 + $0x94] sm:$0xf] }
  0x37   :  { %1170 = vmatpush.bf16.msrb.mxu1 %v2166_v39  ;;  %v2063_v39 = vld [vmem:[%s3108_s0 + $0x1c] sm:$0xf] }
  0x38   :  { %1219 = vmatpush.bf16.msrb.mxu2 %v2174_v36  ;;  %v1568_v36 = vld [vmem:[%s3108_s0 + $0x30] sm:$0xf0]  ;;  %v1579_v46 = vor.u32 %v2063_v39, %v1576_v40 }
  0x39   :  { %1268 = vmatpush.bf16.msrb.mxu3 %v2182_v38  ;;  %v2067_v38 = vld [vmem:[%s3108_s0 + $0x34] sm:$0xf0] }
  0x3a   :  { %1122 = vmatpush.bf16.msrb.mxu0 %v2157_v53  ;;  %v1575_v45 = vor.u32 %v2067_v38, %v1574_v37  ;;  %v1639_v37 = vor.u32 %v2083_v26, %v1638_v25 }
  0x3b   :  { %1171 = vmatpush.bf16.msrb.mxu1 %v2165_v55 }
  0x3c   :  { %1220 = vmatpush.bf16.msrb.mxu2 %v2173_v52 }
  0x3d   :  { %1269 = vmatpush.bf16.msrb.mxu3 %v2181_v54 }
  0x3e   :  { %1123 = vmatpush.bf16.msrb.mxu0 %v2156_v5 }
  0x3f   :  { %1172 = vmatpush.bf16.msrb.mxu1 %v2164_v7 }
  0x40   :  { %1221 = vmatpush.bf16.msrb.mxu2 %v2172_v4  ;;  %v1603_v4 = vor.u32 %v2070_v59, %v1600_v60 }
  0x41   :  { %938 = vmatmul.bf16.gmra.mxu0 %v1615_v16  ;;  %1270 = vmatpush.bf16.msrb.mxu3 %v2180_v6  ;;  %v1743_v16 = vor.u32 %v2112_v9, %v1742_v8  ;;  %v1607_v8 = vor.u32 %v2075_v62, %v1606_v61 }
  0x42   :  { %987 = vmatmul.bf16.gmra.mxu1 %v1619_v17  ;;  %v1747_v17 = vor.u32 %v2108_v10, %v1744_v11 }
  0x43   :  { %1036 = vmatmul.bf16.gmra.mxu2 %v1623_v18  ;;  %v1751_v18 = vor.u32 %v2113_v13, %v1750_v12 }
  0x44   :  { %1085 = vmatmul.bf16.gmra.mxu3 %v1627_v19  ;;  %v1755_v19 = vor.u32 %v2109_v14, %v1752_v15 }
  0x51   :  { %943 = vmatmul.bf16.gmra.mxu0 %v1647_v32  ;;  %v2614_v32 = vld [vmem:[%s3107_s2] ss:$0 sm:$0xff] }
  0x52   :  { %992 = vmatmul.bf16.gmra.mxu1 %v1651_v33  ;;  %v1566_v33 = vld [vmem:[%s3108_s0 + $0x10] sm:$0xf] }
  0x53   :  { %1041 = vmatmul.bf16.gmra.mxu2 %v1655_v34  ;;  %v2066_v34 = vld [vmem:[%s3108_s0 + $0x2c] sm:$0xf0] }
  0x54   :  { %1090 = vmatmul.bf16.gmra.mxu3 %v1659_v35  ;;  %v2062_v35 = vld [vmem:[%s3108_s0 + $0x14] sm:$0xf]  ;;  %v1567_v41 = vor.u32 %v2066_v34, %v1566_v33  ;;  %v1635_v33 = vor.u32 %v2078_v23, %v1632_v24  ;;  %v2095_v23 = vld [vmem:[%s3108_s0 + $0x11c] sm:$0xf] }
  0x55   :  { %v1571_v42 = vor.u32 %v2062_v35, %v1568_v36  ;;  %v1704_v24 = vld [vmem:[%s3108_s0 + $0x138] sm:$0xf0] }
  0x61   :  { %948 = vmatmul.bf16.gmra.mxu0 %v1679_v48 }
  0x62   :  { %997 = vmatmul.bf16.gmra.mxu1 %v1683_v49 }
  0x63   :  { %1046 = vmatmul.bf16.gmra.mxu2 %v1687_v50 }
  0x64   :  { %1095 = vmatmul.bf16.gmra.mxu3 %v1691_v51 }
  0x71   :  { %953 = vmatmul.bf16.gmra.mxu0 %v1711_v0  ;;  %v1608_v0 = vld [vmem:[%s3108_s0 + $0x78] sm:$0xf0] }
  0x72   :  { %1002 = vmatmul.bf16.gmra.mxu1 %v1715_v1  ;;  %v1611_v9 = vor.u32 %v2071_v63, %v1608_v0 }
  0x73   :  { %1051 = vmatmul.bf16.gmra.mxu2 %v1719_v2 }
  0x74   :  { %1100 = vmatmul.bf16.gmra.mxu3 %v1723_v3  ;;  %v1599_v3 = vor.u32 %v2074_v58, %v1598_v57  ;;  %v2087_v57 = vld [vmem:[%s3108_s0 + $0xdc] sm:$0xf] }
  0x75   :  { %v1672_v58 = vld [vmem:[%s3108_s0 + $0xf8] sm:$0xf0] }
  0x81   :  { %958 = vmatmul.bf16.gmra.mxu0 %v1743_v16 }
  0x82   :  { %1007 = vmatmul.bf16.gmra.mxu1 %v1747_v17 }
  0x83   :  { %1056 = vmatmul.bf16.gmra.mxu2 %v1751_v18 }
  0x84   :  { %1105 = vmatmul.bf16.gmra.mxu3 %v1755_v19 }
  0x91   :  { %963 = vmatmul.bf16.gmra.mxu0 %v1775_v28  ;;  %v1640_v28 = vld [vmem:[%s3108_s0 + $0xb8] sm:$0xf0] }
  0x92   :  { %1012 = vmatmul.bf16.gmra.mxu1 %v1779_v29  ;;  %v1643_v38 = vor.u32 %v2079_v27, %v1640_v28 }
  0x93   :  { %1061 = vmatmul.bf16.gmra.mxu2 %v1783_v30 }
  0x94   :  { %1110 = vmatmul.bf16.gmra.mxu3 %v1787_v31  ;;  %v1631_v31 = vor.u32 %v2082_v22, %v1630_v21  ;;  %v1702_v21 = vld [vmem:[%s3108_s0 + $0x118] sm:$0xf] }
  0x95   :  { %v2099_v22 = vld [vmem:[%s3108_s0 + $0x134] sm:$0xf0] }
  0x9e   :  { %v929_v43 = vpop.f32.mrf.mxu0 }
  0x9f   :  { %v978_v44 = vpop.f32.mrf.mxu1  ;;  %v930_v47 = vadd.f32 %v2614_v32, %v929_v43 }
  0xa1   :  { %v979_v48 = vadd.f32 %v978_v44, %v930_v47  ;;  %1124 = vmatmul.bf16.vlgmr.msrb.gmra.mxu0 %v1567_v41 }
  0xa2   :  { %1173 = vmatmul.bf16.vlgmr.msrb.gmra.mxu1 %v1571_v42 }
  0xa3   :  { %1222 = vmatmul.bf16.vlgmr.msrb.gmra.mxu2 %v1575_v45 }
  0xa4   :  { %1271 = vmatmul.bf16.vlgmr.msrb.gmra.mxu3 %v1579_v46 }
  0xa6   :  { %v1027_v49 = vpop.f32.mrf.mxu2  ;;  %v931_v52 = vpop.f32.mrf.mxu0 }
  0xa7   :  { %v1076_v50 = vpop.f32.mrf.mxu3  ;;  %v1028_v51 = vadd.f32 %v1027_v49, %v979_v48  ;;  %v980_v53 = vpop.f32.mrf.mxu1  ;;  %v932_v54 = vadd.f32 %v2614_v32, %v931_v52  ;;  %v2086_v52 = vld [vmem:[%s3108_s0 + $0xd4] sm:$0xf] }
  0xa9   :  { %v2642_v55 = vadd.f32 %v1076_v50, %v1028_v51  ;;  %v981_v56 = vadd.f32 %v980_v53, %v932_v54  ;;  %v1662_v50 = vld [vmem:[%s3108_s0 + $0xd0] sm:$0xf]  ;;  %v1664_v53 = vld [vmem:[%s3108_s0 + $0xf0] sm:$0xf0]  ;;  %v1670_v54 = vld [vmem:[%s3108_s0 + $0xd8] sm:$0xf] }
  0xaa   :  { %v2090_v51 = vld [vmem:[%s3108_s0 + $0xec] sm:$0xf0]  ;;  %v1667_v62 = vor.u32 %v2086_v52, %v1664_v53  ;;  %v1734_v52 = vld [vmem:[%s3108_s0 + $0x158] sm:$0xf] }
  0xab   :  { %v1663_v61 = vor.u32 %v2090_v51, %v1662_v50  ;;  %v2102_v50 = vld [vmem:[%s3108_s0 + $0x154] sm:$0xf]  ;;  %v2107_v53 = vld [vmem:[%s3108_s0 + $0x174] sm:$0xf0] }
  0xac   :  { %v1728_v51 = vld [vmem:[%s3108_s0 + $0x170] sm:$0xf0] }
  0xae   :  { %v1029_v1 = vpop.f32.mrf.mxu2  ;;  %v934_v6 = vpop.f32.mrf.mxu0 }
  0xaf   :  { %v1078_v2 = vpop.f32.mrf.mxu3  ;;  %v1030_v5 = vadd.f32 %v1029_v1, %v981_v56  ;;  %v983_v7 = vpop.f32.mrf.mxu1  ;;  %v935_v10 = vadd.f32 %v2614_v32, %v934_v6  ;;  %v2091_v56 = vld [vmem:[%s3108_s0 + $0xf4] sm:$0xf0] }
  0xb1   :  { %v2669_v11 = vadd.f32 %v1078_v2, %v1030_v5  ;;  %v984_v12 = vadd.f32 %v983_v7, %v935_v10  ;;  %1129 = vmatmul.bf16.gmra.mxu0 %v1599_v3  ;;  %v1671_v2 = vor.u32 %v2091_v56, %v1670_v54  ;;  %v1675_v3 = vor.u32 %v2087_v57, %v1672_v58  ;;  %v2103_v54 = vld [vmem:[%s3108_s0 + $0x15c] sm:$0xf] }
  0xb2   :  { %1178 = vmatmul.bf16.gmra.mxu1 %v1603_v4  ;;  %v1736_v56 = vld [vmem:[%s3108_s0 + $0x178] sm:$0xf0] }
  0xb3   :  { %1227 = vmatmul.bf16.gmra.mxu2 %v1607_v8 }
  0xb4   :  { %1276 = vmatmul.bf16.gmra.mxu3 %v1611_v9 }
  0xb6   :  { %v1032_v13 = vpop.f32.mrf.mxu2  ;;  %v936_v16 = vpop.f32.mrf.mxu0 }
  0xb7   :  { %v1081_v14 = vpop.f32.mrf.mxu3  ;;  %v1033_v15 = vadd.f32 %v1032_v13, %v984_v12  ;;  %v985_v17 = vpop.f32.mrf.mxu1  ;;  %v937_v18 = vadd.f32 %v2614_v32, %v936_v16  ;;  %v1694_v16 = vld [vmem:[%s3108_s0 + $0x110] sm:$0xf] }
  0xb9   :  { %v2672_v19 = vadd.f32 %v1081_v14, %v1033_v15  ;;  %v986_v20 = vadd.f32 %v985_v17, %v937_v18  ;;  %v2098_v17 = vld [vmem:[%s3108_s0 + $0x12c] sm:$0xf0]  ;;  %v2094_v18 = vld [vmem:[%s3108_s0 + $0x114] sm:$0xf] }
  0xba   :  { %v1695_v27 = vor.u32 %v2098_v17, %v1694_v16  ;;  %v1758_v16 = vld [vmem:[%s3108_s0 + $0x190] sm:$0xf] }
  0xbb   :  { %v2114_v17 = vld [vmem:[%s3108_s0 + $0x1ac] sm:$0xf0] }
  0xbe   :  { %v1034_v29 = vpop.f32.mrf.mxu2  ;;  %v939_v35 = vpop.f32.mrf.mxu0 }
  0xbf   :  { %v1083_v30 = vpop.f32.mrf.mxu3  ;;  %v1035_v34 = vadd.f32 %v1034_v29, %v986_v20  ;;  %v988_v36 = vpop.f32.mrf.mxu1  ;;  %v940_v39 = vadd.f32 %v2614_v32, %v939_v35  ;;  %v1696_v20 = vld [vmem:[%s3108_s0 + $0x130] sm:$0xf0] }
  0xc0   :  { %v1699_v28 = vor.u32 %v2094_v18, %v1696_v20  ;;  %v2110_v18 = vld [vmem:[%s3108_s0 + $0x194] sm:$0xf] }
  0xc1   :  { %v2699_v40 = vadd.f32 %v1083_v30, %v1035_v34  ;;  %v989_v41 = vadd.f32 %v988_v36, %v940_v39  ;;  %1134 = vmatmul.bf16.gmra.mxu0 %v1631_v31  ;;  %v1707_v34 = vor.u32 %v2095_v23, %v1704_v24  ;;  %v1760_v20 = vld [vmem:[%s3108_s0 + $0x1b0] sm:$0xf0]  ;;  %v2111_v23 = vld [vmem:[%s3108_s0 + $0x19c] sm:$0xf] }
  0xc2   :  { %1183 = vmatmul.bf16.gmra.mxu1 %v1635_v33  ;;  %v1703_v33 = vor.u32 %v2099_v22, %v1702_v21  ;;  %v1766_v21 = vld [vmem:[%s3108_s0 + $0x198] sm:$0xf]  ;;  %v1768_v24 = vld [vmem:[%s3108_s0 + $0x1b8] sm:$0xf0] }
  0xc3   :  { %1232 = vmatmul.bf16.gmra.mxu2 %v1639_v37  ;;  %v2115_v22 = vld [vmem:[%s3108_s0 + $0x1b4] sm:$0xf0] }
  0xc4   :  { %1281 = vmatmul.bf16.gmra.mxu3 %v1643_v38 }
  0xc6   :  { %v1037_v42 = vpop.f32.mrf.mxu2  ;;  %v941_v45 = vpop.f32.mrf.mxu0 }
  0xc7   :  { %v1086_v43 = vpop.f32.mrf.mxu3  ;;  %v1038_v44 = vadd.f32 %v1037_v42, %v989_v41  ;;  %v990_v46 = vpop.f32.mrf.mxu1  ;;  %v942_v47 = vadd.f32 %v2614_v32, %v941_v45 }
  0xc9   :  { %v2702_v48 = vadd.f32 %v1086_v43, %v1038_v44  ;;  %v991_v49 = vadd.f32 %v990_v46, %v942_v47  ;;  %v1726_v47 = vld [vmem:[%s3108_s0 + $0x150] sm:$0xf] }
  0xce   :  { %v1039_v59 = vpop.f32.mrf.mxu2  ;;  %v944_v0 = vpop.f32.mrf.mxu0 }
  0xcf   :  { %v1088_v60 = vpop.f32.mrf.mxu3  ;;  %v1040_v63 = vadd.f32 %v1039_v59, %v991_v49  ;;  %v993_v1 = vpop.f32.mrf.mxu1  ;;  %v945_v4 = vadd.f32 %v2614_v32, %v944_v0  ;;  %v2106_v49 = vld [vmem:[%s3108_s0 + $0x16c] sm:$0xf0]  ;;  %v1735_v0 = vor.u32 %v2107_v53, %v1734_v52  ;;  %v2118_v52 = vld [vmem:[%s3108_s0 + $0x1d4] sm:$0xf] }
  0xd0   :  { %v1727_v59 = vor.u32 %v2106_v49, %v1726_v47  ;;  %v1792_v53 = vld [vmem:[%s3108_s0 + $0x1f0] sm:$0xf0] }
  0xd1   :  { %v2729_v5 = vadd.f32 %v1088_v60, %v1040_v63  ;;  %v994_v6 = vadd.f32 %v993_v1, %v945_v4  ;;  %1139 = vmatmul.bf16.gmra.mxu0 %v1663_v61  ;;  %v1731_v60 = vor.u32 %v2102_v50, %v1728_v51  ;;  %v1739_v1 = vor.u32 %v2103_v54, %v1736_v56  ;;  %v1790_v50 = vld [vmem:[%s3108_s0 + $0x1d0] sm:$0xf]  ;;  %v1798_v54 = vld [vmem:[%s3108_s0 + $0x1d8] sm:$0xf] }
  0xd2   :  { %1188 = vmatmul.bf16.gmra.mxu1 %v1667_v62  ;;  %v2122_v51 = vld [vmem:[%s3108_s0 + $0x1ec] sm:$0xf0]  ;;  %v2123_v56 = vld [vmem:[%s3108_s0 + $0x1f4] sm:$0xf0] }
  0xd3   :  { %1237 = vmatmul.bf16.gmra.mxu2 %v1671_v2 }
  0xd4   :  { %1286 = vmatmul.bf16.gmra.mxu3 %v1675_v3 }
  0xd6   :  { %v1042_v7 = vpop.f32.mrf.mxu2  ;;  %v946_v10 = vpop.f32.mrf.mxu0 }
  0xd7   :  { %v1091_v8 = vpop.f32.mrf.mxu3  ;;  %v1043_v9 = vadd.f32 %v1042_v7, %v994_v6  ;;  %v995_v12 = vpop.f32.mrf.mxu1  ;;  %v947_v13 = vadd.f32 %v2614_v32, %v946_v10 }
  0xd9   :  { %v2732_v14 = vadd.f32 %v1091_v8, %v1043_v9  ;;  %v996_v15 = vadd.f32 %v995_v12, %v947_v13 }
  0xde   :  { %v1044_v25 = vpop.f32.mrf.mxu2  ;;  %v949_v30 = vpop.f32.mrf.mxu0 }
  0xdf   :  { %v1093_v26 = vpop.f32.mrf.mxu3  ;;  %v1045_v29 = vadd.f32 %v1044_v25, %v996_v15  ;;  %v998_v31 = vpop.f32.mrf.mxu1  ;;  %v950_v35 = vadd.f32 %v2614_v32, %v949_v30 }
  0xe1   :  { %v2759_v36 = vadd.f32 %v1093_v26, %v1045_v29  ;;  %v999_v37 = vadd.f32 %v998_v31, %v950_v35  ;;  %1144 = vmatmul.bf16.gmra.mxu0 %v1695_v27  ;;  %v1759_v27 = vor.u32 %v2114_v17, %v1758_v16 }
  0xe2   :  { %1193 = vmatmul.bf16.gmra.mxu1 %v1699_v28  ;;  %v1763_v28 = vor.u32 %v2110_v18, %v1760_v20 }
  0xe3   :  { %1242 = vmatmul.bf16.gmra.mxu2 %v1703_v33  ;;  %v1767_v33 = vor.u32 %v2115_v22, %v1766_v21 }
  0xe4   :  { %1291 = vmatmul.bf16.gmra.mxu3 %v1707_v34  ;;  %v1771_v34 = vor.u32 %v2111_v23, %v1768_v24 }
  0xe6   :  { %v1047_v38 = vpop.f32.mrf.mxu2  ;;  %v951_v42 = vpop.f32.mrf.mxu0 }
  0xe7   :  { %v1096_v39 = vpop.f32.mrf.mxu3  ;;  %v1048_v41 = vadd.f32 %v1047_v38, %v999_v37  ;;  %v1000_v43 = vpop.f32.mrf.mxu1  ;;  %v952_v44 = vadd.f32 %v2614_v32, %v951_v42 }
  0xe9   :  { %v2762_v45 = vadd.f32 %v1096_v39, %v1048_v41  ;;  %v1001_v46 = vadd.f32 %v1000_v43, %v952_v44 }
  0xee   :  { %v1049_v57 = vpop.f32.mrf.mxu2  ;;  %v954_v62 = vpop.f32.mrf.mxu0 }
  0xef   :  { %v1098_v58 = vpop.f32.mrf.mxu3  ;;  %v1050_v61 = vadd.f32 %v1049_v57, %v1001_v46  ;;  %v1003_v63 = vpop.f32.mrf.mxu1  ;;  %v955_v2 = vadd.f32 %v2614_v32, %v954_v62  ;;  %v2119_v57 = vld [vmem:[%s3108_s0 + $0x1dc] sm:$0xf]  ;;  %v1795_v62 = vor.u32 %v2118_v52, %v1792_v53 }
  0xf1   :  { %v2789_v3 = vadd.f32 %v1098_v58, %v1050_v61  ;;  %v1004_v4 = vadd.f32 %v1003_v63, %v955_v2  ;;  %1149 = vmatmul.bf16.gmra.mxu0 %v1727_v59  ;;  %v1800_v58 = vld [vmem:[%s3108_s0 + $0x1f8] sm:$0xf0]  ;;  %v1791_v61 = vor.u32 %v2122_v51, %v1790_v50  ;;  %v1799_v2 = vor.u32 %v2123_v56, %v1798_v54 }
  0xf2   :  { %1198 = vmatmul.bf16.gmra.mxu1 %v1731_v60 }
  0xf3   :  { %1247 = vmatmul.bf16.gmra.mxu2 %v1735_v0 }
  0xf4   :  { %1296 = vmatmul.bf16.gmra.mxu3 %v1739_v1 }
  0xf6   :  { %v1052_v6 = vpop.f32.mrf.mxu2  ;;  %v956_v9 = vpop.f32.mrf.mxu0 }
  0xf7   :  { %v1101_v7 = vpop.f32.mrf.mxu3  ;;  %v1053_v8 = vadd.f32 %v1052_v6, %v1004_v4  ;;  %v1005_v10 = vpop.f32.mrf.mxu1  ;;  %v957_v12 = vadd.f32 %v2614_v32, %v956_v9  ;;  %v1803_v4 = vor.u32 %v2119_v57, %v1800_v58 }
  0xf9   :  { %v2792_v13 = vadd.f32 %v1101_v7, %v1053_v8  ;;  %v1006_v15 = vadd.f32 %v1005_v10, %v957_v12 }
  0xfe   :  { %v1054_v25 = vpop.f32.mrf.mxu2  ;;  %v959_v30 = vpop.f32.mrf.mxu0 }
  0xff   :  { %v1103_v26 = vpop.f32.mrf.mxu3  ;;  %v1055_v29 = vadd.f32 %v1054_v25, %v1006_v15  ;;  %v1008_v31 = vpop.f32.mrf.mxu1  ;;  %v960_v35 = vadd.f32 %v2614_v32, %v959_v30 }
 0x101   :  { %v2819_v37 = vadd.f32 %v1103_v26, %v1055_v29  ;;  %v1009_v38 = vadd.f32 %v1008_v31, %v960_v35  ;;  %1154 = vmatmul.bf16.gmra.mxu0 %v1759_v27 }
 0x102   :  { %1203 = vmatmul.bf16.gmra.mxu1 %v1763_v28 }
 0x103   :  { %1252 = vmatmul.bf16.gmra.mxu2 %v1767_v33 }
 0x104   :  { %1301 = vmatmul.bf16.gmra.mxu3 %v1771_v34 }
 0x106   :  { %v1057_v39 = vpop.f32.mrf.mxu2  ;;  %v961_v43 = vpop.f32.mrf.mxu0 }
 0x107   :  { %v1106_v41 = vpop.f32.mrf.mxu3  ;;  %v1058_v42 = vadd.f32 %v1057_v39, %v1009_v38  ;;  %v1010_v44 = vpop.f32.mrf.mxu1  ;;  %v962_v46 = vadd.f32 %v2614_v32, %v961_v43 }
 0x109   :  { %v2822_v47 = vadd.f32 %v1106_v41, %v1058_v42  ;;  %v1011_v49 = vadd.f32 %v1010_v44, %v962_v46 }
 0x10e   :  { %v1059_v59 = vpop.f32.mrf.mxu2  ;;  %v964_v0 = vpop.f32.mrf.mxu0 }
 0x10f   :  { %v1108_v60 = vpop.f32.mrf.mxu3  ;;  %v1060_v63 = vadd.f32 %v1059_v59, %v1011_v49  ;;  %v1013_v1 = vpop.f32.mrf.mxu1  ;;  %v965_v6 = vadd.f32 %v2614_v32, %v964_v0 }
 0x111   :  { %v2849_v7 = vadd.f32 %v1108_v60, %v1060_v63  ;;  %v1014_v8 = vadd.f32 %v1013_v1, %v965_v6  ;;  %1159 = vmatmul.bf16.gmra.mxu0 %v1791_v61 }
 0x112   :  { %1208 = vmatmul.bf16.gmra.mxu1 %v1795_v62 }
 0x113   :  { %1257 = vmatmul.bf16.gmra.mxu2 %v1799_v2 }
 0x114   :  { %1306 = vmatmul.bf16.gmra.mxu3 %v1803_v4 }
 0x116   :  { %v1062_v9 = vpop.f32.mrf.mxu2  ;;  %v966_v15 = vpop.f32.mrf.mxu0 }
 0x117   :  { %v1111_v10 = vpop.f32.mrf.mxu3  ;;  %v1063_v12 = vadd.f32 %v1062_v9, %v1014_v8  ;;  %v1015_v16 = vpop.f32.mrf.mxu1  ;;  %v967_v17 = vadd.f32 %v2614_v32, %v966_v15 }
 0x119   :  { %v2852_v18 = vadd.f32 %v1111_v10, %v1063_v12  ;;  %v1016_v20 = vadd.f32 %v1015_v16, %v967_v17 }
 0x11e   :  { %v1064_v21 = vpop.f32.mrf.mxu2  ;;  %v1125_v24 = vpop.f32.mrf.mxu0 }
 0x11f   :  { %v1113_v22 = vpop.f32.mrf.mxu3  ;;  %v1065_v23 = vadd.f32 %v1064_v21, %v1016_v20  ;;  %v1174_v25 = vpop.f32.mrf.mxu1  ;;  %v1126_v26 = vadd.f32 %v1125_v24, %v2642_v55 }
 0x121   :  { %v2855_v27 = vadd.f32 %v1113_v22, %v1065_v23  ;;  %v1175_v28 = vadd.f32 %v1174_v25, %v1126_v26 }
 0x126   :  { %v1223_v29 = vpop.f32.mrf.mxu2  ;;  %v1127_v33 = vpop.f32.mrf.mxu0 }
 0x127   :  { %v1272_v30 = vpop.f32.mrf.mxu3  ;;  %v1224_v31 = vadd.f32 %v1223_v29, %v1175_v28  ;;  %v1176_v34 = vpop.f32.mrf.mxu1  ;;  %v1128_v32 = vadd.f32 %v1127_v33, %v2669_v11 }
 0x129   :  { %v2858_v35 = vadd.f32 %v1272_v30, %v1224_v31  ;;  %v1177_v38 = vadd.f32 %v1176_v34, %v1128_v32 }
 0x12b   :  { %v1313_v50 = vsel %vm1312_vm0, %v2858_v35, 0.0 }
 0x12e   :  { %v1225_v39 = vpop.f32.mrf.mxu2  ;;  %v1130_v43 = vpop.f32.mrf.mxu0 }
 0x12f   :  { %v1274_v41 = vpop.f32.mrf.mxu3  ;;  %v1226_v42 = vadd.f32 %v1225_v39, %v1177_v38  ;;  %v1179_v44 = vpop.f32.mrf.mxu1  ;;  %v1131_v55 = vadd.f32 %v1130_v43, %v2672_v19 }
 0x131   :  { %v2861_v46 = vadd.f32 %v1274_v41, %v1226_v42  ;;  %v1180_v49 = vadd.f32 %v1179_v44, %v1131_v55 }
 0x133   :  { %v1314_v11 = vsel %vm1312_vm0, %v2861_v46, 0.0 }
 0x134   :  { %v1315_v51 = vadd.f32 %v1314_v11, %v1313_v50 }
 0x136   :  { %v1228_v52 = vpop.f32.mrf.mxu2  ;;  %v1132_v56 = vpop.f32.mrf.mxu0 }
 0x137   :  { %v1277_v53 = vpop.f32.mrf.mxu3  ;;  %v1229_v54 = vadd.f32 %v1228_v52, %v1180_v49  ;;  %v1181_v57 = vpop.f32.mrf.mxu1  ;;  %v1133_v58 = vadd.f32 %v1132_v56, %v2699_v40 }
 0x139   :  { %v2868_v59 = vadd.f32 %v1277_v53, %v1229_v54  ;;  %v1182_v19 = vadd.f32 %v1181_v57, %v1133_v58 }
 0x13b   :  { %v1316_v60 = vsel %vm1312_vm0, %v2868_v59, 0.0 }
 0x13c   :  { %v1317_v61 = vadd.f32 %v1316_v60, %v1315_v51 }
 0x13e   :  { %v1230_v62 = vpop.f32.mrf.mxu2  ;;  %v1135_v1 = vpop.f32.mrf.mxu0 }
 0x13f   :  { %v1279_v63 = vpop.f32.mrf.mxu3  ;;  %v1231_v0 = vadd.f32 %v1230_v62, %v1182_v19  ;;  %v1184_v2 = vpop.f32.mrf.mxu1  ;;  %v1136_v4 = vadd.f32 %v1135_v1, %v2702_v48 }
 0x141   :  { %v2873_v6 = vadd.f32 %v1279_v63, %v1231_v0  ;;  %v1185_v8 = vadd.f32 %v1184_v2, %v1136_v4 }
 0x143   :  { %v1318_v40 = vsel %vm1312_vm0, %v2873_v6, 0.0 }
 0x144   :  { %v1319_v9 = vadd.f32 %v1318_v40, %v1317_v61 }
 0x146   :  { %v1233_v10 = vpop.f32.mrf.mxu2  ;;  %v1137_v16 = vpop.f32.mrf.mxu0 }
 0x147   :  { %v1282_v12 = vpop.f32.mrf.mxu3  ;;  %v1234_v15 = vadd.f32 %v1233_v10, %v1185_v8  ;;  %v1186_v17 = vpop.f32.mrf.mxu1  ;;  %v1138_v21 = vadd.f32 %v1137_v16, %v2729_v5 }
 0x149   :  { %v2877_v20 = vadd.f32 %v1282_v12, %v1234_v15  ;;  %v1187_v23 = vadd.f32 %v1186_v17, %v1138_v21 }
 0x14b   :  { %v1320_v22 = vsel %vm1312_vm0, %v2877_v20, 0.0 }
 0x14c   :  { %v1321_v48 = vadd.f32 %v1320_v22, %v1319_v9 }
 0x14e   :  { %v1235_v24 = vpop.f32.mrf.mxu2  ;;  %v1140_v28 = vpop.f32.mrf.mxu0 }
 0x14f   :  { %v1284_v25 = vpop.f32.mrf.mxu3  ;;  %v1236_v26 = vadd.f32 %v1235_v24, %v1187_v23  ;;  %v1189_v29 = vpop.f32.mrf.mxu1  ;;  %v1141_v31 = vadd.f32 %v1140_v28, %v2732_v14 }
 0x151   :  { %v2882_v30 = vadd.f32 %v1284_v25, %v1236_v26  ;;  %v1190_v32 = vadd.f32 %v1189_v29, %v1141_v31 }
 0x153   :  { %v1322_v33 = vsel %vm1312_vm0, %v2882_v30, 0.0 }
 0x154   :  { %v1323_v34 = vadd.f32 %v1322_v33, %v1321_v48 }
 0x156   :  { %v1238_v5 = vpop.f32.mrf.mxu2  ;;  %v1142_v41 = vpop.f32.mrf.mxu0 }
 0x157   :  { %v1287_v38 = vpop.f32.mrf.mxu3  ;;  %v1239_v39 = vadd.f32 %v1238_v5, %v1190_v32  ;;  %v1191_v42 = vpop.f32.mrf.mxu1  ;;  %v1143_v44 = vadd.f32 %v1142_v41, %v2759_v36 }
 0x159   :  { %v2887_v43 = vadd.f32 %v1287_v38, %v1239_v39  ;;  %v1192_v50 = vadd.f32 %v1191_v42, %v1143_v44 }
 0x15b   :  { %v1324_v55 = vsel %vm1312_vm0, %v2887_v43, 0.0 }
 0x15c   :  { %v1325_v49 = vadd.f32 %v1324_v55, %v1323_v34 }
 0x15e   :  { %v1240_v14 = vpop.f32.mrf.mxu2  ;;  %v1145_v52 = vpop.f32.mrf.mxu0 }
 0x15f   :  { %v1289_v11 = vpop.f32.mrf.mxu3  ;;  %v1241_v51 = vadd.f32 %v1240_v14, %v1192_v50  ;;  %v1194_v53 = vpop.f32.mrf.mxu1  ;;  %v1146_v56 = vadd.f32 %v1145_v52, %v2762_v45 }
 0x161   :  { %v2892_v54 = vadd.f32 %v1289_v11, %v1241_v51  ;;  %v1195_v19 = vadd.f32 %v1194_v53, %v1146_v56 }
 0x163   :  { %v1326_v57 = vsel %vm1312_vm0, %v2892_v54, 0.0 }
 0x164   :  { %v1327_v58 = vadd.f32 %v1326_v57, %v1325_v49 }
 0x166   :  { %v1243_v36 = vpop.f32.mrf.mxu2  ;;  %v1147_v62 = vpop.f32.mrf.mxu0 }
 0x167   :  { %v1292_v60 = vpop.f32.mrf.mxu3  ;;  %v1244_v61 = vadd.f32 %v1243_v36, %v1195_v19  ;;  %v1196_v63 = vpop.f32.mrf.mxu1  ;;  %v1148_v1 = vadd.f32 %v1147_v62, %v2789_v3 }
 0x169   :  { %v2897_v0 = vadd.f32 %v1292_v60, %v1244_v61  ;;  %v1197_v8 = vadd.f32 %v1196_v63, %v1148_v1 }
 0x16b   :  { %v1328_v2 = vsel %vm1312_vm0, %v2897_v0, 0.0 }
 0x16c   :  { %v1329_v4 = vadd.f32 %v1328_v2, %v1327_v58 }
 0x16e   :  { %v1245_v45 = vpop.f32.mrf.mxu2  ;;  %v1150_v10 = vpop.f32.mrf.mxu0 }
 0x16f   :  { %v1294_v40 = vpop.f32.mrf.mxu3  ;;  %v1246_v9 = vadd.f32 %v1245_v45, %v1197_v8  ;;  %v1199_v12 = vpop.f32.mrf.mxu1  ;;  %v1151_v16 = vadd.f32 %v1150_v10, %v2792_v13  ;;  %v2196_v45 = vmov 128.0  }
 0x170   :  { %2192 = vrcp.f32 %v2196_v45 }
 0x171   :  { %v2902_v15 = vadd.f32 %v1294_v40, %v1246_v9  ;;  %v1200_v22 = vadd.f32 %v1199_v12, %v1151_v16 }
 0x173   :  { %v1330_v17 = vsel %vm1312_vm0, %v2902_v15, 0.0 }
 0x174   :  { %v1331_v21 = vadd.f32 %v1330_v17, %v1329_v4 }
 0x176   :  { %v1248_v3 = vpop.f32.mrf.mxu2  ;;  %v1152_v24 = vpop.f32.mrf.mxu0 }
 0x177   :  { %v1297_v48 = vpop.f32.mrf.mxu3  ;;  %v1249_v23 = vadd.f32 %v1248_v3, %v1200_v22  ;;  %v1201_v25 = vpop.f32.mrf.mxu1  ;;  %v1153_v28 = vadd.f32 %v1152_v24, %v2819_v37 }
 0x178   :  { %v2193_v16 = vpop.eup %2192 }
 0x179   :  { %v2907_v26 = vadd.f32 %v1297_v48, %v1249_v23  ;;  %v1202_v33 = vadd.f32 %v1201_v25, %v1153_v28  ;;  %v1351_v48 = vmul.f32 128.0, %v2193_v16  ;;  %vm1355_vm1 = vweird.f32 %v2193_v16 }
 0x17b   :  { %v1332_v29 = vsel %vm1312_vm0, %v2907_v26, 0.0  ;;  %v1352_v28 = vsub.f32 1.0, %v1351_v48 }
 0x17c   :  { %v1333_v31 = vadd.f32 %v1332_v29, %v1331_v21 }
 0x17e   :  { %v1250_v13 = vpop.f32.mrf.mxu2  ;;  %v1155_v5 = vpop.f32.mrf.mxu0 }
 0x17f   :  { %v1299_v34 = vpop.f32.mrf.mxu3  ;;  %v1251_v32 = vadd.f32 %v1250_v13, %v1202_v33  ;;  %v1204_v38 = vpop.f32.mrf.mxu1  ;;  %v1156_v41 = vadd.f32 %v1155_v5, %v2822_v47  ;;  %v1353_v33 = vmul.f32 %v2193_v16, %v1352_v28 }
 0x181   :  { %v2912_v39 = vadd.f32 %v1299_v34, %v1251_v32  ;;  %v1205_v55 = vadd.f32 %v1204_v38, %v1156_v41 }
 0x183   :  { %v1334_v42 = vsel %vm1312_vm0, %v2912_v39, 0.0 }
 0x184   :  { %v1335_v44 = vadd.f32 %v1334_v42, %v1333_v31 }
 0x186   :  { %v1253_v37 = vpop.f32.mrf.mxu2  ;;  %v1157_v14 = vpop.f32.mrf.mxu0 }
 0x187   :  { %v1302_v49 = vpop.f32.mrf.mxu3  ;;  %v1254_v50 = vadd.f32 %v1253_v37, %v1205_v55  ;;  %v1206_v11 = vpop.f32.mrf.mxu1  ;;  %v1158_v52 = vadd.f32 %v1157_v14, %v2849_v7 }
 0x189   :  { %v1303_v51 = vadd.f32 %v1302_v49, %v1254_v50  ;;  %v1207_v57 = vadd.f32 %v1206_v11, %v1158_v52 }
 0x18b   :  { %v1336_v53 = vsel %vm1312_vm0, %v1303_v51, 0.0 }
 0x18c   :  { %v1337_v56 = vadd.f32 %v1336_v53, %v1335_v44 }
 0x18e   :  { %v1255_v58 = vpop.f32.mrf.mxu2  ;;  %v1160_v36 = vpop.f32.mrf.mxu0 }
 0x18f   :  { %v1304_v19 = vpop.f32.mrf.mxu3  ;;  %v1256_v47 = vadd.f32 %v1255_v58, %v1207_v57  ;;  %v1161_v61 = vadd.f32 %v1160_v36, %v2852_v18  ;;  %v1209_v62 = vpop.f32.mrf.mxu1 }
 0x191   :  { %v1305_v60 = vadd.f32 %v1304_v19, %v1256_v47  ;;  %v1210_v2 = vadd.f32 %v1209_v62, %v1161_v61 }
 0x193   :  { %v1338_v63 = vsel %vm1312_vm0, %v1305_v60, 0.0 }
 0x194   :  { %v1339_v1 = vadd.f32 %v1338_v63, %v1337_v56 }
 0x196   :  { %v1258_v4 = vpop.f32.mrf.mxu2  ;;  %v1162_v40 = vpop.f32.mrf.mxu0 }
 0x197   :  { %v1307_v8 = vpop.f32.mrf.mxu3  ;;  %v1259_v7 = vadd.f32 %v1258_v4, %v1210_v2  ;;  %v1163_v10 = vadd.f32 %v1162_v40, %v2855_v27  ;;  %v1211_v21 = vpop.f32.mrf.mxu1  ;;  %v1354_v27 = vadd.f32 %v2193_v16, %v1353_v33 }
 0x199   :  { %v1308_v9 = vadd.f32 %v1307_v8, %v1259_v7  ;;  %v1212_v18 = vadd.f32 %v1211_v21, %v1163_v10  ;;  %v2924_v38 = vsel %vm1355_vm1, %v2193_v16, %v1354_v27 }
 0x19b   :  { %v1340_v12 = vsel %vm1312_vm0, %v1308_v9, 0.0 }
 0x19c   :  { %v1341_v17 = vadd.f32 %v1340_v12, %v1339_v1 }
 0x19e   :  { %v1260_v22 = vpop.f32.mrf.mxu2 }
 0x19f   :  { %v1261_v3 = vadd.f32 %v1260_v22, %v1212_v18  ;;  %v1309_v23 = vpop.f32.mrf.mxu3 }
 0x1a1   :  { %v1310_v24 = vadd.f32 %v1309_v23, %v1261_v3 }
 0x1a3   :  { %v1342_v25 = vsel %vm1312_vm0, %v1310_v24, 0.0 }
 0x1a4   :  { %v1343_v29 = vadd.f32 %v1342_v25, %v1341_v17 }
 0x1a6   :  { %v1344_v31 = vrot.slane %v1343_v29, 4 }
 0x1a8   :  { %v1345_v13 = vadd.f32 %v1344_v31, %v1343_v29 }
 0x1aa   :  { %v1346_v34 = vrot.slane %v1345_v13, 2 }
 0x1ac   :  { %v1347_v32 = vadd.f32 %v1346_v34, %v1345_v13 }
 0x1ae   :  { %v1348_v5 = vrot.slane %v1347_v32, 1 }
 0x1b0   :  { %v1349_v41 = vadd.f32 %v1348_v5, %v1347_v32 }
 0x1b2   :  { %v1357_v42 = vmul.f32 %v2924_v38, %v1349_v41 }
 0x1b4   :  { %v2928_v44 = vsub.f32 %v2858_v35, %v1357_v42  ;;  %v2931_v55 = vsub.f32 %v2861_v46, %v1357_v42  ;;  %v2934_v37 = vsub.f32 %v2868_v59, %v1357_v42  ;;  %v2937_v49 = vsub.f32 %v2873_v6, %v1357_v42 }
 0x1b5   :  { %v2940_v50 = vsub.f32 %v2877_v20, %v1357_v42  ;;  %v2943_v14 = vsub.f32 %v2882_v30, %v1357_v42  ;;  %v2946_v11 = vsub.f32 %v2887_v43, %v1357_v42  ;;  %v2949_v35 = vsub.f32 %v2892_v54, %v1357_v42 }
 0x1b6   :  { %v2952_v46 = vsub.f32 %v2897_v0, %v1357_v42  ;;  %v2955_v59 = vsub.f32 %v2902_v15, %v1357_v42  ;;  %v2958_v6 = vsub.f32 %v2907_v26, %v1357_v42  ;;  %v2961_v20 = vsub.f32 %v2912_v39, %v1357_v42 }
 0x1b7   :  { %v2963_v30 = vsub.f32 %v1303_v51, %v1357_v42  ;;  %v2965_v52 = vsub.f32 %v1305_v60, %v1357_v42  ;;  %v2967_v43 = vsub.f32 %v1308_v9, %v1357_v42  ;;  %v2969_v54 = vsub.f32 %v1310_v24, %v1357_v42 }
 0x1b8   :  { %v1374_v0 = vmul.f32 %v2928_v44, %v2928_v44  ;;  %v1375_v15 = vmul.f32 %v2931_v55, %v2931_v55  ;;  %v1376_v26 = vmul.f32 %v2934_v37, %v2934_v37  ;;  %v1377_v39 = vmul.f32 %v2937_v49, %v2937_v49 }
 0x1b9   :  { %v1378_v57 = vmul.f32 %v2940_v50, %v2940_v50  ;;  %v1379_v47 = vmul.f32 %v2943_v14, %v2943_v14  ;;  %v1380_v61 = vmul.f32 %v2946_v11, %v2946_v11  ;;  %v1381_v1 = vmul.f32 %v2949_v35, %v2949_v35 }
 0x1ba   :  { %v1390_v51 = vsel %vm1312_vm0, %v1374_v0, 0.0  ;;  %v1391_v53 = vsel %vm1312_vm0, %v1375_v15, 0.0  ;;  %v1393_v58 = vsel %vm1312_vm0, %v1376_v26, 0.0  ;;  %v1395_v36 = vsel %vm1312_vm0, %v1377_v39, 0.0 }
 0x1bb   :  { %v1392_v56 = vadd.f32 %v1391_v53, %v1390_v51  ;;  %v1397_v62 = vsel %vm1312_vm0, %v1378_v57, 0.0  ;;  %v1399_v2 = vsel %vm1312_vm0, %v1379_v47, 0.0  ;;  %v1382_v8 = vmul.f32 %v2952_v46, %v2952_v46 }
 0x1bc   :  { %v1401_v45 = vsel %vm1312_vm0, %v1380_v61, 0.0  ;;  %v1383_v40 = vmul.f32 %v2955_v59, %v2955_v59  ;;  %v1403_v9 = vsel %vm1312_vm0, %v1381_v1, 0.0  ;;  %v1384_v12 = vmul.f32 %v2958_v6, %v2958_v6 }
 0x1bd   :  { %v1394_v19 = vadd.f32 %v1393_v58, %v1392_v56  ;;  %v1405_v16 = vsel %vm1312_vm0, %v1382_v8, 0.0  ;;  %v1385_v21 = vmul.f32 %v2961_v20, %v2961_v20  ;;  %v1386_v3 = vmul.f32 %v2963_v30, %v2963_v30 }
 0x1be   :  { %v1407_v18 = vsel %vm1312_vm0, %v1383_v40, 0.0  ;;  %v1409_v48 = vsel %vm1312_vm0, %v1384_v12, 0.0  ;;  %v1387_v24 = vmul.f32 %v2965_v52, %v2965_v52  ;;  %v1388_v29 = vmul.f32 %v2967_v43, %v2967_v43 }
 0x1bf   :  { %v1396_v60 = vadd.f32 %v1395_v36, %v1394_v19  ;;  %v1411_v25 = vsel %vm1312_vm0, %v1385_v21, 0.0  ;;  %v1413_v31 = vsel %vm1312_vm0, %v1386_v3, 0.0  ;;  %v1389_v13 = vmul.f32 %v2969_v54, %v2969_v54 }
 0x1c0   :  { %v1415_v34 = vsel %vm1312_vm0, %v1387_v24, 0.0  ;;  %v1417_v32 = vsel %vm1312_vm0, %v1388_v29, 0.0 }
 0x1c1   :  { %v1398_v63 = vadd.f32 %v1397_v62, %v1396_v60  ;;  %v1419_v41 = vsel %vm1312_vm0, %v1389_v13, 0.0 }
 0x1c3   :  { %v1400_v4 = vadd.f32 %v1399_v2, %v1398_v63 }
 0x1c5   :  { %v1402_v7 = vadd.f32 %v1401_v45, %v1400_v4  ;;  %v2190_v4 = vld [vmem:[%s3109_s3] ss:$0 sm:$0xff] }
 0x1c7   :  { %v1404_v10 = vadd.f32 %v1403_v9, %v1402_v7 }
 0x1c9   :  { %v1406_v17 = vadd.f32 %v1405_v16, %v1404_v10 }
 0x1cb   :  { %v1408_v22 = vadd.f32 %v1407_v18, %v1406_v17 }
 0x1cd   :  { %v1410_v23 = vadd.f32 %v1409_v48, %v1408_v22 }
 0x1cf   :  { %v1412_v28 = vadd.f32 %v1411_v25, %v1410_v23 }
 0x1d1   :  { %v1414_v33 = vadd.f32 %v1413_v31, %v1412_v28 }
 0x1d3   :  { %v1416_v27 = vadd.f32 %v1415_v34, %v1414_v33 }
 0x1d5   :  { %v1418_v5 = vadd.f32 %v1417_v32, %v1416_v27 }
 0x1d7   :  { %v1420_v42 = vadd.f32 %v1419_v41, %v1418_v5 }
 0x1d9   :  { %v1421_v0 = vrot.slane %v1420_v42, 4 }
 0x1db   :  { %v1422_v15 = vadd.f32 %v1421_v0, %v1420_v42 }
 0x1dd   :  { %v1423_v26 = vrot.slane %v1422_v15, 2 }
 0x1df   :  { %v1424_v39 = vadd.f32 %v1423_v26, %v1422_v15 }
 0x1e1   :  { %v1425_v51 = vrot.slane %v1424_v39, 1 }
 0x1e3   :  { %v1426_v53 = vadd.f32 %v1425_v51, %v1424_v39 }
 0x1e5   :  { %v1427_v56 = vmul.f32 %v1426_v53, %v2924_v38 }
 0x1e7   :  { %v1428_v57 = vadd.f32 1e-05, %v1427_v56 }
 0x1e9   :  { %2194 = vrsqrt.f32 %v1428_v57  ;;  %vm1435_vm3 = vweird.f32 %v1428_v57 }
 0x1ef   :  { %v2195_v58 = vpop.eup %2194 }
 0x1f0   :  { %v1430_v19 = vmul.f32 %v2195_v58, %v1428_v57  ;;  %vm1436_vm2 = vweird.f32 %v2195_v58 }
 0x1f1   :  { %vm1437_vm4 = vmor %vm1435_vm3, %vm1436_vm2 }
 0x1f2   :  { %v1431_v47 = vmul.f32 %v2195_v58, %v1430_v19 }
 0x1f4   :  { %v1432_v36 = vmul.f32 0.5, %v1431_v47 }
 0x1f6   :  { %v1433_v60 = vsub.f32 1.5, %v1432_v36 }
 0x1f8   :  { %v1434_v61 = vmul.f32 %v2195_v58, %v1433_v60 }
 0x1fa   :  { %v1438_v62 = vsel %vm1437_vm4, %v2195_v58, %v1434_v61 }
 0x1fb   :  { %v1439_v63 = vmul.f32 %v1438_v62, %v2928_v44  ;;  %v1440_v1 = vmul.f32 %v1438_v62, %v2931_v55  ;;  %v1441_v2 = vmul.f32 %v1438_v62, %v2934_v37  ;;  %v1442_v38 = vmul.f32 %v1438_v62, %v2937_v49 }
 0x1fc   :  { %v1443_v8 = vmul.f32 %v1438_v62, %v2940_v50  ;;  %v1444_v45 = vmul.f32 %v1438_v62, %v2943_v14  ;;  %v1445_v7 = vmul.f32 %v1438_v62, %v2946_v11  ;;  %v1446_v40 = vmul.f32 %v1438_v62, %v2949_v35  ;;  %v2191_v35 = vld [vmem:[%s3110_s4] ss:$0 sm:$0xff] }
 0x1fd   :  { %v1447_v44 = vmul.f32 %v1438_v62, %v2952_v46  ;;  %v1448_v55 = vmul.f32 %v1438_v62, %v2955_v59  ;;  %v1449_v37 = vmul.f32 %v1438_v62, %v2958_v6  ;;  %v1450_v49 = vmul.f32 %v1438_v62, %v2961_v20 }
 0x1fe   :  { %v1451_v9 = vmul.f32 %v1438_v62, %v2963_v30  ;;  %v1452_v10 = vmul.f32 %v1438_v62, %v2965_v52  ;;  %v1453_v50 = vmul.f32 %v1438_v62, %v2967_v43  ;;  %v1454_v14 = vmul.f32 %v1438_v62, %v2969_v54 }
 0x1ff   :  { %v1459_v12 = vmul.f32 %v2190_v4, %v1439_v63  ;;  %v1460_v11 = vmul.f32 %v2190_v4, %v1440_v1  ;;  %v1461_v16 = vmul.f32 %v2190_v4, %v1441_v2  ;;  %v1462_v46 = vmul.f32 %v2190_v4, %v1442_v38 }
 0x200   :  { %v1463_v59 = vmul.f32 %v2190_v4, %v1443_v8  ;;  %v1464_v6 = vmul.f32 %v2190_v4, %v1444_v45  ;;  %v1465_v17 = vmul.f32 %v2190_v4, %v1445_v7  ;;  %v1466_v18 = vmul.f32 %v2190_v4, %v1446_v40 }
 0x201   :  { %v1479_v20 = vadd.f32 %v2191_v35, %v1459_v12  ;;  %v1480_v21 = vadd.f32 %v2191_v35, %v1460_v11  ;;  %v1481_v30 = vadd.f32 %v2191_v35, %v1461_v16  ;;  %v1482_v52 = vadd.f32 %v2191_v35, %v1462_v46 }
 0x202   :  { %v1467_v22 = vmul.f32 %v2190_v4, %v1447_v44  ;;  %v1483_v43 = vadd.f32 %v2191_v35, %v1463_v59  ;;  %v1468_v3 = vmul.f32 %v2190_v4, %v1448_v55  ;;  %v1469_v54 = vmul.f32 %v2190_v4, %v1449_v37 }
 0x203   :  { %v1484_v48 = vadd.f32 %v2191_v35, %v1464_v6  ;;  %v1485_v23 = vadd.f32 %v2191_v35, %v1465_v17  ;;  %v1495_v24 = vmax.f32 %v1479_v20, 0.0  ;;  %v1496_v25 = vmax.f32 %v1480_v21, 0.0 }
 0x204   :  { %v1497_v28 = vmax.f32 %v1481_v30, 0.0  ;;  %v1470_v29 = vmul.f32 %v2190_v4, %v1450_v49  ;;  %v1486_v31 = vadd.f32 %v2191_v35, %v1466_v18  ;;  %v1498_v33 = vmax.f32 %v1482_v52, 0.0 }
 0x205   :  { %v1471_v13 = vmul.f32 %v2190_v4, %v1451_v9  ;;  %v1472_v34 = vmul.f32 %v2190_v4, %v1452_v10  ;;  %v1487_v27 = vadd.f32 %v2191_v35, %v1467_v22  ;;  %v1499_v32 = vmax.f32 %v1483_v43, 0.0 }
 0x206   :  { %v1473_v5 = vmul.f32 %v2190_v4, %v1453_v50  ;;  %v1488_v41 = vadd.f32 %v2191_v35, %v1468_v3  ;;  %v1489_v42 = vadd.f32 %v2191_v35, %v1469_v54  ;;  %v1500_v0 = vmax.f32 %v1484_v48, 0.0 }
 0x207   :  { %v1501_v15 = vmax.f32 %v1485_v23, 0.0  ;;  %v1511_v26 = vpack.c.bf16 %v1495_v24, %v1495_v24  ;;  %v1512_v39 = vpack.c.bf16 %v1496_v25, %v1496_v25  ;;  %v1513_v51 = vpack.c.bf16 %v1497_v28, %v1497_v28 }
 0x208   :  { %v1474_v53 = vmul.f32 %v2190_v4, %v1454_v14  ;;  %v1490_v56 = vadd.f32 %v2191_v35, %v1470_v29  ;;  %v1502_v57 = vmax.f32 %v1486_v31, 0.0  ;;  %v1514_v58 = vpack.c.bf16 %v1498_v33, %v1498_v33 }
 0x209   :  { %v1491_v19 = vadd.f32 %v2191_v35, %v1471_v13  ;;  %v1503_v47 = vmax.f32 %v1487_v27, 0.0  ;;  %v1515_v36 = vpack.c.bf16 %v1499_v32, %v1499_v32  ;;  %1528 = vst.msk [vmem:[%s3111_s5] sm:$0xf] %vm1527_vm5, %v1511_v26  ;;  %v1492_v60 = vadd.f32 %v2191_v35, %v1472_v34 }
 0x20a   :  { %v1504_v61 = vmax.f32 %v1488_v41, 0.0  ;;  %v1516_v62 = vpack.c.bf16 %v1500_v0, %v1500_v0  ;;  %1529 = vst.msk [vmem:[%s3111_s5 + $0x4] sm:$0xf] %vm1527_vm5, %v1512_v39  ;;  %v1493_v63 = vadd.f32 %v2191_v35, %v1473_v5  ;;  %v1505_v1 = vmax.f32 %v1489_v42, 0.0 }
 0x20b   :  { %v1517_v2 = vpack.c.bf16 %v1501_v15, %v1501_v15  ;;  %1530 = vst.msk [vmem:[%s3111_s5 + $0x8] sm:$0xf] %vm1527_vm5, %v1513_v51  ;;  %v1494_v38 = vadd.f32 %v2191_v35, %v1474_v53  ;;  %v1506_v4 = vmax.f32 %v1490_v56, 0.0  ;;  %v1518_v8 = vpack.c.bf16 %v1502_v57, %v1502_v57 }
 0x20c   :  { %1531 = vst.msk [vmem:[%s3111_s5 + $0xc] sm:$0xf] %vm1527_vm5, %v1514_v58  ;;  %v1507_v45 = vmax.f32 %v1491_v19, 0.0  ;;  %v1519_v7 = vpack.c.bf16 %v1503_v47, %v1503_v47  ;;  %v1508_v40 = vmax.f32 %v1492_v60, 0.0  ;;  %v1520_v44 = vpack.c.bf16 %v1504_v61, %v1504_v61 }
 0x20d   :  { %1532 = vst.msk [vmem:[%s3111_s5 + $0x10] sm:$0xf] %vm1527_vm5, %v1515_v36  ;;  %v1509_v55 = vmax.f32 %v1493_v63, 0.0  ;;  %v1521_v37 = vpack.c.bf16 %v1505_v1, %v1505_v1  ;;  %v1510_v49 = vmax.f32 %v1494_v38, 0.0  ;;  %v1522_v9 = vpack.c.bf16 %v1506_v4, %v1506_v4 }
 0x20e   :  { %1533 = vst.msk [vmem:[%s3111_s5 + $0x14] sm:$0xf] %vm1527_vm5, %v1516_v62  ;;  %v1523_v10 = vpack.c.bf16 %v1507_v45, %v1507_v45  ;;  %v1524_v50 = vpack.c.bf16 %v1508_v40, %v1508_v40 }
 0x20f   :  { %1534 = vst.msk [vmem:[%s3111_s5 + $0x18] sm:$0xf] %vm1527_vm5, %v1517_v2  ;;  %v1525_v14 = vpack.c.bf16 %v1509_v55, %v1509_v55  ;;  %v1526_v12 = vpack.c.bf16 %v1510_v49, %v1510_v49 }
 0x210   :  { %1535 = vst.msk [vmem:[%s3111_s5 + $0x1c] sm:$0xf] %vm1527_vm5, %v1518_v8 }
 0x211   :  { %1536 = vst.msk [vmem:[%s3111_s5 + $0x20] sm:$0xf] %vm1527_vm5, %v1519_v7 }
 0x212   :  { %1537 = vst.msk [vmem:[%s3111_s5 + $0x24] sm:$0xf] %vm1527_vm5, %v1520_v44 }
 0x213   :  { %1538 = vst.msk [vmem:[%s3111_s5 + $0x28] sm:$0xf] %vm1527_vm5, %v1521_v37 }
 0x214   :  { %1539 = vst.msk [vmem:[%s3111_s5 + $0x2c] sm:$0xf] %vm1527_vm5, %v1522_v9 }
 0x215   :  { %1540 = vst.msk [vmem:[%s3111_s5 + $0x30] sm:$0xf] %vm1527_vm5, %v1523_v10 }
 0x216   :  { %1541 = vst.msk [vmem:[%s3111_s5 + $0x34] sm:$0xf] %vm1527_vm5, %v1524_v50 }
 0x217   :  { %1542 = vst.msk [vmem:[%s3111_s5 + $0x38] sm:$0xf] %vm1527_vm5, %v1525_v14 }
 0x218   :  { %1543 = vst.msk [vmem:[%s3111_s5 + $0x3c] sm:$0xf] %vm1527_vm5, %v1526_v12 }

// kernel: pixel_dt_gan_forward.13
= control target key start
LH: loop header
LB: loop body
LE: loop exit
PB: predicated region body
PF: predicated region fallthrough
CT: control target
= control target key end

     0   :  { %s4684_s0 = inlined_call_operand.vmem [shape: bf16[512,512], index: 0, kind: input, shape index: {}]   ;;  %s4685_s1 = inlined_call_operand.vmem [shape: bf16[512,4], index: 1, kind: input, shape index: {}]   ;;  %s4686_s2 = inlined_call_operand.vmem [shape: f32[1,4], index: 2, kind: input, shape index: {}]   ;;  %s4687_s3 = inlined_call_operand.vmem [shape: f32[512,4], index: 3, kind: input, shape index: {}]   ;;  %s4688_s4 = inlined_call_operand.vmem [shape: f32[512,4], index: 4, kind: output, shape index: {0}]   ;;  %s4689_s5 = inlined_call_operand.hbm [shape: f32[1,1], index: 5, kind: output, shape index: {1}]  }
   0x1   :  { %v2987_v0 = vld [vmem:[%s4685_s1 + $0x38] sm:$0xff]  ;;  %v2986_v4 = vld [vmem:[%s4685_s1 + $0x30] sm:$0xff]  ;;  %v2985_v8 = vld [vmem:[%s4685_s1 + $0x28] sm:$0xff] }
   0x2   :  { %v2995_v1 = vld [vmem:[%s4685_s1 + $0x78] sm:$0xff]  ;;  %1048 = vmatpush.bf16.msra.mxu0 %v2987_v0  ;;  %v2994_v5 = vld [vmem:[%s4685_s1 + $0x70] sm:$0xff]  ;;  %v2993_v9 = vld [vmem:[%s4685_s1 + $0x68] sm:$0xff] }
   0x3   :  { %v3003_v2 = vld [vmem:[%s4685_s1 + $0xb8] sm:$0xff]  ;;  %1217 = vmatpush.bf16.msra.mxu1 %v2995_v1  ;;  %v3002_v6 = vld [vmem:[%s4685_s1 + $0xb0] sm:$0xff]  ;;  %v3001_v10 = vld [vmem:[%s4685_s1 + $0xa8] sm:$0xff] }
   0x4   :  { %v3011_v3 = vld [vmem:[%s4685_s1 + $0xf8] sm:$0xff]  ;;  %1386 = vmatpush.bf16.msra.mxu2 %v3003_v2  ;;  %v3010_v7 = vld [vmem:[%s4685_s1 + $0xf0] sm:$0xff]  ;;  %v3009_v11 = vld [vmem:[%s4685_s1 + $0xe8] sm:$0xff] }
   0x5   :  { %1555 = vmatpush.bf16.msra.mxu3 %v3011_v3  ;;  %v2984_v12 = vld [vmem:[%s4685_s1 + $0x20] sm:$0xff]  ;;  %v2983_v16 = vld [vmem:[%s4685_s1 + $0x18] sm:$0xff] }
   0x6   :  { %1049 = vmatpush.bf16.msra.mxu0 %v2986_v4  ;;  %v2992_v13 = vld [vmem:[%s4685_s1 + $0x60] sm:$0xff]  ;;  %v2991_v17 = vld [vmem:[%s4685_s1 + $0x58] sm:$0xff] }
   0x7   :  { %1218 = vmatpush.bf16.msra.mxu1 %v2994_v5  ;;  %v3000_v14 = vld [vmem:[%s4685_s1 + $0xa0] sm:$0xff] }
   0x8   :  { %1387 = vmatpush.bf16.msra.mxu2 %v3002_v6  ;;  %v3008_v15 = vld [vmem:[%s4685_s1 + $0xe0] sm:$0xff] }
   0x9   :  { %1556 = vmatpush.bf16.msra.mxu3 %v3010_v7 }
   0xa   :  { %1050 = vmatpush.bf16.msra.mxu0 %v2985_v8 }
   0xb   :  { %1219 = vmatpush.bf16.msra.mxu1 %v2993_v9 }
   0xc   :  { %1388 = vmatpush.bf16.msra.mxu2 %v3001_v10 }
   0xd   :  { %1557 = vmatpush.bf16.msra.mxu3 %v3009_v11 }
   0xe   :  { %1051 = vmatpush.bf16.msra.mxu0 %v2984_v12 }
   0xf   :  { %1220 = vmatpush.bf16.msra.mxu1 %v2992_v13 }
  0x10   :  { %11 = vsyncpa [#allocation3], 0  ;;  %1389 = vmatpush.bf16.msra.mxu2 %v3000_v14  ;;  %v2999_v18 = vld [vmem:[%s4685_s1 + $0x98] sm:$0xff]  ;;  %v2982_v20 = vld [vmem:[%s4685_s1 + $0x10] sm:$0xff]  ;;  %vm1788_vm0 = vcmask 31744   ;;  %s2201_s21 = sshll.u32 %s4689_s5, 4  ;;  %s2202_s21 = int_to_ptr.hbm [resolvable:$true] %s2201_s21 }
  0x11   :  { %1558 = vmatpush.bf16.msra.mxu3 %v3008_v15  ;;  %v3007_v19 = vld [vmem:[%s4685_s1 + $0xd8] sm:$0xff]  ;;  %v2990_v21 = vld [vmem:[%s4685_s1 + $0x50] sm:$0xff]  ;;  %v2981_v24 = vld [vmem:[%s4685_s1 + $0x8] sm:$0xff]  ;;  %vm2190_vm2 = vcmask 0  }
  0x12   :  { %1052 = vmatpush.bf16.msra.mxu0 %v2983_v16  ;;  %v2998_v22 = vld [vmem:[%s4685_s1 + $0x90] sm:$0xff]  ;;  %v2989_v25 = vld [vmem:[%s4685_s1 + $0x48] sm:$0xff]  ;;  %v2980_v28 = vld [vmem:[%s4685_s1] sm:$0xff] }
  0x13   :  { %1221 = vmatpush.bf16.msra.mxu1 %v2991_v17  ;;  %v3006_v23 = vld [vmem:[%s4685_s1 + $0xd0] sm:$0xff]  ;;  %v2997_v26 = vld [vmem:[%s4685_s1 + $0x88] sm:$0xff]  ;;  %v2988_v29 = vld [vmem:[%s4685_s1 + $0x40] sm:$0xff] }
  0x14   :  { %1390 = vmatpush.bf16.msra.mxu2 %v2999_v18  ;;  %v3005_v27 = vld [vmem:[%s4685_s1 + $0xc8] sm:$0xff]  ;;  %v2996_v30 = vld [vmem:[%s4685_s1 + $0x80] sm:$0xff]  ;;  %v2854_v33 = vld [vmem:[%s4684_s0 + $0xc] sm:$0xf0] }
  0x15   :  { %1559 = vmatpush.bf16.msra.mxu3 %v3007_v19  ;;  %v3004_v31 = vld [vmem:[%s4685_s1 + $0xc0] sm:$0xff]  ;;  %v2216_v35 = vld [vmem:[%s4684_s0 + $0x10] sm:$0xf0]  ;;  %v2222_v36 = vld [vmem:[%s4684_s0 + $0x8] sm:$0xf] }
  0x16   :  { %1053 = vmatpush.bf16.msra.mxu0 %v2982_v20  ;;  %v2214_v32 = vld [vmem:[%s4684_s0] sm:$0xf]  ;;  %v2852_v34 = vld [vmem:[%s4684_s0 + $0x4] sm:$0xf]  ;;  %v2855_v37 = vld [vmem:[%s4684_s0 + $0x14] sm:$0xf0] }
  0x17   :  { %1222 = vmatpush.bf16.msra.mxu1 %v2990_v21  ;;  %v2853_v38 = vld [vmem:[%s4684_s0 + $0xc] sm:$0xf]  ;;  %v2224_v39 = vld [vmem:[%s4684_s0 + $0x18] sm:$0xf0]  ;;  %v2215_v40 = vor.u32 %v2854_v33, %v2214_v32  ;;  %v2219_v41 = vor.u32 %v2852_v34, %v2216_v35  ;;  %v2223_v42 = vor.u32 %v2855_v37, %v2222_v36  ;;  %v2230_v44 = vld [vmem:[%s4684_s0 + $0x20] sm:$0xf] }
  0x18   :  { %1391 = vmatpush.bf16.msra.mxu2 %v2998_v22  ;;  %v2227_v43 = vor.u32 %v2853_v38, %v2224_v39  ;;  %v2858_v45 = vld [vmem:[%s4684_s0 + $0x2c] sm:$0xf0]  ;;  %v2856_v46 = vld [vmem:[%s4684_s0 + $0x24] sm:$0xf]  ;;  %v2232_v47 = vld [vmem:[%s4684_s0 + $0x30] sm:$0xf0] }
  0x19   :  { %1560 = vmatpush.bf16.msra.mxu3 %v3006_v23  ;;  %v2238_v48 = vld [vmem:[%s4684_s0 + $0x28] sm:$0xf]  ;;  %v2859_v49 = vld [vmem:[%s4684_s0 + $0x34] sm:$0xf0]  ;;  %v2857_v50 = vld [vmem:[%s4684_s0 + $0x2c] sm:$0xf]  ;;  %v2231_v52 = vor.u32 %v2858_v45, %v2230_v44  ;;  %v2235_v53 = vor.u32 %v2856_v46, %v2232_v47 }
  0x1a   :  { %1054 = vmatpush.bf16.msra.mxu0 %v2981_v24  ;;  %v2240_v51 = vld [vmem:[%s4684_s0 + $0x38] sm:$0xf0]  ;;  %v2239_v54 = vor.u32 %v2859_v49, %v2238_v48  ;;  %v2246_v56 = vld [vmem:[%s4684_s0 + $0x40] sm:$0xf]  ;;  %v2862_v57 = vld [vmem:[%s4684_s0 + $0x4c] sm:$0xf0] }
  0x1b   :  { %1223 = vmatpush.bf16.msra.mxu1 %v2989_v25  ;;  %v2243_v55 = vor.u32 %v2857_v50, %v2240_v51  ;;  %v2860_v58 = vld [vmem:[%s4684_s0 + $0x44] sm:$0xf]  ;;  %v2248_v59 = vld [vmem:[%s4684_s0 + $0x50] sm:$0xf0]  ;;  %v2254_v60 = vld [vmem:[%s4684_s0 + $0x48] sm:$0xf]  ;;  %v2247_v0 = vor.u32 %v2862_v57, %v2246_v56 }
  0x1c   :  { %1392 = vmatpush.bf16.msra.mxu2 %v2997_v26  ;;  %v2863_v61 = vld [vmem:[%s4684_s0 + $0x54] sm:$0xf0]  ;;  %v2861_v62 = vld [vmem:[%s4684_s0 + $0x4c] sm:$0xf]  ;;  %v2256_v63 = vld [vmem:[%s4684_s0 + $0x58] sm:$0xf0]  ;;  %v2251_v1 = vor.u32 %v2860_v58, %v2248_v59 }
  0x1d   :  { %1561 = vmatpush.bf16.msra.mxu3 %v3005_v27  ;;  %v2255_v2 = vor.u32 %v2863_v61, %v2254_v60  ;;  %v2259_v3 = vor.u32 %v2861_v62, %v2256_v63  ;;  %v2262_v4 = vld [vmem:[%s4684_s0 + $0x60] sm:$0xf]  ;;  %v2866_v5 = vld [vmem:[%s4684_s0 + $0x6c] sm:$0xf0]  ;;  %v2864_v6 = vld [vmem:[%s4684_s0 + $0x64] sm:$0xf] }
  0x1e   :  { %1055 = vmatpush.bf16.msra.mxu0 %v2980_v28  ;;  %v2264_v7 = vld [vmem:[%s4684_s0 + $0x70] sm:$0xf0]  ;;  %v2270_v8 = vld [vmem:[%s4684_s0 + $0x68] sm:$0xf]  ;;  %v2867_v9 = vld [vmem:[%s4684_s0 + $0x74] sm:$0xf0]  ;;  %v2263_v12 = vor.u32 %v2866_v5, %v2262_v4 }
  0x1f   :  { %1224 = vmatpush.bf16.msra.mxu1 %v2988_v29  ;;  %v2865_v10 = vld [vmem:[%s4684_s0 + $0x6c] sm:$0xf]  ;;  %v2272_v11 = vld [vmem:[%s4684_s0 + $0x78] sm:$0xf0]  ;;  %v2267_v13 = vor.u32 %v2864_v6, %v2264_v7  ;;  %v2271_v14 = vor.u32 %v2867_v9, %v2270_v8  ;;  %v2278_v16 = vld [vmem:[%s4684_s0 + $0x80] sm:$0xf] }
  0x20   :  { %1393 = vmatpush.bf16.msra.mxu2 %v2996_v30  ;;  %v2275_v15 = vor.u32 %v2865_v10, %v2272_v11  ;;  %v2870_v17 = vld [vmem:[%s4684_s0 + $0x8c] sm:$0xf0]  ;;  %v2868_v18 = vld [vmem:[%s4684_s0 + $0x84] sm:$0xf]  ;;  %v2280_v19 = vld [vmem:[%s4684_s0 + $0x90] sm:$0xf0] }
  0x21   :  { %1562 = vmatpush.bf16.msra.mxu3 %v3004_v31  ;;  %1056 = vmatmul.bf16.vlgmr.msra.gmra.mxu0 %v2215_v40  ;;  %v2286_v20 = vld [vmem:[%s4684_s0 + $0x88] sm:$0xf]  ;;  %v2871_v21 = vld [vmem:[%s4684_s0 + $0x94] sm:$0xf0]  ;;  %v2869_v22 = vld [vmem:[%s4684_s0 + $0x8c] sm:$0xf]  ;;  %v2279_v24 = vor.u32 %v2870_v17, %v2278_v16  ;;  %v2283_v25 = vor.u32 %v2868_v18, %v2280_v19 }
  0x22   :  { %1225 = vmatmul.bf16.vlgmr.msra.gmra.mxu1 %v2219_v41  ;;  %v2288_v23 = vld [vmem:[%s4684_s0 + $0x98] sm:$0xf0]  ;;  %v2287_v26 = vor.u32 %v2871_v21, %v2286_v20  ;;  %v2294_v28 = vld [vmem:[%s4684_s0 + $0xa0] sm:$0xf]  ;;  %v2874_v29 = vld [vmem:[%s4684_s0 + $0xac] sm:$0xf0] }
  0x23   :  { %1394 = vmatmul.bf16.vlgmr.msra.gmra.mxu2 %v2223_v42  ;;  %v2291_v27 = vor.u32 %v2869_v22, %v2288_v23  ;;  %v2872_v30 = vld [vmem:[%s4684_s0 + $0xa4] sm:$0xf]  ;;  %v2296_v31 = vld [vmem:[%s4684_s0 + $0xb0] sm:$0xf0]  ;;  %v2302_v32 = vld [vmem:[%s4684_s0 + $0xa8] sm:$0xf]  ;;  %v2295_v36 = vor.u32 %v2874_v29, %v2294_v28 }
  0x24   :  { %1563 = vmatmul.bf16.vlgmr.msra.gmra.mxu3 %v2227_v43  ;;  %v2875_v33 = vld [vmem:[%s4684_s0 + $0xb4] sm:$0xf0]  ;;  %v2873_v34 = vld [vmem:[%s4684_s0 + $0xac] sm:$0xf]  ;;  %v2304_v35 = vld [vmem:[%s4684_s0 + $0xb8] sm:$0xf0]  ;;  %v2299_v37 = vor.u32 %v2872_v30, %v2296_v31 }
  0x25   :  { %v2303_v38 = vor.u32 %v2875_v33, %v2302_v32  ;;  %v2307_v39 = vor.u32 %v2873_v34, %v2304_v35  ;;  %v2310_v40 = vld [vmem:[%s4684_s0 + $0xc0] sm:$0xf]  ;;  %v2878_v41 = vld [vmem:[%s4684_s0 + $0xcc] sm:$0xf0]  ;;  %v2876_v42 = vld [vmem:[%s4684_s0 + $0xc4] sm:$0xf] }
  0x26   :  { %v2312_v43 = vld [vmem:[%s4684_s0 + $0xd0] sm:$0xf0]  ;;  %v2318_v44 = vld [vmem:[%s4684_s0 + $0xc8] sm:$0xf]  ;;  %v2879_v45 = vld [vmem:[%s4684_s0 + $0xd4] sm:$0xf0]  ;;  %v2311_v48 = vor.u32 %v2878_v41, %v2310_v40 }
  0x27   :  { %v2877_v46 = vld [vmem:[%s4684_s0 + $0xcc] sm:$0xf]  ;;  %v2320_v47 = vld [vmem:[%s4684_s0 + $0xd8] sm:$0xf0]  ;;  %v2315_v49 = vor.u32 %v2876_v42, %v2312_v43  ;;  %v2319_v50 = vor.u32 %v2879_v45, %v2318_v44  ;;  %v2334_v56 = vld [vmem:[%s4684_s0 + $0xe8] sm:$0xf] }
  0x28   :  { %v2323_v51 = vor.u32 %v2877_v46, %v2320_v47  ;;  %v2883_v57 = vld [vmem:[%s4684_s0 + $0xf4] sm:$0xf0]  ;;  %v2881_v58 = vld [vmem:[%s4684_s0 + $0xec] sm:$0xf]  ;;  %v2336_v59 = vld [vmem:[%s4684_s0 + $0xf8] sm:$0xf0] }
  0x29   :  { %v2335_v62 = vor.u32 %v2883_v57, %v2334_v56  ;;  %v2339_v63 = vor.u32 %v2881_v58, %v2336_v59  ;;  %v2344_v4 = vld [vmem:[%s4684_s0 + $0x110] sm:$0xf0]  ;;  %v2350_v5 = vld [vmem:[%s4684_s0 + $0x108] sm:$0xf]  ;;  %v2887_v6 = vld [vmem:[%s4684_s0 + $0x114] sm:$0xf0] }
  0x2a   :  { %v2885_v7 = vld [vmem:[%s4684_s0 + $0x10c] sm:$0xf]  ;;  %v2352_v8 = vld [vmem:[%s4684_s0 + $0x118] sm:$0xf0]  ;;  %v2366_v28 = vld [vmem:[%s4684_s0 + $0x128] sm:$0xf] }
  0x2b   :  { %v2891_v29 = vld [vmem:[%s4684_s0 + $0x134] sm:$0xf0]  ;;  %v2889_v30 = vld [vmem:[%s4684_s0 + $0x12c] sm:$0xf]  ;;  %v2368_v31 = vld [vmem:[%s4684_s0 + $0x138] sm:$0xf0] }
  0x2c   :  { %v2367_v40 = vor.u32 %v2891_v29, %v2366_v28  ;;  %v2371_v41 = vor.u32 %v2889_v30, %v2368_v31  ;;  %v1853_v45 = vld [vmem:[%s4687_s3] sm:$0xff]  ;;  %v2894_v58 = vld [vmem:[%s4684_s0 + $0x14c] sm:$0xf0]  ;;  %v1856_v29 = vld [vmem:[%s4687_s3 + $0x18] sm:$0xff] }
  0x2d   :  { %v2374_v57 = vld [vmem:[%s4684_s0 + $0x140] sm:$0xf] }
  0x31   :  { %1061 = vmatmul.bf16.gmra.mxu0 %v2231_v52  ;;  %v2326_v52 = vld [vmem:[%s4684_s0 + $0xe0] sm:$0xf] }
  0x32   :  { %1230 = vmatmul.bf16.gmra.mxu1 %v2235_v53  ;;  %v2882_v53 = vld [vmem:[%s4684_s0 + $0xec] sm:$0xf0] }
  0x33   :  { %1399 = vmatmul.bf16.gmra.mxu2 %v2239_v54  ;;  %v2880_v54 = vld [vmem:[%s4684_s0 + $0xe4] sm:$0xf]  ;;  %v2327_v60 = vor.u32 %v2882_v53, %v2326_v52 }
  0x34   :  { %1568 = vmatmul.bf16.gmra.mxu3 %v2243_v55  ;;  %v2328_v55 = vld [vmem:[%s4684_s0 + $0xf0] sm:$0xf0] }
  0x35   :  { %v2331_v61 = vor.u32 %v2880_v54, %v2328_v55 }
  0x41   :  { %1066 = vmatmul.bf16.gmra.mxu0 %v2247_v0  ;;  %v3498_v0 = vld [vmem:[%s4686_s2] ss:$0 sm:$0xff] }
  0x42   :  { %1235 = vmatmul.bf16.gmra.mxu1 %v2251_v1  ;;  %v2342_v1 = vld [vmem:[%s4684_s0 + $0x100] sm:$0xf] }
  0x43   :  { %1404 = vmatmul.bf16.gmra.mxu2 %v2255_v2  ;;  %v2886_v2 = vld [vmem:[%s4684_s0 + $0x10c] sm:$0xf0] }
  0x44   :  { %1573 = vmatmul.bf16.gmra.mxu3 %v2259_v3  ;;  %v2884_v3 = vld [vmem:[%s4684_s0 + $0x104] sm:$0xf]  ;;  %v2343_v9 = vor.u32 %v2886_v2, %v2342_v1  ;;  %v2895_v1 = vld [vmem:[%s4684_s0 + $0x154] sm:$0xf0] }
  0x45   :  { %v2347_v10 = vor.u32 %v2884_v3, %v2344_v4  ;;  %v2893_v3 = vld [vmem:[%s4684_s0 + $0x14c] sm:$0xf]  ;;  %v2384_v4 = vld [vmem:[%s4684_s0 + $0x158] sm:$0xf0] }
  0x51   :  { %1071 = vmatmul.bf16.gmra.mxu0 %v2263_v12 }
  0x52   :  { %1240 = vmatmul.bf16.gmra.mxu1 %v2267_v13  ;;  %v2351_v13 = vor.u32 %v2887_v6, %v2350_v5 }
  0x53   :  { %1409 = vmatmul.bf16.gmra.mxu2 %v2271_v14  ;;  %v2355_v14 = vor.u32 %v2885_v7, %v2352_v8 }
  0x54   :  { %1578 = vmatmul.bf16.gmra.mxu3 %v2275_v15 }
  0x61   :  { %1076 = vmatmul.bf16.gmra.mxu0 %v2279_v24  ;;  %v2358_v24 = vld [vmem:[%s4684_s0 + $0x120] sm:$0xf] }
  0x62   :  { %1245 = vmatmul.bf16.gmra.mxu1 %v2283_v25  ;;  %v2890_v25 = vld [vmem:[%s4684_s0 + $0x12c] sm:$0xf0] }
  0x63   :  { %1414 = vmatmul.bf16.gmra.mxu2 %v2287_v26  ;;  %v2888_v26 = vld [vmem:[%s4684_s0 + $0x124] sm:$0xf]  ;;  %v2359_v35 = vor.u32 %v2890_v25, %v2358_v24 }
  0x64   :  { %1583 = vmatmul.bf16.gmra.mxu3 %v2291_v27  ;;  %v2360_v27 = vld [vmem:[%s4684_s0 + $0x130] sm:$0xf0] }
  0x71   :  { %1081 = vmatmul.bf16.gmra.mxu0 %v2295_v36  ;;  %v2363_v36 = vor.u32 %v2888_v26, %v2360_v27 }
  0x72   :  { %1250 = vmatmul.bf16.gmra.mxu1 %v2299_v37 }
  0x73   :  { %1419 = vmatmul.bf16.gmra.mxu2 %v2303_v38 }
  0x74   :  { %1588 = vmatmul.bf16.gmra.mxu3 %v2307_v39 }
  0x81   :  { %1086 = vmatmul.bf16.gmra.mxu0 %v2311_v48 }
  0x82   :  { %1255 = vmatmul.bf16.gmra.mxu1 %v2315_v49 }
  0x83   :  { %1424 = vmatmul.bf16.gmra.mxu2 %v2319_v50  ;;  %v1854_v50 = vld [vmem:[%s4687_s3 + $0x8] sm:$0xff] }
  0x84   :  { %1593 = vmatmul.bf16.gmra.mxu3 %v2323_v51 }
  0x91   :  { %1091 = vmatmul.bf16.gmra.mxu0 %v2327_v60 }
  0x92   :  { %1260 = vmatmul.bf16.gmra.mxu1 %v2331_v61  ;;  %v2892_v61 = vld [vmem:[%s4684_s0 + $0x144] sm:$0xf] }
  0x93   :  { %1429 = vmatmul.bf16.gmra.mxu2 %v2335_v62  ;;  %v2376_v62 = vld [vmem:[%s4684_s0 + $0x150] sm:$0xf0] }
  0x94   :  { %1598 = vmatmul.bf16.gmra.mxu3 %v2339_v63  ;;  %v2382_v63 = vld [vmem:[%s4684_s0 + $0x148] sm:$0xf] }
  0x9e   :  { %v1057_v11 = vpop.f32.mrf.mxu0 }
  0x9f   :  { %v1226_v12 = vpop.f32.mrf.mxu1  ;;  %v1058_v15 = vadd.f32 %v3498_v0, %v1057_v11  ;;  %v2379_v11 = vor.u32 %v2892_v61, %v2376_v62 }
  0xa1   :  { %1096 = vmatmul.bf16.gmra.mxu0 %v2343_v9  ;;  %v1227_v16 = vadd.f32 %v1226_v12, %v1058_v15 }
  0xa2   :  { %1265 = vmatmul.bf16.gmra.mxu1 %v2347_v10  ;;  %v2375_v10 = vor.u32 %v2894_v58, %v2374_v57 }
  0xa3   :  { %1434 = vmatmul.bf16.gmra.mxu2 %v2351_v13  ;;  %v1855_v13 = vld [vmem:[%s4687_s3 + $0x10] sm:$0xff] }
  0xa4   :  { %1603 = vmatmul.bf16.gmra.mxu3 %v2355_v14 }
  0xa6   :  { %v1395_v17 = vpop.f32.mrf.mxu2  ;;  %v1059_v20 = vpop.f32.mrf.mxu0 }
  0xa7   :  { %v1564_v18 = vpop.f32.mrf.mxu3  ;;  %v1396_v19 = vadd.f32 %v1395_v17, %v1227_v16  ;;  %v1228_v21 = vpop.f32.mrf.mxu1  ;;  %v1060_v23 = vadd.f32 %v3498_v0, %v1059_v20  ;;  %v2383_v17 = vor.u32 %v2895_v1, %v2382_v63 }
  0xa9   :  { %v1565_v22 = vadd.f32 %v1564_v18, %v1396_v19  ;;  %v1229_v32 = vadd.f32 %v1228_v21, %v1060_v23  ;;  %v2387_v18 = vor.u32 %v2893_v3, %v2384_v4 }
  0xab   :  { %3017 = vtanh.f32 %v1565_v22 }
  0xae   :  { %v1397_v33 = vpop.f32.mrf.mxu2  ;;  %v1062_v38 = vpop.f32.mrf.mxu0 }
  0xaf   :  { %v1566_v34 = vpop.f32.mrf.mxu3  ;;  %v1398_v37 = vadd.f32 %v1397_v33, %v1229_v32  ;;  %v1231_v39 = vpop.f32.mrf.mxu1  ;;  %v1063_v42 = vadd.f32 %v3498_v0, %v1062_v38  ;;  %v2898_v38 = vld [vmem:[%s4684_s0 + $0x16c] sm:$0xf0] }
  0xb1   :  { %v3018_v43 = vpop.eup %3017  ;;  %v1567_v44 = vadd.f32 %v1566_v34, %v1398_v37  ;;  %1101 = vmatmul.bf16.gmra.mxu0 %v2359_v35  ;;  %v1232_v46 = vadd.f32 %v1231_v39, %v1063_v42  ;;  %v2896_v39 = vld [vmem:[%s4684_s0 + $0x164] sm:$0xf]  ;;  %v2899_v42 = vld [vmem:[%s4684_s0 + $0x174] sm:$0xf0] }
  0xb2   :  { %1789 = vst.msk [vmem:[%s4688_s4] sm:$0xff] %vm1788_vm0, %v3018_v43  ;;  %1270 = vmatmul.bf16.gmra.mxu1 %v2363_v36  ;;  %v1917_v47 = vsub.f32 %v3018_v43, %v1853_v45  ;;  %v2390_v36 = vld [vmem:[%s4684_s0 + $0x160] sm:$0xf]  ;;  %v2400_v45 = vld [vmem:[%s4684_s0 + $0x178] sm:$0xf0] }
  0xb3   :  { %3019 = vtanh.f32 %v1567_v44  ;;  %1439 = vmatmul.bf16.gmra.mxu2 %v2367_v40  ;;  %v2392_v40 = vld [vmem:[%s4684_s0 + $0x170] sm:$0xf0]  ;;  %v2897_v44 = vld [vmem:[%s4684_s0 + $0x16c] sm:$0xf] }
  0xb4   :  { %1608 = vmatmul.bf16.gmra.mxu3 %v2371_v41  ;;  %v1981_v59 = vand.u32 2147483647, %v1917_v47  ;;  %v2398_v41 = vld [vmem:[%s4684_s0 + $0x168] sm:$0xf]  ;;  %v2403_v58 = vor.u32 %v2897_v44, %v2400_v45 }
  0xb5   :  { %v2399_v57 = vor.u32 %v2899_v42, %v2398_v41 }
  0xb6   :  { %v1400_v48 = vpop.f32.mrf.mxu2  ;;  %v1064_v52 = vpop.f32.mrf.mxu0  ;;  %v2045_v6 = vsel %vm1788_vm0, %v1981_v59, 0.0 }
  0xb7   :  { %v1569_v49 = vpop.f32.mrf.mxu3  ;;  %v1401_v51 = vadd.f32 %v1400_v48, %v1232_v46  ;;  %v1233_v53 = vpop.f32.mrf.mxu1  ;;  %v1065_v56 = vadd.f32 %v3498_v0, %v1064_v52 }
  0xb9   :  { %v3020_v54 = vpop.eup %3019  ;;  %v1570_v55 = vadd.f32 %v1569_v49, %v1401_v51  ;;  %v1234_v5 = vadd.f32 %v1233_v53, %v1065_v56  ;;  %v2395_v51 = vor.u32 %v2896_v39, %v2392_v40  ;;  %v1857_v53 = vld [vmem:[%s4687_s3 + $0x20] sm:$0xff] }
  0xba   :  { %1790 = vst.msk [vmem:[%s4688_s4 + $0x8] sm:$0xff] %vm1788_vm0, %v3020_v54  ;;  %v1918_v60 = vsub.f32 %v3020_v54, %v1854_v50  ;;  %v2391_v50 = vor.u32 %v2898_v38, %v2390_v36 }
  0xbb   :  { %3021 = vtanh.f32 %v1570_v55 }
  0xbc   :  { %v1982_v2 = vand.u32 2147483647, %v1918_v60 }
  0xbe   :  { %v2046_v7 = vsel %vm1788_vm0, %v1982_v2, 0.0  ;;  %v1402_v8 = vpop.f32.mrf.mxu2  ;;  %v1067_v15 = vpop.f32.mrf.mxu0 }
  0xbf   :  { %v1571_v9 = vpop.f32.mrf.mxu3  ;;  %v2047_v12 = vadd.f32 %v2046_v7, %v2045_v6  ;;  %v1403_v14 = vadd.f32 %v1402_v8, %v1234_v5  ;;  %v1236_v16 = vpop.f32.mrf.mxu1  ;;  %v1068_v19 = vadd.f32 %v3498_v0, %v1067_v15  ;;  %v1858_v6 = vld [vmem:[%s4687_s3 + $0x28] sm:$0xff]  ;;  %v2902_v15 = vld [vmem:[%s4684_s0 + $0x18c] sm:$0xf0] }
  0xc1   :  { %v3022_v20 = vpop.eup %3021  ;;  %v1572_v21 = vadd.f32 %v1571_v9, %v1403_v14  ;;  %1106 = vmatmul.bf16.gmra.mxu0 %v2375_v10  ;;  %v1237_v23 = vadd.f32 %v1236_v16, %v1068_v19  ;;  %v2900_v16 = vld [vmem:[%s4684_s0 + $0x184] sm:$0xf]  ;;  %v2903_v19 = vld [vmem:[%s4684_s0 + $0x194] sm:$0xf0] }
  0xc2   :  { %1791 = vst.msk [vmem:[%s4688_s4 + $0x10] sm:$0xff] %vm1788_vm0, %v3022_v20  ;;  %v1919_v22 = vsub.f32 %v3022_v20, %v1855_v13  ;;  %1275 = vmatmul.bf16.gmra.mxu1 %v2379_v11  ;;  %v2406_v13 = vld [vmem:[%s4684_s0 + $0x180] sm:$0xf] }
  0xc3   :  { %3023 = vtanh.f32 %v1572_v21  ;;  %1444 = vmatmul.bf16.gmra.mxu2 %v2383_v17  ;;  %v2408_v17 = vld [vmem:[%s4684_s0 + $0x190] sm:$0xf0]  ;;  %v2901_v21 = vld [vmem:[%s4684_s0 + $0x18c] sm:$0xf] }
  0xc4   :  { %1613 = vmatmul.bf16.gmra.mxu3 %v2387_v18  ;;  %v1983_v24 = vand.u32 2147483647, %v1919_v22  ;;  %v2414_v18 = vld [vmem:[%s4684_s0 + $0x188] sm:$0xf]  ;;  %v2416_v22 = vld [vmem:[%s4684_s0 + $0x198] sm:$0xf0] }
  0xc6   :  { %v2048_v25 = vsel %vm1788_vm0, %v1983_v24, 0.0  ;;  %v1405_v26 = vpop.f32.mrf.mxu2  ;;  %v1069_v31 = vpop.f32.mrf.mxu0 }
  0xc7   :  { %v1574_v27 = vpop.f32.mrf.mxu3  ;;  %v2049_v28 = vadd.f32 %v2048_v25, %v2047_v12  ;;  %v1406_v30 = vadd.f32 %v1405_v26, %v1237_v23  ;;  %v1238_v32 = vpop.f32.mrf.mxu1  ;;  %v1070_v35 = vadd.f32 %v3498_v0, %v1069_v31 }
  0xc9   :  { %v3024_v33 = vpop.eup %3023  ;;  %v1575_v34 = vadd.f32 %v1574_v27, %v1406_v30  ;;  %v1239_v46 = vadd.f32 %v1238_v32, %v1070_v35  ;;  %v2407_v27 = vor.u32 %v2902_v15, %v2406_v13  ;;  %v1859_v30 = vld [vmem:[%s4687_s3 + $0x30] sm:$0xff]  ;;  %v2419_v35 = vor.u32 %v2901_v21, %v2416_v22 }
  0xca   :  { %1792 = vst.msk [vmem:[%s4688_s4 + $0x18] sm:$0xff] %vm1788_vm0, %v3024_v33  ;;  %v1920_v37 = vsub.f32 %v3024_v33, %v1856_v29 }
  0xcb   :  { %3025 = vtanh.f32 %v1575_v34  ;;  %v2415_v34 = vor.u32 %v2903_v19, %v2414_v18 }
  0xcc   :  { %v1984_v43 = vand.u32 2147483647, %v1920_v37 }
  0xce   :  { %v2050_v47 = vsel %vm1788_vm0, %v1984_v43, 0.0  ;;  %v1407_v48 = vpop.f32.mrf.mxu2  ;;  %v1072_v55 = vpop.f32.mrf.mxu0 }
  0xcf   :  { %v1576_v49 = vpop.f32.mrf.mxu3  ;;  %v2051_v52 = vadd.f32 %v2050_v47, %v2049_v28  ;;  %v1408_v54 = vadd.f32 %v1407_v48, %v1239_v46  ;;  %v1241_v56 = vpop.f32.mrf.mxu1  ;;  %v1073_v59 = vadd.f32 %v3498_v0, %v1072_v55  ;;  %v2411_v28 = vor.u32 %v2900_v16, %v2408_v17  ;;  %v1860_v46 = vld [vmem:[%s4687_s3 + $0x38] sm:$0xff]  ;;  %v2906_v55 = vld [vmem:[%s4684_s0 + $0x1ac] sm:$0xf0] }
  0xd1   :  { %v3026_v60 = vpop.eup %3025  ;;  %v1577_v61 = vadd.f32 %v1576_v49, %v1408_v54  ;;  %1111 = vmatmul.bf16.gmra.mxu0 %v2391_v50  ;;  %v1242_v63 = vadd.f32 %v1241_v56, %v1073_v59  ;;  %v2904_v56 = vld [vmem:[%s4684_s0 + $0x1a4] sm:$0xf]  ;;  %v2907_v59 = vld [vmem:[%s4684_s0 + $0x1b4] sm:$0xf0] }
  0xd2   :  { %1793 = vst.msk [vmem:[%s4688_s4 + $0x20] sm:$0xff] %vm1788_vm0, %v3026_v60  ;;  %v1921_v62 = vsub.f32 %v3026_v60, %v1857_v53  ;;  %1280 = vmatmul.bf16.gmra.mxu1 %v2395_v51  ;;  %v2422_v53 = vld [vmem:[%s4684_s0 + $0x1a0] sm:$0xf] }
  0xd3   :  { %3027 = vtanh.f32 %v1577_v61  ;;  %1449 = vmatmul.bf16.gmra.mxu2 %v2399_v57  ;;  %v2424_v57 = vld [vmem:[%s4684_s0 + $0x1b0] sm:$0xf0]  ;;  %v2905_v61 = vld [vmem:[%s4684_s0 + $0x1ac] sm:$0xf] }
  0xd4   :  { %1618 = vmatmul.bf16.gmra.mxu3 %v2403_v58  ;;  %v1985_v1 = vand.u32 2147483647, %v1921_v62  ;;  %v2430_v58 = vld [vmem:[%s4684_s0 + $0x1a8] sm:$0xf]  ;;  %v2432_v62 = vld [vmem:[%s4684_s0 + $0x1b8] sm:$0xf0] }
  0xd6   :  { %v2052_v2 = vsel %vm1788_vm0, %v1985_v1, 0.0  ;;  %v1410_v3 = vpop.f32.mrf.mxu2  ;;  %v1074_v8 = vpop.f32.mrf.mxu0 }
  0xd7   :  { %v1579_v4 = vpop.f32.mrf.mxu3  ;;  %v2053_v5 = vadd.f32 %v2052_v2, %v2051_v52  ;;  %v1411_v7 = vadd.f32 %v1410_v3, %v1242_v63  ;;  %v1243_v9 = vpop.f32.mrf.mxu1  ;;  %v1075_v12 = vadd.f32 %v3498_v0, %v1074_v8 }
  0xd9   :  { %v3028_v10 = vpop.eup %3027  ;;  %v1580_v11 = vadd.f32 %v1579_v4, %v1411_v7  ;;  %v1244_v23 = vadd.f32 %v1243_v9, %v1075_v12  ;;  %v2423_v4 = vor.u32 %v2906_v55, %v2422_v53  ;;  %v1861_v7 = vld [vmem:[%s4687_s3 + $0x40] sm:$0xff]  ;;  %v2435_v12 = vor.u32 %v2905_v61, %v2432_v62 }
  0xda   :  { %1794 = vst.msk [vmem:[%s4688_s4 + $0x28] sm:$0xff] %vm1788_vm0, %v3028_v10  ;;  %v1922_v14 = vsub.f32 %v3028_v10, %v1858_v6 }
  0xdb   :  { %3029 = vtanh.f32 %v1580_v11  ;;  %v2431_v11 = vor.u32 %v2907_v59, %v2430_v58 }
  0xdc   :  { %v1986_v20 = vand.u32 2147483647, %v1922_v14 }
  0xde   :  { %v2054_v24 = vsel %vm1788_vm0, %v1986_v20, 0.0  ;;  %v1412_v25 = vpop.f32.mrf.mxu2  ;;  %v1077_v32 = vpop.f32.mrf.mxu0 }
  0xdf   :  { %v1581_v26 = vpop.f32.mrf.mxu3  ;;  %v2055_v29 = vadd.f32 %v2054_v24, %v2053_v5  ;;  %v1413_v31 = vadd.f32 %v1412_v25, %v1244_v23  ;;  %v1246_v33 = vpop.f32.mrf.mxu1  ;;  %v1078_v36 = vadd.f32 %v3498_v0, %v1077_v32  ;;  %v2427_v5 = vor.u32 %v2904_v56, %v2424_v57  ;;  %v1862_v23 = vld [vmem:[%s4687_s3 + $0x48] sm:$0xff]  ;;  %v2910_v32 = vld [vmem:[%s4684_s0 + $0x1cc] sm:$0xf0] }
  0xe1   :  { %v3030_v37 = vpop.eup %3029  ;;  %v1582_v38 = vadd.f32 %v1581_v26, %v1413_v31  ;;  %1116 = vmatmul.bf16.gmra.mxu0 %v2407_v27  ;;  %v1247_v40 = vadd.f32 %v1246_v33, %v1078_v36  ;;  %v2908_v33 = vld [vmem:[%s4684_s0 + $0x1c4] sm:$0xf]  ;;  %v2911_v36 = vld [vmem:[%s4684_s0 + $0x1d4] sm:$0xf0] }
  0xe2   :  { %1795 = vst.msk [vmem:[%s4688_s4 + $0x30] sm:$0xff] %vm1788_vm0, %v3030_v37  ;;  %v1923_v39 = vsub.f32 %v3030_v37, %v1859_v30  ;;  %1285 = vmatmul.bf16.gmra.mxu1 %v2411_v28  ;;  %v2438_v30 = vld [vmem:[%s4684_s0 + $0x1c0] sm:$0xf] }
  0xe3   :  { %3031 = vtanh.f32 %v1582_v38  ;;  %1454 = vmatmul.bf16.gmra.mxu2 %v2415_v34  ;;  %v2440_v34 = vld [vmem:[%s4684_s0 + $0x1d0] sm:$0xf0]  ;;  %v2909_v38 = vld [vmem:[%s4684_s0 + $0x1cc] sm:$0xf] }
  0xe4   :  { %1623 = vmatmul.bf16.gmra.mxu3 %v2419_v35  ;;  %v1987_v41 = vand.u32 2147483647, %v1923_v39  ;;  %v2446_v35 = vld [vmem:[%s4684_s0 + $0x1c8] sm:$0xf]  ;;  %v2448_v39 = vld [vmem:[%s4684_s0 + $0x1d8] sm:$0xf0] }
  0xe6   :  { %v2056_v42 = vsel %vm1788_vm0, %v1987_v41, 0.0  ;;  %v1415_v43 = vpop.f32.mrf.mxu2  ;;  %v1079_v48 = vpop.f32.mrf.mxu0 }
  0xe7   :  { %v1584_v44 = vpop.f32.mrf.mxu3  ;;  %v2057_v45 = vadd.f32 %v2056_v42, %v2055_v29  ;;  %v1416_v47 = vadd.f32 %v1415_v43, %v1247_v40  ;;  %v1248_v49 = vpop.f32.mrf.mxu1  ;;  %v1080_v52 = vadd.f32 %v3498_v0, %v1079_v48 }
  0xe9   :  { %v3032_v50 = vpop.eup %3031  ;;  %v1585_v51 = vadd.f32 %v1584_v44, %v1416_v47  ;;  %v1249_v63 = vadd.f32 %v1248_v49, %v1080_v52  ;;  %v2439_v44 = vor.u32 %v2910_v32, %v2438_v30  ;;  %v1863_v47 = vld [vmem:[%s4687_s3 + $0x50] sm:$0xff]  ;;  %v2451_v52 = vor.u32 %v2909_v38, %v2448_v39 }
  0xea   :  { %1796 = vst.msk [vmem:[%s4688_s4 + $0x38] sm:$0xff] %vm1788_vm0, %v3032_v50  ;;  %v1924_v54 = vsub.f32 %v3032_v50, %v1860_v46 }
  0xeb   :  { %3033 = vtanh.f32 %v1585_v51  ;;  %v2447_v51 = vor.u32 %v2911_v36, %v2446_v35 }
  0xec   :  { %v1988_v60 = vand.u32 2147483647, %v1924_v54 }
  0xee   :  { %v2058_v1 = vsel %vm1788_vm0, %v1988_v60, 0.0  ;;  %v1417_v2 = vpop.f32.mrf.mxu2  ;;  %v1082_v9 = vpop.f32.mrf.mxu0 }
  0xef   :  { %v1586_v3 = vpop.f32.mrf.mxu3  ;;  %v2059_v6 = vadd.f32 %v2058_v1, %v2057_v45  ;;  %v1418_v8 = vadd.f32 %v1417_v2, %v1249_v63  ;;  %v1251_v10 = vpop.f32.mrf.mxu1  ;;  %v1083_v13 = vadd.f32 %v3498_v0, %v1082_v9  ;;  %v2443_v45 = vor.u32 %v2908_v33, %v2440_v34  ;;  %v1864_v63 = vld [vmem:[%s4687_s3 + $0x58] sm:$0xff]  ;;  %v2914_v9 = vld [vmem:[%s4684_s0 + $0x1ec] sm:$0xf0] }
  0xf1   :  { %v3034_v14 = vpop.eup %3033  ;;  %v1587_v15 = vadd.f32 %v1586_v3, %v1418_v8  ;;  %1121 = vmatmul.bf16.gmra.mxu0 %v2423_v4  ;;  %v1252_v17 = vadd.f32 %v1251_v10, %v1083_v13  ;;  %v2912_v10 = vld [vmem:[%s4684_s0 + $0x1e4] sm:$0xf]  ;;  %v2915_v13 = vld [vmem:[%s4684_s0 + $0x1f4] sm:$0xf0] }
  0xf2   :  { %1797 = vst.msk [vmem:[%s4688_s4 + $0x40] sm:$0xff] %vm1788_vm0, %v3034_v14  ;;  %v1925_v16 = vsub.f32 %v3034_v14, %v1861_v7  ;;  %1290 = vmatmul.bf16.gmra.mxu1 %v2427_v5  ;;  %v2454_v7 = vld [vmem:[%s4684_s0 + $0x1e0] sm:$0xf] }
  0xf3   :  { %3035 = vtanh.f32 %v1587_v15  ;;  %1459 = vmatmul.bf16.gmra.mxu2 %v2431_v11  ;;  %v2456_v11 = vld [vmem:[%s4684_s0 + $0x1f0] sm:$0xf0]  ;;  %v2913_v15 = vld [vmem:[%s4684_s0 + $0x1ec] sm:$0xf] }
  0xf4   :  { %1628 = vmatmul.bf16.gmra.mxu3 %v2435_v12  ;;  %v1989_v18 = vand.u32 2147483647, %v1925_v16  ;;  %v2462_v12 = vld [vmem:[%s4684_s0 + $0x1e8] sm:$0xf]  ;;  %v2464_v16 = vld [vmem:[%s4684_s0 + $0x1f8] sm:$0xf0] }
  0xf6   :  { %v2060_v19 = vsel %vm1788_vm0, %v1989_v18, 0.0  ;;  %v1420_v20 = vpop.f32.mrf.mxu2  ;;  %v1084_v25 = vpop.f32.mrf.mxu0 }
  0xf7   :  { %v1589_v21 = vpop.f32.mrf.mxu3  ;;  %v2061_v22 = vadd.f32 %v2060_v19, %v2059_v6  ;;  %v1421_v24 = vadd.f32 %v1420_v20, %v1252_v17  ;;  %v1253_v26 = vpop.f32.mrf.mxu1  ;;  %v1085_v29 = vadd.f32 %v3498_v0, %v1084_v25 }
  0xf9   :  { %v3036_v27 = vpop.eup %3035  ;;  %v1590_v28 = vadd.f32 %v1589_v21, %v1421_v24  ;;  %v1254_v40 = vadd.f32 %v1253_v26, %v1085_v29  ;;  %v2455_v21 = vor.u32 %v2914_v9, %v2454_v7  ;;  %v1865_v24 = vld [vmem:[%s4687_s3 + $0x60] sm:$0xff]  ;;  %v2467_v29 = vor.u32 %v2913_v15, %v2464_v16 }
  0xfa   :  { %1798 = vst.msk [vmem:[%s4688_s4 + $0x48] sm:$0xff] %vm1788_vm0, %v3036_v27  ;;  %v1926_v31 = vsub.f32 %v3036_v27, %v1862_v23 }
  0xfb   :  { %3037 = vtanh.f32 %v1590_v28  ;;  %v2463_v28 = vor.u32 %v2915_v13, %v2462_v12 }
  0xfc   :  { %v1990_v37 = vand.u32 2147483647, %v1926_v31 }
  0xfe   :  { %v2062_v41 = vsel %vm1788_vm0, %v1990_v37, 0.0  ;;  %v1422_v42 = vpop.f32.mrf.mxu2  ;;  %v1087_v49 = vpop.f32.mrf.mxu0 }
  0xff   :  { %v1591_v43 = vpop.f32.mrf.mxu3  ;;  %v2063_v46 = vadd.f32 %v2062_v41, %v2061_v22  ;;  %v1423_v48 = vadd.f32 %v1422_v42, %v1254_v40  ;;  %v1256_v50 = vpop.f32.mrf.mxu1  ;;  %v1088_v53 = vadd.f32 %v3498_v0, %v1087_v49  ;;  %v2459_v22 = vor.u32 %v2912_v10, %v2456_v11  ;;  %v1866_v40 = vld [vmem:[%s4687_s3 + $0x68] sm:$0xff]  ;;  %v2918_v49 = vld [vmem:[%s4684_s0 + $0x20c] sm:$0xf0] }
 0x101   :  { %v3038_v54 = vpop.eup %3037  ;;  %v1592_v55 = vadd.f32 %v1591_v43, %v1423_v48  ;;  %1126 = vmatmul.bf16.gmra.mxu0 %v2439_v44  ;;  %v1257_v57 = vadd.f32 %v1256_v50, %v1088_v53  ;;  %v2916_v50 = vld [vmem:[%s4684_s0 + $0x204] sm:$0xf]  ;;  %v2919_v53 = vld [vmem:[%s4684_s0 + $0x214] sm:$0xf0] }
 0x102   :  { %1799 = vst.msk [vmem:[%s4688_s4 + $0x50] sm:$0xff] %vm1788_vm0, %v3038_v54  ;;  %v1927_v56 = vsub.f32 %v3038_v54, %v1863_v47  ;;  %1295 = vmatmul.bf16.gmra.mxu1 %v2443_v45  ;;  %v2470_v47 = vld [vmem:[%s4684_s0 + $0x200] sm:$0xf] }
 0x103   :  { %3039 = vtanh.f32 %v1592_v55  ;;  %1464 = vmatmul.bf16.gmra.mxu2 %v2447_v51  ;;  %v2472_v51 = vld [vmem:[%s4684_s0 + $0x210] sm:$0xf0]  ;;  %v2917_v55 = vld [vmem:[%s4684_s0 + $0x20c] sm:$0xf] }
 0x104   :  { %1633 = vmatmul.bf16.gmra.mxu3 %v2451_v52  ;;  %v1991_v58 = vand.u32 2147483647, %v1927_v56  ;;  %v2478_v52 = vld [vmem:[%s4684_s0 + $0x208] sm:$0xf]  ;;  %v2480_v56 = vld [vmem:[%s4684_s0 + $0x218] sm:$0xf0] }
 0x106   :  { %v2064_v59 = vsel %vm1788_vm0, %v1991_v58, 0.0  ;;  %v1425_v60 = vpop.f32.mrf.mxu2  ;;  %v1089_v2 = vpop.f32.mrf.mxu0 }
 0x107   :  { %v1594_v61 = vpop.f32.mrf.mxu3  ;;  %v2065_v62 = vadd.f32 %v2064_v59, %v2063_v46  ;;  %v1426_v1 = vadd.f32 %v1425_v60, %v1257_v57  ;;  %v1258_v3 = vpop.f32.mrf.mxu1  ;;  %v1090_v6 = vadd.f32 %v3498_v0, %v1089_v2 }
 0x109   :  { %v3040_v4 = vpop.eup %3039  ;;  %v1595_v5 = vadd.f32 %v1594_v61, %v1426_v1  ;;  %v1259_v17 = vadd.f32 %v1258_v3, %v1090_v6  ;;  %v2471_v61 = vor.u32 %v2918_v49, %v2470_v47  ;;  %v1867_v1 = vld [vmem:[%s4687_s3 + $0x70] sm:$0xff]  ;;  %v2483_v6 = vor.u32 %v2917_v55, %v2480_v56 }
 0x10a   :  { %1800 = vst.msk [vmem:[%s4688_s4 + $0x58] sm:$0xff] %vm1788_vm0, %v3040_v4  ;;  %v1928_v8 = vsub.f32 %v3040_v4, %v1864_v63 }
 0x10b   :  { %3041 = vtanh.f32 %v1595_v5  ;;  %v2479_v5 = vor.u32 %v2919_v53, %v2478_v52 }
 0x10c   :  { %v1992_v14 = vand.u32 2147483647, %v1928_v8 }
 0x10e   :  { %v2066_v18 = vsel %vm1788_vm0, %v1992_v14, 0.0  ;;  %v1427_v19 = vpop.f32.mrf.mxu2  ;;  %v1092_v26 = vpop.f32.mrf.mxu0 }
 0x10f   :  { %v1596_v20 = vpop.f32.mrf.mxu3  ;;  %v2067_v23 = vadd.f32 %v2066_v18, %v2065_v62  ;;  %v1428_v25 = vadd.f32 %v1427_v19, %v1259_v17  ;;  %v1261_v27 = vpop.f32.mrf.mxu1  ;;  %v1093_v30 = vadd.f32 %v3498_v0, %v1092_v26  ;;  %v2475_v62 = vor.u32 %v2916_v50, %v2472_v51  ;;  %v1868_v17 = vld [vmem:[%s4687_s3 + $0x78] sm:$0xff]  ;;  %v2922_v26 = vld [vmem:[%s4684_s0 + $0x22c] sm:$0xf0] }
 0x111   :  { %v3042_v31 = vpop.eup %3041  ;;  %v1597_v32 = vadd.f32 %v1596_v20, %v1428_v25  ;;  %1131 = vmatmul.bf16.gmra.mxu0 %v2455_v21  ;;  %v1262_v34 = vadd.f32 %v1261_v27, %v1093_v30  ;;  %v2920_v27 = vld [vmem:[%s4684_s0 + $0x224] sm:$0xf]  ;;  %v2923_v30 = vld [vmem:[%s4684_s0 + $0x234] sm:$0xf0] }
 0x112   :  { %1801 = vst.msk [vmem:[%s4688_s4 + $0x60] sm:$0xff] %vm1788_vm0, %v3042_v31  ;;  %v1929_v33 = vsub.f32 %v3042_v31, %v1865_v24  ;;  %1300 = vmatmul.bf16.gmra.mxu1 %v2459_v22  ;;  %v2486_v24 = vld [vmem:[%s4684_s0 + $0x220] sm:$0xf] }
 0x113   :  { %3043 = vtanh.f32 %v1597_v32  ;;  %1469 = vmatmul.bf16.gmra.mxu2 %v2463_v28  ;;  %v2488_v28 = vld [vmem:[%s4684_s0 + $0x230] sm:$0xf0]  ;;  %v2921_v32 = vld [vmem:[%s4684_s0 + $0x22c] sm:$0xf] }
 0x114   :  { %1638 = vmatmul.bf16.gmra.mxu3 %v2467_v29  ;;  %v1993_v35 = vand.u32 2147483647, %v1929_v33  ;;  %v2494_v29 = vld [vmem:[%s4684_s0 + $0x228] sm:$0xf]  ;;  %v2496_v33 = vld [vmem:[%s4684_s0 + $0x238] sm:$0xf0] }
 0x116   :  { %v2068_v36 = vsel %vm1788_vm0, %v1993_v35, 0.0  ;;  %v1430_v37 = vpop.f32.mrf.mxu2  ;;  %v1094_v42 = vpop.f32.mrf.mxu0 }
 0x117   :  { %v1599_v38 = vpop.f32.mrf.mxu3  ;;  %v2069_v39 = vadd.f32 %v2068_v36, %v2067_v23  ;;  %v1431_v41 = vadd.f32 %v1430_v37, %v1262_v34  ;;  %v1263_v43 = vpop.f32.mrf.mxu1  ;;  %v1095_v46 = vadd.f32 %v3498_v0, %v1094_v42 }
 0x119   :  { %v3044_v44 = vpop.eup %3043  ;;  %v1600_v45 = vadd.f32 %v1599_v38, %v1431_v41  ;;  %v1264_v57 = vadd.f32 %v1263_v43, %v1095_v46  ;;  %v2487_v38 = vor.u32 %v2922_v26, %v2486_v24  ;;  %v1869_v41 = vld [vmem:[%s4687_s3 + $0x80] sm:$0xff]  ;;  %v2499_v46 = vor.u32 %v2921_v32, %v2496_v33 }
 0x11a   :  { %1802 = vst.msk [vmem:[%s4688_s4 + $0x68] sm:$0xff] %vm1788_vm0, %v3044_v44  ;;  %v1930_v48 = vsub.f32 %v3044_v44, %v1866_v40 }
 0x11b   :  { %3045 = vtanh.f32 %v1600_v45  ;;  %v2495_v45 = vor.u32 %v2923_v30, %v2494_v29 }
 0x11c   :  { %v1994_v54 = vand.u32 2147483647, %v1930_v48 }
 0x11e   :  { %v2070_v58 = vsel %vm1788_vm0, %v1994_v54, 0.0  ;;  %v1432_v59 = vpop.f32.mrf.mxu2  ;;  %v1097_v3 = vpop.f32.mrf.mxu0 }
 0x11f   :  { %v1601_v60 = vpop.f32.mrf.mxu3  ;;  %v2071_v63 = vadd.f32 %v2070_v58, %v2069_v39  ;;  %v1433_v2 = vadd.f32 %v1432_v59, %v1264_v57  ;;  %v1266_v4 = vpop.f32.mrf.mxu1  ;;  %v1098_v7 = vadd.f32 %v3498_v0, %v1097_v3  ;;  %v2491_v39 = vor.u32 %v2920_v27, %v2488_v28  ;;  %v1870_v57 = vld [vmem:[%s4687_s3 + $0x88] sm:$0xff]  ;;  %v2926_v3 = vld [vmem:[%s4684_s0 + $0x24c] sm:$0xf0] }
 0x121   :  { %v3046_v8 = vpop.eup %3045  ;;  %v1602_v9 = vadd.f32 %v1601_v60, %v1433_v2  ;;  %1136 = vmatmul.bf16.gmra.mxu0 %v2471_v61  ;;  %v1267_v11 = vadd.f32 %v1266_v4, %v1098_v7  ;;  %v2924_v4 = vld [vmem:[%s4684_s0 + $0x244] sm:$0xf]  ;;  %v2927_v7 = vld [vmem:[%s4684_s0 + $0x254] sm:$0xf0] }
 0x122   :  { %1803 = vst.msk [vmem:[%s4688_s4 + $0x70] sm:$0xff] %vm1788_vm0, %v3046_v8  ;;  %v1931_v10 = vsub.f32 %v3046_v8, %v1867_v1  ;;  %1305 = vmatmul.bf16.gmra.mxu1 %v2475_v62  ;;  %v2502_v1 = vld [vmem:[%s4684_s0 + $0x240] sm:$0xf] }
 0x123   :  { %3047 = vtanh.f32 %v1602_v9  ;;  %1474 = vmatmul.bf16.gmra.mxu2 %v2479_v5  ;;  %v2504_v5 = vld [vmem:[%s4684_s0 + $0x250] sm:$0xf0]  ;;  %v2925_v9 = vld [vmem:[%s4684_s0 + $0x24c] sm:$0xf] }
 0x124   :  { %1643 = vmatmul.bf16.gmra.mxu3 %v2483_v6  ;;  %v1995_v12 = vand.u32 2147483647, %v1931_v10  ;;  %v2510_v6 = vld [vmem:[%s4684_s0 + $0x248] sm:$0xf]  ;;  %v2512_v10 = vld [vmem:[%s4684_s0 + $0x258] sm:$0xf0] }
 0x126   :  { %v2072_v13 = vsel %vm1788_vm0, %v1995_v12, 0.0  ;;  %v1435_v14 = vpop.f32.mrf.mxu2  ;;  %v1099_v19 = vpop.f32.mrf.mxu0 }
 0x127   :  { %v1604_v15 = vpop.f32.mrf.mxu3  ;;  %v2073_v16 = vadd.f32 %v2072_v13, %v2071_v63  ;;  %v1436_v18 = vadd.f32 %v1435_v14, %v1267_v11  ;;  %v1268_v20 = vpop.f32.mrf.mxu1  ;;  %v1100_v23 = vadd.f32 %v3498_v0, %v1099_v19 }
 0x129   :  { %v3048_v21 = vpop.eup %3047  ;;  %v1605_v22 = vadd.f32 %v1604_v15, %v1436_v18  ;;  %v1269_v34 = vadd.f32 %v1268_v20, %v1100_v23  ;;  %v2503_v15 = vor.u32 %v2926_v3, %v2502_v1  ;;  %v1871_v18 = vld [vmem:[%s4687_s3 + $0x90] sm:$0xff]  ;;  %v2515_v23 = vor.u32 %v2925_v9, %v2512_v10 }
 0x12a   :  { %1804 = vst.msk [vmem:[%s4688_s4 + $0x78] sm:$0xff] %vm1788_vm0, %v3048_v21  ;;  %v1932_v25 = vsub.f32 %v3048_v21, %v1868_v17 }
 0x12b   :  { %3049 = vtanh.f32 %v1605_v22  ;;  %v2511_v22 = vor.u32 %v2927_v7, %v2510_v6 }
 0x12c   :  { %v1996_v31 = vand.u32 2147483647, %v1932_v25 }
 0x12e   :  { %v2074_v35 = vsel %vm1788_vm0, %v1996_v31, 0.0  ;;  %v1437_v36 = vpop.f32.mrf.mxu2  ;;  %v1102_v43 = vpop.f32.mrf.mxu0 }
 0x12f   :  { %v1606_v37 = vpop.f32.mrf.mxu3  ;;  %v2075_v40 = vadd.f32 %v2074_v35, %v2073_v16  ;;  %v1438_v42 = vadd.f32 %v1437_v36, %v1269_v34  ;;  %v1271_v44 = vpop.f32.mrf.mxu1  ;;  %v1103_v47 = vadd.f32 %v3498_v0, %v1102_v43  ;;  %v2507_v16 = vor.u32 %v2924_v4, %v2504_v5  ;;  %v1872_v34 = vld [vmem:[%s4687_s3 + $0x98] sm:$0xff]  ;;  %v2930_v43 = vld [vmem:[%s4684_s0 + $0x26c] sm:$0xf0] }
 0x131   :  { %v3050_v48 = vpop.eup %3049  ;;  %v1607_v49 = vadd.f32 %v1606_v37, %v1438_v42  ;;  %1141 = vmatmul.bf16.gmra.mxu0 %v2487_v38  ;;  %v1272_v51 = vadd.f32 %v1271_v44, %v1103_v47  ;;  %v2928_v44 = vld [vmem:[%s4684_s0 + $0x264] sm:$0xf] }
 0x132   :  { %1805 = vst.msk [vmem:[%s4688_s4 + $0x80] sm:$0xff] %vm1788_vm0, %v3050_v48  ;;  %v1933_v50 = vsub.f32 %v3050_v48, %v1869_v41  ;;  %1310 = vmatmul.bf16.gmra.mxu1 %v2491_v39  ;;  %v2518_v41 = vld [vmem:[%s4684_s0 + $0x260] sm:$0xf]  ;;  %v2929_v48 = vld [vmem:[%s4684_s0 + $0x26c] sm:$0xf] }
 0x133   :  { %3051 = vtanh.f32 %v1607_v49  ;;  %1479 = vmatmul.bf16.gmra.mxu2 %v2495_v45  ;;  %v2526_v45 = vld [vmem:[%s4684_s0 + $0x268] sm:$0xf]  ;;  %v2528_v49 = vld [vmem:[%s4684_s0 + $0x278] sm:$0xf0] }
 0x134   :  { %1648 = vmatmul.bf16.gmra.mxu3 %v2499_v46  ;;  %v1997_v52 = vand.u32 2147483647, %v1933_v50  ;;  %v2931_v46 = vld [vmem:[%s4684_s0 + $0x274] sm:$0xf0] }
 0x136   :  { %v2076_v53 = vsel %vm1788_vm0, %v1997_v52, 0.0  ;;  %v1440_v54 = vpop.f32.mrf.mxu2  ;;  %v1104_v59 = vpop.f32.mrf.mxu0 }
 0x137   :  { %v1609_v55 = vpop.f32.mrf.mxu3  ;;  %v2077_v56 = vadd.f32 %v2076_v53, %v2075_v40  ;;  %v1441_v58 = vadd.f32 %v1440_v54, %v1272_v51  ;;  %v1273_v60 = vpop.f32.mrf.mxu1  ;;  %v1105_v63 = vadd.f32 %v3498_v0, %v1104_v59  ;;  %v2519_v54 = vor.u32 %v2930_v43, %v2518_v41 }
 0x139   :  { %v3052_v61 = vpop.eup %3051  ;;  %v1610_v62 = vadd.f32 %v1609_v55, %v1441_v58  ;;  %v1274_v11 = vadd.f32 %v1273_v60, %v1105_v63  ;;  %v3976_v63 = vld [vmem:[%s4686_s2] ss:$0 sm:$0xff] }
 0x13a   :  { %1806 = vst.msk [vmem:[%s4688_s4 + $0x88] sm:$0xff] %vm1788_vm0, %v3052_v61  ;;  %v1934_v2 = vsub.f32 %v3052_v61, %v1870_v57  ;;  %v1873_v57 = vld [vmem:[%s4687_s3 + $0xa0] sm:$0xff]  ;;  %v2527_v61 = vor.u32 %v2931_v46, %v2526_v45 }
 0x13b   :  { %3053 = vtanh.f32 %v1610_v62  ;;  %v2531_v62 = vor.u32 %v2929_v48, %v2528_v49 }
 0x13c   :  { %v1998_v8 = vand.u32 2147483647, %v1934_v2 }
 0x13e   :  { %v2078_v12 = vsel %vm1788_vm0, %v1998_v8, 0.0  ;;  %v1442_v13 = vpop.f32.mrf.mxu2  ;;  %v1107_v20 = vpop.f32.mrf.mxu0 }
 0x13f   :  { %v1611_v14 = vpop.f32.mrf.mxu3  ;;  %v2079_v17 = vadd.f32 %v2078_v12, %v2077_v56  ;;  %v1443_v19 = vadd.f32 %v1442_v13, %v1274_v11  ;;  %v1276_v21 = vpop.f32.mrf.mxu1  ;;  %v1108_v24 = vadd.f32 %v3498_v0, %v1107_v20  ;;  %v1874_v11 = vld [vmem:[%s4687_s3 + $0xa8] sm:$0xff]  ;;  %v2934_v20 = vld [vmem:[%s4684_s0 + $0x28c] sm:$0xf0] }
 0x141   :  { %v3054_v25 = vpop.eup %3053  ;;  %v1612_v26 = vadd.f32 %v1611_v14, %v1443_v19  ;;  %1146 = vmatmul.bf16.gmra.mxu0 %v2503_v15  ;;  %v1277_v28 = vadd.f32 %v1276_v21, %v1108_v24  ;;  %v2932_v21 = vld [vmem:[%s4684_s0 + $0x284] sm:$0xf]  ;;  %v2935_v24 = vld [vmem:[%s4684_s0 + $0x294] sm:$0xf0] }
 0x142   :  { %1807 = vst.msk [vmem:[%s4688_s4 + $0x90] sm:$0xff] %vm1788_vm0, %v3054_v25  ;;  %v1935_v27 = vsub.f32 %v3054_v25, %v1871_v18  ;;  %1315 = vmatmul.bf16.gmra.mxu1 %v2507_v16  ;;  %v2534_v18 = vld [vmem:[%s4684_s0 + $0x280] sm:$0xf] }
 0x143   :  { %3055 = vtanh.f32 %v1612_v26  ;;  %1484 = vmatmul.bf16.gmra.mxu2 %v2511_v22  ;;  %v2536_v22 = vld [vmem:[%s4684_s0 + $0x290] sm:$0xf0]  ;;  %v2933_v26 = vld [vmem:[%s4684_s0 + $0x28c] sm:$0xf] }
 0x144   :  { %1653 = vmatmul.bf16.gmra.mxu3 %v2515_v23  ;;  %v1999_v29 = vand.u32 2147483647, %v1935_v27  ;;  %v2542_v23 = vld [vmem:[%s4684_s0 + $0x288] sm:$0xf]  ;;  %v2544_v27 = vld [vmem:[%s4684_s0 + $0x298] sm:$0xf0] }
 0x146   :  { %v2080_v30 = vsel %vm1788_vm0, %v1999_v29, 0.0  ;;  %v1445_v31 = vpop.f32.mrf.mxu2  ;;  %v1109_v36 = vpop.f32.mrf.mxu0 }
 0x147   :  { %v1614_v32 = vpop.f32.mrf.mxu3  ;;  %v2081_v33 = vadd.f32 %v2080_v30, %v2079_v17  ;;  %v1446_v35 = vadd.f32 %v1445_v31, %v1277_v28  ;;  %v1278_v37 = vpop.f32.mrf.mxu1  ;;  %v1110_v40 = vadd.f32 %v3498_v0, %v1109_v36  ;;  %v2520_v0 = vld [vmem:[%s4684_s0 + $0x270] sm:$0xf0] }
 0x148   :  { %v2523_v55 = vor.u32 %v2928_v44, %v2520_v0 }
 0x149   :  { %v3056_v38 = vpop.eup %3055  ;;  %v1615_v39 = vadd.f32 %v1614_v32, %v1446_v35  ;;  %v1279_v50 = vadd.f32 %v1278_v37, %v1110_v40  ;;  %v2535_v32 = vor.u32 %v2934_v20, %v2534_v18  ;;  %v1875_v35 = vld [vmem:[%s4687_s3 + $0xb0] sm:$0xff]  ;;  %v2547_v40 = vor.u32 %v2933_v26, %v2544_v27 }
 0x14a   :  { %1808 = vst.msk [vmem:[%s4688_s4 + $0x98] sm:$0xff] %vm1788_vm0, %v3056_v38  ;;  %v1936_v42 = vsub.f32 %v3056_v38, %v1872_v34 }
 0x14b   :  { %3057 = vtanh.f32 %v1615_v39  ;;  %v2543_v39 = vor.u32 %v2935_v24, %v2542_v23 }
 0x14c   :  { %v2000_v47 = vand.u32 2147483647, %v1936_v42 }
 0x14e   :  { %v2082_v51 = vsel %vm1788_vm0, %v2000_v47, 0.0  ;;  %v1447_v52 = vpop.f32.mrf.mxu2  ;;  %v1112_v59 = vpop.f32.mrf.mxu0 }
 0x14f   :  { %v1616_v53 = vpop.f32.mrf.mxu3  ;;  %v2083_v56 = vadd.f32 %v2082_v51, %v2081_v33  ;;  %v1448_v58 = vadd.f32 %v1447_v52, %v1279_v50  ;;  %v1281_v60 = vpop.f32.mrf.mxu1  ;;  %v1113_v1 = vadd.f32 %v3976_v63, %v1112_v59  ;;  %v2539_v33 = vor.u32 %v2932_v21, %v2536_v22  ;;  %v1876_v50 = vld [vmem:[%s4687_s3 + $0xb8] sm:$0xff]  ;;  %v2938_v59 = vld [vmem:[%s4684_s0 + $0x2ac] sm:$0xf0] }
 0x151   :  { %v3058_v2 = vpop.eup %3057  ;;  %v1617_v3 = vadd.f32 %v1616_v53, %v1448_v58  ;;  %1151 = vmatmul.bf16.gmra.mxu0 %v2519_v54  ;;  %v1282_v5 = vadd.f32 %v1281_v60, %v1113_v1  ;;  %v2936_v60 = vld [vmem:[%s4684_s0 + $0x2a4] sm:$0xf]  ;;  %v2939_v1 = vld [vmem:[%s4684_s0 + $0x2b4] sm:$0xf0] }
 0x152   :  { %1809 = vst.msk [vmem:[%s4688_s4 + $0xa0] sm:$0xff] %vm1788_vm0, %v3058_v2  ;;  %v1937_v4 = vsub.f32 %v3058_v2, %v1873_v57  ;;  %1320 = vmatmul.bf16.gmra.mxu1 %v2523_v55  ;;  %v2550_v57 = vld [vmem:[%s4684_s0 + $0x2a0] sm:$0xf] }
 0x153   :  { %3059 = vtanh.f32 %v1617_v3  ;;  %1489 = vmatmul.bf16.gmra.mxu2 %v2527_v61  ;;  %v2552_v61 = vld [vmem:[%s4684_s0 + $0x2b0] sm:$0xf0]  ;;  %v2937_v3 = vld [vmem:[%s4684_s0 + $0x2ac] sm:$0xf] }
 0x154   :  { %1658 = vmatmul.bf16.gmra.mxu3 %v2531_v62  ;;  %v2001_v6 = vand.u32 2147483647, %v1937_v4  ;;  %v2558_v62 = vld [vmem:[%s4684_s0 + $0x2a8] sm:$0xf]  ;;  %v2560_v4 = vld [vmem:[%s4684_s0 + $0x2b8] sm:$0xf0] }
 0x156   :  { %v2084_v7 = vsel %vm1788_vm0, %v2001_v6, 0.0  ;;  %v1450_v8 = vpop.f32.mrf.mxu2  ;;  %v1114_v13 = vpop.f32.mrf.mxu0 }
 0x157   :  { %v1619_v9 = vpop.f32.mrf.mxu3  ;;  %v2085_v10 = vadd.f32 %v2084_v7, %v2083_v56  ;;  %v1451_v12 = vadd.f32 %v1450_v8, %v1282_v5  ;;  %v1283_v14 = vpop.f32.mrf.mxu1  ;;  %v1115_v17 = vadd.f32 %v3976_v63, %v1114_v13 }
 0x159   :  { %v3060_v15 = vpop.eup %3059  ;;  %v1620_v16 = vadd.f32 %v1619_v9, %v1451_v12  ;;  %v1284_v28 = vadd.f32 %v1283_v14, %v1115_v17  ;;  %v2551_v9 = vor.u32 %v2938_v59, %v2550_v57  ;;  %v1877_v12 = vld [vmem:[%s4687_s3 + $0xc0] sm:$0xff]  ;;  %v2563_v17 = vor.u32 %v2937_v3, %v2560_v4 }
 0x15a   :  { %1810 = vst.msk [vmem:[%s4688_s4 + $0xa8] sm:$0xff] %vm1788_vm0, %v3060_v15  ;;  %v1938_v19 = vsub.f32 %v3060_v15, %v1874_v11 }
 0x15b   :  { %3061 = vtanh.f32 %v1620_v16  ;;  %v2559_v16 = vor.u32 %v2939_v1, %v2558_v62 }
 0x15c   :  { %v2002_v25 = vand.u32 2147483647, %v1938_v19 }
 0x15e   :  { %v2086_v29 = vsel %vm1788_vm0, %v2002_v25, 0.0  ;;  %v1452_v30 = vpop.f32.mrf.mxu2  ;;  %v1117_v37 = vpop.f32.mrf.mxu0 }
 0x15f   :  { %v1621_v31 = vpop.f32.mrf.mxu3  ;;  %v2087_v34 = vadd.f32 %v2086_v29, %v2085_v10  ;;  %v1453_v36 = vadd.f32 %v1452_v30, %v1284_v28  ;;  %v1286_v38 = vpop.f32.mrf.mxu1  ;;  %v1118_v41 = vadd.f32 %v3976_v63, %v1117_v37  ;;  %v2555_v10 = vor.u32 %v2936_v60, %v2552_v61  ;;  %v1878_v28 = vld [vmem:[%s4687_s3 + $0xc8] sm:$0xff]  ;;  %v2942_v37 = vld [vmem:[%s4684_s0 + $0x2cc] sm:$0xf0] }
 0x161   :  { %v3062_v42 = vpop.eup %3061  ;;  %v1622_v43 = vadd.f32 %v1621_v31, %v1453_v36  ;;  %1156 = vmatmul.bf16.gmra.mxu0 %v2535_v32  ;;  %v1287_v0 = vadd.f32 %v1286_v38, %v1118_v41  ;;  %v2940_v38 = vld [vmem:[%s4684_s0 + $0x2c4] sm:$0xf]  ;;  %v2943_v41 = vld [vmem:[%s4684_s0 + $0x2d4] sm:$0xf0] }
 0x162   :  { %1811 = vst.msk [vmem:[%s4688_s4 + $0xb0] sm:$0xff] %vm1788_vm0, %v3062_v42  ;;  %v1939_v44 = vsub.f32 %v3062_v42, %v1875_v35  ;;  %1325 = vmatmul.bf16.gmra.mxu1 %v2539_v33  ;;  %v2566_v35 = vld [vmem:[%s4684_s0 + $0x2c0] sm:$0xf] }
 0x163   :  { %3063 = vtanh.f32 %v1622_v43  ;;  %1494 = vmatmul.bf16.gmra.mxu2 %v2543_v39  ;;  %v2568_v39 = vld [vmem:[%s4684_s0 + $0x2d0] sm:$0xf0]  ;;  %v2941_v43 = vld [vmem:[%s4684_s0 + $0x2cc] sm:$0xf] }
 0x164   :  { %1663 = vmatmul.bf16.gmra.mxu3 %v2547_v40  ;;  %v2003_v45 = vand.u32 2147483647, %v1939_v44  ;;  %v2574_v40 = vld [vmem:[%s4684_s0 + $0x2c8] sm:$0xf]  ;;  %v2576_v44 = vld [vmem:[%s4684_s0 + $0x2d8] sm:$0xf0] }
 0x166   :  { %v2088_v46 = vsel %vm1788_vm0, %v2003_v45, 0.0  ;;  %v1455_v47 = vpop.f32.mrf.mxu2  ;;  %v1119_v52 = vpop.f32.mrf.mxu0 }
 0x167   :  { %v1624_v48 = vpop.f32.mrf.mxu3  ;;  %v2089_v49 = vadd.f32 %v2088_v46, %v2087_v34  ;;  %v1456_v51 = vadd.f32 %v1455_v47, %v1287_v0  ;;  %v1288_v53 = vpop.f32.mrf.mxu1  ;;  %v1120_v56 = vadd.f32 %v3976_v63, %v1119_v52 }
 0x169   :  { %v3064_v54 = vpop.eup %3063  ;;  %v1625_v55 = vadd.f32 %v1624_v48, %v1456_v51  ;;  %v1289_v5 = vadd.f32 %v1288_v53, %v1120_v56  ;;  %v2567_v48 = vor.u32 %v2942_v37, %v2566_v35  ;;  %v1879_v51 = vld [vmem:[%s4687_s3 + $0xd0] sm:$0xff]  ;;  %v2579_v56 = vor.u32 %v2941_v43, %v2576_v44 }
 0x16a   :  { %1812 = vst.msk [vmem:[%s4688_s4 + $0xb8] sm:$0xff] %vm1788_vm0, %v3064_v54  ;;  %v1940_v58 = vsub.f32 %v3064_v54, %v1876_v50 }
 0x16b   :  { %3065 = vtanh.f32 %v1625_v55  ;;  %v2575_v55 = vor.u32 %v2943_v41, %v2574_v40 }
 0x16c   :  { %v2004_v2 = vand.u32 2147483647, %v1940_v58 }
 0x16e   :  { %v2090_v6 = vsel %vm1788_vm0, %v2004_v2, 0.0  ;;  %v1457_v7 = vpop.f32.mrf.mxu2  ;;  %v1122_v14 = vpop.f32.mrf.mxu0 }
 0x16f   :  { %v1626_v8 = vpop.f32.mrf.mxu3  ;;  %v2091_v11 = vadd.f32 %v2090_v6, %v2089_v49  ;;  %v1458_v13 = vadd.f32 %v1457_v7, %v1289_v5  ;;  %v1291_v15 = vpop.f32.mrf.mxu1  ;;  %v1123_v18 = vadd.f32 %v3976_v63, %v1122_v14  ;;  %v2571_v49 = vor.u32 %v2940_v38, %v2568_v39  ;;  %v1880_v5 = vld [vmem:[%s4687_s3 + $0xd8] sm:$0xff]  ;;  %v2946_v14 = vld [vmem:[%s4684_s0 + $0x2ec] sm:$0xf0] }
 0x171   :  { %v3066_v19 = vpop.eup %3065  ;;  %v1627_v20 = vadd.f32 %v1626_v8, %v1458_v13  ;;  %1161 = vmatmul.bf16.gmra.mxu0 %v2551_v9  ;;  %v1292_v22 = vadd.f32 %v1291_v15, %v1123_v18  ;;  %v2944_v15 = vld [vmem:[%s4684_s0 + $0x2e4] sm:$0xf]  ;;  %v2947_v18 = vld [vmem:[%s4684_s0 + $0x2f4] sm:$0xf0] }
 0x172   :  { %1813 = vst.msk [vmem:[%s4688_s4 + $0xc0] sm:$0xff] %vm1788_vm0, %v3066_v19  ;;  %v1941_v21 = vsub.f32 %v3066_v19, %v1877_v12  ;;  %1330 = vmatmul.bf16.gmra.mxu1 %v2555_v10  ;;  %v2582_v12 = vld [vmem:[%s4684_s0 + $0x2e0] sm:$0xf] }
 0x173   :  { %3067 = vtanh.f32 %v1627_v20  ;;  %1499 = vmatmul.bf16.gmra.mxu2 %v2559_v16  ;;  %v2584_v16 = vld [vmem:[%s4684_s0 + $0x2f0] sm:$0xf0]  ;;  %v2945_v20 = vld [vmem:[%s4684_s0 + $0x2ec] sm:$0xf] }
 0x174   :  { %1668 = vmatmul.bf16.gmra.mxu3 %v2563_v17  ;;  %v2005_v23 = vand.u32 2147483647, %v1941_v21  ;;  %v2590_v17 = vld [vmem:[%s4684_s0 + $0x2e8] sm:$0xf]  ;;  %v2592_v21 = vld [vmem:[%s4684_s0 + $0x2f8] sm:$0xf0] }
 0x176   :  { %v2092_v24 = vsel %vm1788_vm0, %v2005_v23, 0.0  ;;  %v1460_v25 = vpop.f32.mrf.mxu2  ;;  %v1124_v30 = vpop.f32.mrf.mxu0 }
 0x177   :  { %v1629_v26 = vpop.f32.mrf.mxu3  ;;  %v2093_v27 = vadd.f32 %v2092_v24, %v2091_v11  ;;  %v1461_v29 = vadd.f32 %v1460_v25, %v1292_v22  ;;  %v1293_v31 = vpop.f32.mrf.mxu1  ;;  %v1125_v34 = vadd.f32 %v3976_v63, %v1124_v30 }
 0x179   :  { %v3068_v32 = vpop.eup %3067  ;;  %v1630_v33 = vadd.f32 %v1629_v26, %v1461_v29  ;;  %v1294_v0 = vadd.f32 %v1293_v31, %v1125_v34  ;;  %v2583_v26 = vor.u32 %v2946_v14, %v2582_v12  ;;  %v1881_v29 = vld [vmem:[%s4687_s3 + $0xe0] sm:$0xff]  ;;  %v2595_v34 = vor.u32 %v2945_v20, %v2592_v21 }
 0x17a   :  { %1814 = vst.msk [vmem:[%s4688_s4 + $0xc8] sm:$0xff] %vm1788_vm0, %v3068_v32  ;;  %v1942_v36 = vsub.f32 %v3068_v32, %v1878_v28 }
 0x17b   :  { %3069 = vtanh.f32 %v1630_v33  ;;  %v2591_v33 = vor.u32 %v2947_v18, %v2590_v17 }
 0x17c   :  { %v2006_v42 = vand.u32 2147483647, %v1942_v36 }
 0x17e   :  { %v2094_v45 = vsel %vm1788_vm0, %v2006_v42, 0.0  ;;  %v1462_v46 = vpop.f32.mrf.mxu2  ;;  %v1127_v53 = vpop.f32.mrf.mxu0 }
 0x17f   :  { %v1631_v47 = vpop.f32.mrf.mxu3  ;;  %v2095_v50 = vadd.f32 %v2094_v45, %v2093_v27  ;;  %v1463_v52 = vadd.f32 %v1462_v46, %v1294_v0  ;;  %v1296_v54 = vpop.f32.mrf.mxu1  ;;  %v1128_v57 = vadd.f32 %v3976_v63, %v1127_v53  ;;  %v2587_v27 = vor.u32 %v2944_v15, %v2584_v16  ;;  %v1882_v0 = vld [vmem:[%s4687_s3 + $0xe8] sm:$0xff]  ;;  %v2950_v53 = vld [vmem:[%s4684_s0 + $0x30c] sm:$0xf0] }
 0x181   :  { %v3070_v58 = vpop.eup %3069  ;;  %v1632_v59 = vadd.f32 %v1631_v47, %v1463_v52  ;;  %1166 = vmatmul.bf16.gmra.mxu0 %v2567_v48  ;;  %v1297_v61 = vadd.f32 %v1296_v54, %v1128_v57  ;;  %v2948_v54 = vld [vmem:[%s4684_s0 + $0x304] sm:$0xf]  ;;  %v2951_v57 = vld [vmem:[%s4684_s0 + $0x314] sm:$0xf0] }
 0x182   :  { %1815 = vst.msk [vmem:[%s4688_s4 + $0xd0] sm:$0xff] %vm1788_vm0, %v3070_v58  ;;  %v1943_v60 = vsub.f32 %v3070_v58, %v1879_v51  ;;  %1335 = vmatmul.bf16.gmra.mxu1 %v2571_v49  ;;  %v2598_v51 = vld [vmem:[%s4684_s0 + $0x300] sm:$0xf] }
 0x183   :  { %3071 = vtanh.f32 %v1632_v59  ;;  %1504 = vmatmul.bf16.gmra.mxu2 %v2575_v55  ;;  %v2600_v55 = vld [vmem:[%s4684_s0 + $0x310] sm:$0xf0]  ;;  %v2949_v59 = vld [vmem:[%s4684_s0 + $0x30c] sm:$0xf] }
 0x184   :  { %1673 = vmatmul.bf16.gmra.mxu3 %v2579_v56  ;;  %v2007_v62 = vand.u32 2147483647, %v1943_v60  ;;  %v2606_v56 = vld [vmem:[%s4684_s0 + $0x308] sm:$0xf]  ;;  %v2608_v60 = vld [vmem:[%s4684_s0 + $0x318] sm:$0xf0] }
 0x186   :  { %v2096_v1 = vsel %vm1788_vm0, %v2007_v62, 0.0  ;;  %v1465_v2 = vpop.f32.mrf.mxu2  ;;  %v1129_v7 = vpop.f32.mrf.mxu0 }
 0x187   :  { %v1634_v3 = vpop.f32.mrf.mxu3  ;;  %v2097_v4 = vadd.f32 %v2096_v1, %v2095_v50  ;;  %v1466_v6 = vadd.f32 %v1465_v2, %v1297_v61  ;;  %v1298_v8 = vpop.f32.mrf.mxu1  ;;  %v1130_v11 = vadd.f32 %v3976_v63, %v1129_v7 }
 0x189   :  { %v3072_v9 = vpop.eup %3071  ;;  %v1635_v10 = vadd.f32 %v1634_v3, %v1466_v6  ;;  %v1299_v22 = vadd.f32 %v1298_v8, %v1130_v11  ;;  %v2599_v3 = vor.u32 %v2950_v53, %v2598_v51  ;;  %v1883_v6 = vld [vmem:[%s4687_s3 + $0xf0] sm:$0xff]  ;;  %v2611_v11 = vor.u32 %v2949_v59, %v2608_v60 }
 0x18a   :  { %1816 = vst.msk [vmem:[%s4688_s4 + $0xd8] sm:$0xff] %vm1788_vm0, %v3072_v9  ;;  %v1944_v13 = vsub.f32 %v3072_v9, %v1880_v5 }
 0x18b   :  { %3073 = vtanh.f32 %v1635_v10  ;;  %v2607_v10 = vor.u32 %v2951_v57, %v2606_v56 }
 0x18c   :  { %v2008_v19 = vand.u32 2147483647, %v1944_v13 }
 0x18e   :  { %v2098_v23 = vsel %vm1788_vm0, %v2008_v19, 0.0  ;;  %v1467_v24 = vpop.f32.mrf.mxu2  ;;  %v1132_v31 = vpop.f32.mrf.mxu0 }
 0x18f   :  { %v1636_v25 = vpop.f32.mrf.mxu3  ;;  %v2099_v28 = vadd.f32 %v2098_v23, %v2097_v4  ;;  %v1468_v30 = vadd.f32 %v1467_v24, %v1299_v22  ;;  %v1301_v32 = vpop.f32.mrf.mxu1  ;;  %v1133_v35 = vadd.f32 %v3976_v63, %v1132_v31  ;;  %v2603_v4 = vor.u32 %v2948_v54, %v2600_v55  ;;  %v1884_v22 = vld [vmem:[%s4687_s3 + $0xf8] sm:$0xff]  ;;  %v2954_v31 = vld [vmem:[%s4684_s0 + $0x32c] sm:$0xf0] }
 0x191   :  { %v3074_v36 = vpop.eup %3073  ;;  %v1637_v37 = vadd.f32 %v1636_v25, %v1468_v30  ;;  %1171 = vmatmul.bf16.gmra.mxu0 %v2583_v26  ;;  %v1302_v39 = vadd.f32 %v1301_v32, %v1133_v35  ;;  %v2952_v32 = vld [vmem:[%s4684_s0 + $0x324] sm:$0xf]  ;;  %v2955_v35 = vld [vmem:[%s4684_s0 + $0x334] sm:$0xf0] }
 0x192   :  { %1817 = vst.msk [vmem:[%s4688_s4 + $0xe0] sm:$0xff] %vm1788_vm0, %v3074_v36  ;;  %v1945_v38 = vsub.f32 %v3074_v36, %v1881_v29  ;;  %1340 = vmatmul.bf16.gmra.mxu1 %v2587_v27  ;;  %v2614_v29 = vld [vmem:[%s4684_s0 + $0x320] sm:$0xf] }
 0x193   :  { %3075 = vtanh.f32 %v1637_v37  ;;  %1509 = vmatmul.bf16.gmra.mxu2 %v2591_v33  ;;  %v2616_v33 = vld [vmem:[%s4684_s0 + $0x330] sm:$0xf0]  ;;  %v2953_v37 = vld [vmem:[%s4684_s0 + $0x32c] sm:$0xf] }
 0x194   :  { %1678 = vmatmul.bf16.gmra.mxu3 %v2595_v34  ;;  %v2009_v40 = vand.u32 2147483647, %v1945_v38  ;;  %v2622_v34 = vld [vmem:[%s4684_s0 + $0x328] sm:$0xf]  ;;  %v2624_v38 = vld [vmem:[%s4684_s0 + $0x338] sm:$0xf0] }
 0x196   :  { %v2100_v41 = vsel %vm1788_vm0, %v2009_v40, 0.0  ;;  %v1470_v42 = vpop.f32.mrf.mxu2  ;;  %v1134_v46 = vpop.f32.mrf.mxu0 }
 0x197   :  { %v1639_v43 = vpop.f32.mrf.mxu3  ;;  %v2101_v44 = vadd.f32 %v2100_v41, %v2099_v28  ;;  %v1471_v45 = vadd.f32 %v1470_v42, %v1302_v39  ;;  %v1303_v47 = vpop.f32.mrf.mxu1  ;;  %v1135_v50 = vadd.f32 %v3976_v63, %v1134_v46 }
 0x199   :  { %v3076_v48 = vpop.eup %3075  ;;  %v1640_v49 = vadd.f32 %v1639_v43, %v1471_v45  ;;  %v1304_v61 = vadd.f32 %v1303_v47, %v1135_v50  ;;  %v2615_v43 = vor.u32 %v2954_v31, %v2614_v29  ;;  %v1885_v45 = vld [vmem:[%s4687_s3 + $0x100] sm:$0xff]  ;;  %v2627_v50 = vor.u32 %v2953_v37, %v2624_v38 }
 0x19a   :  { %1818 = vst.msk [vmem:[%s4688_s4 + $0xe8] sm:$0xff] %vm1788_vm0, %v3076_v48  ;;  %v1946_v52 = vsub.f32 %v3076_v48, %v1882_v0 }
 0x19b   :  { %3077 = vtanh.f32 %v1640_v49  ;;  %v2623_v49 = vor.u32 %v2955_v35, %v2622_v34 }
 0x19c   :  { %v2010_v58 = vand.u32 2147483647, %v1946_v52 }
 0x19e   :  { %v2102_v62 = vsel %vm1788_vm0, %v2010_v58, 0.0  ;;  %v1472_v1 = vpop.f32.mrf.mxu2  ;;  %v1137_v8 = vpop.f32.mrf.mxu0 }
 0x19f   :  { %v1641_v2 = vpop.f32.mrf.mxu3  ;;  %v2103_v5 = vadd.f32 %v2102_v62, %v2101_v44  ;;  %v1473_v7 = vadd.f32 %v1472_v1, %v1304_v61  ;;  %v1306_v9 = vpop.f32.mrf.mxu1  ;;  %v1138_v12 = vadd.f32 %v3976_v63, %v1137_v8  ;;  %v2619_v44 = vor.u32 %v2952_v32, %v2616_v33  ;;  %v1886_v61 = vld [vmem:[%s4687_s3 + $0x108] sm:$0xff]  ;;  %v2958_v8 = vld [vmem:[%s4684_s0 + $0x34c] sm:$0xf0] }
 0x1a1   :  { %v3078_v13 = vpop.eup %3077  ;;  %v1642_v14 = vadd.f32 %v1641_v2, %v1473_v7  ;;  %1176 = vmatmul.bf16.gmra.mxu0 %v2599_v3  ;;  %v1307_v16 = vadd.f32 %v1306_v9, %v1138_v12  ;;  %v2956_v9 = vld [vmem:[%s4684_s0 + $0x344] sm:$0xf]  ;;  %v2959_v12 = vld [vmem:[%s4684_s0 + $0x354] sm:$0xf0] }
 0x1a2   :  { %1819 = vst.msk [vmem:[%s4688_s4 + $0xf0] sm:$0xff] %vm1788_vm0, %v3078_v13  ;;  %v1947_v15 = vsub.f32 %v3078_v13, %v1883_v6  ;;  %1345 = vmatmul.bf16.gmra.mxu1 %v2603_v4  ;;  %v2630_v6 = vld [vmem:[%s4684_s0 + $0x340] sm:$0xf] }
 0x1a3   :  { %3079 = vtanh.f32 %v1642_v14  ;;  %1514 = vmatmul.bf16.gmra.mxu2 %v2607_v10  ;;  %v2632_v10 = vld [vmem:[%s4684_s0 + $0x350] sm:$0xf0]  ;;  %v2957_v14 = vld [vmem:[%s4684_s0 + $0x34c] sm:$0xf] }
 0x1a4   :  { %1683 = vmatmul.bf16.gmra.mxu3 %v2611_v11  ;;  %v2011_v17 = vand.u32 2147483647, %v1947_v15  ;;  %v2638_v11 = vld [vmem:[%s4684_s0 + $0x348] sm:$0xf]  ;;  %v2640_v15 = vld [vmem:[%s4684_s0 + $0x358] sm:$0xf0] }
 0x1a6   :  { %v2104_v18 = vsel %vm1788_vm0, %v2011_v17, 0.0  ;;  %v1475_v19 = vpop.f32.mrf.mxu2  ;;  %v1139_v24 = vpop.f32.mrf.mxu0 }
 0x1a7   :  { %v1644_v20 = vpop.f32.mrf.mxu3  ;;  %v2105_v21 = vadd.f32 %v2104_v18, %v2103_v5  ;;  %v1476_v23 = vadd.f32 %v1475_v19, %v1307_v16  ;;  %v1308_v25 = vpop.f32.mrf.mxu1  ;;  %v1140_v28 = vadd.f32 %v3976_v63, %v1139_v24 }
 0x1a9   :  { %v3080_v26 = vpop.eup %3079  ;;  %v1645_v27 = vadd.f32 %v1644_v20, %v1476_v23  ;;  %v1309_v39 = vadd.f32 %v1308_v25, %v1140_v28  ;;  %v2631_v20 = vor.u32 %v2958_v8, %v2630_v6  ;;  %v1887_v23 = vld [vmem:[%s4687_s3 + $0x110] sm:$0xff]  ;;  %v2643_v28 = vor.u32 %v2957_v14, %v2640_v15 }
 0x1aa   :  { %1820 = vst.msk [vmem:[%s4688_s4 + $0xf8] sm:$0xff] %vm1788_vm0, %v3080_v26  ;;  %v1948_v30 = vsub.f32 %v3080_v26, %v1884_v22 }
 0x1ab   :  { %3081 = vtanh.f32 %v1645_v27  ;;  %v2639_v27 = vor.u32 %v2959_v12, %v2638_v11 }
 0x1ac   :  { %v2012_v36 = vand.u32 2147483647, %v1948_v30 }
 0x1ae   :  { %v2106_v40 = vsel %vm1788_vm0, %v2012_v36, 0.0  ;;  %v1477_v41 = vpop.f32.mrf.mxu2  ;;  %v1142_v47 = vpop.f32.mrf.mxu0 }
 0x1af   :  { %v1646_v42 = vpop.f32.mrf.mxu3  ;;  %v2107_v0 = vadd.f32 %v2106_v40, %v2105_v21  ;;  %v1478_v46 = vadd.f32 %v1477_v41, %v1309_v39  ;;  %v1311_v48 = vpop.f32.mrf.mxu1  ;;  %v1143_v51 = vadd.f32 %v3976_v63, %v1142_v47  ;;  %v2635_v21 = vor.u32 %v2956_v9, %v2632_v10  ;;  %v1888_v39 = vld [vmem:[%s4687_s3 + $0x118] sm:$0xff]  ;;  %v2962_v47 = vld [vmem:[%s4684_s0 + $0x36c] sm:$0xf0] }
 0x1b1   :  { %v3082_v52 = vpop.eup %3081  ;;  %v1647_v53 = vadd.f32 %v1646_v42, %v1478_v46  ;;  %1181 = vmatmul.bf16.gmra.mxu0 %v2615_v43  ;;  %v1312_v55 = vadd.f32 %v1311_v48, %v1143_v51  ;;  %v2960_v48 = vld [vmem:[%s4684_s0 + $0x364] sm:$0xf]  ;;  %v2963_v51 = vld [vmem:[%s4684_s0 + $0x374] sm:$0xf0] }
 0x1b2   :  { %1821 = vst.msk [vmem:[%s4688_s4 + $0x100] sm:$0xff] %vm1788_vm0, %v3082_v52  ;;  %v1949_v54 = vsub.f32 %v3082_v52, %v1885_v45  ;;  %1350 = vmatmul.bf16.gmra.mxu1 %v2619_v44  ;;  %v2646_v45 = vld [vmem:[%s4684_s0 + $0x360] sm:$0xf] }
 0x1b3   :  { %3083 = vtanh.f32 %v1647_v53  ;;  %1519 = vmatmul.bf16.gmra.mxu2 %v2623_v49  ;;  %v2648_v49 = vld [vmem:[%s4684_s0 + $0x370] sm:$0xf0]  ;;  %v2961_v53 = vld [vmem:[%s4684_s0 + $0x36c] sm:$0xf] }
 0x1b4   :  { %1688 = vmatmul.bf16.gmra.mxu3 %v2627_v50  ;;  %v2013_v56 = vand.u32 2147483647, %v1949_v54  ;;  %v2654_v50 = vld [vmem:[%s4684_s0 + $0x368] sm:$0xf]  ;;  %v2656_v54 = vld [vmem:[%s4684_s0 + $0x378] sm:$0xf0] }
 0x1b6   :  { %v2108_v57 = vsel %vm1788_vm0, %v2013_v56, 0.0  ;;  %v1480_v58 = vpop.f32.mrf.mxu2  ;;  %v1144_v1 = vpop.f32.mrf.mxu0 }
 0x1b7   :  { %v1649_v59 = vpop.f32.mrf.mxu3  ;;  %v2109_v60 = vadd.f32 %v2108_v57, %v2107_v0  ;;  %v1481_v62 = vadd.f32 %v1480_v58, %v1312_v55  ;;  %v1313_v2 = vpop.f32.mrf.mxu1  ;;  %v1145_v5 = vadd.f32 %v3976_v63, %v1144_v1 }
 0x1b9   :  { %v3084_v3 = vpop.eup %3083  ;;  %v1650_v4 = vadd.f32 %v1649_v59, %v1481_v62  ;;  %v1314_v16 = vadd.f32 %v1313_v2, %v1145_v5  ;;  %v2647_v59 = vor.u32 %v2962_v47, %v2646_v45  ;;  %v1889_v62 = vld [vmem:[%s4687_s3 + $0x120] sm:$0xff]  ;;  %v2659_v5 = vor.u32 %v2961_v53, %v2656_v54 }
 0x1ba   :  { %1822 = vst.msk [vmem:[%s4688_s4 + $0x108] sm:$0xff] %vm1788_vm0, %v3084_v3  ;;  %v1950_v7 = vsub.f32 %v3084_v3, %v1886_v61 }
 0x1bb   :  { %3085 = vtanh.f32 %v1650_v4  ;;  %v2655_v4 = vor.u32 %v2963_v51, %v2654_v50 }
 0x1bc   :  { %v2014_v13 = vand.u32 2147483647, %v1950_v7 }
 0x1be   :  { %v2110_v17 = vsel %vm1788_vm0, %v2014_v13, 0.0  ;;  %v1482_v18 = vpop.f32.mrf.mxu2  ;;  %v1147_v25 = vpop.f32.mrf.mxu0 }
 0x1bf   :  { %v1651_v19 = vpop.f32.mrf.mxu3  ;;  %v2111_v22 = vadd.f32 %v2110_v17, %v2109_v60  ;;  %v1483_v24 = vadd.f32 %v1482_v18, %v1314_v16  ;;  %v1316_v26 = vpop.f32.mrf.mxu1  ;;  %v1148_v29 = vadd.f32 %v3976_v63, %v1147_v25  ;;  %v2651_v60 = vor.u32 %v2960_v48, %v2648_v49  ;;  %v1890_v16 = vld [vmem:[%s4687_s3 + $0x128] sm:$0xff]  ;;  %v2966_v25 = vld [vmem:[%s4684_s0 + $0x38c] sm:$0xf0] }
 0x1c1   :  { %v3086_v30 = vpop.eup %3085  ;;  %v1652_v31 = vadd.f32 %v1651_v19, %v1483_v24  ;;  %1186 = vmatmul.bf16.gmra.mxu0 %v2631_v20  ;;  %v1317_v33 = vadd.f32 %v1316_v26, %v1148_v29  ;;  %v2964_v26 = vld [vmem:[%s4684_s0 + $0x384] sm:$0xf]  ;;  %v2967_v29 = vld [vmem:[%s4684_s0 + $0x394] sm:$0xf0] }
 0x1c2   :  { %1823 = vst.msk [vmem:[%s4688_s4 + $0x110] sm:$0xff] %vm1788_vm0, %v3086_v30  ;;  %v1951_v32 = vsub.f32 %v3086_v30, %v1887_v23  ;;  %1355 = vmatmul.bf16.gmra.mxu1 %v2635_v21  ;;  %v2662_v23 = vld [vmem:[%s4684_s0 + $0x380] sm:$0xf] }
 0x1c3   :  { %3087 = vtanh.f32 %v1652_v31  ;;  %1524 = vmatmul.bf16.gmra.mxu2 %v2639_v27  ;;  %v2664_v27 = vld [vmem:[%s4684_s0 + $0x390] sm:$0xf0]  ;;  %v2965_v31 = vld [vmem:[%s4684_s0 + $0x38c] sm:$0xf] }
 0x1c4   :  { %1693 = vmatmul.bf16.gmra.mxu3 %v2643_v28  ;;  %v2015_v34 = vand.u32 2147483647, %v1951_v32  ;;  %v2670_v28 = vld [vmem:[%s4684_s0 + $0x388] sm:$0xf]  ;;  %v2672_v32 = vld [vmem:[%s4684_s0 + $0x398] sm:$0xf0] }
 0x1c6   :  { %v2112_v35 = vsel %vm1788_vm0, %v2015_v34, 0.0  ;;  %v1485_v36 = vpop.f32.mrf.mxu2  ;;  %v1149_v41 = vpop.f32.mrf.mxu0 }
 0x1c7   :  { %v1654_v37 = vpop.f32.mrf.mxu3  ;;  %v2113_v38 = vadd.f32 %v2112_v35, %v2111_v22  ;;  %v1486_v40 = vadd.f32 %v1485_v36, %v1317_v33  ;;  %v1318_v42 = vpop.f32.mrf.mxu1  ;;  %v1150_v0 = vadd.f32 %v3976_v63, %v1149_v41 }
 0x1c9   :  { %v3088_v43 = vpop.eup %3087  ;;  %v1655_v44 = vadd.f32 %v1654_v37, %v1486_v40  ;;  %v1319_v55 = vadd.f32 %v1318_v42, %v1150_v0  ;;  %v2663_v37 = vor.u32 %v2966_v25, %v2662_v23  ;;  %v1891_v40 = vld [vmem:[%s4687_s3 + $0x130] sm:$0xff]  ;;  %v2675_v0 = vor.u32 %v2965_v31, %v2672_v32 }
 0x1ca   :  { %1824 = vst.msk [vmem:[%s4688_s4 + $0x118] sm:$0xff] %vm1788_vm0, %v3088_v43  ;;  %v1952_v46 = vsub.f32 %v3088_v43, %v1888_v39 }
 0x1cb   :  { %3089 = vtanh.f32 %v1655_v44  ;;  %v2671_v44 = vor.u32 %v2967_v29, %v2670_v28 }
 0x1cc   :  { %v2016_v52 = vand.u32 2147483647, %v1952_v46 }
 0x1ce   :  { %v2114_v56 = vsel %vm1788_vm0, %v2016_v52, 0.0  ;;  %v1487_v57 = vpop.f32.mrf.mxu2  ;;  %v1152_v2 = vpop.f32.mrf.mxu0 }
 0x1cf   :  { %v1656_v58 = vpop.f32.mrf.mxu3  ;;  %v2115_v61 = vadd.f32 %v2114_v56, %v2113_v38  ;;  %v1488_v1 = vadd.f32 %v1487_v57, %v1319_v55  ;;  %v1321_v3 = vpop.f32.mrf.mxu1  ;;  %v1153_v6 = vadd.f32 %v3976_v63, %v1152_v2  ;;  %v2667_v38 = vor.u32 %v2964_v26, %v2664_v27  ;;  %v1892_v55 = vld [vmem:[%s4687_s3 + $0x138] sm:$0xff]  ;;  %v2970_v2 = vld [vmem:[%s4684_s0 + $0x3ac] sm:$0xf0] }
 0x1d1   :  { %v3090_v7 = vpop.eup %3089  ;;  %v1657_v8 = vadd.f32 %v1656_v58, %v1488_v1  ;;  %1191 = vmatmul.bf16.gmra.mxu0 %v2647_v59  ;;  %v1322_v10 = vadd.f32 %v1321_v3, %v1153_v6  ;;  %v2968_v3 = vld [vmem:[%s4684_s0 + $0x3a4] sm:$0xf]  ;;  %v2971_v6 = vld [vmem:[%s4684_s0 + $0x3b4] sm:$0xf0] }
 0x1d2   :  { %1825 = vst.msk [vmem:[%s4688_s4 + $0x120] sm:$0xff] %vm1788_vm0, %v3090_v7  ;;  %v1953_v9 = vsub.f32 %v3090_v7, %v1889_v62  ;;  %1360 = vmatmul.bf16.gmra.mxu1 %v2651_v60  ;;  %v2678_v62 = vld [vmem:[%s4684_s0 + $0x3a0] sm:$0xf] }
 0x1d3   :  { %3091 = vtanh.f32 %v1657_v8  ;;  %1529 = vmatmul.bf16.gmra.mxu2 %v2655_v4  ;;  %v2680_v4 = vld [vmem:[%s4684_s0 + $0x3b0] sm:$0xf0]  ;;  %v2969_v8 = vld [vmem:[%s4684_s0 + $0x3ac] sm:$0xf] }
 0x1d4   :  { %1698 = vmatmul.bf16.gmra.mxu3 %v2659_v5  ;;  %v2017_v11 = vand.u32 2147483647, %v1953_v9  ;;  %v2686_v5 = vld [vmem:[%s4684_s0 + $0x3a8] sm:$0xf]  ;;  %v2688_v9 = vld [vmem:[%s4684_s0 + $0x3b8] sm:$0xf0] }
 0x1d6   :  { %v2116_v12 = vsel %vm1788_vm0, %v2017_v11, 0.0  ;;  %v1490_v13 = vpop.f32.mrf.mxu2  ;;  %v1154_v18 = vpop.f32.mrf.mxu0 }
 0x1d7   :  { %v1659_v14 = vpop.f32.mrf.mxu3  ;;  %v2117_v15 = vadd.f32 %v2116_v12, %v2115_v61  ;;  %v1491_v17 = vadd.f32 %v1490_v13, %v1322_v10  ;;  %v1323_v19 = vpop.f32.mrf.mxu1  ;;  %v1155_v22 = vadd.f32 %v3976_v63, %v1154_v18 }
 0x1d9   :  { %v3092_v20 = vpop.eup %3091  ;;  %v1660_v21 = vadd.f32 %v1659_v14, %v1491_v17  ;;  %v1324_v33 = vadd.f32 %v1323_v19, %v1155_v22  ;;  %v2679_v14 = vor.u32 %v2970_v2, %v2678_v62  ;;  %v1893_v17 = vld [vmem:[%s4687_s3 + $0x140] sm:$0xff]  ;;  %v2691_v22 = vor.u32 %v2969_v8, %v2688_v9 }
 0x1da   :  { %1826 = vst.msk [vmem:[%s4688_s4 + $0x128] sm:$0xff] %vm1788_vm0, %v3092_v20  ;;  %v1954_v24 = vsub.f32 %v3092_v20, %v1890_v16 }
 0x1db   :  { %3093 = vtanh.f32 %v1660_v21  ;;  %v2687_v21 = vor.u32 %v2971_v6, %v2686_v5 }
 0x1dc   :  { %v2018_v30 = vand.u32 2147483647, %v1954_v24 }
 0x1de   :  { %v2118_v34 = vsel %vm1788_vm0, %v2018_v30, 0.0  ;;  %v1492_v35 = vpop.f32.mrf.mxu2  ;;  %v1157_v42 = vpop.f32.mrf.mxu0 }
 0x1df   :  { %v1661_v36 = vpop.f32.mrf.mxu3  ;;  %v2119_v39 = vadd.f32 %v2118_v34, %v2117_v15  ;;  %v1493_v41 = vadd.f32 %v1492_v35, %v1324_v33  ;;  %v1326_v43 = vpop.f32.mrf.mxu1  ;;  %v1158_v45 = vadd.f32 %v3976_v63, %v1157_v42  ;;  %v2683_v15 = vor.u32 %v2968_v3, %v2680_v4  ;;  %v1894_v33 = vld [vmem:[%s4687_s3 + $0x148] sm:$0xff]  ;;  %v2974_v42 = vld [vmem:[%s4684_s0 + $0x3cc] sm:$0xf0] }
 0x1e1   :  { %v3094_v46 = vpop.eup %3093  ;;  %v1662_v47 = vadd.f32 %v1661_v36, %v1493_v41  ;;  %1196 = vmatmul.bf16.gmra.mxu0 %v2663_v37  ;;  %v1327_v49 = vadd.f32 %v1326_v43, %v1158_v45  ;;  %v2972_v43 = vld [vmem:[%s4684_s0 + $0x3c4] sm:$0xf] }
 0x1e2   :  { %1827 = vst.msk [vmem:[%s4688_s4 + $0x130] sm:$0xff] %vm1788_vm0, %v3094_v46  ;;  %v1955_v48 = vsub.f32 %v3094_v46, %v1891_v40  ;;  %1365 = vmatmul.bf16.gmra.mxu1 %v2667_v38  ;;  %v2694_v40 = vld [vmem:[%s4684_s0 + $0x3c0] sm:$0xf]  ;;  %v2973_v46 = vld [vmem:[%s4684_s0 + $0x3cc] sm:$0xf] }
 0x1e3   :  { %3095 = vtanh.f32 %v1662_v47  ;;  %1534 = vmatmul.bf16.gmra.mxu2 %v2671_v44  ;;  %v2702_v44 = vld [vmem:[%s4684_s0 + $0x3c8] sm:$0xf]  ;;  %v2704_v47 = vld [vmem:[%s4684_s0 + $0x3d8] sm:$0xf0] }
 0x1e4   :  { %1703 = vmatmul.bf16.gmra.mxu3 %v2675_v0  ;;  %v2019_v50 = vand.u32 2147483647, %v1955_v48  ;;  %v2975_v0 = vld [vmem:[%s4684_s0 + $0x3d4] sm:$0xf0] }
 0x1e6   :  { %v2120_v51 = vsel %vm1788_vm0, %v2019_v50, 0.0  ;;  %v1495_v52 = vpop.f32.mrf.mxu2  ;;  %v1159_v57 = vpop.f32.mrf.mxu0 }
 0x1e7   :  { %v1664_v53 = vpop.f32.mrf.mxu3  ;;  %v2121_v54 = vadd.f32 %v2120_v51, %v2119_v39  ;;  %v1496_v56 = vadd.f32 %v1495_v52, %v1327_v49  ;;  %v1328_v58 = vpop.f32.mrf.mxu1  ;;  %v1160_v61 = vadd.f32 %v3976_v63, %v1159_v57  ;;  %v2695_v52 = vor.u32 %v2974_v42, %v2694_v40 }
 0x1e9   :  { %v3096_v59 = vpop.eup %3095  ;;  %v1665_v60 = vadd.f32 %v1664_v53, %v1496_v56  ;;  %v1329_v10 = vadd.f32 %v1328_v58, %v1160_v61  ;;  %v4443_v61 = vld [vmem:[%s4686_s2] ss:$0 sm:$0xff] }
 0x1ea   :  { %1828 = vst.msk [vmem:[%s4688_s4 + $0x138] sm:$0xff] %vm1788_vm0, %v3096_v59  ;;  %v1956_v1 = vsub.f32 %v3096_v59, %v1892_v55  ;;  %v1895_v55 = vld [vmem:[%s4687_s3 + $0x150] sm:$0xff]  ;;  %v2703_v59 = vor.u32 %v2975_v0, %v2702_v44 }
 0x1eb   :  { %3097 = vtanh.f32 %v1665_v60  ;;  %v2707_v60 = vor.u32 %v2973_v46, %v2704_v47 }
 0x1ec   :  { %v2020_v7 = vand.u32 2147483647, %v1956_v1 }
 0x1ee   :  { %v2122_v11 = vsel %vm1788_vm0, %v2020_v7, 0.0  ;;  %v1497_v12 = vpop.f32.mrf.mxu2  ;;  %v1162_v19 = vpop.f32.mrf.mxu0 }
 0x1ef   :  { %v1666_v13 = vpop.f32.mrf.mxu3  ;;  %v2123_v16 = vadd.f32 %v2122_v11, %v2121_v54  ;;  %v1498_v18 = vadd.f32 %v1497_v12, %v1329_v10  ;;  %v1331_v20 = vpop.f32.mrf.mxu1  ;;  %v1163_v23 = vadd.f32 %v3976_v63, %v1162_v19  ;;  %v1896_v10 = vld [vmem:[%s4687_s3 + $0x158] sm:$0xff]  ;;  %v2978_v19 = vld [vmem:[%s4684_s0 + $0x3ec] sm:$0xf0] }
 0x1f1   :  { %v3098_v24 = vpop.eup %3097  ;;  %v1667_v25 = vadd.f32 %v1666_v13, %v1498_v18  ;;  %1201 = vmatmul.bf16.gmra.mxu0 %v2679_v14  ;;  %v1332_v27 = vadd.f32 %v1331_v20, %v1163_v23  ;;  %v2976_v20 = vld [vmem:[%s4684_s0 + $0x3e4] sm:$0xf]  ;;  %v2979_v23 = vld [vmem:[%s4684_s0 + $0x3f4] sm:$0xf0] }
 0x1f2   :  { %1829 = vst.msk [vmem:[%s4688_s4 + $0x140] sm:$0xff] %vm1788_vm0, %v3098_v24  ;;  %v1957_v26 = vsub.f32 %v3098_v24, %v1893_v17  ;;  %1370 = vmatmul.bf16.gmra.mxu1 %v2683_v15  ;;  %v2710_v17 = vld [vmem:[%s4684_s0 + $0x3e0] sm:$0xf] }
 0x1f3   :  { %3099 = vtanh.f32 %v1667_v25  ;;  %1539 = vmatmul.bf16.gmra.mxu2 %v2687_v21  ;;  %v2712_v21 = vld [vmem:[%s4684_s0 + $0x3f0] sm:$0xf0]  ;;  %v2977_v25 = vld [vmem:[%s4684_s0 + $0x3ec] sm:$0xf] }
 0x1f4   :  { %1708 = vmatmul.bf16.gmra.mxu3 %v2691_v22  ;;  %v2021_v28 = vand.u32 2147483647, %v1957_v26  ;;  %v2718_v22 = vld [vmem:[%s4684_s0 + $0x3e8] sm:$0xf]  ;;  %v2720_v26 = vld [vmem:[%s4684_s0 + $0x3f8] sm:$0xf0] }
 0x1f6   :  { %v2124_v29 = vsel %vm1788_vm0, %v2021_v28, 0.0  ;;  %v1500_v30 = vpop.f32.mrf.mxu2  ;;  %v1164_v35 = vpop.f32.mrf.mxu0 }
 0x1f7   :  { %v1669_v31 = vpop.f32.mrf.mxu3  ;;  %v2125_v32 = vadd.f32 %v2124_v29, %v2123_v16  ;;  %v1501_v34 = vadd.f32 %v1500_v30, %v1332_v27  ;;  %v1333_v36 = vpop.f32.mrf.mxu1  ;;  %v1165_v39 = vadd.f32 %v3976_v63, %v1164_v35  ;;  %v2696_v63 = vld [vmem:[%s4684_s0 + $0x3d0] sm:$0xf0] }
 0x1f8   :  { %v2699_v53 = vor.u32 %v2972_v43, %v2696_v63 }
 0x1f9   :  { %v3100_v37 = vpop.eup %3099  ;;  %v1670_v38 = vadd.f32 %v1669_v31, %v1501_v34  ;;  %v1334_v48 = vadd.f32 %v1333_v36, %v1165_v39  ;;  %v2711_v31 = vor.u32 %v2978_v19, %v2710_v17  ;;  %v1897_v34 = vld [vmem:[%s4687_s3 + $0x160] sm:$0xff]  ;;  %v2723_v39 = vor.u32 %v2977_v25, %v2720_v26 }
 0x1fa   :  { %1830 = vst.msk [vmem:[%s4688_s4 + $0x148] sm:$0xff] %vm1788_vm0, %v3100_v37  ;;  %v1958_v41 = vsub.f32 %v3100_v37, %v1894_v33 }
 0x1fb   :  { %3101 = vtanh.f32 %v1670_v38  ;;  %v2719_v38 = vor.u32 %v2979_v23, %v2718_v22 }
 0x1fc   :  { %v2022_v45 = vand.u32 2147483647, %v1958_v41 }
 0x1fe   :  { %v2126_v49 = vsel %vm1788_vm0, %v2022_v45, 0.0  ;;  %v1502_v50 = vpop.f32.mrf.mxu2  ;;  %v1167_v57 = vpop.f32.mrf.mxu0 }
 0x1ff   :  { %v1671_v51 = vpop.f32.mrf.mxu3  ;;  %v2127_v54 = vadd.f32 %v2126_v49, %v2125_v32  ;;  %v1503_v56 = vadd.f32 %v1502_v50, %v1334_v48  ;;  %v1336_v58 = vpop.f32.mrf.mxu1  ;;  %v1168_v62 = vadd.f32 %v4443_v61, %v1167_v57  ;;  %v2715_v32 = vor.u32 %v2976_v20, %v2712_v21  ;;  %v1898_v48 = vld [vmem:[%s4687_s3 + $0x168] sm:$0xff] }
 0x201   :  { %v3102_v1 = vpop.eup %3101  ;;  %v1672_v2 = vadd.f32 %v1671_v51, %v1503_v56  ;;  %1206 = vmatmul.bf16.gmra.mxu0 %v2695_v52  ;;  %v1337_v4 = vadd.f32 %v1336_v58, %v1168_v62 }
 0x202   :  { %1831 = vst.msk [vmem:[%s4688_s4 + $0x150] sm:$0xff] %vm1788_vm0, %v3102_v1  ;;  %v1959_v3 = vsub.f32 %v3102_v1, %v1895_v55  ;;  %1375 = vmatmul.bf16.gmra.mxu1 %v2699_v53  ;;  %v1899_v1 = vld [vmem:[%s4687_s3 + $0x170] sm:$0xff] }
 0x203   :  { %3103 = vtanh.f32 %v1672_v2  ;;  %1544 = vmatmul.bf16.gmra.mxu2 %v2703_v59 }
 0x204   :  { %1713 = vmatmul.bf16.gmra.mxu3 %v2707_v60  ;;  %v2023_v5 = vand.u32 2147483647, %v1959_v3 }
 0x206   :  { %v2128_v6 = vsel %vm1788_vm0, %v2023_v5, 0.0  ;;  %v1505_v7 = vpop.f32.mrf.mxu2  ;;  %v1169_v12 = vpop.f32.mrf.mxu0 }
 0x207   :  { %v1674_v8 = vpop.f32.mrf.mxu3  ;;  %v2129_v9 = vadd.f32 %v2128_v6, %v2127_v54  ;;  %v1506_v11 = vadd.f32 %v1505_v7, %v1337_v4  ;;  %v1338_v13 = vpop.f32.mrf.mxu1  ;;  %v1170_v16 = vadd.f32 %v4443_v61, %v1169_v12 }
 0x209   :  { %v3104_v14 = vpop.eup %3103  ;;  %v1675_v15 = vadd.f32 %v1674_v8, %v1506_v11  ;;  %v1339_v27 = vadd.f32 %v1338_v13, %v1170_v16 }
 0x20a   :  { %1832 = vst.msk [vmem:[%s4688_s4 + $0x158] sm:$0xff] %vm1788_vm0, %v3104_v14  ;;  %v1960_v18 = vsub.f32 %v3104_v14, %v1896_v10 }
 0x20b   :  { %3105 = vtanh.f32 %v1675_v15  ;;  %v1900_v15 = vld [vmem:[%s4687_s3 + $0x178] sm:$0xff] }
 0x20c   :  { %v2024_v24 = vand.u32 2147483647, %v1960_v18 }
 0x20e   :  { %v2130_v28 = vsel %vm1788_vm0, %v2024_v24, 0.0  ;;  %v1507_v29 = vpop.f32.mrf.mxu2  ;;  %v1172_v36 = vpop.f32.mrf.mxu0 }
 0x20f   :  { %v1676_v30 = vpop.f32.mrf.mxu3  ;;  %v2131_v33 = vadd.f32 %v2130_v28, %v2129_v9  ;;  %v1508_v35 = vadd.f32 %v1507_v29, %v1339_v27  ;;  %v1341_v37 = vpop.f32.mrf.mxu1  ;;  %v1173_v40 = vadd.f32 %v4443_v61, %v1172_v36  ;;  %v1901_v29 = vld [vmem:[%s4687_s3 + $0x180] sm:$0xff] }
 0x211   :  { %v3106_v41 = vpop.eup %3105  ;;  %v1677_v42 = vadd.f32 %v1676_v30, %v1508_v35  ;;  %1211 = vmatmul.bf16.gmra.mxu0 %v2711_v31  ;;  %v1342_v63 = vadd.f32 %v1341_v37, %v1173_v40 }
 0x212   :  { %1833 = vst.msk [vmem:[%s4688_s4 + $0x160] sm:$0xff] %vm1788_vm0, %v3106_v41  ;;  %v1961_v43 = vsub.f32 %v3106_v41, %v1897_v34  ;;  %1380 = vmatmul.bf16.gmra.mxu1 %v2715_v32 }
 0x213   :  { %3107 = vtanh.f32 %v1677_v42  ;;  %1549 = vmatmul.bf16.gmra.mxu2 %v2719_v38 }
 0x214   :  { %1718 = vmatmul.bf16.gmra.mxu3 %v2723_v39  ;;  %v2025_v44 = vand.u32 2147483647, %v1961_v43  ;;  %v1902_v43 = vld [vmem:[%s4687_s3 + $0x188] sm:$0xff] }
 0x216   :  { %v2132_v0 = vsel %vm1788_vm0, %v2025_v44, 0.0  ;;  %v1510_v45 = vpop.f32.mrf.mxu2  ;;  %v1174_v50 = vpop.f32.mrf.mxu0 }
 0x217   :  { %v1679_v46 = vpop.f32.mrf.mxu3  ;;  %v2133_v47 = vadd.f32 %v2132_v0, %v2131_v33  ;;  %v1511_v49 = vadd.f32 %v1510_v45, %v1342_v63  ;;  %v1343_v51 = vpop.f32.mrf.mxu1  ;;  %v1175_v54 = vadd.f32 %v4443_v61, %v1174_v50 }
 0x219   :  { %v3108_v52 = vpop.eup %3107  ;;  %v1680_v53 = vadd.f32 %v1679_v46, %v1511_v49  ;;  %v1344_v57 = vadd.f32 %v1343_v51, %v1175_v54 }
 0x21a   :  { %1834 = vst.msk [vmem:[%s4688_s4 + $0x168] sm:$0xff] %vm1788_vm0, %v3108_v52  ;;  %v1962_v55 = vsub.f32 %v3108_v52, %v1898_v48 }
 0x21b   :  { %3109 = vtanh.f32 %v1680_v53 }
 0x21c   :  { %v2026_v56 = vand.u32 2147483647, %v1962_v55  ;;  %v1903_v55 = vld [vmem:[%s4687_s3 + $0x190] sm:$0xff] }
 0x21e   :  { %v2134_v58 = vsel %vm1788_vm0, %v2026_v56, 0.0  ;;  %v1512_v59 = vpop.f32.mrf.mxu2  ;;  %v1177_v3 = vpop.f32.mrf.mxu0 }
 0x21f   :  { %v1681_v60 = vpop.f32.mrf.mxu3  ;;  %v2135_v62 = vadd.f32 %v2134_v58, %v2133_v47  ;;  %v1513_v2 = vadd.f32 %v1512_v59, %v1344_v57  ;;  %v1346_v4 = vpop.f32.mrf.mxu1  ;;  %v1178_v5 = vadd.f32 %v4443_v61, %v1177_v3 }
 0x221   :  { %v3110_v6 = vpop.eup %3109  ;;  %v1682_v7 = vadd.f32 %v1681_v60, %v1513_v2  ;;  %v1347_v9 = vadd.f32 %v1346_v4, %v1178_v5 }
 0x222   :  { %1835 = vst.msk [vmem:[%s4688_s4 + $0x170] sm:$0xff] %vm1788_vm0, %v3110_v6  ;;  %v1963_v8 = vsub.f32 %v3110_v6, %v1899_v1 }
 0x223   :  { %3111 = vtanh.f32 %v1682_v7 }
 0x224   :  { %v2027_v10 = vand.u32 2147483647, %v1963_v8  ;;  %v1904_v8 = vld [vmem:[%s4687_s3 + $0x198] sm:$0xff] }
 0x226   :  { %v2136_v11 = vsel %vm1788_vm0, %v2027_v10, 0.0  ;;  %v1515_v12 = vpop.f32.mrf.mxu2  ;;  %v1179_v17 = vpop.f32.mrf.mxu0 }
 0x227   :  { %v1684_v13 = vpop.f32.mrf.mxu3  ;;  %v2137_v14 = vadd.f32 %v2136_v11, %v2135_v62  ;;  %v1516_v16 = vadd.f32 %v1515_v12, %v1347_v9  ;;  %v1348_v18 = vpop.f32.mrf.mxu1  ;;  %v1180_v21 = vadd.f32 %v4443_v61, %v1179_v17 }
 0x229   :  { %v3112_v19 = vpop.eup %3111  ;;  %v1685_v20 = vadd.f32 %v1684_v13, %v1516_v16  ;;  %v1349_v24 = vadd.f32 %v1348_v18, %v1180_v21 }
 0x22a   :  { %1836 = vst.msk [vmem:[%s4688_s4 + $0x178] sm:$0xff] %vm1788_vm0, %v3112_v19  ;;  %v1964_v22 = vsub.f32 %v3112_v19, %v1900_v15 }
 0x22b   :  { %3113 = vtanh.f32 %v1685_v20 }
 0x22c   :  { %v2028_v23 = vand.u32 2147483647, %v1964_v22  ;;  %v1905_v22 = vld [vmem:[%s4687_s3 + $0x1a0] sm:$0xff] }
 0x22e   :  { %v2138_v25 = vsel %vm1788_vm0, %v2028_v23, 0.0  ;;  %v1517_v26 = vpop.f32.mrf.mxu2  ;;  %v1182_v31 = vpop.f32.mrf.mxu0 }
 0x22f   :  { %v1686_v27 = vpop.f32.mrf.mxu3  ;;  %v2139_v28 = vadd.f32 %v2138_v25, %v2137_v14  ;;  %v1518_v30 = vadd.f32 %v1517_v26, %v1349_v24  ;;  %v1351_v32 = vpop.f32.mrf.mxu1  ;;  %v1183_v33 = vadd.f32 %v4443_v61, %v1182_v31 }
 0x231   :  { %v3114_v34 = vpop.eup %3113  ;;  %v1687_v35 = vadd.f32 %v1686_v27, %v1518_v30  ;;  %v1352_v37 = vadd.f32 %v1351_v32, %v1183_v33 }
 0x232   :  { %1837 = vst.msk [vmem:[%s4688_s4 + $0x180] sm:$0xff] %vm1788_vm0, %v3114_v34  ;;  %v1965_v36 = vsub.f32 %v3114_v34, %v1901_v29 }
 0x233   :  { %3115 = vtanh.f32 %v1687_v35 }
 0x234   :  { %v2029_v38 = vand.u32 2147483647, %v1965_v36  ;;  %v1906_v36 = vld [vmem:[%s4687_s3 + $0x1a8] sm:$0xff] }
 0x236   :  { %v2140_v39 = vsel %vm1788_vm0, %v2029_v38, 0.0  ;;  %v1520_v40 = vpop.f32.mrf.mxu2  ;;  %v1184_v44 = vpop.f32.mrf.mxu0 }
 0x237   :  { %v1689_v41 = vpop.f32.mrf.mxu3  ;;  %v2141_v42 = vadd.f32 %v2140_v39, %v2139_v28  ;;  %v1521_v63 = vadd.f32 %v1520_v40, %v1352_v37  ;;  %v1353_v0 = vpop.f32.mrf.mxu1  ;;  %v1185_v47 = vadd.f32 %v4443_v61, %v1184_v44 }
 0x239   :  { %v3116_v45 = vpop.eup %3115  ;;  %v1690_v46 = vadd.f32 %v1689_v41, %v1521_v63  ;;  %v1354_v50 = vadd.f32 %v1353_v0, %v1185_v47 }
 0x23a   :  { %1838 = vst.msk [vmem:[%s4688_s4 + $0x188] sm:$0xff] %vm1788_vm0, %v3116_v45  ;;  %v1966_v48 = vsub.f32 %v3116_v45, %v1902_v43 }
 0x23b   :  { %3117 = vtanh.f32 %v1690_v46 }
 0x23c   :  { %v2030_v49 = vand.u32 2147483647, %v1966_v48 }
 0x23e   :  { %v2142_v51 = vsel %vm1788_vm0, %v2030_v49, 0.0  ;;  %v1522_v52 = vpop.f32.mrf.mxu2  ;;  %v1187_v57 = vpop.f32.mrf.mxu0 }
 0x23f   :  { %v1691_v53 = vpop.f32.mrf.mxu3  ;;  %v2143_v54 = vadd.f32 %v2142_v51, %v2141_v42  ;;  %v1523_v56 = vadd.f32 %v1522_v52, %v1354_v50  ;;  %v1356_v58 = vpop.f32.mrf.mxu1  ;;  %v1188_v59 = vadd.f32 %v4443_v61, %v1187_v57 }
 0x241   :  { %v3118_v60 = vpop.eup %3117  ;;  %v1692_v62 = vadd.f32 %v1691_v53, %v1523_v56  ;;  %v1357_v2 = vadd.f32 %v1356_v58, %v1188_v59 }
 0x242   :  { %1839 = vst.msk [vmem:[%s4688_s4 + $0x190] sm:$0xff] %vm1788_vm0, %v3118_v60  ;;  %v1967_v1 = vsub.f32 %v3118_v60, %v1903_v55 }
 0x243   :  { %3119 = vtanh.f32 %v1692_v62 }
 0x244   :  { %v2031_v3 = vand.u32 2147483647, %v1967_v1 }
 0x246   :  { %v2144_v4 = vsel %vm1788_vm0, %v2031_v3, 0.0  ;;  %v1525_v5 = vpop.f32.mrf.mxu2  ;;  %v1189_v10 = vpop.f32.mrf.mxu0 }
 0x247   :  { %v1694_v6 = vpop.f32.mrf.mxu3  ;;  %v2145_v7 = vadd.f32 %v2144_v4, %v2143_v54  ;;  %v1526_v9 = vadd.f32 %v1525_v5, %v1357_v2  ;;  %v1358_v11 = vpop.f32.mrf.mxu1  ;;  %v1190_v14 = vadd.f32 %v4443_v61, %v1189_v10 }
 0x249   :  { %v3120_v12 = vpop.eup %3119  ;;  %v1695_v13 = vadd.f32 %v1694_v6, %v1526_v9  ;;  %v1359_v17 = vadd.f32 %v1358_v11, %v1190_v14 }
 0x24a   :  { %1840 = vst.msk [vmem:[%s4688_s4 + $0x198] sm:$0xff] %vm1788_vm0, %v3120_v12  ;;  %v1968_v15 = vsub.f32 %v3120_v12, %v1904_v8 }
 0x24b   :  { %3121 = vtanh.f32 %v1695_v13 }
 0x24c   :  { %v2032_v16 = vand.u32 2147483647, %v1968_v15 }
 0x24e   :  { %v2146_v18 = vsel %vm1788_vm0, %v2032_v16, 0.0  ;;  %v1527_v19 = vpop.f32.mrf.mxu2  ;;  %v1192_v24 = vpop.f32.mrf.mxu0 }
 0x24f   :  { %v1696_v20 = vpop.f32.mrf.mxu3  ;;  %v2147_v21 = vadd.f32 %v2146_v18, %v2145_v7  ;;  %v1528_v23 = vadd.f32 %v1527_v19, %v1359_v17  ;;  %v1361_v25 = vpop.f32.mrf.mxu1  ;;  %v1193_v26 = vadd.f32 %v4443_v61, %v1192_v24 }
 0x251   :  { %v3122_v27 = vpop.eup %3121  ;;  %v1697_v28 = vadd.f32 %v1696_v20, %v1528_v23  ;;  %v1362_v30 = vadd.f32 %v1361_v25, %v1193_v26 }
 0x252   :  { %1841 = vst.msk [vmem:[%s4688_s4 + $0x1a0] sm:$0xff] %vm1788_vm0, %v3122_v27  ;;  %v1969_v29 = vsub.f32 %v3122_v27, %v1905_v22 }
 0x253   :  { %3123 = vtanh.f32 %v1697_v28 }
 0x254   :  { %v2033_v31 = vand.u32 2147483647, %v1969_v29 }
 0x256   :  { %v2148_v32 = vsel %vm1788_vm0, %v2033_v31, 0.0  ;;  %v1530_v33 = vpop.f32.mrf.mxu2  ;;  %v1194_v38 = vpop.f32.mrf.mxu0 }
 0x257   :  { %v1699_v34 = vpop.f32.mrf.mxu3  ;;  %v2149_v35 = vadd.f32 %v2148_v32, %v2147_v21  ;;  %v1531_v37 = vadd.f32 %v1530_v33, %v1362_v30  ;;  %v1363_v39 = vpop.f32.mrf.mxu1  ;;  %v1195_v42 = vadd.f32 %v4443_v61, %v1194_v38 }
 0x259   :  { %v3124_v40 = vpop.eup %3123  ;;  %v1700_v41 = vadd.f32 %v1699_v34, %v1531_v37  ;;  %v1364_v44 = vadd.f32 %v1363_v39, %v1195_v42 }
 0x25a   :  { %1842 = vst.msk [vmem:[%s4688_s4 + $0x1a8] sm:$0xff] %vm1788_vm0, %v3124_v40  ;;  %v1970_v43 = vsub.f32 %v3124_v40, %v1906_v36 }
 0x25b   :  { %3125 = vtanh.f32 %v1700_v41  ;;  %v1907_v41 = vld [vmem:[%s4687_s3 + $0x1b0] sm:$0xff] }
 0x25c   :  { %v2034_v63 = vand.u32 2147483647, %v1970_v43 }
 0x25e   :  { %v2150_v0 = vsel %vm1788_vm0, %v2034_v63, 0.0  ;;  %v1532_v45 = vpop.f32.mrf.mxu2  ;;  %v1197_v49 = vpop.f32.mrf.mxu0 }
 0x25f   :  { %v1701_v46 = vpop.f32.mrf.mxu3  ;;  %v4574_v47 = vadd.f32 %v2150_v0, %v2149_v35  ;;  %v1533_v48 = vadd.f32 %v1532_v45, %v1364_v44  ;;  %v1366_v50 = vpop.f32.mrf.mxu1  ;;  %v1198_v51 = vadd.f32 %v4443_v61, %v1197_v49  ;;  %v1908_v0 = vld [vmem:[%s4687_s3 + $0x1b8] sm:$0xff]  ;;  %v1909_v49 = vld [vmem:[%s4687_s3 + $0x1c0] sm:$0xff] }
 0x261   :  { %v4577_v52 = vpop.eup %3125  ;;  %v1702_v53 = vadd.f32 %v1701_v46, %v1533_v48  ;;  %v1367_v54 = vadd.f32 %v1366_v50, %v1198_v51 }
 0x262   :  { %1843 = vst.msk [vmem:[%s4688_s4 + $0x1b0] sm:$0xff] %vm1788_vm0, %v4577_v52  ;;  %v1971_v46 = vsub.f32 %v4577_v52, %v1907_v41 }
 0x263   :  { %3127 = vtanh.f32 %v1702_v53  ;;  %v1910_v53 = vld [vmem:[%s4687_s3 + $0x1c8] sm:$0xff] }
 0x266   :  { %v1535_v55 = vpop.f32.mrf.mxu2  ;;  %v1199_v58 = vpop.f32.mrf.mxu0 }
 0x267   :  { %v1704_v56 = vpop.f32.mrf.mxu3  ;;  %v1536_v57 = vadd.f32 %v1535_v55, %v1367_v54  ;;  %v1368_v59 = vpop.f32.mrf.mxu1  ;;  %v1200_v1 = vadd.f32 %v4443_v61, %v1199_v58  ;;  %v2035_v54 = vand.u32 2147483647, %v1971_v46 }
 0x269   :  { %v4584_v60 = vpop.eup %3127  ;;  %v1705_v62 = vadd.f32 %v1704_v56, %v1536_v57  ;;  %v1369_v2 = vadd.f32 %v1368_v59, %v1200_v1  ;;  %v1911_v57 = vld [vmem:[%s4687_s3 + $0x1d0] sm:$0xff] }
 0x26a   :  { %1844 = vst.msk [vmem:[%s4688_s4 + $0x1b8] sm:$0xff] %vm1788_vm0, %v4584_v60  ;;  %v1972_v51 = vsub.f32 %v4584_v60, %v1908_v0  ;;  %v1912_v60 = vld [vmem:[%s4687_s3 + $0x1d8] sm:$0xff] }
 0x26b   :  { %3129 = vtanh.f32 %v1705_v62 }
 0x26c   :  { %v2036_v62 = vand.u32 2147483647, %v1972_v51 }
 0x26e   :  { %v1537_v3 = vpop.f32.mrf.mxu2  ;;  %v1202_v6 = vpop.f32.mrf.mxu0 }
 0x26f   :  { %v1706_v4 = vpop.f32.mrf.mxu3  ;;  %v1538_v5 = vadd.f32 %v1537_v3, %v1369_v2  ;;  %v1371_v7 = vpop.f32.mrf.mxu1  ;;  %v1203_v8 = vadd.f32 %v4443_v61, %v1202_v6 }
 0x271   :  { %v4593_v9 = vpop.eup %3129  ;;  %v1707_v10 = vadd.f32 %v1706_v4, %v1538_v5  ;;  %v1372_v11 = vadd.f32 %v1371_v7, %v1203_v8  ;;  %v2152_v5 = vsel %vm1788_vm0, %v2035_v54, 0.0  ;;  %v1913_v8 = vld [vmem:[%s4687_s3 + $0x1e0] sm:$0xff] }
 0x272   :  { %1845 = vst.msk [vmem:[%s4688_s4 + $0x1c0] sm:$0xff] %vm1788_vm0, %v4593_v9  ;;  %v1973_v52 = vsub.f32 %v4593_v9, %v1909_v49  ;;  %v2154_v9 = vsel %vm1788_vm0, %v2036_v62, 0.0 }
 0x273   :  { %3131 = vtanh.f32 %v1707_v10 }
 0x274   :  { %v2037_v6 = vand.u32 2147483647, %v1973_v52 }
 0x276   :  { %v1540_v12 = vpop.f32.mrf.mxu2  ;;  %v1204_v15 = vpop.f32.mrf.mxu0 }
 0x277   :  { %v1709_v13 = vpop.f32.mrf.mxu3  ;;  %v1541_v14 = vadd.f32 %v1540_v12, %v1372_v11  ;;  %v1373_v16 = vpop.f32.mrf.mxu1  ;;  %v1205_v19 = vadd.f32 %v4443_v61, %v1204_v15  ;;  %v2156_v15 = vsel %vm1788_vm0, %v2037_v6, 0.0 }
 0x279   :  { %v4600_v17 = vpop.eup %3131  ;;  %v1710_v18 = vadd.f32 %v1709_v13, %v1541_v14  ;;  %v1374_v20 = vadd.f32 %v1373_v16, %v1205_v19  ;;  %v1914_v14 = vld [vmem:[%s4687_s3 + $0x1e8] sm:$0xff] }
 0x27a   :  { %1846 = vst.msk [vmem:[%s4688_s4 + $0x1c8] sm:$0xff] %vm1788_vm0, %v4600_v17  ;;  %v1974_v1 = vsub.f32 %v4600_v17, %v1910_v53 }
 0x27b   :  { %3133 = vtanh.f32 %v1710_v18 }
 0x27c   :  { %v2038_v10 = vand.u32 2147483647, %v1974_v1 }
 0x27e   :  { %v1542_v21 = vpop.f32.mrf.mxu2  ;;  %v1207_v24 = vpop.f32.mrf.mxu0 }
 0x27f   :  { %v1711_v22 = vpop.f32.mrf.mxu3  ;;  %v1543_v23 = vadd.f32 %v1542_v21, %v1374_v20  ;;  %v1376_v25 = vpop.f32.mrf.mxu1  ;;  %v1208_v26 = vadd.f32 %v4443_v61, %v1207_v24  ;;  %v1915_v21 = vld [vmem:[%s4687_s3 + $0x1f0] sm:$0xff] }
 0x281   :  { %v3134_v27 = vpop.eup %3133  ;;  %v1712_v28 = vadd.f32 %v1711_v22, %v1543_v23  ;;  %v1377_v29 = vadd.f32 %v1376_v25, %v1208_v26  ;;  %v2158_v22 = vsel %vm1788_vm0, %v2038_v10, 0.0 }
 0x282   :  { %1847 = vst.msk [vmem:[%s4688_s4 + $0x1d0] sm:$0xff] %vm1788_vm0, %v3134_v27  ;;  %v1975_v7 = vsub.f32 %v3134_v27, %v1911_v57 }
 0x283   :  { %3135 = vtanh.f32 %v1712_v28 }
 0x284   :  { %v2039_v16 = vand.u32 2147483647, %v1975_v7 }
 0x286   :  { %v1545_v30 = vpop.f32.mrf.mxu2  ;;  %v1209_v33 = vpop.f32.mrf.mxu0  ;;  %v2160_v28 = vsel %vm1788_vm0, %v2039_v16, 0.0 }
 0x287   :  { %v1714_v31 = vpop.f32.mrf.mxu3  ;;  %v1546_v32 = vadd.f32 %v1545_v30, %v1377_v29  ;;  %v1378_v34 = vpop.f32.mrf.mxu1  ;;  %v1210_v37 = vadd.f32 %v4443_v61, %v1209_v33 }
 0x289   :  { %v3136_v35 = vpop.eup %3135  ;;  %v1715_v36 = vadd.f32 %v1714_v31, %v1546_v32  ;;  %v1379_v38 = vadd.f32 %v1378_v34, %v1210_v37  ;;  %v1916_v37 = vld [vmem:[%s4687_s3 + $0x1f8] sm:$0xff]  ;;  %s3176_s3 = smov [#allocation2]  }
 0x28a   :  { %1848 = vst.msk [vmem:[%s4688_s4 + $0x1d8] sm:$0xff] %vm1788_vm0, %v3136_v35  ;;  %v1976_v11 = vsub.f32 %v3136_v35, %v1912_v60 }
 0x28b   :  { %3137 = vtanh.f32 %v1715_v36 }
 0x28c   :  { %v2040_v23 = vand.u32 2147483647, %v1976_v11 }
 0x28e   :  { %v1547_v39 = vpop.f32.mrf.mxu2  ;;  %v1212_v43 = vpop.f32.mrf.mxu0  ;;  %v2162_v33 = vsel %vm1788_vm0, %v2040_v23, 0.0 }
 0x28f   :  { %v1716_v40 = vpop.f32.mrf.mxu3  ;;  %v1548_v42 = vadd.f32 %v1547_v39, %v1379_v38  ;;  %v1213_v63 = vadd.f32 %v4443_v61, %v1212_v43  ;;  %v1381_v48 = vpop.f32.mrf.mxu1 }
 0x291   :  { %v3138_v44 = vpop.eup %3137  ;;  %v1717_v45 = vadd.f32 %v1716_v40, %v1548_v42  ;;  %v1382_v50 = vadd.f32 %v1381_v48, %v1213_v63 }
 0x292   :  { %1849 = vst.msk [vmem:[%s4688_s4 + $0x1e0] sm:$0xff] %vm1788_vm0, %v3138_v44  ;;  %v1977_v17 = vsub.f32 %v3138_v44, %v1913_v8 }
 0x293   :  { %3139 = vtanh.f32 %v1717_v45 }
 0x294   :  { %v2041_v29 = vand.u32 2147483647, %v1977_v17 }
 0x296   :  { %v1550_v55 = vpop.f32.mrf.mxu2  ;;  %v1214_v59 = vpop.f32.mrf.mxu0  ;;  %v2164_v36 = vsel %vm1788_vm0, %v2041_v29, 0.0 }
 0x297   :  { %v1719_v56 = vpop.f32.mrf.mxu3  ;;  %v1551_v58 = vadd.f32 %v1550_v55, %v1382_v50  ;;  %v1215_v4 = vadd.f32 %v4443_v61, %v1214_v59  ;;  %v1383_v12 = vpop.f32.mrf.mxu1  ;;  %v2153_v61 = vadd.f32 %v2152_v5, %v4574_v47  ;;  %v3175_v55 = vmov 2048.0  }
 0x299   :  { %v3140_v2 = vpop.eup %3139  ;;  %v1720_v3 = vadd.f32 %v1719_v56, %v1551_v58  ;;  %v1384_v13 = vadd.f32 %v1383_v12, %v1215_v4  ;;  %v2155_v19 = vadd.f32 %v2154_v9, %v2153_v61 }
 0x29a   :  { %1850 = vst.msk [vmem:[%s4688_s4 + $0x1e8] sm:$0xff] %vm1788_vm0, %v3140_v2  ;;  %v1978_v24 = vsub.f32 %v3140_v2, %v1914_v14 }
 0x29b   :  { %3141 = vtanh.f32 %v1720_v3  ;;  %v2157_v26 = vadd.f32 %v2156_v15, %v2155_v19 }
 0x29c   :  { %v2042_v32 = vand.u32 2147483647, %v1978_v24 }
 0x29d   :  { %v2159_v31 = vadd.f32 %v2158_v22, %v2157_v26 }
 0x29e   :  { %v1552_v18 = vpop.f32.mrf.mxu2  ;;  %v2166_v39 = vsel %vm1788_vm0, %v2042_v32, 0.0 }
 0x29f   :  { %v1553_v20 = vadd.f32 %v1552_v18, %v1384_v13  ;;  %v1721_v47 = vpop.f32.mrf.mxu3  ;;  %v2161_v34 = vadd.f32 %v2160_v28, %v2159_v31 }
 0x2a1   :  { %v3142_v25 = vpop.eup %3141  ;;  %v1722_v27 = vadd.f32 %v1721_v47, %v1553_v20  ;;  %v2163_v38 = vadd.f32 %v2162_v33, %v2161_v34 }
 0x2a2   :  { %1851 = vst.msk [vmem:[%s4688_s4 + $0x1f0] sm:$0xff] %vm1788_vm0, %v3142_v25  ;;  %v1979_v30 = vsub.f32 %v3142_v25, %v1915_v21 }
 0x2a3   :  { %3143 = vtanh.f32 %v1722_v27  ;;  %v2165_v41 = vadd.f32 %v2164_v36, %v2163_v38 }
 0x2a4   :  { %v2043_v35 = vand.u32 2147483647, %v1979_v30  ;;  %3145 = vrcp.f32 %v3175_v55 }
 0x2a5   :  { %v2167_v63 = vadd.f32 %v2166_v39, %v2165_v41 }
 0x2a6   :  { %v2168_v43 = vsel %vm1788_vm0, %v2043_v35, 0.0 }
 0x2a7   :  { %v2169_v0 = vadd.f32 %v2168_v43, %v2167_v63 }
 0x2a9   :  { %v3144_v40 = vpop.eup %3143 }
 0x2aa   :  { %1852 = vst.msk [vmem:[%s4688_s4 + $0x1f8] sm:$0xff] %vm1788_vm0, %v3144_v40  ;;  %v1980_v42 = vsub.f32 %v3144_v40, %v1916_v37  ;;  %v3146_v56 = vpop.eup %3145  ;;  %s2199_s4 = sshll.u32 %s3176_s3, 4  ;;  %s2200_s4 = int_to_ptr.vmem [resolvable:$true] %s2199_s4 }
 0x2ab   :  { %v2183_v57 = vmul.f32 2048.0, %v3146_v56  ;;  %vm2187_vm1 = vweird.f32 %v3146_v56 }
 0x2ac   :  { %v2044_v44 = vand.u32 2147483647, %v1980_v42 }
 0x2ad   :  { %v2184_v58 = vsub.f32 1.0, %v2183_v57 }
 0x2ae   :  { %v2170_v45 = vsel %vm1788_vm0, %v2044_v44, 0.0 }
 0x2af   :  { %v2171_v46 = vadd.f32 %v2170_v45, %v2169_v0  ;;  %v2185_v59 = vmul.f32 %v3146_v56, %v2184_v58 }
 0x2b1   :  { %2172 = vadd.xlane.f32.xlu0 %v2171_v46  ;;  %v2186_v62 = vadd.f32 %v3146_v56, %v2185_v59 }
 0x2b3   :  { %v2188_v1 = vsel %vm2187_vm1, %v3146_v56, %v2186_v62 }
 0x324   :  { %v2173_v48 = vpop.xlane.xlu0 %2172 }
 0x325   :  { %v2174_v49 = vrot.slane %v2173_v48, 4 }
 0x327   :  { %v2175_v50 = vadd.f32 %v2174_v49, %v2173_v48 }
 0x329   :  { %v2176_v51 = vrot.slane %v2175_v50, 2 }
 0x32b   :  { %v2177_v53 = vadd.f32 %v2176_v51, %v2175_v50 }
 0x32d   :  { %v2178_v54 = vrot.slane %v2177_v53, 1 }
 0x32f   :  { %v2179_v52 = vadd.f32 %v2178_v54, %v2177_v53 }
 0x331   :  { %3012 = vpush %v2179_v52 }
 0x362   :  { %s3013_s22 = spop %3012 }
 0x363   :  { %v2181_v2 = vstv %s3013_s22 }
 0x364   :  { %v2189_v60 = vmul.f32 %v2188_v1, %v2181_v2 }
 0x366   :  { %2191 = vst.msk [vmem:[#allocation2] sm:$0x1] %vm2190_vm2, %v2189_v60 }
 0x367   :  { %2204 = dma.vmem_to_hbm [thread:$0]  %s2200_s4, 16, %s2202_s21, [#allocation3]  }
 0x368   :  { %3173 = dma.done.wait [#allocation3], 16  }
 0x369   :  { %3174 = vsyncadd [#allocation3], 4294967280 }
 0x36a   :  { %2211 = vsyncpa [#allocation3], 1 }

// kernel: pixel_dt_gan_forward.16
= control target key start
LH: loop header
LB: loop body
LE: loop exit
PB: predicated region body
PF: predicated region fallthrough
CT: control target
= control target key end

     0   :  { %s708_s18 = smov 0   ;;  %s811_s0 = inlined_call_operand.vmem [shape: bf16[256,128], index: 0, kind: input, shape index: {}]   ;;  %s812_s1 = inlined_call_operand.vmem [shape: bf16[128,32], index: 1, kind: input, shape index: {}]   ;;  %s813_s2 = inlined_call_operand.vmem [shape: f32[1,32], index: 2, kind: input, shape index: {}]   ;;  %s814_s3 = inlined_call_operand.vmem [shape: f32[1,32], index: 3, kind: input, shape index: {}]   ;;  %s815_s4 = inlined_call_operand.vmem [shape: f32[1,32], index: 4, kind: input, shape index: {}]   ;;  %s816_s5 = inlined_call_operand.vmem [shape: bf16[256,32], index: 5, kind: output, shape index: {}]  }
   0x1 LB: > { %s546_s19 = sadd.s32 4294967295, %s676_s18   ;;  %p550_p0 = scmp.ge.s32.totalorder %s676_s18, 1  ;;  %s676_s18 = sphi %s708_s18, %s15_s18  }
   0x2   : > { %p188_p1 = scmp.lt.s32.totalorder %s676_s18, 3 }
   0x4   : > { %p189_p2 = pnand %p550_p0, %p188_p1 }
   0x5   : > { %s551_s26 = sshll.u32 (!%p189_p2), %s546_s19, 4 }
   0x6   : > { %192 = sbr.rel (%p189_p2) target bundleno = 209 (0xd1), region = 40  ;;  %p217_p3 = scmp.lt.s32.totalorder (!%p189_p2), %s551_s26, 31 }
   0xb   : > { %v636_v0 = vld [vmem:[%s812_s1 + $0x38] sm:$0xff]  ;;  %v635_v1 = vld [vmem:[%s812_s1 + $0x30] sm:$0xff]  ;;  %v634_v2 = vld [vmem:[%s812_s1 + $0x28] sm:$0xff]  ;;  %s818_s26 = smov (!%p217_p3, %s551_s26), 31  ;;  %vm473_vm2 = vcmask 257024  }
   0xc   : > { %360 = vmatpush.bf16.msra.mxu0 %v636_v0  ;;  %637 = vmatpush.bf16.msra.mxu1 %v636_v0  ;;  %v633_v3 = vld [vmem:[%s812_s1 + $0x20] sm:$0xff]  ;;  %v632_v4 = vld [vmem:[%s812_s1 + $0x18] sm:$0xff]  ;;  %v631_v5 = vld [vmem:[%s812_s1 + $0x10] sm:$0xff]  ;;  %s552_s8 = sshll.u32 %s818_s26, 2 }
   0xd   : > { %638 = vmatpush.bf16.msra.mxu2 %v636_v0  ;;  %639 = vmatpush.bf16.msra.mxu3 %v636_v0  ;;  %v630_v6 = vld [vmem:[%s812_s1 + $0x8] sm:$0xff]  ;;  %v629_v7 = vld [vmem:[%s812_s1] sm:$0xff]  ;;  %s220_s13 = scalar_lea.vmem %s811_s0, %s552_s8  ;;  %s760_s19 = scalar_lea.vmem %s816_s5, %s552_s8 }
   0xe   : > { %v621_v8 = vld [vmem:[%s220_s13] sm:$0xff]  ;;  %v623_v9 = vld [vmem:[%s220_s13 + $0x10] sm:$0xff]  ;;  %v622_v12 = vld [vmem:[%s220_s13 + $0x8] sm:$0xff] }
   0xf   : > { %v625_v10 = vld [vmem:[%s220_s13 + $0x20] sm:$0xff]  ;;  %v627_v11 = vld [vmem:[%s220_s13 + $0x30] sm:$0xff]  ;;  %v624_v13 = vld [vmem:[%s220_s13 + $0x18] sm:$0xff] }
  0x10   : > { %361 = vmatpush.bf16.msra.mxu0 %v635_v1  ;;  %640 = vmatpush.bf16.msra.mxu1 %v635_v1  ;;  %v626_v14 = vld [vmem:[%s220_s13 + $0x28] sm:$0xff]  ;;  %v628_v15 = vld [vmem:[%s220_s13 + $0x38] sm:$0xff]  ;;  %v751_v16 = vld [vmem:[%s813_s2] ss:$0 sm:$0xff] }
  0x11   : > { %641 = vmatpush.bf16.msra.mxu2 %v635_v1  ;;  %642 = vmatpush.bf16.msra.mxu3 %v635_v1 }
  0x14   : > { %362 = vmatpush.bf16.msra.mxu0 %v634_v2  ;;  %643 = vmatpush.bf16.msra.mxu1 %v634_v2 }
  0x15   : > { %644 = vmatpush.bf16.msra.mxu2 %v634_v2  ;;  %645 = vmatpush.bf16.msra.mxu3 %v634_v2 }
  0x18   : > { %363 = vmatpush.bf16.msra.mxu0 %v633_v3  ;;  %646 = vmatpush.bf16.msra.mxu1 %v633_v3 }
  0x19   : > { %647 = vmatpush.bf16.msra.mxu2 %v633_v3  ;;  %648 = vmatpush.bf16.msra.mxu3 %v633_v3 }
  0x1c   : > { %364 = vmatpush.bf16.msra.mxu0 %v632_v4  ;;  %649 = vmatpush.bf16.msra.mxu1 %v632_v4 }
  0x1d   : > { %650 = vmatpush.bf16.msra.mxu2 %v632_v4  ;;  %651 = vmatpush.bf16.msra.mxu3 %v632_v4 }
  0x20   : > { %365 = vmatpush.bf16.msra.mxu0 %v631_v5  ;;  %652 = vmatpush.bf16.msra.mxu1 %v631_v5 }
  0x21   : > { %653 = vmatpush.bf16.msra.mxu2 %v631_v5  ;;  %654 = vmatpush.bf16.msra.mxu3 %v631_v5 }
  0x24   : > { %366 = vmatpush.bf16.msra.mxu0 %v630_v6  ;;  %655 = vmatpush.bf16.msra.mxu1 %v630_v6 }
  0x25   : > { %656 = vmatpush.bf16.msra.mxu2 %v630_v6  ;;  %657 = vmatpush.bf16.msra.mxu3 %v630_v6 }
  0x28   : > { %367 = vmatpush.bf16.msra.mxu0 %v629_v7  ;;  %658 = vmatpush.bf16.msra.mxu1 %v629_v7 }
  0x29   : > { %659 = vmatpush.bf16.msra.mxu2 %v629_v7  ;;  %660 = vmatpush.bf16.msra.mxu3 %v629_v7 }
  0x2b   : > { %368 = vmatmul.bf16.vlgmr.msra.gmra.mxu0 %v621_v8  ;;  %378 = vmatmul.bf16.vlgmr.msra.gmra.mxu1 %v623_v9 }
  0x2c   : > { %388 = vmatmul.bf16.vlgmr.msra.gmra.mxu2 %v625_v10  ;;  %398 = vmatmul.bf16.vlgmr.msra.gmra.mxu3 %v627_v11 }
  0x3b   : > { %373 = vmatmul.bf16.gmra.mxu0 %v622_v12  ;;  %383 = vmatmul.bf16.gmra.mxu1 %v624_v13 }
  0x3c   : > { %393 = vmatmul.bf16.gmra.mxu2 %v626_v14  ;;  %403 = vmatmul.bf16.gmra.mxu3 %v628_v15 }
  0xa8   : > { %v369_v17 = vpop.f32.mrf.mxu0  ;;  %v379_v18 = vpop.f32.mrf.mxu1 }
  0xa9   : > { %v370_v19 = vadd.f32 %v751_v16, %v369_v17  ;;  %v380_v20 = vadd.f32 %v751_v16, %v379_v18 }
  0xab   : > { %vm409_vm0 = vcmp.gt.f32.partialorder %v370_v19, 0.0  ;;  %v425_v21 = vmul.f32 0.2, %v370_v19  ;;  %vm413_vm1 = vcmp.gt.f32.partialorder %v380_v20, 0.0  ;;  %v429_v22 = vmul.f32 0.2, %v380_v20 }
  0xad   : > { %v441_v23 = vsel %vm409_vm0, %v370_v19, %v425_v21  ;;  %v445_v24 = vsel %vm413_vm1, %v380_v20, %v429_v22 }
  0xae   : > { %v457_v25 = vpack.c.bf16 %v441_v23, %v441_v23  ;;  %v461_v26 = vpack.c.bf16 %v445_v24, %v445_v24 }
  0xaf   : > { %v389_v27 = vpop.f32.mrf.mxu2  ;;  %v399_v28 = vpop.f32.mrf.mxu3 }
  0xb0   : > { %474 = vst.msk [vmem:[%s760_s19] sm:$0xf] %vm473_vm2, %v457_v25  ;;  %v390_v29 = vadd.f32 %v751_v16, %v389_v27  ;;  %v400_v30 = vadd.f32 %v751_v16, %v399_v28  ;;  %v371_v31 = vpop.f32.mrf.mxu0  ;;  %v381_v32 = vpop.f32.mrf.mxu1 }
  0xb1   : > { %478 = vst.msk [vmem:[%s760_s19 + $0x10] sm:$0xf] %vm473_vm2, %v461_v26  ;;  %v372_v33 = vadd.f32 %v751_v16, %v371_v31  ;;  %v382_v34 = vadd.f32 %v751_v16, %v381_v32 }
  0xb2   : > { %vm417_vm3 = vcmp.gt.f32.partialorder %v390_v29, 0.0  ;;  %v433_v35 = vmul.f32 0.2, %v390_v29  ;;  %vm421_vm4 = vcmp.gt.f32.partialorder %v400_v30, 0.0  ;;  %v437_v36 = vmul.f32 0.2, %v400_v30 }
  0xb3   : > { %vm410_vm5 = vcmp.gt.f32.partialorder %v372_v33, 0.0  ;;  %v426_v37 = vmul.f32 0.2, %v372_v33  ;;  %vm414_vm6 = vcmp.gt.f32.partialorder %v382_v34, 0.0  ;;  %v430_v38 = vmul.f32 0.2, %v382_v34 }
  0xb4   : > { %v449_v39 = vsel %vm417_vm3, %v390_v29, %v433_v35  ;;  %v453_v40 = vsel %vm421_vm4, %v400_v30, %v437_v36 }
  0xb5   : > { %v465_v41 = vpack.c.bf16 %v449_v39, %v449_v39  ;;  %v469_v42 = vpack.c.bf16 %v453_v40, %v453_v40  ;;  %v442_v43 = vsel %vm410_vm5, %v372_v33, %v426_v37  ;;  %v446_v44 = vsel %vm414_vm6, %v382_v34, %v430_v38 }
  0xb6   : > { %v458_v45 = vpack.c.bf16 %v442_v43, %v442_v43  ;;  %v462_v46 = vpack.c.bf16 %v446_v44, %v446_v44 }
  0xb7   : > { %482 = vst.msk [vmem:[%s760_s19 + $0x20] sm:$0xf] %vm473_vm2, %v465_v41  ;;  %v391_v47 = vpop.f32.mrf.mxu2  ;;  %v401_v48 = vpop.f32.mrf.mxu3 }
  0xb8   : > { %486 = vst.msk [vmem:[%s760_s19 + $0x30] sm:$0xf] %vm473_vm2, %v469_v42  ;;  %v392_v49 = vadd.f32 %v751_v16, %v391_v47  ;;  %v402_v50 = vadd.f32 %v751_v16, %v401_v48  ;;  %v374_v51 = vpop.f32.mrf.mxu0  ;;  %v384_v52 = vpop.f32.mrf.mxu1 }
  0xb9   : > { %475 = vst.msk [vmem:[%s760_s19 + $0x4] sm:$0xf] %vm473_vm2, %v458_v45  ;;  %v375_v53 = vadd.f32 %v751_v16, %v374_v51  ;;  %v385_v54 = vadd.f32 %v751_v16, %v384_v52 }
  0xba   : > { %479 = vst.msk [vmem:[%s760_s19 + $0x14] sm:$0xf] %vm473_vm2, %v462_v46  ;;  %vm418_vm7 = vcmp.gt.f32.partialorder %v392_v49, 0.0  ;;  %v434_v55 = vmul.f32 0.2, %v392_v49  ;;  %vm422_vm8 = vcmp.gt.f32.partialorder %v402_v50, 0.0 }
  0xbb   : > { %v438_v56 = vmul.f32 0.2, %v402_v50  ;;  %vm411_vm9 = vcmp.gt.f32.partialorder %v375_v53, 0.0  ;;  %v427_v57 = vmul.f32 0.2, %v375_v53  ;;  %vm415_vm10 = vcmp.gt.f32.partialorder %v385_v54, 0.0 }
  0xbc   : > { %v450_v58 = vsel %vm418_vm7, %v392_v49, %v434_v55  ;;  %v431_v59 = vmul.f32 0.2, %v385_v54 }
  0xbd   : > { %v466_v60 = vpack.c.bf16 %v450_v58, %v450_v58  ;;  %v454_v61 = vsel %vm422_vm8, %v402_v50, %v438_v56  ;;  %v443_v62 = vsel %vm411_vm9, %v375_v53, %v427_v57 }
  0xbe   : > { %v470_v63 = vpack.c.bf16 %v454_v61, %v454_v61  ;;  %v459_v0 = vpack.c.bf16 %v443_v62, %v443_v62  ;;  %v447_v1 = vsel %vm415_vm10, %v385_v54, %v431_v59 }
  0xbf   : > { %483 = vst.msk [vmem:[%s760_s19 + $0x24] sm:$0xf] %vm473_vm2, %v466_v60  ;;  %v463_v2 = vpack.c.bf16 %v447_v1, %v447_v1  ;;  %v394_v3 = vpop.f32.mrf.mxu2  ;;  %v404_v4 = vpop.f32.mrf.mxu3 }
  0xc0   : > { %487 = vst.msk [vmem:[%s760_s19 + $0x34] sm:$0xf] %vm473_vm2, %v470_v63  ;;  %v395_v5 = vadd.f32 %v751_v16, %v394_v3  ;;  %v405_v6 = vadd.f32 %v751_v16, %v404_v4  ;;  %v376_v7 = vpop.f32.mrf.mxu0  ;;  %v386_v8 = vpop.f32.mrf.mxu1 }
  0xc1   : > { %476 = vst.msk [vmem:[%s760_s19 + $0x8] sm:$0xf] %vm473_vm2, %v459_v0  ;;  %v377_v9 = vadd.f32 %v751_v16, %v376_v7  ;;  %v387_v10 = vadd.f32 %v751_v16, %v386_v8 }
  0xc2   : > { %480 = vst.msk [vmem:[%s760_s19 + $0x18] sm:$0xf] %vm473_vm2, %v463_v2  ;;  %vm419_vm11 = vcmp.gt.f32.partialorder %v395_v5, 0.0  ;;  %v435_v11 = vmul.f32 0.2, %v395_v5  ;;  %vm423_vm12 = vcmp.gt.f32.partialorder %v405_v6, 0.0 }
  0xc3   : > { %v439_v12 = vmul.f32 0.2, %v405_v6  ;;  %vm412_vm13 = vcmp.gt.f32.partialorder %v377_v9, 0.0  ;;  %v428_v13 = vmul.f32 0.2, %v377_v9  ;;  %vm416_vm14 = vcmp.gt.f32.partialorder %v387_v10, 0.0 }
  0xc4   : > { %v451_v14 = vsel %vm419_vm11, %v395_v5, %v435_v11  ;;  %v432_v15 = vmul.f32 0.2, %v387_v10 }
  0xc5   : > { %v467_v17 = vpack.c.bf16 %v451_v14, %v451_v14  ;;  %v455_v18 = vsel %vm423_vm12, %v405_v6, %v439_v12  ;;  %v444_v19 = vsel %vm412_vm13, %v377_v9, %v428_v13 }
  0xc6   : > { %v471_v20 = vpack.c.bf16 %v455_v18, %v455_v18  ;;  %v460_v21 = vpack.c.bf16 %v444_v19, %v444_v19  ;;  %v448_v22 = vsel %vm416_vm14, %v387_v10, %v432_v15 }
  0xc7   : > { %484 = vst.msk [vmem:[%s760_s19 + $0x28] sm:$0xf] %vm473_vm2, %v467_v17  ;;  %v464_v23 = vpack.c.bf16 %v448_v22, %v448_v22  ;;  %v396_v24 = vpop.f32.mrf.mxu2  ;;  %v406_v25 = vpop.f32.mrf.mxu3 }
  0xc8   : > { %488 = vst.msk [vmem:[%s760_s19 + $0x38] sm:$0xf] %vm473_vm2, %v471_v20  ;;  %v397_v26 = vadd.f32 %v751_v16, %v396_v24  ;;  %v407_v27 = vadd.f32 %v751_v16, %v406_v25 }
  0xc9   : > { %477 = vst.msk [vmem:[%s760_s19 + $0xc] sm:$0xf] %vm473_vm2, %v460_v21 }
  0xca   : > { %481 = vst.msk [vmem:[%s760_s19 + $0x1c] sm:$0xf] %vm473_vm2, %v464_v23  ;;  %vm420_vm15 = vcmp.gt.f32.partialorder %v397_v26, 0.0  ;;  %v436_v28 = vmul.f32 0.2, %v397_v26  ;;  %vm424_vm0 = vcmp.gt.f32.partialorder %v407_v27, 0.0 }
  0xcb   : > { %v440_v29 = vmul.f32 0.2, %v407_v27 }
  0xcc   : > { %v452_v30 = vsel %vm420_vm15, %v397_v26, %v436_v28 }
  0xcd   : > { %v468_v31 = vpack.c.bf16 %v452_v30, %v452_v30  ;;  %v456_v32 = vsel %vm424_vm0, %v407_v27, %v440_v29 }
  0xce   : > { %v472_v33 = vpack.c.bf16 %v456_v32, %v456_v32 }
  0xcf   : > { %485 = vst.msk [vmem:[%s760_s19 + $0x2c] sm:$0xf] %vm473_vm2, %v468_v31 }
  0xd0   : > { %489 = vst.msk [vmem:[%s760_s19 + $0x3c] sm:$0xf] %vm473_vm2, %v472_v33 }
  0xd1 PF: > { %s15_s18 = sadd.s32 1, %s676_s18  }
  0xd2   : > { %p12_p4 = scmp.ge.s32.totalorder %s15_s18, 4  }
  0xd4   :  { %14 = sbr.rel (!%p12_p4) target bundleno = 1 (0x1), region = 70 }

// kernel: pixel_dt_gan_forward.17
= control target key start
LH: loop header
LB: loop body
LE: loop exit
PB: predicated region body
PF: predicated region fallthrough
CT: control target
= control target key end

     0   :  { %s1907_s0 = inlined_call_operand.vmem [shape: bf16[64,512], index: 0, kind: input, shape index: {}]   ;;  %s1908_s1 = inlined_call_operand.vmem [shape: bf16[512,64], index: 1, kind: input, shape index: {}]   ;;  %s1909_s2 = inlined_call_operand.vmem [shape: f32[1,64], index: 2, kind: input, shape index: {}]   ;;  %s1910_s3 = inlined_call_operand.vmem [shape: f32[1,64], index: 3, kind: input, shape index: {}]   ;;  %s1911_s4 = inlined_call_operand.vmem [shape: f32[1,64], index: 4, kind: input, shape index: {}]   ;;  %s1912_s5 = inlined_call_operand.vmem [shape: f32[64,64], index: 5, kind: input, shape index: {}]   ;;  %s1913_s6 = inlined_call_operand.<no memory space> [shape: f32[1,1], index: 6, kind: input, shape index: {}]   ;;  %s1914_s7 = inlined_call_operand.hbm [shape: f32[1,1], index: 7, kind: output, shape index: {0}]   ;;  %s1915_s8 = inlined_call_operand.hbm [shape: f32[1,1], index: 8, kind: output, shape index: {1}]   ;;  %s1916_s9 = inlined_call_operand.hbm [shape: f32[1,1], index: 9, kind: output, shape index: {2}]  }
   0x1   :  { %v15_v0 = vstv %s1913_s6 }
   0x2   :  { %16 = vst [vmem:[#allocation2] sm:$0x1] %v15_v0 }
   0x3   :  { %17 = vsyncpa [#allocation4], 0  ;;  %v1387_v1 = vld [vmem:[%s1908_s1 + $0x38] sm:$0xff]  ;;  %v1386_v5 = vld [vmem:[%s1908_s1 + $0x30] sm:$0xff] }
   0x4   :  { %v1395_v2 = vld [vmem:[%s1908_s1 + $0x78] sm:$0xff]  ;;  %389 = vmatpush.bf16.msra.mxu0 %v1387_v1  ;;  %v1394_v6 = vld [vmem:[%s1908_s1 + $0x70] sm:$0xff]  ;;  %v1385_v9 = vld [vmem:[%s1908_s1 + $0x28] sm:$0xff] }
   0x5   :  { %v1403_v3 = vld [vmem:[%s1908_s1 + $0xb8] sm:$0xff]  ;;  %418 = vmatpush.bf16.msra.mxu1 %v1395_v2  ;;  %v1402_v7 = vld [vmem:[%s1908_s1 + $0xb0] sm:$0xff]  ;;  %v1393_v10 = vld [vmem:[%s1908_s1 + $0x68] sm:$0xff] }
   0x6   :  { %v1411_v4 = vld [vmem:[%s1908_s1 + $0xf8] sm:$0xff]  ;;  %447 = vmatpush.bf16.msra.mxu2 %v1403_v3  ;;  %v1410_v8 = vld [vmem:[%s1908_s1 + $0xf0] sm:$0xff]  ;;  %v1401_v11 = vld [vmem:[%s1908_s1 + $0xa8] sm:$0xff] }
   0x7   :  { %476 = vmatpush.bf16.msra.mxu3 %v1411_v4  ;;  %v1409_v12 = vld [vmem:[%s1908_s1 + $0xe8] sm:$0xff]  ;;  %v1384_v13 = vld [vmem:[%s1908_s1 + $0x20] sm:$0xff]  ;;  %v1383_v17 = vld [vmem:[%s1908_s1 + $0x18] sm:$0xff] }
   0x8   :  { %390 = vmatpush.bf16.msra.mxu0 %v1386_v5  ;;  %v1392_v14 = vld [vmem:[%s1908_s1 + $0x60] sm:$0xff]  ;;  %v1391_v18 = vld [vmem:[%s1908_s1 + $0x58] sm:$0xff] }
   0x9   :  { %419 = vmatpush.bf16.msra.mxu1 %v1394_v6  ;;  %v1400_v15 = vld [vmem:[%s1908_s1 + $0xa0] sm:$0xff]  ;;  %v1399_v19 = vld [vmem:[%s1908_s1 + $0x98] sm:$0xff] }
   0xa   :  { %448 = vmatpush.bf16.msra.mxu2 %v1402_v7  ;;  %v1408_v16 = vld [vmem:[%s1908_s1 + $0xe0] sm:$0xff]  ;;  %v1407_v20 = vld [vmem:[%s1908_s1 + $0xd8] sm:$0xff] }
   0xb   :  { %477 = vmatpush.bf16.msra.mxu3 %v1410_v8 }
   0xc   :  { %391 = vmatpush.bf16.msra.mxu0 %v1385_v9 }
   0xd   :  { %420 = vmatpush.bf16.msra.mxu1 %v1393_v10 }
   0xe   :  { %449 = vmatpush.bf16.msra.mxu2 %v1401_v11 }
   0xf   :  { %478 = vmatpush.bf16.msra.mxu3 %v1409_v12 }
  0x10   :  { %392 = vmatpush.bf16.msra.mxu0 %v1384_v13 }
  0x11   :  { %421 = vmatpush.bf16.msra.mxu1 %v1392_v14 }
  0x12   :  { %450 = vmatpush.bf16.msra.mxu2 %v1400_v15 }
  0x13   :  { %479 = vmatpush.bf16.msra.mxu3 %v1408_v16 }
  0x14   :  { %18 = vsyncpa [#allocation6], 0  ;;  %393 = vmatpush.bf16.msra.mxu0 %v1383_v17  ;;  %v1382_v21 = vld [vmem:[%s1908_s1 + $0x10] sm:$0xff]  ;;  %v1381_v25 = vld [vmem:[%s1908_s1 + $0x8] sm:$0xff]  ;;  %vm530_vm0 = vcmask 523264   ;;  %s1514_s21 = smov [#allocation3]  }
  0x15   :  { %422 = vmatpush.bf16.msra.mxu1 %v1391_v18  ;;  %v1390_v22 = vld [vmem:[%s1908_s1 + $0x50] sm:$0xff]  ;;  %v1389_v26 = vld [vmem:[%s1908_s1 + $0x48] sm:$0xff]  ;;  %v1380_v29 = vld [vmem:[%s1908_s1] sm:$0xff]  ;;  %s1126_s22 = sshll.u32 %s1514_s21, 4  ;;  %s1128_s25 = sshll.u32 %s1914_s7, 4  ;;  %s1127_s22 = int_to_ptr.vmem [resolvable:$true] %s1126_s22  ;;  %s1129_s25 = int_to_ptr.hbm [resolvable:$true] %s1128_s25 }
  0x16   :  { %451 = vmatpush.bf16.msra.mxu2 %v1399_v19  ;;  %v1398_v23 = vld [vmem:[%s1908_s1 + $0x90] sm:$0xff]  ;;  %v1397_v27 = vld [vmem:[%s1908_s1 + $0x88] sm:$0xff]  ;;  %v1388_v30 = vld [vmem:[%s1908_s1 + $0x40] sm:$0xff]  ;;  %s1150_s11 = sshll.u32 %s1916_s9, 4  ;;  %s1151_s11 = int_to_ptr.hbm [resolvable:$true] %s1150_s11 }
  0x17   :  { %480 = vmatpush.bf16.msra.mxu3 %v1407_v20  ;;  %v1406_v24 = vld [vmem:[%s1908_s1 + $0xd0] sm:$0xff]  ;;  %v1405_v28 = vld [vmem:[%s1908_s1 + $0xc8] sm:$0xff]  ;;  %v1396_v31 = vld [vmem:[%s1908_s1 + $0x80] sm:$0xff] }
  0x18   :  { %394 = vmatpush.bf16.msra.mxu0 %v1382_v21  ;;  %v1404_v32 = vld [vmem:[%s1908_s1 + $0xc0] sm:$0xff]  ;;  %v1366_v34 = vld [vmem:[%s1907_s0 + $0xc] sm:$0xf0]  ;;  %v1172_v36 = vld [vmem:[%s1907_s0 + $0x10] sm:$0xf0] }
  0x19   :  { %423 = vmatpush.bf16.msra.mxu1 %v1390_v22  ;;  %v1170_v33 = vld [vmem:[%s1907_s0] sm:$0xf]  ;;  %v1364_v35 = vld [vmem:[%s1907_s0 + $0x4] sm:$0xf]  ;;  %v1178_v37 = vld [vmem:[%s1907_s0 + $0x8] sm:$0xf] }
  0x1a   :  { %452 = vmatpush.bf16.msra.mxu2 %v1398_v23  ;;  %v1367_v38 = vld [vmem:[%s1907_s0 + $0x14] sm:$0xf0]  ;;  %v1365_v39 = vld [vmem:[%s1907_s0 + $0xc] sm:$0xf]  ;;  %v1180_v40 = vld [vmem:[%s1907_s0 + $0x18] sm:$0xf0]  ;;  %v1171_v41 = vor.u32 %v1366_v34, %v1170_v33  ;;  %v1175_v42 = vor.u32 %v1364_v35, %v1172_v36 }
  0x1b   :  { %481 = vmatpush.bf16.msra.mxu3 %v1406_v24  ;;  %v1179_v43 = vor.u32 %v1367_v38, %v1178_v37  ;;  %v1183_v44 = vor.u32 %v1365_v39, %v1180_v40  ;;  %v1186_v45 = vld [vmem:[%s1907_s0 + $0x20] sm:$0xf]  ;;  %v1370_v46 = vld [vmem:[%s1907_s0 + $0x2c] sm:$0xf0]  ;;  %v1368_v47 = vld [vmem:[%s1907_s0 + $0x24] sm:$0xf] }
  0x1c   :  { %395 = vmatpush.bf16.msra.mxu0 %v1381_v25  ;;  %v1188_v48 = vld [vmem:[%s1907_s0 + $0x30] sm:$0xf0]  ;;  %v1194_v49 = vld [vmem:[%s1907_s0 + $0x28] sm:$0xf]  ;;  %v1371_v50 = vld [vmem:[%s1907_s0 + $0x34] sm:$0xf0]  ;;  %v1187_v53 = vor.u32 %v1370_v46, %v1186_v45 }
  0x1d   :  { %424 = vmatpush.bf16.msra.mxu1 %v1389_v26  ;;  %v1369_v51 = vld [vmem:[%s1907_s0 + $0x2c] sm:$0xf]  ;;  %v1196_v52 = vld [vmem:[%s1907_s0 + $0x38] sm:$0xf0]  ;;  %v1191_v54 = vor.u32 %v1368_v47, %v1188_v48  ;;  %v1195_v55 = vor.u32 %v1371_v50, %v1194_v49  ;;  %v1202_v57 = vld [vmem:[%s1907_s0 + $0x40] sm:$0xf] }
  0x1e   :  { %453 = vmatpush.bf16.msra.mxu2 %v1397_v27  ;;  %v1199_v56 = vor.u32 %v1369_v51, %v1196_v52  ;;  %v1374_v58 = vld [vmem:[%s1907_s0 + $0x4c] sm:$0xf0]  ;;  %v1372_v59 = vld [vmem:[%s1907_s0 + $0x44] sm:$0xf]  ;;  %v1204_v60 = vld [vmem:[%s1907_s0 + $0x50] sm:$0xf0] }
  0x1f   :  { %482 = vmatpush.bf16.msra.mxu3 %v1405_v28  ;;  %v1210_v61 = vld [vmem:[%s1907_s0 + $0x48] sm:$0xf]  ;;  %v1375_v62 = vld [vmem:[%s1907_s0 + $0x54] sm:$0xf0]  ;;  %v1373_v63 = vld [vmem:[%s1907_s0 + $0x4c] sm:$0xf]  ;;  %v1203_v1 = vor.u32 %v1374_v58, %v1202_v57  ;;  %v1207_v2 = vor.u32 %v1372_v59, %v1204_v60 }
  0x20   :  { %396 = vmatpush.bf16.msra.mxu0 %v1380_v29  ;;  %v1212_v0 = vld [vmem:[%s1907_s0 + $0x58] sm:$0xf0]  ;;  %v1211_v3 = vor.u32 %v1375_v62, %v1210_v61  ;;  %v1218_v5 = vld [vmem:[%s1907_s0 + $0x60] sm:$0xf]  ;;  %v1378_v6 = vld [vmem:[%s1907_s0 + $0x6c] sm:$0xf0] }
  0x21   :  { %425 = vmatpush.bf16.msra.mxu1 %v1388_v30  ;;  %v1215_v4 = vor.u32 %v1373_v63, %v1212_v0  ;;  %v1376_v7 = vld [vmem:[%s1907_s0 + $0x64] sm:$0xf]  ;;  %v1220_v8 = vld [vmem:[%s1907_s0 + $0x70] sm:$0xf0]  ;;  %v1226_v9 = vld [vmem:[%s1907_s0 + $0x68] sm:$0xf]  ;;  %v1219_v13 = vor.u32 %v1378_v6, %v1218_v5 }
  0x22   :  { %454 = vmatpush.bf16.msra.mxu2 %v1396_v31  ;;  %v1379_v10 = vld [vmem:[%s1907_s0 + $0x74] sm:$0xf0]  ;;  %v1377_v11 = vld [vmem:[%s1907_s0 + $0x6c] sm:$0xf]  ;;  %v1228_v12 = vld [vmem:[%s1907_s0 + $0x78] sm:$0xf0]  ;;  %v1223_v14 = vor.u32 %v1376_v7, %v1220_v8 }
  0x23   :  { %483 = vmatpush.bf16.msra.mxu3 %v1404_v32  ;;  %397 = vmatmul.bf16.vlgmr.msra.gmra.mxu0 %v1171_v41  ;;  %v1227_v15 = vor.u32 %v1379_v10, %v1226_v9  ;;  %v1231_v16 = vor.u32 %v1377_v11, %v1228_v12  ;;  %v1765_v23 = vld [vmem:[%s1909_s2] ss:$0 sm:$0xff]  ;;  %v1512_v37 = vmov 32.0   ;;  %s1515_s2 = smov [#allocation5]  }
  0x24   :  { %426 = vmatmul.bf16.vlgmr.msra.gmra.mxu1 %v1175_v42  ;;  %1428 = vrcp.f32 %v1512_v37  ;;  %s1137_s7 = sshll.u32 %s1515_s2, 4  ;;  %s1138_s7 = int_to_ptr.vmem [resolvable:$true] %s1137_s7 }
  0x25   :  { %455 = vmatmul.bf16.vlgmr.msra.gmra.mxu2 %v1179_v43 }
  0x26   :  { %484 = vmatmul.bf16.vlgmr.msra.gmra.mxu3 %v1183_v44 }
  0x2a   :  { %v1429_v46 = vpop.eup %1428 }
  0x2b   :  { %vm557_vm1 = vweird.f32 %v1429_v46 }
  0x33   :  { %402 = vmatmul.bf16.gmra.mxu0 %v1187_v53 }
  0x34   :  { %431 = vmatmul.bf16.gmra.mxu1 %v1191_v54  ;;  %v553_v54 = vmul.f32 32.0, %v1429_v46 }
  0x35   :  { %460 = vmatmul.bf16.gmra.mxu2 %v1195_v55 }
  0x36   :  { %489 = vmatmul.bf16.gmra.mxu3 %v1199_v56  ;;  %v554_v61 = vsub.f32 1.0, %v553_v54 }
  0x43   :  { %407 = vmatmul.bf16.gmra.mxu0 %v1203_v1 }
  0x44   :  { %436 = vmatmul.bf16.gmra.mxu1 %v1207_v2  ;;  %v555_v2 = vmul.f32 %v1429_v46, %v554_v61 }
  0x45   :  { %465 = vmatmul.bf16.gmra.mxu2 %v1211_v3 }
  0x46   :  { %494 = vmatmul.bf16.gmra.mxu3 %v1215_v4  ;;  %v556_v7 = vadd.f32 %v1429_v46, %v555_v2 }
  0x48   :  { %v1775_v12 = vsel %vm557_vm1, %v1429_v46, %v556_v7  ;;  %vm1105_vm1 = vcmask 0  }
  0x53   :  { %412 = vmatmul.bf16.gmra.mxu0 %v1219_v13 }
  0x54   :  { %441 = vmatmul.bf16.gmra.mxu1 %v1223_v14 }
  0x55   :  { %470 = vmatmul.bf16.gmra.mxu2 %v1227_v15 }
  0x56   :  { %499 = vmatmul.bf16.gmra.mxu3 %v1231_v16 }
  0xa0   :  { %v398_v17 = vpop.f32.mrf.mxu0 }
  0xa1   :  { %v427_v18 = vpop.f32.mrf.mxu1  ;;  %v399_v26 = vadd.f32 %v1765_v23, %v398_v17 }
  0xa3   :  { %v428_v31 = vadd.f32 %v427_v18, %v399_v26 }
  0xa8   :  { %v456_v19 = vpop.f32.mrf.mxu2  ;;  %v400_v21 = vpop.f32.mrf.mxu0 }
  0xa9   :  { %v485_v20 = vpop.f32.mrf.mxu3  ;;  %v429_v22 = vpop.f32.mrf.mxu1  ;;  %v401_v27 = vadd.f32 %v1765_v23, %v400_v21  ;;  %v457_v38 = vadd.f32 %v456_v19, %v428_v31 }
  0xab   :  { %v430_v32 = vadd.f32 %v429_v22, %v401_v27  ;;  %v486_v44 = vadd.f32 %v485_v20, %v457_v38 }
  0xad   :  { %v531_v51 = vsel %vm530_vm0, %v486_v44, 0.0 }
  0xb0   :  { %v458_v24 = vpop.f32.mrf.mxu2  ;;  %v403_v28 = vpop.f32.mrf.mxu0 }
  0xb1   :  { %v487_v25 = vpop.f32.mrf.mxu3  ;;  %v432_v29 = vpop.f32.mrf.mxu1  ;;  %v404_v30 = vadd.f32 %v1765_v23, %v403_v28  ;;  %v459_v34 = vadd.f32 %v458_v24, %v430_v32 }
  0xb3   :  { %v433_v33 = vadd.f32 %v432_v29, %v404_v30  ;;  %v488_v42 = vadd.f32 %v487_v25, %v459_v34 }
  0xb5   :  { %v532_v47 = vsel %vm530_vm0, %v488_v42, 0.0 }
  0xb6   :  { %v533_v57 = vadd.f32 %v532_v47, %v531_v51 }
  0xb8   :  { %v461_v35 = vpop.f32.mrf.mxu2  ;;  %v405_v40 = vpop.f32.mrf.mxu0 }
  0xb9   :  { %v490_v36 = vpop.f32.mrf.mxu3  ;;  %v462_v39 = vadd.f32 %v461_v35, %v433_v33  ;;  %v434_v41 = vpop.f32.mrf.mxu1  ;;  %v406_v43 = vadd.f32 %v1765_v23, %v405_v40 }
  0xbb   :  { %v491_v45 = vadd.f32 %v490_v36, %v462_v39  ;;  %v435_v48 = vadd.f32 %v434_v41, %v406_v43 }
  0xbd   :  { %v534_v52 = vsel %vm530_vm0, %v491_v45, 0.0 }
  0xbe   :  { %v535_v59 = vadd.f32 %v534_v52, %v533_v57 }
  0xc0   :  { %v463_v49 = vpop.f32.mrf.mxu2  ;;  %v408_v55 = vpop.f32.mrf.mxu0 }
  0xc1   :  { %v492_v50 = vpop.f32.mrf.mxu3  ;;  %v464_v53 = vadd.f32 %v463_v49, %v435_v48  ;;  %v437_v56 = vpop.f32.mrf.mxu1  ;;  %v409_v13 = vadd.f32 %v1765_v23, %v408_v55 }
  0xc3   :  { %v493_v58 = vadd.f32 %v492_v50, %v464_v53  ;;  %v438_v20 = vadd.f32 %v437_v56, %v409_v13 }
  0xc5   :  { %v536_v60 = vsel %vm530_vm0, %v493_v58, 0.0 }
  0xc6   :  { %v537_v62 = vadd.f32 %v536_v60, %v535_v59 }
  0xc8   :  { %v546_v63 = vrot.slane %v537_v62, 4  ;;  %v466_v0 = vpop.f32.mrf.mxu2  ;;  %v410_v3 = vpop.f32.mrf.mxu0 }
  0xc9   :  { %v495_v1 = vpop.f32.mrf.mxu3  ;;  %v439_v5 = vpop.f32.mrf.mxu1  ;;  %v411_v14 = vadd.f32 %v1765_v23, %v410_v3  ;;  %v467_v34 = vadd.f32 %v466_v0, %v438_v20 }
  0xca   :  { %v547_v4 = vadd.f32 %v546_v63, %v537_v62 }
  0xcb   :  { %v440_v21 = vadd.f32 %v439_v5, %v411_v14 }
  0xcc   :  { %v548_v6 = vrot.slane %v547_v4, 2 }
  0xce   :  { %v549_v8 = vadd.f32 %v548_v6, %v547_v4 }
  0xd0   :  { %v550_v9 = vrot.slane %v549_v8, 1  ;;  %v468_v10 = vpop.f32.mrf.mxu2  ;;  %v413_v15 = vpop.f32.mrf.mxu0 }
  0xd1   :  { %v497_v11 = vpop.f32.mrf.mxu3  ;;  %v414_v17 = vadd.f32 %v1765_v23, %v413_v15  ;;  %v442_v19 = vpop.f32.mrf.mxu1  ;;  %v469_v28 = vadd.f32 %v468_v10, %v440_v21 }
  0xd2   :  { %v551_v16 = vadd.f32 %v550_v9, %v549_v8 }
  0xd3   :  { %v443_v22 = vadd.f32 %v442_v19, %v414_v17  ;;  %v498_v41 = vadd.f32 %v497_v11, %v469_v28 }
  0xd4   :  { %v559_v18 = vmul.f32 %v1775_v12, %v551_v16 }
  0xd5   :  { %v623_v50 = vsel %vm530_vm0, %v498_v41, 0.0 }
  0xd6   :  { %v1781_v24 = vsub.f32 %v486_v44, %v559_v18  ;;  %v1783_v25 = vsub.f32 %v488_v42, %v559_v18  ;;  %v1785_v26 = vsub.f32 %v491_v45, %v559_v18  ;;  %v1787_v27 = vsub.f32 %v493_v58, %v559_v18 }
  0xd7   :  { %v496_v45 = vadd.f32 %v495_v1, %v467_v34 }
  0xd8   :  { %v568_v29 = vmul.f32 %v1781_v24, %v1781_v24  ;;  %v569_v30 = vmul.f32 %v1783_v25, %v1783_v25  ;;  %v570_v31 = vmul.f32 %v1785_v26, %v1785_v26  ;;  %v471_v32 = vpop.f32.mrf.mxu2  ;;  %v415_v36 = vpop.f32.mrf.mxu0  ;;  %v571_v37 = vmul.f32 %v1787_v27, %v1787_v27 }
  0xd9   :  { %v500_v33 = vpop.f32.mrf.mxu3  ;;  %v472_v35 = vadd.f32 %v471_v32, %v443_v22  ;;  %v416_v42 = vadd.f32 %v1765_v23, %v415_v36  ;;  %v444_v48 = vpop.f32.mrf.mxu1  ;;  %v621_v54 = vsel %vm530_vm0, %v496_v45, 0.0 }
  0xda   :  { %v584_v38 = vsel %vm530_vm0, %v568_v29, 0.0  ;;  %v585_v39 = vsel %vm530_vm0, %v569_v30, 0.0  ;;  %v587_v43 = vsel %vm530_vm0, %v570_v31, 0.0  ;;  %v589_v47 = vsel %vm530_vm0, %v571_v37, 0.0 }
  0xdb   :  { %v586_v40 = vadd.f32 %v585_v39, %v584_v38  ;;  %v501_v46 = vadd.f32 %v500_v33, %v472_v35  ;;  %v445_v51 = vadd.f32 %v444_v48, %v416_v42  ;;  %v624_v23 = vadd.f32 %v623_v50, %v621_v54  ;;  %v1831_v39 = vld [vmem:[%s1910_s3] ss:$0 sm:$0xff]  ;;  %s1139_s3 = sshll.u32 %s1915_s8, 4  ;;  %s1140_s3 = int_to_ptr.hbm [resolvable:$true] %s1139_s3 }
  0xdd   :  { %v588_v44 = vadd.f32 %v587_v43, %v586_v40  ;;  %v625_v55 = vsel %vm530_vm0, %v501_v46, 0.0 }
  0xde   :  { %v626_v60 = vadd.f32 %v625_v55, %v624_v23  ;;  %v851_v23 = vld [vmem:[%s1912_s5 + $0x8] sm:$0xff] }
  0xdf   :  { %v590_v49 = vadd.f32 %v589_v47, %v588_v44  ;;  %v1838_v44 = vld [vmem:[%s1911_s4] ss:$0 sm:$0xff]  ;;  %s1516_s4 = smov [#allocation7]  }
  0xe0   :  { %v473_v52 = vpop.f32.mrf.mxu2  ;;  %s1148_s29 = sshll.u32 %s1516_s4, 4  ;;  %s1149_s29 = int_to_ptr.vmem [resolvable:$true] %s1148_s29 }
  0xe1   :  { %v599_v53 = vrot.slane %v590_v49, 4  ;;  %v474_v56 = vadd.f32 %v473_v52, %v445_v51  ;;  %v502_v57 = vpop.f32.mrf.mxu3 }
  0xe3   :  { %v600_v58 = vadd.f32 %v599_v53, %v590_v49  ;;  %v503_v59 = vadd.f32 %v502_v57, %v474_v56  ;;  %v850_v56 = vld [vmem:[%s1912_s5] sm:$0xff] }
  0xe5   :  { %v601_v61 = vrot.slane %v600_v58, 2  ;;  %v627_v62 = vsel %vm530_vm0, %v503_v59, 0.0 }
  0xe6   :  { %v628_v63 = vadd.f32 %v627_v62, %v626_v60 }
  0xe7   :  { %v602_v0 = vadd.f32 %v601_v61, %v600_v58 }
  0xe8   :  { %v629_v1 = vrot.slane %v628_v63, 4 }
  0xe9   :  { %v603_v2 = vrot.slane %v602_v0, 1 }
  0xea   :  { %v630_v3 = vadd.f32 %v629_v1, %v628_v63 }
  0xeb   :  { %v604_v4 = vadd.f32 %v603_v2, %v602_v0 }
  0xec   :  { %v631_v5 = vrot.slane %v630_v3, 2 }
  0xed   :  { %v605_v6 = vmul.f32 %v604_v4, %v1775_v12 }
  0xee   :  { %v632_v7 = vadd.f32 %v631_v5, %v630_v3  ;;  %v852_v5 = vld [vmem:[%s1912_s5 + $0x10] sm:$0xff] }
  0xef   :  { %v706_v8 = vadd.f32 1e-05, %v605_v6  ;;  %v853_v6 = vld [vmem:[%s1912_s5 + $0x18] sm:$0xff] }
  0xf0   :  { %v633_v9 = vrot.slane %v632_v7, 1 }
  0xf1   :  { %1430 = vrsqrt.f32 %v706_v8  ;;  %vm720_vm3 = vweird.f32 %v706_v8 }
  0xf2   :  { %v634_v10 = vadd.f32 %v633_v9, %v632_v7 }
  0xf4   :  { %v635_v11 = vmul.f32 %v634_v10, %v1775_v12 }
  0xf6   :  { %v1808_v13 = vsub.f32 %v496_v45, %v635_v11  ;;  %v1810_v14 = vsub.f32 %v498_v41, %v635_v11  ;;  %v1812_v15 = vsub.f32 %v501_v46, %v635_v11  ;;  %v1814_v16 = vsub.f32 %v503_v59, %v635_v11 }
  0xf7   :  { %v1431_v17 = vpop.eup %1430 }
  0xf8   :  { %v715_v18 = vmul.f32 %v1431_v17, %v706_v8  ;;  %v648_v19 = vmul.f32 %v1808_v13, %v1808_v13  ;;  %v649_v20 = vmul.f32 %v1810_v14, %v1810_v14  ;;  %v650_v21 = vmul.f32 %v1812_v15, %v1812_v15 }
  0xf9   :  { %v651_v28 = vmul.f32 %v1814_v16, %v1814_v16  ;;  %vm721_vm2 = vweird.f32 %v1431_v17 }
  0xfa   :  { %v716_v22 = vmul.f32 %v1431_v17, %v715_v18  ;;  %v667_v29 = vsel %vm530_vm0, %v648_v19, 0.0  ;;  %v669_v30 = vsel %vm530_vm0, %v649_v20, 0.0  ;;  %v671_v33 = vsel %vm530_vm0, %v650_v21, 0.0  ;;  %vm722_vm4 = vmor %vm720_vm3, %vm721_vm2 }
  0xfb   :  { %v670_v31 = vadd.f32 %v669_v30, %v667_v29  ;;  %v673_v36 = vsel %vm530_vm0, %v651_v28, 0.0 }
  0xfc   :  { %v717_v32 = vmul.f32 0.5, %v716_v22 }
  0xfd   :  { %v672_v34 = vadd.f32 %v671_v33, %v670_v31 }
  0xfe   :  { %v718_v35 = vsub.f32 1.5, %v717_v32 }
  0xff   :  { %v674_v37 = vadd.f32 %v673_v36, %v672_v34 }
 0x100   :  { %v719_v38 = vmul.f32 %v1431_v17, %v718_v35 }
 0x101   :  { %v675_v40 = vrot.slane %v674_v37, 4 }
 0x102   :  { %v723_v41 = vsel %vm722_vm4, %v1431_v17, %v719_v38 }
 0x103   :  { %v796_v42 = vmul.f32 %v723_v41, %v1785_v26  ;;  %v797_v43 = vmul.f32 %v723_v41, %v1787_v27  ;;  %v676_v45 = vadd.f32 %v675_v40, %v674_v37  ;;  %v794_v46 = vmul.f32 %v723_v41, %v1781_v24 }
 0x104   :  { %v795_v47 = vmul.f32 %v723_v41, %v1783_v25 }
 0x105   :  { %v809_v48 = vmul.f32 %v1831_v39, %v797_v43  ;;  %v677_v49 = vrot.slane %v676_v45, 2  ;;  %v806_v50 = vmul.f32 %v1831_v39, %v794_v46  ;;  %v808_v51 = vmul.f32 %v1831_v39, %v796_v42 }
 0x106   :  { %v807_v26 = vmul.f32 %v1831_v39, %v795_v47 }
 0x107   :  { %v821_v27 = vadd.f32 %v1838_v44, %v809_v48  ;;  %v678_v52 = vadd.f32 %v677_v49, %v676_v45  ;;  %v818_v53 = vadd.f32 %v1838_v44, %v806_v50  ;;  %v820_v54 = vadd.f32 %v1838_v44, %v808_v51  ;;  %v856_v51 = vld [vmem:[%s1912_s5 + $0x30] sm:$0xff] }
 0x108   :  { %v819_v24 = vadd.f32 %v1838_v44, %v807_v26  ;;  %v857_v26 = vld [vmem:[%s1912_s5 + $0x38] sm:$0xff] }
 0x109   :  { %v679_v55 = vrot.slane %v678_v52, 1  ;;  %vm826_vm5 = vcmp.gt.f32.partialorder %v818_v53, 0.0  ;;  %v834_v25 = vmul.f32 0.2, %v818_v53  ;;  %vm828_vm7 = vcmp.gt.f32.partialorder %v820_v54, 0.0 }
 0x10a   :  { %vm827_vm6 = vcmp.gt.f32.partialorder %v819_v24, 0.0  ;;  %v835_v57 = vmul.f32 0.2, %v819_v24  ;;  %v836_v58 = vmul.f32 0.2, %v820_v54  ;;  %vm829_vm8 = vcmp.gt.f32.partialorder %v821_v27, 0.0 }
 0x10b   :  { %v680_v59 = vadd.f32 %v679_v55, %v678_v52  ;;  %v842_v60 = vsel %vm826_vm5, %v818_v53, %v834_v25  ;;  %v837_v61 = vmul.f32 0.2, %v821_v27 }
 0x10c   :  { %v843_v62 = vsel %vm827_vm6, %v819_v24, %v835_v57  ;;  %v858_v63 = vmul.f32 %v850_v56, %v842_v60  ;;  %v844_v3 = vsel %vm828_vm7, %v820_v54, %v836_v58 }
 0x10d   :  { %v681_v0 = vmul.f32 %v680_v59, %v1775_v12  ;;  %v859_v1 = vmul.f32 %v851_v23, %v843_v62  ;;  %v845_v4 = vsel %vm829_vm8, %v821_v27, %v837_v61  ;;  %v860_v10 = vmul.f32 %v852_v5, %v844_v3 }
 0x10e   :  { %v898_v2 = vsel %vm530_vm0, %v858_v63, 0.0  ;;  %v861_v12 = vmul.f32 %v853_v6, %v845_v4 }
 0x10f   :  { %v710_v7 = vadd.f32 1e-05, %v681_v0  ;;  %v899_v8 = vsel %vm530_vm0, %v859_v1, 0.0  ;;  %v952_v11 = vsel %vm530_vm0, %v860_v10, 0.0 }
 0x110   :  { %v900_v9 = vadd.f32 %v899_v8, %v898_v2  ;;  %v954_v17 = vsel %vm530_vm0, %v861_v12, 0.0 }
 0x111   :  { %1432 = vrsqrt.f32 %v710_v7  ;;  %v955_v20 = vadd.f32 %v954_v17, %v952_v11  ;;  %vm760_vm10 = vweird.f32 %v710_v7 }
 0x112   :  { %913 = vadd.xlane.f32.xlu0 %v900_v9 }
 0x117   :  { %v1433_v18 = vpop.eup %1432 }
 0x118   :  { %v755_v19 = vmul.f32 %v1433_v18, %v710_v7  ;;  %vm761_vm9 = vweird.f32 %v1433_v18 }
 0x119   :  { %vm762_vm11 = vmor %vm760_vm10, %vm761_vm9 }
 0x11a   :  { %v756_v21 = vmul.f32 %v1433_v18, %v755_v19  ;;  %964 = vadd.xlane.f32.xlu0 %v955_v20 }
 0x11c   :  { %v757_v22 = vmul.f32 0.5, %v756_v21 }
 0x11e   :  { %v758_v28 = vsub.f32 1.5, %v757_v22 }
 0x120   :  { %v759_v29 = vmul.f32 %v1433_v18, %v758_v28 }
 0x122   :  { %v763_v30 = vsel %vm762_vm11, %v1433_v18, %v759_v29  ;;  %v1513_v29 = vmov 2.0  }
 0x123   :  { %v800_v31 = vmul.f32 %v763_v30, %v1812_v15  ;;  %v801_v32 = vmul.f32 %v763_v30, %v1814_v16  ;;  %v798_v33 = vmul.f32 %v763_v30, %v1808_v13  ;;  %v799_v34 = vmul.f32 %v763_v30, %v1810_v14  ;;  %v854_v13 = vld [vmem:[%s1912_s5 + $0x20] sm:$0xff]  ;;  %v855_v14 = vld [vmem:[%s1912_s5 + $0x28] sm:$0xff] }
 0x124   :  { %1434 = vrcp.f32 %v1513_v29 }
 0x125   :  { %v813_v35 = vmul.f32 %v1831_v39, %v801_v32  ;;  %v810_v36 = vmul.f32 %v1831_v39, %v798_v33  ;;  %v811_v37 = vmul.f32 %v1831_v39, %v799_v34  ;;  %v812_v38 = vmul.f32 %v1831_v39, %v800_v31  ;;  %v923_v33 = vld [vmem:[#allocation2] sm:$0x1] }
 0x127   :  { %v825_v40 = vadd.f32 %v1838_v44, %v813_v35  ;;  %v822_v41 = vadd.f32 %v1838_v44, %v810_v36  ;;  %v823_v15 = vadd.f32 %v1838_v44, %v811_v37  ;;  %v824_v16 = vadd.f32 %v1838_v44, %v812_v38 }
 0x129   :  { %vm830_vm12 = vcmp.gt.f32.partialorder %v822_v41, 0.0  ;;  %vm831_vm13 = vcmp.gt.f32.partialorder %v823_v15, 0.0  ;;  %v838_v42 = vmul.f32 0.2, %v822_v41  ;;  %v839_v39 = vmul.f32 0.2, %v823_v15 }
 0x12a   :  { %vm832_vm14 = vcmp.gt.f32.partialorder %v824_v16, 0.0  ;;  %vm833_vm15 = vcmp.gt.f32.partialorder %v825_v40, 0.0  ;;  %v840_v43 = vmul.f32 0.2, %v824_v16  ;;  %v841_v45 = vmul.f32 0.2, %v825_v40  ;;  %v1435_v30 = vpop.eup %1434 }
 0x12b   :  { %v846_v46 = vsel %vm830_vm12, %v822_v41, %v838_v42  ;;  %v847_v47 = vsel %vm831_vm13, %v823_v15, %v839_v39  ;;  %v1098_v31 = vmul.f32 2.0, %v1435_v30 }
 0x12c   :  { %v862_v48 = vmul.f32 %v854_v13, %v846_v46  ;;  %v863_v44 = vmul.f32 %v855_v14, %v847_v47  ;;  %v848_v49 = vsel %vm832_vm14, %v824_v16, %v840_v43  ;;  %v849_v50 = vsel %vm833_vm15, %v825_v40, %v841_v45 }
 0x12d   :  { %v864_v54 = vmul.f32 %v856_v51, %v848_v49  ;;  %v865_v24 = vmul.f32 %v857_v26, %v849_v50  ;;  %v1099_v34 = vsub.f32 1.0, %v1098_v31 }
 0x12e   :  { %v1014_v27 = vsel %vm530_vm0, %v862_v48, 0.0  ;;  %v1016_v52 = vsel %vm530_vm0, %v863_v44, 0.0 }
 0x12f   :  { %v1017_v53 = vadd.f32 %v1016_v52, %v1014_v27  ;;  %v1076_v55 = vsel %vm530_vm0, %v864_v54, 0.0  ;;  %v1078_v25 = vsel %vm530_vm0, %v865_v24, 0.0  ;;  %v1100_v36 = vmul.f32 %v1435_v30, %v1099_v34 }
 0x130   :  { %v1079_v56 = vadd.f32 %v1078_v25, %v1076_v55  ;;  %vm1102_vm0 = vweird.f32 %v1435_v30 }
 0x131   :  { %1022 = vadd.xlane.f32.xlu1 %v1017_v53  ;;  %v1101_v41 = vadd.f32 %v1435_v30, %v1100_v36 }
 0x133   :  { %v1103_v14 = vsel %vm1102_vm0, %v1435_v30, %v1101_v41 }
 0x139   :  { %1080 = vadd.xlane.f32.xlu1 %v1079_v56 }
 0x185   :  { %v914_v23 = vpop.xlane.xlu0 %913 }
 0x186   :  { %v915_v57 = vrot.slane %v914_v23, 4 }
 0x188   :  { %v916_v58 = vadd.f32 %v915_v57, %v914_v23 }
 0x18a   :  { %v917_v59 = vrot.slane %v916_v58, 2 }
 0x18c   :  { %v918_v60 = vadd.f32 %v917_v59, %v916_v58 }
 0x18d   :  { %v965_v61 = vpop.xlane.xlu0 %964 }
 0x18e   :  { %v966_v62 = vrot.slane %v965_v61, 4  ;;  %v919_v63 = vrot.slane %v918_v60, 1 }
 0x190   :  { %v967_v0 = vadd.f32 %v966_v62, %v965_v61  ;;  %v920_v1 = vadd.f32 %v919_v63, %v918_v60 }
 0x192   :  { %v968_v2 = vrot.slane %v967_v0, 2  ;;  %1412 = vpush %v920_v1 }
 0x194   :  { %v969_v3 = vadd.f32 %v968_v2, %v967_v0 }
 0x196   :  { %v970_v4 = vrot.slane %v969_v3, 1 }
 0x198   :  { %v971_v5 = vadd.f32 %v970_v4, %v969_v3 }
 0x19a   :  { %1414 = vpush %v971_v5 }
 0x1a4   :  { %v1023_v6 = vpop.xlane.xlu1 %1022 }
 0x1a5   :  { %v1024_v7 = vrot.slane %v1023_v6, 4 }
 0x1a7   :  { %v1025_v8 = vadd.f32 %v1024_v7, %v1023_v6 }
 0x1a9   :  { %v1026_v9 = vrot.slane %v1025_v8, 2 }
 0x1ab   :  { %v1027_v10 = vadd.f32 %v1026_v9, %v1025_v8 }
 0x1ac   :  { %v1081_v12 = vpop.xlane.xlu1 %1080 }
 0x1ad   :  { %v1082_v11 = vrot.slane %v1081_v12, 4  ;;  %v1028_v17 = vrot.slane %v1027_v10, 1 }
 0x1af   :  { %v1083_v18 = vadd.f32 %v1082_v11, %v1081_v12  ;;  %v1029_v19 = vadd.f32 %v1028_v17, %v1027_v10 }
 0x1b1   :  { %v1084_v20 = vrot.slane %v1083_v18, 2  ;;  %1416 = vpush %v1029_v19 }
 0x1b3   :  { %v1085_v21 = vadd.f32 %v1084_v20, %v1083_v18 }
 0x1b5   :  { %v1086_v22 = vrot.slane %v1085_v21, 1 }
 0x1b7   :  { %v1087_v28 = vadd.f32 %v1086_v22, %v1085_v21 }
 0x1b9   :  { %1418 = vpush %v1087_v28 }
 0x1c3   :  { %s1413_s5 = spop %1412 }
 0x1c4   :  { %v922_v32 = vstv %s1413_s5 }
 0x1c5   :  { %v924_v35 = vadd.f32 %v923_v33, %v922_v32 }
 0x1c7   :  { %v1360_v38 = vadd.f32 -1.0, %v924_v35 }
 0x1c9   :  { %v1092_v16 = vmul.f32 %v1360_v38, %v1360_v38 }
 0x1cb   :  { %s1415_s20 = spop %1414 }
 0x1cc   :  { %v973_v37 = vstv %s1415_s20 }
 0x1cd   :  { %v974_v40 = vadd.f32 %v973_v37, %v923_v33 }
 0x1cf   :  { %v1361_v15 = vadd.f32 -1.0, %v974_v40 }
 0x1d1   :  { %v1095_v13 = vmul.f32 %v1361_v15, %v1361_v15 }
 0x1d3   :  { %v1096_v42 = vadd.f32 %v1095_v13, %v1092_v16 }
 0x1d5   :  { %v1104_v39 = vmul.f32 %v1103_v14, %v1096_v42 }
 0x1d7   :  { %1106 = vst.msk [vmem:[#allocation3] sm:$0x1] %vm1105_vm1, %v1104_v39 }
 0x1d8   :  { %1131 = dma.vmem_to_hbm [thread:$0]  %s1127_s22, 16, %s1129_s25, [#allocation4]  }
 0x1e2   :  { %s1417_s26 = spop %1416 }
 0x1e3   :  { %v1031_v43 = vstv %s1417_s26 }
 0x1e4   :  { %v1032_v45 = vadd.f32 %v1031_v43, %v923_v33 }
 0x1e6   :  { %v1362_v47 = vadd.f32 -1.0, %v1032_v45  ;;  %v1107_v44 = vmul.f32 %v1032_v45, %v1032_v45 }
 0x1e8   :  { %v1114_v51 = vmul.f32 %v1362_v47, %v1362_v47 }
 0x1ea   :  { %s1419_s0 = spop %1418 }
 0x1eb   :  { %v1089_v46 = vstv %s1419_s0 }
 0x1ec   :  { %v1090_v48 = vadd.f32 %v1089_v46, %v923_v33 }
 0x1ee   :  { %v1109_v49 = vmul.f32 %v1090_v48, %v1090_v48  ;;  %v1363_v50 = vadd.f32 -1.0, %v1090_v48 }
 0x1f0   :  { %v1110_v26 = vadd.f32 %v1109_v49, %v1107_v44  ;;  %v1117_v27 = vmul.f32 %v1363_v50, %v1363_v50 }
 0x1f2   :  { %v1118_v52 = vadd.f32 %v1117_v27, %v1114_v51  ;;  %v1111_v53 = vmul.f32 %v1110_v26, %v1103_v14 }
 0x1f4   :  { %1112 = vst.msk [vmem:[#allocation5] sm:$0x1] %vm1105_vm1, %v1111_v53  ;;  %v1119_v54 = vmul.f32 %v1118_v52, %v1103_v14 }
 0x1f5   :  { %1142 = dma.vmem_to_hbm [thread:$0]  %s1138_s7, 16, %s1140_s3, [#allocation6]  }
 0x1f6   :  { %1120 = vst.msk [vmem:[#allocation7] sm:$0x1] %vm1105_vm1, %v1119_v54 }
 0x1f7   :  { %1153 = dma.vmem_to_hbm [thread:$0]  %s1149_s29, 16, %s1151_s11, [#allocation6]  }
 0x1f8   :  { %1508 = dma.done.wait [#allocation4], 16  }
 0x1f9   :  { %1509 = vsyncadd [#allocation4], 4294967280 }
 0x1fa   :  { %1510 = dma.done.wait [#allocation6], 32  }
 0x1fb   :  { %1511 = vsyncadd [#allocation6], 4294967264 }
 0x1fc   :  { %1166 = vsyncpa [#allocation4], 1 }
 0x1fd   :  { %1167 = vsyncpa [#allocation6], 1 }

// kernel: pixel_dt_gan_forward.14
= control target key start
LH: loop header
LB: loop body
LE: loop exit
PB: predicated region body
PF: predicated region fallthrough
CT: control target
= control target key end

     0   :  { %s670_s18 = smov 0   ;;  %s769_s0 = inlined_call_operand.vmem [shape: bf16[256,64], index: 0, kind: input, shape index: {}]   ;;  %s770_s1 = inlined_call_operand.vmem [shape: bf16[64,32], index: 1, kind: input, shape index: {}]   ;;  %s771_s2 = inlined_call_operand.vmem [shape: f32[1,32], index: 2, kind: input, shape index: {}]   ;;  %s772_s3 = inlined_call_operand.vmem [shape: f32[1,32], index: 3, kind: input, shape index: {}]   ;;  %s773_s4 = inlined_call_operand.vmem [shape: f32[1,32], index: 4, kind: input, shape index: {}]   ;;  %s774_s5 = inlined_call_operand.vmem [shape: bf16[256,32], index: 5, kind: output, shape index: {}]  }
   0x1 LB: > { %s532_s19 = sadd.s32 4294967295, %s638_s18   ;;  %p536_p0 = scmp.ge.s32.totalorder %s638_s18, 1  ;;  %s638_s18 = sphi %s670_s18, %s15_s18  }
   0x2   : > { %p188_p1 = scmp.lt.s32.totalorder %s638_s18, 3 }
   0x4   : > { %p189_p2 = pnand %p536_p0, %p188_p1 }
   0x5   : > { %s537_s20 = sshll.u32 (!%p189_p2), %s532_s19, 4 }
   0x6   : > { %192 = sbr.rel (%p189_p2) target bundleno = 193 (0xc1), region = 40  ;;  %p217_p3 = scmp.lt.s32.totalorder (!%p189_p2), %s537_s20, 31 }
   0xb   : > { %v610_v0 = vld [vmem:[%s770_s1 + $0x18] sm:$0xff]  ;;  %v609_v1 = vld [vmem:[%s770_s1 + $0x10] sm:$0xff]  ;;  %s776_s20 = smov (!%p217_p3, %s537_s20), 31  ;;  %v608_v2 = vld [vmem:[%s770_s1 + $0x8] sm:$0xff]  ;;  %vm321_vm0 = vcmask 523264   ;;  %vm459_vm3 = vcmask 257024  }
   0xc   : > { %350 = vmatpush.bf16.msra.mxu0 %v610_v0  ;;  %611 = vmatpush.bf16.msra.mxu1 %v610_v0  ;;  %s538_s25 = sshll.u32 %s776_s20, 2  ;;  %v607_v3 = vld [vmem:[%s770_s1] sm:$0xff] }
   0xd   : > { %612 = vmatpush.bf16.msra.mxu2 %v610_v0  ;;  %613 = vmatpush.bf16.msra.mxu3 %v610_v0  ;;  %s220_s30 = scalar_lea.vmem %s769_s0, %s538_s25  ;;  %v709_v12 = vld [vmem:[%s771_s2] ss:$0 sm:$0xff]  ;;  %s718_s10 = scalar_lea.vmem %s774_s5, %s538_s25 }
   0xe   : > { %v599_v4 = vld [vmem:[%s220_s30] sm:$0xff]  ;;  %v601_v5 = vld [vmem:[%s220_s30 + $0x10] sm:$0xff]  ;;  %v600_v8 = vld [vmem:[%s220_s30 + $0x8] sm:$0xff] }
   0xf   : > { %v603_v6 = vld [vmem:[%s220_s30 + $0x20] sm:$0xff]  ;;  %v605_v7 = vld [vmem:[%s220_s30 + $0x30] sm:$0xff]  ;;  %v602_v9 = vld [vmem:[%s220_s30 + $0x18] sm:$0xff] }
  0x10   : > { %351 = vmatpush.bf16.msra.mxu0 %v609_v1  ;;  %614 = vmatpush.bf16.msra.mxu1 %v609_v1  ;;  %v604_v10 = vld [vmem:[%s220_s30 + $0x28] sm:$0xff]  ;;  %v606_v11 = vld [vmem:[%s220_s30 + $0x38] sm:$0xff] }
  0x11   : > { %615 = vmatpush.bf16.msra.mxu2 %v609_v1  ;;  %616 = vmatpush.bf16.msra.mxu3 %v609_v1 }
  0x14   : > { %352 = vmatpush.bf16.msra.mxu0 %v608_v2  ;;  %617 = vmatpush.bf16.msra.mxu1 %v608_v2 }
  0x15   : > { %618 = vmatpush.bf16.msra.mxu2 %v608_v2  ;;  %619 = vmatpush.bf16.msra.mxu3 %v608_v2 }
  0x18   : > { %353 = vmatpush.bf16.msra.mxu0 %v607_v3  ;;  %620 = vmatpush.bf16.msra.mxu1 %v607_v3 }
  0x19   : > { %621 = vmatpush.bf16.msra.mxu2 %v607_v3  ;;  %622 = vmatpush.bf16.msra.mxu3 %v607_v3 }
  0x1b   : > { %589 = vmatmul.msk.bf16.vlgmr.msra.gmra.mxu0 %vm321_vm0, %v599_v4  ;;  %591 = vmatmul.msk.bf16.vlgmr.msra.gmra.mxu1 %vm321_vm0, %v601_v5 }
  0x1c   : > { %593 = vmatmul.msk.bf16.vlgmr.msra.gmra.mxu2 %vm321_vm0, %v603_v6  ;;  %595 = vmatmul.msk.bf16.vlgmr.msra.gmra.mxu3 %vm321_vm0, %v605_v7 }
  0x2b   : > { %590 = vmatmul.msk.bf16.gmra.mxu0 %vm321_vm0, %v600_v8  ;;  %592 = vmatmul.msk.bf16.gmra.mxu1 %vm321_vm0, %v602_v9 }
  0x2c   : > { %594 = vmatmul.msk.bf16.gmra.mxu2 %vm321_vm0, %v604_v10  ;;  %596 = vmatmul.msk.bf16.gmra.mxu3 %vm321_vm0, %v606_v11 }
  0x98   : > { %v355_v13 = vpop.f32.mrf.mxu0  ;;  %v365_v14 = vpop.f32.mrf.mxu1 }
  0x99   : > { %v356_v15 = vadd.f32 %v709_v12, %v355_v13  ;;  %v366_v16 = vadd.f32 %v709_v12, %v365_v14 }
  0x9b   : > { %vm395_vm1 = vcmp.gt.f32.partialorder %v356_v15, 0.0  ;;  %v411_v17 = vmul.f32 0.2, %v356_v15  ;;  %vm399_vm2 = vcmp.gt.f32.partialorder %v366_v16, 0.0  ;;  %v415_v18 = vmul.f32 0.2, %v366_v16 }
  0x9d   : > { %v427_v19 = vsel %vm395_vm1, %v356_v15, %v411_v17  ;;  %v431_v20 = vsel %vm399_vm2, %v366_v16, %v415_v18 }
  0x9e   : > { %v443_v21 = vpack.c.bf16 %v427_v19, %v427_v19  ;;  %v447_v22 = vpack.c.bf16 %v431_v20, %v431_v20 }
  0x9f   : > { %v375_v23 = vpop.f32.mrf.mxu2  ;;  %v385_v24 = vpop.f32.mrf.mxu3 }
  0xa0   : > { %460 = vst.msk [vmem:[%s718_s10] sm:$0xf] %vm459_vm3, %v443_v21  ;;  %v376_v25 = vadd.f32 %v709_v12, %v375_v23  ;;  %v386_v26 = vadd.f32 %v709_v12, %v385_v24  ;;  %v357_v27 = vpop.f32.mrf.mxu0  ;;  %v367_v28 = vpop.f32.mrf.mxu1 }
  0xa1   : > { %464 = vst.msk [vmem:[%s718_s10 + $0x10] sm:$0xf] %vm459_vm3, %v447_v22  ;;  %v358_v29 = vadd.f32 %v709_v12, %v357_v27  ;;  %v368_v30 = vadd.f32 %v709_v12, %v367_v28 }
  0xa2   : > { %vm403_vm4 = vcmp.gt.f32.partialorder %v376_v25, 0.0  ;;  %v419_v31 = vmul.f32 0.2, %v376_v25  ;;  %vm407_vm5 = vcmp.gt.f32.partialorder %v386_v26, 0.0  ;;  %v423_v32 = vmul.f32 0.2, %v386_v26 }
  0xa3   : > { %vm396_vm6 = vcmp.gt.f32.partialorder %v358_v29, 0.0  ;;  %v412_v33 = vmul.f32 0.2, %v358_v29  ;;  %vm400_vm7 = vcmp.gt.f32.partialorder %v368_v30, 0.0  ;;  %v416_v34 = vmul.f32 0.2, %v368_v30 }
  0xa4   : > { %v435_v35 = vsel %vm403_vm4, %v376_v25, %v419_v31  ;;  %v439_v36 = vsel %vm407_vm5, %v386_v26, %v423_v32 }
  0xa5   : > { %v451_v37 = vpack.c.bf16 %v435_v35, %v435_v35  ;;  %v455_v38 = vpack.c.bf16 %v439_v36, %v439_v36  ;;  %v428_v39 = vsel %vm396_vm6, %v358_v29, %v412_v33  ;;  %v432_v40 = vsel %vm400_vm7, %v368_v30, %v416_v34 }
  0xa6   : > { %v444_v41 = vpack.c.bf16 %v428_v39, %v428_v39  ;;  %v448_v42 = vpack.c.bf16 %v432_v40, %v432_v40 }
  0xa7   : > { %468 = vst.msk [vmem:[%s718_s10 + $0x20] sm:$0xf] %vm459_vm3, %v451_v37  ;;  %v377_v43 = vpop.f32.mrf.mxu2  ;;  %v387_v44 = vpop.f32.mrf.mxu3 }
  0xa8   : > { %472 = vst.msk [vmem:[%s718_s10 + $0x30] sm:$0xf] %vm459_vm3, %v455_v38  ;;  %v378_v45 = vadd.f32 %v709_v12, %v377_v43  ;;  %v388_v46 = vadd.f32 %v709_v12, %v387_v44  ;;  %v360_v47 = vpop.f32.mrf.mxu0  ;;  %v370_v48 = vpop.f32.mrf.mxu1 }
  0xa9   : > { %461 = vst.msk [vmem:[%s718_s10 + $0x4] sm:$0xf] %vm459_vm3, %v444_v41  ;;  %v361_v49 = vadd.f32 %v709_v12, %v360_v47  ;;  %v371_v50 = vadd.f32 %v709_v12, %v370_v48 }
  0xaa   : > { %465 = vst.msk [vmem:[%s718_s10 + $0x14] sm:$0xf] %vm459_vm3, %v448_v42  ;;  %vm404_vm8 = vcmp.gt.f32.partialorder %v378_v45, 0.0  ;;  %v420_v51 = vmul.f32 0.2, %v378_v45  ;;  %vm408_vm9 = vcmp.gt.f32.partialorder %v388_v46, 0.0 }
  0xab   : > { %v424_v52 = vmul.f32 0.2, %v388_v46  ;;  %vm397_vm10 = vcmp.gt.f32.partialorder %v361_v49, 0.0  ;;  %v413_v53 = vmul.f32 0.2, %v361_v49  ;;  %vm401_vm11 = vcmp.gt.f32.partialorder %v371_v50, 0.0 }
  0xac   : > { %v436_v54 = vsel %vm404_vm8, %v378_v45, %v420_v51  ;;  %v417_v55 = vmul.f32 0.2, %v371_v50 }
  0xad   : > { %v452_v56 = vpack.c.bf16 %v436_v54, %v436_v54  ;;  %v440_v57 = vsel %vm408_vm9, %v388_v46, %v424_v52  ;;  %v429_v58 = vsel %vm397_vm10, %v361_v49, %v413_v53 }
  0xae   : > { %v456_v59 = vpack.c.bf16 %v440_v57, %v440_v57  ;;  %v445_v60 = vpack.c.bf16 %v429_v58, %v429_v58  ;;  %v433_v61 = vsel %vm401_vm11, %v371_v50, %v417_v55 }
  0xaf   : > { %469 = vst.msk [vmem:[%s718_s10 + $0x24] sm:$0xf] %vm459_vm3, %v452_v56  ;;  %v449_v62 = vpack.c.bf16 %v433_v61, %v433_v61  ;;  %v380_v63 = vpop.f32.mrf.mxu2  ;;  %v390_v0 = vpop.f32.mrf.mxu3 }
  0xb0   : > { %473 = vst.msk [vmem:[%s718_s10 + $0x34] sm:$0xf] %vm459_vm3, %v456_v59  ;;  %v381_v1 = vadd.f32 %v709_v12, %v380_v63  ;;  %v391_v2 = vadd.f32 %v709_v12, %v390_v0  ;;  %v362_v3 = vpop.f32.mrf.mxu0  ;;  %v372_v4 = vpop.f32.mrf.mxu1 }
  0xb1   : > { %462 = vst.msk [vmem:[%s718_s10 + $0x8] sm:$0xf] %vm459_vm3, %v445_v60  ;;  %v363_v5 = vadd.f32 %v709_v12, %v362_v3  ;;  %v373_v6 = vadd.f32 %v709_v12, %v372_v4 }
  0xb2   : > { %466 = vst.msk [vmem:[%s718_s10 + $0x18] sm:$0xf] %vm459_vm3, %v449_v62  ;;  %vm405_vm12 = vcmp.gt.f32.partialorder %v381_v1, 0.0  ;;  %v421_v7 = vmul.f32 0.2, %v381_v1  ;;  %vm409_vm13 = vcmp.gt.f32.partialorder %v391_v2, 0.0 }
  0xb3   : > { %v425_v8 = vmul.f32 0.2, %v391_v2  ;;  %vm398_vm14 = vcmp.gt.f32.partialorder %v363_v5, 0.0  ;;  %v414_v9 = vmul.f32 0.2, %v363_v5  ;;  %vm402_vm15 = vcmp.gt.f32.partialorder %v373_v6, 0.0 }
  0xb4   : > { %v437_v10 = vsel %vm405_vm12, %v381_v1, %v421_v7  ;;  %v418_v11 = vmul.f32 0.2, %v373_v6 }
  0xb5   : > { %v453_v13 = vpack.c.bf16 %v437_v10, %v437_v10  ;;  %v441_v14 = vsel %vm409_vm13, %v391_v2, %v425_v8  ;;  %v430_v15 = vsel %vm398_vm14, %v363_v5, %v414_v9 }
  0xb6   : > { %v457_v16 = vpack.c.bf16 %v441_v14, %v441_v14  ;;  %v446_v17 = vpack.c.bf16 %v430_v15, %v430_v15  ;;  %v434_v18 = vsel %vm402_vm15, %v373_v6, %v418_v11 }
  0xb7   : > { %470 = vst.msk [vmem:[%s718_s10 + $0x28] sm:$0xf] %vm459_vm3, %v453_v13  ;;  %v450_v19 = vpack.c.bf16 %v434_v18, %v434_v18  ;;  %v382_v20 = vpop.f32.mrf.mxu2  ;;  %v392_v21 = vpop.f32.mrf.mxu3 }
  0xb8   : > { %474 = vst.msk [vmem:[%s718_s10 + $0x38] sm:$0xf] %vm459_vm3, %v457_v16  ;;  %v383_v22 = vadd.f32 %v709_v12, %v382_v20  ;;  %v393_v23 = vadd.f32 %v709_v12, %v392_v21 }
  0xb9   : > { %463 = vst.msk [vmem:[%s718_s10 + $0xc] sm:$0xf] %vm459_vm3, %v446_v17 }
  0xba   : > { %467 = vst.msk [vmem:[%s718_s10 + $0x1c] sm:$0xf] %vm459_vm3, %v450_v19  ;;  %vm406_vm0 = vcmp.gt.f32.partialorder %v383_v22, 0.0  ;;  %v422_v24 = vmul.f32 0.2, %v383_v22  ;;  %vm410_vm1 = vcmp.gt.f32.partialorder %v393_v23, 0.0 }
  0xbb   : > { %v426_v25 = vmul.f32 0.2, %v393_v23 }
  0xbc   : > { %v438_v26 = vsel %vm406_vm0, %v383_v22, %v422_v24 }
  0xbd   : > { %v454_v27 = vpack.c.bf16 %v438_v26, %v438_v26  ;;  %v442_v28 = vsel %vm410_vm1, %v393_v23, %v426_v25 }
  0xbe   : > { %v458_v29 = vpack.c.bf16 %v442_v28, %v442_v28 }
  0xbf   : > { %471 = vst.msk [vmem:[%s718_s10 + $0x2c] sm:$0xf] %vm459_vm3, %v454_v27 }
  0xc0   : > { %475 = vst.msk [vmem:[%s718_s10 + $0x3c] sm:$0xf] %vm459_vm3, %v458_v29 }
  0xc1 PF: > { %s15_s18 = sadd.s32 1, %s638_s18  }
  0xc2   : > { %p12_p4 = scmp.ge.s32.totalorder %s15_s18, 4  }
  0xc4   :  { %14 = sbr.rel (!%p12_p4) target bundleno = 1 (0x1), region = 70 }

</bundles_post_ra>
